<compile_context>
chip_gen: v7x
topology: tpu7x:2x2x1
jax: 0.10.0
libtpu: 0.0.40
codegen_flags: <defaults>
</compile_context>

<pallas_src>
import functools

import jax
import jax.numpy as jnp
from jax.experimental import pallas as pl
from jax.experimental.pallas import tpu as pltpu


def _round_up(a, b):
    return (a + b - 1) // b * b


# ------------------------------------------------------------------
# Pallas kernels
# ------------------------------------------------------------------
def _mm_kernel(x_ref, w_ref, s_ref, b_ref, o_ref, acc_ref, *, relu):
    """o = relu?((x @ w) * scale + bias); K reduced over grid axis 2."""
    @pl.when(pl.program_id(2) == 0)
    def _():
        acc_ref[...] = jnp.zeros_like(acc_ref)

    acc_ref[...] += jnp.dot(x_ref[...], w_ref[...],
                            preferred_element_type=jnp.float32)

    @pl.when(pl.program_id(2) == pl.num_programs(2) - 1)
    def _():
        acc = acc_ref[...] * s_ref[...] + b_ref[...]
        if relu:
            acc = jnp.maximum(acc, 0.0)
        o_ref[...] = acc.astype(o_ref.dtype)


def _mm_res_kernel(x_ref, w_ref, s_ref, b_ref, r_ref, o_ref, acc_ref, *, relu):
    """o = relu?((x @ w) * scale + bias + residual); K reduced over grid axis 2."""
    @pl.when(pl.program_id(2) == 0)
    def _():
        acc_ref[...] = jnp.zeros_like(acc_ref)

    acc_ref[...] += jnp.dot(x_ref[...], w_ref[...],
                            preferred_element_type=jnp.float32)

    @pl.when(pl.program_id(2) == pl.num_programs(2) - 1)
    def _():
        acc = (acc_ref[...] * s_ref[...] + b_ref[...]
               + r_ref[...].astype(jnp.float32))
        if relu:
            acc = jnp.maximum(acc, 0.0)
        o_ref[...] = acc.astype(o_ref.dtype)


def _max_reduce_kernel(x_ref, o_ref):
    # x block: (KH*KW, tm, Cp); reduce over taps (elementwise max of 9 vregs).
    o_ref[...] = jnp.max(x_ref[...], axis=0).astype(o_ref.dtype)


def _mean_reduce_kernel(x_ref, o_ref):
    # x block: (B, H*W, Cp); mean over spatial in f32.
    o_ref[...] = jnp.mean(x_ref[...].astype(jnp.float32), axis=1
                          ).astype(o_ref.dtype)


# ------------------------------------------------------------------
# Fused GEMM wrapper (conv-as-GEMM and linear share this)
# ------------------------------------------------------------------
def _pick_k_tiling(K):
    """Return (Kp, tk): padded K and a K tile that divides it."""
    Kp = _round_up(K, 128)
    if Kp <= 1152:                 # small/medium K: single K block, no K loop
        return Kp, Kp
    for t in (512, 384, 256, 128):
        if Kp % t == 0:
            return Kp, t
    return Kp, 128                 # unreachable (128 always divides)


def fused_matmul(x, w, scale, bias, residual=None, relu=False,
                 out_dtype=jnp.bfloat16):
    """x:(M,K) w:(K,N) scale/bias:(N,) [residual:(M,N)] -> (M,N) out_dtype."""
    M, K = x.shape
    Kw, N = w.shape
    assert Kw == K, (Kw, K)

    # Tile sizes: M rounded to 16 (bf16 sublane packing), N to 128 lanes.
    tm = 256 if M >= 256 else _round_up(M, 16)
    Mp = _round_up(M, tm)
    tn = 256 if N >= 256 else _round_up(N, 128)
    Np = _round_up(N, tn)
    Kp, tk = _pick_k_tiling(K)
    nk = Kp // tk

    xp = jnp.pad(x.astype(jnp.bfloat16), ((0, Mp - M), (0, Kp - K)))
    wp = jnp.pad(w.astype(jnp.bfloat16), ((0, Kp - K), (0, Np - N)))
    sp = jnp.pad(scale.astype(jnp.float32), (0, Np - N)).reshape(1, Np)
    bp = jnp.pad(bias.astype(jnp.float32), (0, Np - N)).reshape(1, Np)

    grid = (Mp // tm, Np // tn, nk)
    x_spec = pl.BlockSpec((tm, tk), lambda i, j, k: (i, k))
    w_spec = pl.BlockSpec((tk, tn), lambda i, j, k: (k, j))
    v_spec = pl.BlockSpec((1, tn), lambda i, j, k: (0, j))     # scale / bias
    o_spec = pl.BlockSpec((tm, tn), lambda i, j, k: (i, j))
    scratch = [pltpu.VMEM((tm, tn), jnp.float32)]               # f32 accum tile
    cparams = pltpu.CompilerParams(
        dimension_semantics=("parallel", "parallel", "arbitrary"))

    if residual is None:
        out = pl.pallas_call(
            functools.partial(_mm_kernel, relu=relu),
            out_shape=jax.ShapeDtypeStruct((Mp, Np), out_dtype),
            grid=grid,
            in_specs=[x_spec, w_spec, v_spec, v_spec],
            out_specs=o_spec,
            scratch_shapes=scratch,
            compiler_params=cparams,
        )(xp, wp, sp, bp)
    else:
        rp = jnp.pad(residual.astype(jnp.bfloat16),
                     ((0, Mp - M), (0, Np - N)))
        out = pl.pallas_call(
            functools.partial(_mm_res_kernel, relu=relu),
            out_shape=jax.ShapeDtypeStruct((Mp, Np), out_dtype),
            grid=grid,
            in_specs=[x_spec, w_spec, v_spec, v_spec, o_spec],
            out_specs=o_spec,
            scratch_shapes=scratch,
            compiler_params=cparams,
        )(xp, wp, sp, bp, rp)
    return out[:M, :N]


# ------------------------------------------------------------------
# Pooling kernels (Pallas)
# ------------------------------------------------------------------
def maxpool_3x3_s2_p1(x):
    """nn.MaxPool2d(kernel_size=3, stride=2, padding=1) on NHWC bf16 input."""
    B, H, W, C = x.shape
    k, s, p = 3, 2, 1
    OH = (H + 2 * p - k) // s + 1
    OW = (W + 2 * p - k) // s + 1
    xp = jnp.pad(x, ((0, 0), (p, p), (p, p), (0, 0)),
                 constant_values=-jnp.inf)
    slices = [xp[:, i:i + s * OH:s, j:j + s * OW:s, :]
              for i in range(k) for j in range(k)]
    stacked = jnp.stack(slices, axis=0).reshape(k * k, B * OH * OW, C)

    M = B * OH * OW
    Cp = _round_up(C, 128)                  # lane-dense output stores
    tm = 256 if M >= 256 else _round_up(M, 16)
    Mp = _round_up(M, tm)
    stacked = jnp.pad(stacked, ((0, 0), (0, Mp - M), (0, Cp - C)))

    out = pl.pallas_call(
        _max_reduce_kernel,
        out_shape=jax.ShapeDtypeStruct((Mp, Cp), x.dtype),
        grid=(Mp // tm,),
        in_specs=[pl.BlockSpec((k * k, tm, Cp), lambda i: (0, i, 0))],
        out_specs=pl.BlockSpec((tm, Cp), lambda i: (i, 0)),
        compiler_params=pltpu.CompilerParams(
            dimension_semantics=("parallel",)),
    )(stacked)
    return out[:M, :C].reshape(B, OH, OW, C)


def global_avgpool(x):
    """nn.AdaptiveAvgPool2d((1,1)) + .squeeze() -> (B, C) float32."""
    B, H, W, C = x.shape
    Cp = _round_up(C, 128)
    xr = jnp.pad(x.reshape(B, H * W, C), ((0, 0), (0, 0), (0, Cp - C)))
    out = pl.pallas_call(
        _mean_reduce_kernel,
        out_shape=jax.ShapeDtypeStruct((B, Cp), jnp.float32),
        grid=(1,),
        in_specs=[pl.BlockSpec((B, H * W, Cp), lambda i: (0, 0, 0))],
        out_specs=pl.BlockSpec((B, Cp), lambda i: (0, 0)),
    )(xr)
    return out[:, :C]


# ------------------------------------------------------------------
# Conv / linear glue (patch extraction only; weights already in GEMM layout)
# ------------------------------------------------------------------
def _im2col(x, kh, kw, stride, pad):
    B, H, W, C = x.shape
    OH = (H + 2 * pad - kh) // stride + 1
    OW = (W + 2 * pad - kw) // stride + 1
    xp = jnp.pad(x, ((0, 0), (pad, pad), (pad, pad), (0, 0)))
    cols = [xp[:, i:i + stride * OH:stride, j:j + stride * OW:stride, :]
            for i in range(kh) for j in range(kw)]
    patches = jnp.stack(cols, axis=3)              # (B, OH, OW, kh*kw, C) bf16
    return patches.reshape(B * OH * OW, kh * kw * C), (B, OH, OW)


def conv_bn(x, w_kn, kh, kw, scale, bias, stride, pad, relu, residual=None):
    """Conv2d(bias=False) + folded BatchNorm (+ residual) (+ ReLU).

    w_kn is pre-transposed to (kh*kw*cin, cout) bf16 at parameter-build time.
    """
    cols, (B, OH, OW) = _im2col(x, kh, kw, stride, pad)
    cout = w_kn.shape[1]
    res2d = None if residual is None else residual.reshape(B * OH * OW, cout)
    out = fused_matmul(cols, w_kn, scale, bias, residual=res2d, relu=relu)
    return out.reshape(B, OH, OW, cout)


def linear(x, w_kn, b, relu=False, out_dtype=jnp.bfloat16):
    """PyTorch nn.Linear with w pre-transposed to (in, out) bf16."""
    ones = jnp.ones((w_kn.shape[1],), jnp.float32)
    return fused_matmul(x, w_kn, ones, b, relu=relu, out_dtype=out_dtype)


def basic_block(x, p, stride):
    identity = x
    out = conv_bn(x, p['conv1_w'], 3, 3, p['bn1_scale'], p['bn1_bias'],
                  stride=stride, pad=1, relu=True)
    if 'down_w' in p:
        identity = conv_bn(x, p['down_w'], 1, 1, p['dbn_scale'], p['dbn_bias'],
                           stride=stride, pad=0, relu=False)
    out = conv_bn(out, p['conv2_w'], 3, 3, p['bn2_scale'], p['bn2_bias'],
                  stride=1, pad=1, relu=True, residual=identity)
    return out


# ------------------------------------------------------------------
# Deterministic synthetic parameters (resnet18 + projector + classifier)
# Weights are pre-transposed to GEMM layout and pre-cast to bf16 here.
# ------------------------------------------------------------------
class _Init:
    def __init__(self, seed):
        self.key = jax.random.PRNGKey(seed)

    def normal(self, shape, std=0.05):
        self.key, sub = jax.random.split(self.key)
        return std * jax.random.normal(sub, shape, jnp.float32)


def _bn(init, c):
    gamma = 1.0 + init.normal((c,), 0.1)
    beta = init.normal((c,), 0.1)
    mean = init.normal((c,), 0.1)
    var = 1.0 + jnp.abs(init.normal((c,), 0.1))
    scale = gamma / jnp.sqrt(var + 1e-5)
    bias = beta - mean * scale
    return scale, bias


def _conv_w(init, cout, cin, kh, kw):
    w = init.normal((cout, cin, kh, kw))
    # (cout, cin, kh, kw) -> (kh, kw, cin, cout) -> (kh*kw*cin, cout), bf16
    return jnp.transpose(w, (2, 3, 1, 0)).reshape(kh * kw * cin, cout
                                                  ).astype(jnp.bfloat16)


def _linear_w(init, out_f, in_f):
    # PyTorch stores (out, in); store transposed (in, out) in bf16.
    return jnp.transpose(init.normal((out_f, in_f))).astype(jnp.bfloat16)


def _block_params(init, cin, cout, downsample):
    p = {'conv1_w': _conv_w(init, cout, cin, 3, 3)}
    p['bn1_scale'], p['bn1_bias'] = _bn(init, cout)
    p['conv2_w'] = _conv_w(init, cout, cout, 3, 3)
    p['bn2_scale'], p['bn2_bias'] = _bn(init, cout)
    if downsample:
        p['down_w'] = _conv_w(init, cout, cin, 1, 1)
        p['dbn_scale'], p['dbn_bias'] = _bn(init, cout)
    return p


def make_params(out_dim=128, num_classes=9, seed=42):
    init = _Init(seed)
    enc = {'conv1_w': _conv_w(init, 64, 3, 7, 7)}
    enc['bn1_scale'], enc['bn1_bias'] = _bn(init, 64)
    cfgs = [('layer1', 64, 64, 1), ('layer2', 64, 128, 2),
            ('layer3', 128, 256, 2), ('layer4', 256, 512, 2)]
    for name, cin, cout, stride in cfgs:
        down = (stride != 1) or (cin != cout)
        enc[name] = [_block_params(init, cin, cout, down),
                     _block_params(init, cout, cout, False)]
    return {
        'encoder': enc,
        'proj_w1': _linear_w(init, 512, 512), 'proj_b1': init.normal((512,)),
        'proj_w2': _linear_w(init, out_dim, 512), 'proj_b2': init.normal((out_dim,)),
        'cls_w': _linear_w(init, num_classes, out_dim), 'cls_b': init.normal((num_classes,)),
    }


# ------------------------------------------------------------------
# Full forward: ResNet18 encoder -> projector -> classifier
# ------------------------------------------------------------------
def resnet18_baseline_forward(x_nchw, params):
    x = jnp.transpose(x_nchw, (0, 2, 3, 1)).astype(jnp.bfloat16)  # NCHW->NHWC
    enc = params['encoder']
    # stem: 7x7/2 conv + bn + relu, 3x3/2 maxpool
    x = conv_bn(x, enc['conv1_w'], 7, 7, enc['bn1_scale'], enc['bn1_bias'],
                stride=2, pad=3, relu=True)
    x = maxpool_3x3_s2_p1(x)
    # 4 stages x 2 basic blocks
    for name, stride in (('layer1', 1), ('layer2', 2),
                         ('layer3', 2), ('layer4', 2)):
        blocks = enc[name]
        x = basic_block(x, blocks[0], stride)
        x = basic_block(x, blocks[1], 1)
    # adaptive avg-pool to (1,1) + .squeeze()  -> (B, 512)
    h = global_avgpool(x)
    # projector: Linear(512,512) -> ReLU -> Linear(512, out_dim)
    z = linear(h, params['proj_w1'], params['proj_b1'], relu=True)
    z = linear(z, params['proj_w2'], params['proj_b2'], relu=False)
    # classifier: Linear(out_dim, num_classes), logits in f32
    logits = linear(z, params['cls_w'], params['cls_b'], relu=False,
                    out_dtype=jnp.float32)
    return logits


if __name__ == "__main__":
    key = jax.random.PRNGKey(0)
    # small batch, 3-channel 32x32 image (resnet18 stem requires Cin=3)
    x = jax.random.normal(key, (2, 3, 32, 32), jnp.float32)
    params = make_params(out_dim=128, num_classes=9, seed=42)

    fwd = jax.jit(functools.partial(resnet18_baseline_forward, params=params))
    logits = fwd(x)
    jax.block_until_ready(logits)
    assert logits.shape == (2, 9), logits.shape
    assert jnp.all(jnp.isfinite(logits))
    print("KERNEL_OK")
</pallas_src>

<mosaic_0001>
module attributes {stable_mosaic.version = 11 : i64} {
  func.func @_mm_kernel(%arg0: i32, %arg1: i32, %arg2: i32, %arg3: memref<256x256xbf16, #tpu.memory_space<vmem>>, %arg4: memref<256x128xbf16, #tpu.memory_space<vmem>>, %arg5: memref<1x128xf32, #tpu.memory_space<vmem>>, %arg6: memref<1x128xf32, #tpu.memory_space<vmem>>, %arg7: memref<256x128xbf16, #tpu.memory_space<vmem>>, %arg8: memref<256x128xf32, #tpu.memory_space<vmem>>) attributes {dimension_semantics = [#tpu.dimension_semantics<parallel>, #tpu.dimension_semantics<parallel>, #tpu.dimension_semantics<arbitrary>], iteration_bounds = array<i64: 2, 1, 1>, scalar_prefetch = 0 : i64, scratch_operands = 1 : i64, tpu.core_type = #tpu.core_type<tc>, window_params = [{transform_indices = @transform_0, window_bounds = array<i64: 256, 256>}, {transform_indices = @transform_1, window_bounds = array<i64: 256, 128>}, {transform_indices = @transform_2, window_bounds = array<i64: 1, 128>}, {transform_indices = @transform_3, window_bounds = array<i64: 1, 128>}, {transform_indices = @transform_4, window_bounds = array<i64: 256, 128>}]} {
    %c0_i32 = arith.constant 0 : i32
    %0 = arith.cmpi eq, %arg2, %c0_i32 : i32
    %1 = arith.extui %0 : i1 to i32
    %c0_i32_0 = arith.constant 0 : i32
    %2 = arith.cmpi ne, %1, %c0_i32_0 : i32
    scf.if %2 {
      %cst_10 = arith.constant 0.000000e+00 : f32
      %12 = vector.broadcast %cst_10 : f32 to vector<256x128xf32>
      %c0_11 = arith.constant 0 : index
      %c0_12 = arith.constant 0 : index
      %13 = vector.load %arg8[%c0_11, %c0_12] : memref<256x128xf32, #tpu.memory_space<vmem>>, vector<256x128xf32>
      tpu.vector_store %arg8[%c0_11, %c0_12], %12 {strides = array<i32>} : memref<256x128xf32, #tpu.memory_space<vmem>>, vector<256x128xf32>,
    } else {
    }
    %c0 = arith.constant 0 : index
    %c0_1 = arith.constant 0 : index
    %3 = vector.load %arg8[%c0, %c0_1] : memref<256x128xf32, #tpu.memory_space<vmem>>, vector<256x128xf32>
    %c0_2 = arith.constant 0 : index
    %c0_3 = arith.constant 0 : index
    %4 = vector.load %arg3[%c0_2, %c0_3] : memref<256x256xbf16, #tpu.memory_space<vmem>>, vector<256x256xbf16>
    %c0_4 = arith.constant 0 : index
    %c0_5 = arith.constant 0 : index
    %5 = vector.load %arg4[%c0_4, %c0_5] : memref<256x128xbf16, #tpu.memory_space<vmem>>, vector<256x128xbf16>
    %cst = arith.constant dense<0.000000e+00> : vector<256x128xf32>
    %6 = tpu.matmul %4, %5, %cst {dimension_numbers = #tpu.dot_dimension_numbers<[1], [0], [0], [1], [0, 0, 1, 1], [], []>} : vector<256x256xbf16>, vector<256x128xbf16>, vector<256x128xf32> -> vector<256x128xf32>
    %7 = arith.addf %3, %6 : vector<256x128xf32>
    %c0_6 = arith.constant 0 : index
    %c0_7 = arith.constant 0 : index
    %8 = vector.load %arg8[%c0_6, %c0_7] : memref<256x128xf32, #tpu.memory_space<vmem>>, vector<256x128xf32>
    tpu.vector_store %arg8[%c0_6, %c0_7], %7 {strides = array<i32>} : memref<256x128xf32, #tpu.memory_space<vmem>>, vector<256x128xf32>,
    %c0_i32_8 = arith.constant 0 : i32
    %9 = arith.cmpi eq, %arg2, %c0_i32_8 : i32
    %10 = arith.extui %9 : i1 to i32
    %c0_i32_9 = arith.constant 0 : i32
    %11 = arith.cmpi ne, %10, %c0_i32_9 : i32
    scf.if %11 {
      %c0_10 = arith.constant 0 : index
      %c0_11 = arith.constant 0 : index
      %12 = vector.load %arg8[%c0_10, %c0_11] : memref<256x128xf32, #tpu.memory_space<vmem>>, vector<256x128xf32>
      %c0_12 = arith.constant 0 : index
      %c0_13 = arith.constant 0 : index
      %13 = vector.load %arg5[%c0_12, %c0_13] : memref<1x128xf32, #tpu.memory_space<vmem>>, vector<1x128xf32>
      %14 = vector.broadcast %13 : vector<1x128xf32> to vector<256x128xf32>
      %15 = arith.mulf %12, %14 : vector<256x128xf32>
      %c0_14 = arith.constant 0 : index
      %c0_15 = arith.constant 0 : index
      %16 = vector.load %arg6[%c0_14, %c0_15] : memref<1x128xf32, #tpu.memory_space<vmem>>, vector<1x128xf32>
      %17 = vector.broadcast %16 : vector<1x128xf32> to vector<256x128xf32>
      %18 = arith.addf %15, %17 : vector<256x128xf32>
      %cst_16 = arith.constant 0.000000e+00 : f32
      %19 = vector.broadcast %cst_16 : f32 to vector<256x128xf32>
      %20 = arith.maximumf %18, %19 : vector<256x128xf32>
      %21 = arith.truncf %20 : vector<256x128xf32> to vector<256x128xbf16>
      %c0_17 = arith.constant 0 : index
      %c0_18 = arith.constant 0 : index
      %22 = vector.load %arg7[%c0_17, %c0_18] : memref<256x128xbf16, #tpu.memory_space<vmem>>, vector<256x128xbf16>
      tpu.vector_store %arg7[%c0_17, %c0_18], %21 {strides = array<i32>} : memref<256x128xbf16, #tpu.memory_space<vmem>>, vector<256x128xbf16>,
    } else {
    }
    return
  }
  func.func @transform_0(%arg0: i32, %arg1: i32, %arg2: i32) -> (i32, i32) {
    %c0_i32 = arith.constant 0 : i32
    return %arg0, %arg2 : i32, i32
  }
  func.func @transform_1(%arg0: i32, %arg1: i32, %arg2: i32) -> (i32, i32) {
    %c0_i32 = arith.constant 0 : i32
    return %arg2, %arg1 : i32, i32
  }
  func.func @transform_2(%arg0: i32, %arg1: i32, %arg2: i32) -> (i32, i32) {
    %c0_i32 = arith.constant 0 : i32
    %c0_i32_0 = arith.constant 0 : i32
    return %c0_i32, %arg1 : i32, i32
  }
  func.func @transform_3(%arg0: i32, %arg1: i32, %arg2: i32) -> (i32, i32) {
    %c0_i32 = arith.constant 0 : i32
    %c0_i32_0 = arith.constant 0 : i32
    return %c0_i32, %arg1 : i32, i32
  }
  func.func @transform_4(%arg0: i32, %arg1: i32, %arg2: i32) -> (i32, i32) {
    %c0_i32 = arith.constant 0 : i32
    return %arg0, %arg1 : i32, i32
  }
}

module attributes {stable_mosaic.version = 11 : i64} {
  func.func @_max_reduce_kernel(%arg0: i32, %arg1: memref<9x128x128xbf16, #tpu.memory_space<vmem>>, %arg2: memref<128x128xbf16, #tpu.memory_space<vmem>>) attributes {dimension_semantics = [#tpu.dimension_semantics<parallel>], iteration_bounds = array<i64: 1>, scalar_prefetch = 0 : i64, scratch_operands = 0 : i64, tpu.core_type = #tpu.core_type<tc>, window_params = [{transform_indices = @transform_0, window_bounds = array<i64: 9, 128, 128>}, {transform_indices = @transform_1, window_bounds = array<i64: 128, 128>}]} {
    %c0 = arith.constant 0 : index
    %c0_0 = arith.constant 0 : index
    %c0_1 = arith.constant 0 : index
    %0 = vector.load %arg1[%c0, %c0_0, %c0_1] : memref<9x128x128xbf16, #tpu.memory_space<vmem>>, vector<9x128x128xbf16>
    %cst = arith.constant dense<0xFF80> : vector<128x128xbf16>
    %1 = vector.multi_reduction <maximumf>, %0, %cst [0] : vector<9x128x128xbf16> to vector<128x128xbf16>
    %c0_2 = arith.constant 0 : index
    %c0_3 = arith.constant 0 : index
    %2 = vector.load %arg2[%c0_2, %c0_3] : memref<128x128xbf16, #tpu.memory_space<vmem>>, vector<128x128xbf16>
    tpu.vector_store %arg2[%c0_2, %c0_3], %1 {strides = array<i32>} : memref<128x128xbf16, #tpu.memory_space<vmem>>, vector<128x128xbf16>,
    return
  }
  func.func @transform_0(%arg0: i32) -> (i32, i32, i32) {
    %c0_i32 = arith.constant 0 : i32
    %c0_i32_0 = arith.constant 0 : i32
    %c0_i32_1 = arith.constant 0 : i32
    return %c0_i32, %arg0, %c0_i32_0 : i32, i32, i32
  }
  func.func @transform_1(%arg0: i32) -> (i32, i32) {
    %c0_i32 = arith.constant 0 : i32
    %c0_i32_0 = arith.constant 0 : i32
    return %arg0, %c0_i32 : i32, i32
  }
}

module attributes {stable_mosaic.version = 11 : i64} {
  func.func @_mm_kernel(%arg0: i32, %arg1: i32, %arg2: i32, %arg3: memref<128x640xbf16, #tpu.memory_space<vmem>>, %arg4: memref<640x128xbf16, #tpu.memory_space<vmem>>, %arg5: memref<1x128xf32, #tpu.memory_space<vmem>>, %arg6: memref<1x128xf32, #tpu.memory_space<vmem>>, %arg7: memref<128x128xbf16, #tpu.memory_space<vmem>>, %arg8: memref<128x128xf32, #tpu.memory_space<vmem>>) attributes {dimension_semantics = [#tpu.dimension_semantics<parallel>, #tpu.dimension_semantics<parallel>, #tpu.dimension_semantics<arbitrary>], iteration_bounds = array<i64: 1, 1, 1>, scalar_prefetch = 0 : i64, scratch_operands = 1 : i64, tpu.core_type = #tpu.core_type<tc>, window_params = [{transform_indices = @transform_0, window_bounds = array<i64: 128, 640>}, {transform_indices = @transform_1, window_bounds = array<i64: 640, 128>}, {transform_indices = @transform_2, window_bounds = array<i64: 1, 128>}, {transform_indices = @transform_3, window_bounds = array<i64: 1, 128>}, {transform_indices = @transform_4, window_bounds = array<i64: 128, 128>}]} {
    %c0_i32 = arith.constant 0 : i32
    %0 = arith.cmpi eq, %arg2, %c0_i32 : i32
    %1 = arith.extui %0 : i1 to i32
    %c0_i32_0 = arith.constant 0 : i32
    %2 = arith.cmpi ne, %1, %c0_i32_0 : i32
    scf.if %2 {
      %cst_10 = arith.constant 0.000000e+00 : f32
      %12 = vector.broadcast %cst_10 : f32 to vector<128x128xf32>
      %c0_11 = arith.constant 0 : index
      %c0_12 = arith.constant 0 : index
      %13 = vector.load %arg8[%c0_11, %c0_12] : memref<128x128xf32, #tpu.memory_space<vmem>>, vector<128x128xf32>
      tpu.vector_store %arg8[%c0_11, %c0_12], %12 {strides = array<i32>} : memref<128x128xf32, #tpu.memory_space<vmem>>, vector<128x128xf32>,
    } else {
    }
    %c0 = arith.constant 0 : index
    %c0_1 = arith.constant 0 : index
    %3 = vector.load %arg8[%c0, %c0_1] : memref<128x128xf32, #tpu.memory_space<vmem>>, vector<128x128xf32>
    %c0_2 = arith.constant 0 : index
    %c0_3 = arith.constant 0 : index
    %4 = vector.load %arg3[%c0_2, %c0_3] : memref<128x640xbf16, #tpu.memory_space<vmem>>, vector<128x640xbf16>
    %c0_4 = arith.constant 0 : index
    %c0_5 = arith.constant 0 : index
    %5 = vector.load %arg4[%c0_4, %c0_5] : memref<640x128xbf16, #tpu.memory_space<vmem>>, vector<640x128xbf16>
    %cst = arith.constant dense<0.000000e+00> : vector<128x128xf32>
    %6 = tpu.matmul %4, %5, %cst {dimension_numbers = #tpu.dot_dimension_numbers<[1], [0], [0], [1], [0, 0, 1, 1], [], []>} : vector<128x640xbf16>, vector<640x128xbf16>, vector<128x128xf32> -> vector<128x128xf32>
    %7 = arith.addf %3, %6 : vector<128x128xf32>
    %c0_6 = arith.constant 0 : index
    %c0_7 = arith.constant 0 : index
    %8 = vector.load %arg8[%c0_6, %c0_7] : memref<128x128xf32, #tpu.memory_space<vmem>>, vector<128x128xf32>
    tpu.vector_store %arg8[%c0_6, %c0_7], %7 {strides = array<i32>} : memref<128x128xf32, #tpu.memory_space<vmem>>, vector<128x128xf32>,
    %c0_i32_8 = arith.constant 0 : i32
    %9 = arith.cmpi eq, %arg2, %c0_i32_8 : i32
    %10 = arith.extui %9 : i1 to i32
    %c0_i32_9 = arith.constant 0 : i32
    %11 = arith.cmpi ne, %10, %c0_i32_9 : i32
    scf.if %11 {
      %c0_10 = arith.constant 0 : index
      %c0_11 = arith.constant 0 : index
      %12 = vector.load %arg8[%c0_10, %c0_11] : memref<128x128xf32, #tpu.memory_space<vmem>>, vector<128x128xf32>
      %c0_12 = arith.constant 0 : index
      %c0_13 = arith.constant 0 : index
      %13 = vector.load %arg5[%c0_12, %c0_13] : memref<1x128xf32, #tpu.memory_space<vmem>>, vector<1x128xf32>
      %14 = vector.broadcast %13 : vector<1x128xf32> to vector<128x128xf32>
      %15 = arith.mulf %12, %14 : vector<128x128xf32>
      %c0_14 = arith.constant 0 : index
      %c0_15 = arith.constant 0 : index
      %16 = vector.load %arg6[%c0_14, %c0_15] : memref<1x128xf32, #tpu.memory_space<vmem>>, vector<1x128xf32>
      %17 = vector.broadcast %16 : vector<1x128xf32> to vector<128x128xf32>
      %18 = arith.addf %15, %17 : vector<128x128xf32>
      %cst_16 = arith.constant 0.000000e+00 : f32
      %19 = vector.broadcast %cst_16 : f32 to vector<128x128xf32>
      %20 = arith.maximumf %18, %19 : vector<128x128xf32>
      %21 = arith.truncf %20 : vector<128x128xf32> to vector<128x128xbf16>
      %c0_17 = arith.constant 0 : index
      %c0_18 = arith.constant 0 : index
      %22 = vector.load %arg7[%c0_17, %c0_18] : memref<128x128xbf16, #tpu.memory_space<vmem>>, vector<128x128xbf16>
      tpu.vector_store %arg7[%c0_17, %c0_18], %21 {strides = array<i32>} : memref<128x128xbf16, #tpu.memory_space<vmem>>, vector<128x128xbf16>,
    } else {
    }
    return
  }
  func.func @transform_0(%arg0: i32, %arg1: i32, %arg2: i32) -> (i32, i32) {
    %c0_i32 = arith.constant 0 : i32
    return %arg0, %arg2 : i32, i32
  }
  func.func @transform_1(%arg0: i32, %arg1: i32, %arg2: i32) -> (i32, i32) {
    %c0_i32 = arith.constant 0 : i32
    return %arg2, %arg1 : i32, i32
  }
  func.func @transform_2(%arg0: i32, %arg1: i32, %arg2: i32) -> (i32, i32) {
    %c0_i32 = arith.constant 0 : i32
    %c0_i32_0 = arith.constant 0 : i32
    return %c0_i32, %arg1 : i32, i32
  }
  func.func @transform_3(%arg0: i32, %arg1: i32, %arg2: i32) -> (i32, i32) {
    %c0_i32 = arith.constant 0 : i32
    %c0_i32_0 = arith.constant 0 : i32
    return %c0_i32, %arg1 : i32, i32
  }
  func.func @transform_4(%arg0: i32, %arg1: i32, %arg2: i32) -> (i32, i32) {
    %c0_i32 = arith.constant 0 : i32
    return %arg0, %arg1 : i32, i32
  }
}

module attributes {stable_mosaic.version = 11 : i64} {
  func.func @_mm_res_kernel(%arg0: i32, %arg1: i32, %arg2: i32, %arg3: memref<128x640xbf16, #tpu.memory_space<vmem>>, %arg4: memref<640x128xbf16, #tpu.memory_space<vmem>>, %arg5: memref<1x128xf32, #tpu.memory_space<vmem>>, %arg6: memref<1x128xf32, #tpu.memory_space<vmem>>, %arg7: memref<128x128xbf16, #tpu.memory_space<vmem>>, %arg8: memref<128x128xbf16, #tpu.memory_space<vmem>>, %arg9: memref<128x128xf32, #tpu.memory_space<vmem>>) attributes {dimension_semantics = [#tpu.dimension_semantics<parallel>, #tpu.dimension_semantics<parallel>, #tpu.dimension_semantics<arbitrary>], iteration_bounds = array<i64: 1, 1, 1>, scalar_prefetch = 0 : i64, scratch_operands = 1 : i64, tpu.core_type = #tpu.core_type<tc>, window_params = [{transform_indices = @transform_0, window_bounds = array<i64: 128, 640>}, {transform_indices = @transform_1, window_bounds = array<i64: 640, 128>}, {transform_indices = @transform_2, window_bounds = array<i64: 1, 128>}, {transform_indices = @transform_3, window_bounds = array<i64: 1, 128>}, {transform_indices = @transform_4, window_bounds = array<i64: 128, 128>}, {transform_indices = @transform_5, window_bounds = array<i64: 128, 128>}]} {
    %c0_i32 = arith.constant 0 : i32
    %0 = arith.cmpi eq, %arg2, %c0_i32 : i32
    %1 = arith.extui %0 : i1 to i32
    %c0_i32_0 = arith.constant 0 : i32
    %2 = arith.cmpi ne, %1, %c0_i32_0 : i32
    scf.if %2 {
      %cst_10 = arith.constant 0.000000e+00 : f32
      %12 = vector.broadcast %cst_10 : f32 to vector<128x128xf32>
      %c0_11 = arith.constant 0 : index
      %c0_12 = arith.constant 0 : index
      %13 = vector.load %arg9[%c0_11, %c0_12] : memref<128x128xf32, #tpu.memory_space<vmem>>, vector<128x128xf32>
      tpu.vector_store %arg9[%c0_11, %c0_12], %12 {strides = array<i32>} : memref<128x128xf32, #tpu.memory_space<vmem>>, vector<128x128xf32>,
    } else {
    }
    %c0 = arith.constant 0 : index
    %c0_1 = arith.constant 0 : index
    %3 = vector.load %arg9[%c0, %c0_1] : memref<128x128xf32, #tpu.memory_space<vmem>>, vector<128x128xf32>
    %c0_2 = arith.constant 0 : index
    %c0_3 = arith.constant 0 : index
    %4 = vector.load %arg3[%c0_2, %c0_3] : memref<128x640xbf16, #tpu.memory_space<vmem>>, vector<128x640xbf16>
    %c0_4 = arith.constant 0 : index
    %c0_5 = arith.constant 0 : index
    %5 = vector.load %arg4[%c0_4, %c0_5] : memref<640x128xbf16, #tpu.memory_space<vmem>>, vector<640x128xbf16>
    %cst = arith.constant dense<0.000000e+00> : vector<128x128xf32>
    %6 = tpu.matmul %4, %5, %cst {dimension_numbers = #tpu.dot_dimension_numbers<[1], [0], [0], [1], [0, 0, 1, 1], [], []>} : vector<128x640xbf16>, vector<640x128xbf16>, vector<128x128xf32> -> vector<128x128xf32>
    %7 = arith.addf %3, %6 : vector<128x128xf32>
    %c0_6 = arith.constant 0 : index
    %c0_7 = arith.constant 0 : index
    %8 = vector.load %arg9[%c0_6, %c0_7] : memref<128x128xf32, #tpu.memory_space<vmem>>, vector<128x128xf32>
    tpu.vector_store %arg9[%c0_6, %c0_7], %7 {strides = array<i32>} : memref<128x128xf32, #tpu.memory_space<vmem>>, vector<128x128xf32>,
    %c0_i32_8 = arith.constant 0 : i32
    %9 = arith.cmpi eq, %arg2, %c0_i32_8 : i32
    %10 = arith.extui %9 : i1 to i32
    %c0_i32_9 = arith.constant 0 : i32
    %11 = arith.cmpi ne, %10, %c0_i32_9 : i32
    scf.if %11 {
      %c0_10 = arith.constant 0 : index
      %c0_11 = arith.constant 0 : index
      %12 = vector.load %arg9[%c0_10, %c0_11] : memref<128x128xf32, #tpu.memory_space<vmem>>, vector<128x128xf32>
      %c0_12 = arith.constant 0 : index
      %c0_13 = arith.constant 0 : index
      %13 = vector.load %arg5[%c0_12, %c0_13] : memref<1x128xf32, #tpu.memory_space<vmem>>, vector<1x128xf32>
      %14 = vector.broadcast %13 : vector<1x128xf32> to vector<128x128xf32>
      %15 = arith.mulf %12, %14 : vector<128x128xf32>
      %c0_14 = arith.constant 0 : index
      %c0_15 = arith.constant 0 : index
      %16 = vector.load %arg6[%c0_14, %c0_15] : memref<1x128xf32, #tpu.memory_space<vmem>>, vector<1x128xf32>
      %17 = vector.broadcast %16 : vector<1x128xf32> to vector<128x128xf32>
      %18 = arith.addf %15, %17 : vector<128x128xf32>
      %c0_16 = arith.constant 0 : index
      %c0_17 = arith.constant 0 : index
      %19 = vector.load %arg7[%c0_16, %c0_17] : memref<128x128xbf16, #tpu.memory_space<vmem>>, vector<128x128xbf16>
      %20 = arith.extf %19 : vector<128x128xbf16> to vector<128x128xf32>
      %21 = arith.addf %18, %20 : vector<128x128xf32>
      %cst_18 = arith.constant 0.000000e+00 : f32
      %22 = vector.broadcast %cst_18 : f32 to vector<128x128xf32>
      %23 = arith.maximumf %21, %22 : vector<128x128xf32>
      %24 = arith.truncf %23 : vector<128x128xf32> to vector<128x128xbf16>
      %c0_19 = arith.constant 0 : index
      %c0_20 = arith.constant 0 : index
      %25 = vector.load %arg8[%c0_19, %c0_20] : memref<128x128xbf16, #tpu.memory_space<vmem>>, vector<128x128xbf16>
      tpu.vector_store %arg8[%c0_19, %c0_20], %24 {strides = array<i32>} : memref<128x128xbf16, #tpu.memory_space<vmem>>, vector<128x128xbf16>,
    } else {
    }
    return
  }
  func.func @transform_0(%arg0: i32, %arg1: i32, %arg2: i32) -> (i32, i32) {
    %c0_i32 = arith.constant 0 : i32
    return %arg0, %arg2 : i32, i32
  }
  func.func @transform_1(%arg0: i32, %arg1: i32, %arg2: i32) -> (i32, i32) {
    %c0_i32 = arith.constant 0 : i32
    return %arg2, %arg1 : i32, i32
  }
  func.func @transform_2(%arg0: i32, %arg1: i32, %arg2: i32) -> (i32, i32) {
    %c0_i32 = arith.constant 0 : i32
    %c0_i32_0 = arith.constant 0 : i32
    return %c0_i32, %arg1 : i32, i32
  }
  func.func @transform_3(%arg0: i32, %arg1: i32, %arg2: i32) -> (i32, i32) {
    %c0_i32 = arith.constant 0 : i32
    %c0_i32_0 = arith.constant 0 : i32
    return %c0_i32, %arg1 : i32, i32
  }
  func.func @transform_4(%arg0: i32, %arg1: i32, %arg2: i32) -> (i32, i32) {
    %c0_i32 = arith.constant 0 : i32
    return %arg0, %arg1 : i32, i32
  }
  func.func @transform_5(%arg0: i32, %arg1: i32, %arg2: i32) -> (i32, i32) {
    %c0_i32 = arith.constant 0 : i32
    return %arg0, %arg1 : i32, i32
  }
}

module attributes {stable_mosaic.version = 11 : i64} {
  func.func @_mm_kernel(%arg0: i32, %arg1: i32, %arg2: i32, %arg3: memref<32x640xbf16, #tpu.memory_space<vmem>>, %arg4: memref<640x128xbf16, #tpu.memory_space<vmem>>, %arg5: memref<1x128xf32, #tpu.memory_space<vmem>>, %arg6: memref<1x128xf32, #tpu.memory_space<vmem>>, %arg7: memref<32x128xbf16, #tpu.memory_space<vmem>>, %arg8: memref<32x128xf32, #tpu.memory_space<vmem>>) attributes {dimension_semantics = [#tpu.dimension_semantics<parallel>, #tpu.dimension_semantics<parallel>, #tpu.dimension_semantics<arbitrary>], iteration_bounds = array<i64: 1, 1, 1>, scalar_prefetch = 0 : i64, scratch_operands = 1 : i64, tpu.core_type = #tpu.core_type<tc>, window_params = [{transform_indices = @transform_0, window_bounds = array<i64: 32, 640>}, {transform_indices = @transform_1, window_bounds = array<i64: 640, 128>}, {transform_indices = @transform_2, window_bounds = array<i64: 1, 128>}, {transform_indices = @transform_3, window_bounds = array<i64: 1, 128>}, {transform_indices = @transform_4, window_bounds = array<i64: 32, 128>}]} {
    %c0_i32 = arith.constant 0 : i32
    %0 = arith.cmpi eq, %arg2, %c0_i32 : i32
    %1 = arith.extui %0 : i1 to i32
    %c0_i32_0 = arith.constant 0 : i32
    %2 = arith.cmpi ne, %1, %c0_i32_0 : i32
    scf.if %2 {
      %cst_10 = arith.constant 0.000000e+00 : f32
      %12 = vector.broadcast %cst_10 : f32 to vector<32x128xf32>
      %c0_11 = arith.constant 0 : index
      %c0_12 = arith.constant 0 : index
      %13 = vector.load %arg8[%c0_11, %c0_12] : memref<32x128xf32, #tpu.memory_space<vmem>>, vector<32x128xf32>
      tpu.vector_store %arg8[%c0_11, %c0_12], %12 {strides = array<i32>} : memref<32x128xf32, #tpu.memory_space<vmem>>, vector<32x128xf32>,
    } else {
    }
    %c0 = arith.constant 0 : index
    %c0_1 = arith.constant 0 : index
    %3 = vector.load %arg8[%c0, %c0_1] : memref<32x128xf32, #tpu.memory_space<vmem>>, vector<32x128xf32>
    %c0_2 = arith.constant 0 : index
    %c0_3 = arith.constant 0 : index
    %4 = vector.load %arg3[%c0_2, %c0_3] : memref<32x640xbf16, #tpu.memory_space<vmem>>, vector<32x640xbf16>
    %c0_4 = arith.constant 0 : index
    %c0_5 = arith.constant 0 : index
    %5 = vector.load %arg4[%c0_4, %c0_5] : memref<640x128xbf16, #tpu.memory_space<vmem>>, vector<640x128xbf16>
    %cst = arith.constant dense<0.000000e+00> : vector<32x128xf32>
    %6 = tpu.matmul %4, %5, %cst {dimension_numbers = #tpu.dot_dimension_numbers<[1], [0], [0], [1], [0, 0, 1, 1], [], []>} : vector<32x640xbf16>, vector<640x128xbf16>, vector<32x128xf32> -> vector<32x128xf32>
    %7 = arith.addf %3, %6 : vector<32x128xf32>
    %c0_6 = arith.constant 0 : index
    %c0_7 = arith.constant 0 : index
    %8 = vector.load %arg8[%c0_6, %c0_7] : memref<32x128xf32, #tpu.memory_space<vmem>>, vector<32x128xf32>
    tpu.vector_store %arg8[%c0_6, %c0_7], %7 {strides = array<i32>} : memref<32x128xf32, #tpu.memory_space<vmem>>, vector<32x128xf32>,
    %c0_i32_8 = arith.constant 0 : i32
    %9 = arith.cmpi eq, %arg2, %c0_i32_8 : i32
    %10 = arith.extui %9 : i1 to i32
    %c0_i32_9 = arith.constant 0 : i32
    %11 = arith.cmpi ne, %10, %c0_i32_9 : i32
    scf.if %11 {
      %c0_10 = arith.constant 0 : index
      %c0_11 = arith.constant 0 : index
      %12 = vector.load %arg8[%c0_10, %c0_11] : memref<32x128xf32, #tpu.memory_space<vmem>>, vector<32x128xf32>
      %c0_12 = arith.constant 0 : index
      %c0_13 = arith.constant 0 : index
      %13 = vector.load %arg5[%c0_12, %c0_13] : memref<1x128xf32, #tpu.memory_space<vmem>>, vector<1x128xf32>
      %14 = vector.broadcast %13 : vector<1x128xf32> to vector<32x128xf32>
      %15 = arith.mulf %12, %14 : vector<32x128xf32>
      %c0_14 = arith.constant 0 : index
      %c0_15 = arith.constant 0 : index
      %16 = vector.load %arg6[%c0_14, %c0_15] : memref<1x128xf32, #tpu.memory_space<vmem>>, vector<1x128xf32>
      %17 = vector.broadcast %16 : vector<1x128xf32> to vector<32x128xf32>
      %18 = arith.addf %15, %17 : vector<32x128xf32>
      %cst_16 = arith.constant 0.000000e+00 : f32
      %19 = vector.broadcast %cst_16 : f32 to vector<32x128xf32>
      %20 = arith.maximumf %18, %19 : vector<32x128xf32>
      %21 = arith.truncf %20 : vector<32x128xf32> to vector<32x128xbf16>
      %c0_17 = arith.constant 0 : index
      %c0_18 = arith.constant 0 : index
      %22 = vector.load %arg7[%c0_17, %c0_18] : memref<32x128xbf16, #tpu.memory_space<vmem>>, vector<32x128xbf16>
      tpu.vector_store %arg7[%c0_17, %c0_18], %21 {strides = array<i32>} : memref<32x128xbf16, #tpu.memory_space<vmem>>, vector<32x128xbf16>,
    } else {
    }
    return
  }
  func.func @transform_0(%arg0: i32, %arg1: i32, %arg2: i32) -> (i32, i32) {
    %c0_i32 = arith.constant 0 : i32
    return %arg0, %arg2 : i32, i32
  }
  func.func @transform_1(%arg0: i32, %arg1: i32, %arg2: i32) -> (i32, i32) {
    %c0_i32 = arith.constant 0 : i32
    return %arg2, %arg1 : i32, i32
  }
  func.func @transform_2(%arg0: i32, %arg1: i32, %arg2: i32) -> (i32, i32) {
    %c0_i32 = arith.constant 0 : i32
    %c0_i32_0 = arith.constant 0 : i32
    return %c0_i32, %arg1 : i32, i32
  }
  func.func @transform_3(%arg0: i32, %arg1: i32, %arg2: i32) -> (i32, i32) {
    %c0_i32 = arith.constant 0 : i32
    %c0_i32_0 = arith.constant 0 : i32
    return %c0_i32, %arg1 : i32, i32
  }
  func.func @transform_4(%arg0: i32, %arg1: i32, %arg2: i32) -> (i32, i32) {
    %c0_i32 = arith.constant 0 : i32
    return %arg0, %arg1 : i32, i32
  }
}

module attributes {stable_mosaic.version = 11 : i64} {
  func.func @_mm_kernel(%arg0: i32, %arg1: i32, %arg2: i32, %arg3: memref<32x128xbf16, #tpu.memory_space<vmem>>, %arg4: memref<128x128xbf16, #tpu.memory_space<vmem>>, %arg5: memref<1x128xf32, #tpu.memory_space<vmem>>, %arg6: memref<1x128xf32, #tpu.memory_space<vmem>>, %arg7: memref<32x128xbf16, #tpu.memory_space<vmem>>, %arg8: memref<32x128xf32, #tpu.memory_space<vmem>>) attributes {dimension_semantics = [#tpu.dimension_semantics<parallel>, #tpu.dimension_semantics<parallel>, #tpu.dimension_semantics<arbitrary>], iteration_bounds = array<i64: 1, 1, 1>, scalar_prefetch = 0 : i64, scratch_operands = 1 : i64, tpu.core_type = #tpu.core_type<tc>, window_params = [{transform_indices = @transform_0, window_bounds = array<i64: 32, 128>}, {transform_indices = @transform_1, window_bounds = array<i64: 128, 128>}, {transform_indices = @transform_2, window_bounds = array<i64: 1, 128>}, {transform_indices = @transform_3, window_bounds = array<i64: 1, 128>}, {transform_indices = @transform_4, window_bounds = array<i64: 32, 128>}]} {
    %c0_i32 = arith.constant 0 : i32
    %0 = arith.cmpi eq, %arg2, %c0_i32 : i32
    %1 = arith.extui %0 : i1 to i32
    %c0_i32_0 = arith.constant 0 : i32
    %2 = arith.cmpi ne, %1, %c0_i32_0 : i32
    scf.if %2 {
      %cst_10 = arith.constant 0.000000e+00 : f32
      %12 = vector.broadcast %cst_10 : f32 to vector<32x128xf32>
      %c0_11 = arith.constant 0 : index
      %c0_12 = arith.constant 0 : index
      %13 = vector.load %arg8[%c0_11, %c0_12] : memref<32x128xf32, #tpu.memory_space<vmem>>, vector<32x128xf32>
      tpu.vector_store %arg8[%c0_11, %c0_12], %12 {strides = array<i32>} : memref<32x128xf32, #tpu.memory_space<vmem>>, vector<32x128xf32>,
    } else {
    }
    %c0 = arith.constant 0 : index
    %c0_1 = arith.constant 0 : index
    %3 = vector.load %arg8[%c0, %c0_1] : memref<32x128xf32, #tpu.memory_space<vmem>>, vector<32x128xf32>
    %c0_2 = arith.constant 0 : index
    %c0_3 = arith.constant 0 : index
    %4 = vector.load %arg3[%c0_2, %c0_3] : memref<32x128xbf16, #tpu.memory_space<vmem>>, vector<32x128xbf16>
    %c0_4 = arith.constant 0 : index
    %c0_5 = arith.constant 0 : index
    %5 = vector.load %arg4[%c0_4, %c0_5] : memref<128x128xbf16, #tpu.memory_space<vmem>>, vector<128x128xbf16>
    %cst = arith.constant dense<0.000000e+00> : vector<32x128xf32>
    %6 = tpu.matmul %4, %5, %cst {dimension_numbers = #tpu.dot_dimension_numbers<[1], [0], [0], [1], [0, 0, 1, 1], [], []>} : vector<32x128xbf16>, vector<128x128xbf16>, vector<32x128xf32> -> vector<32x128xf32>
    %7 = arith.addf %3, %6 : vector<32x128xf32>
    %c0_6 = arith.constant 0 : index
    %c0_7 = arith.constant 0 : index
    %8 = vector.load %arg8[%c0_6, %c0_7] : memref<32x128xf32, #tpu.memory_space<vmem>>, vector<32x128xf32>
    tpu.vector_store %arg8[%c0_6, %c0_7], %7 {strides = array<i32>} : memref<32x128xf32, #tpu.memory_space<vmem>>, vector<32x128xf32>,
    %c0_i32_8 = arith.constant 0 : i32
    %9 = arith.cmpi eq, %arg2, %c0_i32_8 : i32
    %10 = arith.extui %9 : i1 to i32
    %c0_i32_9 = arith.constant 0 : i32
    %11 = arith.cmpi ne, %10, %c0_i32_9 : i32
    scf.if %11 {
      %c0_10 = arith.constant 0 : index
      %c0_11 = arith.constant 0 : index
      %12 = vector.load %arg8[%c0_10, %c0_11] : memref<32x128xf32, #tpu.memory_space<vmem>>, vector<32x128xf32>
      %c0_12 = arith.constant 0 : index
      %c0_13 = arith.constant 0 : index
      %13 = vector.load %arg5[%c0_12, %c0_13] : memref<1x128xf32, #tpu.memory_space<vmem>>, vector<1x128xf32>
      %14 = vector.broadcast %13 : vector<1x128xf32> to vector<32x128xf32>
      %15 = arith.mulf %12, %14 : vector<32x128xf32>
      %c0_14 = arith.constant 0 : index
      %c0_15 = arith.constant 0 : index
      %16 = vector.load %arg6[%c0_14, %c0_15] : memref<1x128xf32, #tpu.memory_space<vmem>>, vector<1x128xf32>
      %17 = vector.broadcast %16 : vector<1x128xf32> to vector<32x128xf32>
      %18 = arith.addf %15, %17 : vector<32x128xf32>
      %19 = arith.truncf %18 : vector<32x128xf32> to vector<32x128xbf16>
      %c0_16 = arith.constant 0 : index
      %c0_17 = arith.constant 0 : index
      %20 = vector.load %arg7[%c0_16, %c0_17] : memref<32x128xbf16, #tpu.memory_space<vmem>>, vector<32x128xbf16>
      tpu.vector_store %arg7[%c0_16, %c0_17], %19 {strides = array<i32>} : memref<32x128xbf16, #tpu.memory_space<vmem>>, vector<32x128xbf16>,
    } else {
    }
    return
  }
  func.func @transform_0(%arg0: i32, %arg1: i32, %arg2: i32) -> (i32, i32) {
    %c0_i32 = arith.constant 0 : i32
    return %arg0, %arg2 : i32, i32
  }
  func.func @transform_1(%arg0: i32, %arg1: i32, %arg2: i32) -> (i32, i32) {
    %c0_i32 = arith.constant 0 : i32
    return %arg2, %arg1 : i32, i32
  }
  func.func @transform_2(%arg0: i32, %arg1: i32, %arg2: i32) -> (i32, i32) {
    %c0_i32 = arith.constant 0 : i32
    %c0_i32_0 = arith.constant 0 : i32
    return %c0_i32, %arg1 : i32, i32
  }
  func.func @transform_3(%arg0: i32, %arg1: i32, %arg2: i32) -> (i32, i32) {
    %c0_i32 = arith.constant 0 : i32
    %c0_i32_0 = arith.constant 0 : i32
    return %c0_i32, %arg1 : i32, i32
  }
  func.func @transform_4(%arg0: i32, %arg1: i32, %arg2: i32) -> (i32, i32) {
    %c0_i32 = arith.constant 0 : i32
    return %arg0, %arg1 : i32, i32
  }
}

module attributes {stable_mosaic.version = 11 : i64} {
  func.func @_mm_res_kernel(%arg0: i32, %arg1: i32, %arg2: i32, %arg3: memref<32x1152xbf16, #tpu.memory_space<vmem>>, %arg4: memref<1152x128xbf16, #tpu.memory_space<vmem>>, %arg5: memref<1x128xf32, #tpu.memory_space<vmem>>, %arg6: memref<1x128xf32, #tpu.memory_space<vmem>>, %arg7: memref<32x128xbf16, #tpu.memory_space<vmem>>, %arg8: memref<32x128xbf16, #tpu.memory_space<vmem>>, %arg9: memref<32x128xf32, #tpu.memory_space<vmem>>) attributes {dimension_semantics = [#tpu.dimension_semantics<parallel>, #tpu.dimension_semantics<parallel>, #tpu.dimension_semantics<arbitrary>], iteration_bounds = array<i64: 1, 1, 1>, scalar_prefetch = 0 : i64, scratch_operands = 1 : i64, tpu.core_type = #tpu.core_type<tc>, window_params = [{transform_indices = @transform_0, window_bounds = array<i64: 32, 1152>}, {transform_indices = @transform_1, window_bounds = array<i64: 1152, 128>}, {transform_indices = @transform_2, window_bounds = array<i64: 1, 128>}, {transform_indices = @transform_3, window_bounds = array<i64: 1, 128>}, {transform_indices = @transform_4, window_bounds = array<i64: 32, 128>}, {transform_indices = @transform_5, window_bounds = array<i64: 32, 128>}]} {
    %c0_i32 = arith.constant 0 : i32
    %0 = arith.cmpi eq, %arg2, %c0_i32 : i32
    %1 = arith.extui %0 : i1 to i32
    %c0_i32_0 = arith.constant 0 : i32
    %2 = arith.cmpi ne, %1, %c0_i32_0 : i32
    scf.if %2 {
      %cst_10 = arith.constant 0.000000e+00 : f32
      %12 = vector.broadcast %cst_10 : f32 to vector<32x128xf32>
      %c0_11 = arith.constant 0 : index
      %c0_12 = arith.constant 0 : index
      %13 = vector.load %arg9[%c0_11, %c0_12] : memref<32x128xf32, #tpu.memory_space<vmem>>, vector<32x128xf32>
      tpu.vector_store %arg9[%c0_11, %c0_12], %12 {strides = array<i32>} : memref<32x128xf32, #tpu.memory_space<vmem>>, vector<32x128xf32>,
    } else {
    }
    %c0 = arith.constant 0 : index
    %c0_1 = arith.constant 0 : index
    %3 = vector.load %arg9[%c0, %c0_1] : memref<32x128xf32, #tpu.memory_space<vmem>>, vector<32x128xf32>
    %c0_2 = arith.constant 0 : index
    %c0_3 = arith.constant 0 : index
    %4 = vector.load %arg3[%c0_2, %c0_3] : memref<32x1152xbf16, #tpu.memory_space<vmem>>, vector<32x1152xbf16>
    %c0_4 = arith.constant 0 : index
    %c0_5 = arith.constant 0 : index
    %5 = vector.load %arg4[%c0_4, %c0_5] : memref<1152x128xbf16, #tpu.memory_space<vmem>>, vector<1152x128xbf16>
    %cst = arith.constant dense<0.000000e+00> : vector<32x128xf32>
    %6 = tpu.matmul %4, %5, %cst {dimension_numbers = #tpu.dot_dimension_numbers<[1], [0], [0], [1], [0, 0, 1, 1], [], []>} : vector<32x1152xbf16>, vector<1152x128xbf16>, vector<32x128xf32> -> vector<32x128xf32>
    %7 = arith.addf %3, %6 : vector<32x128xf32>
    %c0_6 = arith.constant 0 : index
    %c0_7 = arith.constant 0 : index
    %8 = vector.load %arg9[%c0_6, %c0_7] : memref<32x128xf32, #tpu.memory_space<vmem>>, vector<32x128xf32>
    tpu.vector_store %arg9[%c0_6, %c0_7], %7 {strides = array<i32>} : memref<32x128xf32, #tpu.memory_space<vmem>>, vector<32x128xf32>,
    %c0_i32_8 = arith.constant 0 : i32
    %9 = arith.cmpi eq, %arg2, %c0_i32_8 : i32
    %10 = arith.extui %9 : i1 to i32
    %c0_i32_9 = arith.constant 0 : i32
    %11 = arith.cmpi ne, %10, %c0_i32_9 : i32
    scf.if %11 {
      %c0_10 = arith.constant 0 : index
      %c0_11 = arith.constant 0 : index
      %12 = vector.load %arg9[%c0_10, %c0_11] : memref<32x128xf32, #tpu.memory_space<vmem>>, vector<32x128xf32>
      %c0_12 = arith.constant 0 : index
      %c0_13 = arith.constant 0 : index
      %13 = vector.load %arg5[%c0_12, %c0_13] : memref<1x128xf32, #tpu.memory_space<vmem>>, vector<1x128xf32>
      %14 = vector.broadcast %13 : vector<1x128xf32> to vector<32x128xf32>
      %15 = arith.mulf %12, %14 : vector<32x128xf32>
      %c0_14 = arith.constant 0 : index
      %c0_15 = arith.constant 0 : index
      %16 = vector.load %arg6[%c0_14, %c0_15] : memref<1x128xf32, #tpu.memory_space<vmem>>, vector<1x128xf32>
      %17 = vector.broadcast %16 : vector<1x128xf32> to vector<32x128xf32>
      %18 = arith.addf %15, %17 : vector<32x128xf32>
      %c0_16 = arith.constant 0 : index
      %c0_17 = arith.constant 0 : index
      %19 = vector.load %arg7[%c0_16, %c0_17] : memref<32x128xbf16, #tpu.memory_space<vmem>>, vector<32x128xbf16>
      %20 = arith.extf %19 : vector<32x128xbf16> to vector<32x128xf32>
      %21 = arith.addf %18, %20 : vector<32x128xf32>
      %cst_18 = arith.constant 0.000000e+00 : f32
      %22 = vector.broadcast %cst_18 : f32 to vector<32x128xf32>
      %23 = arith.maximumf %21, %22 : vector<32x128xf32>
      %24 = arith.truncf %23 : vector<32x128xf32> to vector<32x128xbf16>
      %c0_19 = arith.constant 0 : index
      %c0_20 = arith.constant 0 : index
      %25 = vector.load %arg8[%c0_19, %c0_20] : memref<32x128xbf16, #tpu.memory_space<vmem>>, vector<32x128xbf16>
      tpu.vector_store %arg8[%c0_19, %c0_20], %24 {strides = array<i32>} : memref<32x128xbf16, #tpu.memory_space<vmem>>, vector<32x128xbf16>,
    } else {
    }
    return
  }
  func.func @transform_0(%arg0: i32, %arg1: i32, %arg2: i32) -> (i32, i32) {
    %c0_i32 = arith.constant 0 : i32
    return %arg0, %arg2 : i32, i32
  }
  func.func @transform_1(%arg0: i32, %arg1: i32, %arg2: i32) -> (i32, i32) {
    %c0_i32 = arith.constant 0 : i32
    return %arg2, %arg1 : i32, i32
  }
  func.func @transform_2(%arg0: i32, %arg1: i32, %arg2: i32) -> (i32, i32) {
    %c0_i32 = arith.constant 0 : i32
    %c0_i32_0 = arith.constant 0 : i32
    return %c0_i32, %arg1 : i32, i32
  }
  func.func @transform_3(%arg0: i32, %arg1: i32, %arg2: i32) -> (i32, i32) {
    %c0_i32 = arith.constant 0 : i32
    %c0_i32_0 = arith.constant 0 : i32
    return %c0_i32, %arg1 : i32, i32
  }
  func.func @transform_4(%arg0: i32, %arg1: i32, %arg2: i32) -> (i32, i32) {
    %c0_i32 = arith.constant 0 : i32
    return %arg0, %arg1 : i32, i32
  }
  func.func @transform_5(%arg0: i32, %arg1: i32, %arg2: i32) -> (i32, i32) {
    %c0_i32 = arith.constant 0 : i32
    return %arg0, %arg1 : i32, i32
  }
}

module attributes {stable_mosaic.version = 11 : i64} {
  func.func @_mm_kernel(%arg0: i32, %arg1: i32, %arg2: i32, %arg3: memref<32x1152xbf16, #tpu.memory_space<vmem>>, %arg4: memref<1152x128xbf16, #tpu.memory_space<vmem>>, %arg5: memref<1x128xf32, #tpu.memory_space<vmem>>, %arg6: memref<1x128xf32, #tpu.memory_space<vmem>>, %arg7: memref<32x128xbf16, #tpu.memory_space<vmem>>, %arg8: memref<32x128xf32, #tpu.memory_space<vmem>>) attributes {dimension_semantics = [#tpu.dimension_semantics<parallel>, #tpu.dimension_semantics<parallel>, #tpu.dimension_semantics<arbitrary>], iteration_bounds = array<i64: 1, 1, 1>, scalar_prefetch = 0 : i64, scratch_operands = 1 : i64, tpu.core_type = #tpu.core_type<tc>, window_params = [{transform_indices = @transform_0, window_bounds = array<i64: 32, 1152>}, {transform_indices = @transform_1, window_bounds = array<i64: 1152, 128>}, {transform_indices = @transform_2, window_bounds = array<i64: 1, 128>}, {transform_indices = @transform_3, window_bounds = array<i64: 1, 128>}, {transform_indices = @transform_4, window_bounds = array<i64: 32, 128>}]} {
    %c0_i32 = arith.constant 0 : i32
    %0 = arith.cmpi eq, %arg2, %c0_i32 : i32
    %1 = arith.extui %0 : i1 to i32
    %c0_i32_0 = arith.constant 0 : i32
    %2 = arith.cmpi ne, %1, %c0_i32_0 : i32
    scf.if %2 {
      %cst_10 = arith.constant 0.000000e+00 : f32
      %12 = vector.broadcast %cst_10 : f32 to vector<32x128xf32>
      %c0_11 = arith.constant 0 : index
      %c0_12 = arith.constant 0 : index
      %13 = vector.load %arg8[%c0_11, %c0_12] : memref<32x128xf32, #tpu.memory_space<vmem>>, vector<32x128xf32>
      tpu.vector_store %arg8[%c0_11, %c0_12], %12 {strides = array<i32>} : memref<32x128xf32, #tpu.memory_space<vmem>>, vector<32x128xf32>,
    } else {
    }
    %c0 = arith.constant 0 : index
    %c0_1 = arith.constant 0 : index
    %3 = vector.load %arg8[%c0, %c0_1] : memref<32x128xf32, #tpu.memory_space<vmem>>, vector<32x128xf32>
    %c0_2 = arith.constant 0 : index
    %c0_3 = arith.constant 0 : index
    %4 = vector.load %arg3[%c0_2, %c0_3] : memref<32x1152xbf16, #tpu.memory_space<vmem>>, vector<32x1152xbf16>
    %c0_4 = arith.constant 0 : index
    %c0_5 = arith.constant 0 : index
    %5 = vector.load %arg4[%c0_4, %c0_5] : memref<1152x128xbf16, #tpu.memory_space<vmem>>, vector<1152x128xbf16>
    %cst = arith.constant dense<0.000000e+00> : vector<32x128xf32>
    %6 = tpu.matmul %4, %5, %cst {dimension_numbers = #tpu.dot_dimension_numbers<[1], [0], [0], [1], [0, 0, 1, 1], [], []>} : vector<32x1152xbf16>, vector<1152x128xbf16>, vector<32x128xf32> -> vector<32x128xf32>
    %7 = arith.addf %3, %6 : vector<32x128xf32>
    %c0_6 = arith.constant 0 : index
    %c0_7 = arith.constant 0 : index
    %8 = vector.load %arg8[%c0_6, %c0_7] : memref<32x128xf32, #tpu.memory_space<vmem>>, vector<32x128xf32>
    tpu.vector_store %arg8[%c0_6, %c0_7], %7 {strides = array<i32>} : memref<32x128xf32, #tpu.memory_space<vmem>>, vector<32x128xf32>,
    %c0_i32_8 = arith.constant 0 : i32
    %9 = arith.cmpi eq, %arg2, %c0_i32_8 : i32
    %10 = arith.extui %9 : i1 to i32
    %c0_i32_9 = arith.constant 0 : i32
    %11 = arith.cmpi ne, %10, %c0_i32_9 : i32
    scf.if %11 {
      %c0_10 = arith.constant 0 : index
      %c0_11 = arith.constant 0 : index
      %12 = vector.load %arg8[%c0_10, %c0_11] : memref<32x128xf32, #tpu.memory_space<vmem>>, vector<32x128xf32>
      %c0_12 = arith.constant 0 : index
      %c0_13 = arith.constant 0 : index
      %13 = vector.load %arg5[%c0_12, %c0_13] : memref<1x128xf32, #tpu.memory_space<vmem>>, vector<1x128xf32>
      %14 = vector.broadcast %13 : vector<1x128xf32> to vector<32x128xf32>
      %15 = arith.mulf %12, %14 : vector<32x128xf32>
      %c0_14 = arith.constant 0 : index
      %c0_15 = arith.constant 0 : index
      %16 = vector.load %arg6[%c0_14, %c0_15] : memref<1x128xf32, #tpu.memory_space<vmem>>, vector<1x128xf32>
      %17 = vector.broadcast %16 : vector<1x128xf32> to vector<32x128xf32>
      %18 = arith.addf %15, %17 : vector<32x128xf32>
      %cst_16 = arith.constant 0.000000e+00 : f32
      %19 = vector.broadcast %cst_16 : f32 to vector<32x128xf32>
      %20 = arith.maximumf %18, %19 : vector<32x128xf32>
      %21 = arith.truncf %20 : vector<32x128xf32> to vector<32x128xbf16>
      %c0_17 = arith.constant 0 : index
      %c0_18 = arith.constant 0 : index
      %22 = vector.load %arg7[%c0_17, %c0_18] : memref<32x128xbf16, #tpu.memory_space<vmem>>, vector<32x128xbf16>
      tpu.vector_store %arg7[%c0_17, %c0_18], %21 {strides = array<i32>} : memref<32x128xbf16, #tpu.memory_space<vmem>>, vector<32x128xbf16>,
    } else {
    }
    return
  }
  func.func @transform_0(%arg0: i32, %arg1: i32, %arg2: i32) -> (i32, i32) {
    %c0_i32 = arith.constant 0 : i32
    return %arg0, %arg2 : i32, i32
  }
  func.func @transform_1(%arg0: i32, %arg1: i32, %arg2: i32) -> (i32, i32) {
    %c0_i32 = arith.constant 0 : i32
    return %arg2, %arg1 : i32, i32
  }
  func.func @transform_2(%arg0: i32, %arg1: i32, %arg2: i32) -> (i32, i32) {
    %c0_i32 = arith.constant 0 : i32
    %c0_i32_0 = arith.constant 0 : i32
    return %c0_i32, %arg1 : i32, i32
  }
  func.func @transform_3(%arg0: i32, %arg1: i32, %arg2: i32) -> (i32, i32) {
    %c0_i32 = arith.constant 0 : i32
    %c0_i32_0 = arith.constant 0 : i32
    return %c0_i32, %arg1 : i32, i32
  }
  func.func @transform_4(%arg0: i32, %arg1: i32, %arg2: i32) -> (i32, i32) {
    %c0_i32 = arith.constant 0 : i32
    return %arg0, %arg1 : i32, i32
  }
}

module attributes {stable_mosaic.version = 11 : i64} {
  func.func @_mm_kernel(%arg0: i32, %arg1: i32, %arg2: i32, %arg3: memref<16x1152xbf16, #tpu.memory_space<vmem>>, %arg4: memref<1152x256xbf16, #tpu.memory_space<vmem>>, %arg5: memref<1x256xf32, #tpu.memory_space<vmem>>, %arg6: memref<1x256xf32, #tpu.memory_space<vmem>>, %arg7: memref<16x256xbf16, #tpu.memory_space<vmem>>, %arg8: memref<16x256xf32, #tpu.memory_space<vmem>>) attributes {dimension_semantics = [#tpu.dimension_semantics<parallel>, #tpu.dimension_semantics<parallel>, #tpu.dimension_semantics<arbitrary>], iteration_bounds = array<i64: 1, 1, 1>, scalar_prefetch = 0 : i64, scratch_operands = 1 : i64, tpu.core_type = #tpu.core_type<tc>, window_params = [{transform_indices = @transform_0, window_bounds = array<i64: 16, 1152>}, {transform_indices = @transform_1, window_bounds = array<i64: 1152, 256>}, {transform_indices = @transform_2, window_bounds = array<i64: 1, 256>}, {transform_indices = @transform_3, window_bounds = array<i64: 1, 256>}, {transform_indices = @transform_4, window_bounds = array<i64: 16, 256>}]} {
    %c0_i32 = arith.constant 0 : i32
    %0 = arith.cmpi eq, %arg2, %c0_i32 : i32
    %1 = arith.extui %0 : i1 to i32
    %c0_i32_0 = arith.constant 0 : i32
    %2 = arith.cmpi ne, %1, %c0_i32_0 : i32
    scf.if %2 {
      %cst_10 = arith.constant 0.000000e+00 : f32
      %12 = vector.broadcast %cst_10 : f32 to vector<16x256xf32>
      %c0_11 = arith.constant 0 : index
      %c0_12 = arith.constant 0 : index
      %13 = vector.load %arg8[%c0_11, %c0_12] : memref<16x256xf32, #tpu.memory_space<vmem>>, vector<16x256xf32>
      tpu.vector_store %arg8[%c0_11, %c0_12], %12 {strides = array<i32>} : memref<16x256xf32, #tpu.memory_space<vmem>>, vector<16x256xf32>,
    } else {
    }
    %c0 = arith.constant 0 : index
    %c0_1 = arith.constant 0 : index
    %3 = vector.load %arg8[%c0, %c0_1] : memref<16x256xf32, #tpu.memory_space<vmem>>, vector<16x256xf32>
    %c0_2 = arith.constant 0 : index
    %c0_3 = arith.constant 0 : index
    %4 = vector.load %arg3[%c0_2, %c0_3] : memref<16x1152xbf16, #tpu.memory_space<vmem>>, vector<16x1152xbf16>
    %c0_4 = arith.constant 0 : index
    %c0_5 = arith.constant 0 : index
    %5 = vector.load %arg4[%c0_4, %c0_5] : memref<1152x256xbf16, #tpu.memory_space<vmem>>, vector<1152x256xbf16>
    %cst = arith.constant dense<0.000000e+00> : vector<16x256xf32>
    %6 = tpu.matmul %4, %5, %cst {dimension_numbers = #tpu.dot_dimension_numbers<[1], [0], [0], [1], [0, 0, 1, 1], [], []>} : vector<16x1152xbf16>, vector<1152x256xbf16>, vector<16x256xf32> -> vector<16x256xf32>
    %7 = arith.addf %3, %6 : vector<16x256xf32>
    %c0_6 = arith.constant 0 : index
    %c0_7 = arith.constant 0 : index
    %8 = vector.load %arg8[%c0_6, %c0_7] : memref<16x256xf32, #tpu.memory_space<vmem>>, vector<16x256xf32>
    tpu.vector_store %arg8[%c0_6, %c0_7], %7 {strides = array<i32>} : memref<16x256xf32, #tpu.memory_space<vmem>>, vector<16x256xf32>,
    %c0_i32_8 = arith.constant 0 : i32
    %9 = arith.cmpi eq, %arg2, %c0_i32_8 : i32
    %10 = arith.extui %9 : i1 to i32
    %c0_i32_9 = arith.constant 0 : i32
    %11 = arith.cmpi ne, %10, %c0_i32_9 : i32
    scf.if %11 {
      %c0_10 = arith.constant 0 : index
      %c0_11 = arith.constant 0 : index
      %12 = vector.load %arg8[%c0_10, %c0_11] : memref<16x256xf32, #tpu.memory_space<vmem>>, vector<16x256xf32>
      %c0_12 = arith.constant 0 : index
      %c0_13 = arith.constant 0 : index
      %13 = vector.load %arg5[%c0_12, %c0_13] : memref<1x256xf32, #tpu.memory_space<vmem>>, vector<1x256xf32>
      %14 = vector.broadcast %13 : vector<1x256xf32> to vector<16x256xf32>
      %15 = arith.mulf %12, %14 : vector<16x256xf32>
      %c0_14 = arith.constant 0 : index
      %c0_15 = arith.constant 0 : index
      %16 = vector.load %arg6[%c0_14, %c0_15] : memref<1x256xf32, #tpu.memory_space<vmem>>, vector<1x256xf32>
      %17 = vector.broadcast %16 : vector<1x256xf32> to vector<16x256xf32>
      %18 = arith.addf %15, %17 : vector<16x256xf32>
      %cst_16 = arith.constant 0.000000e+00 : f32
      %19 = vector.broadcast %cst_16 : f32 to vector<16x256xf32>
      %20 = arith.maximumf %18, %19 : vector<16x256xf32>
      %21 = arith.truncf %20 : vector<16x256xf32> to vector<16x256xbf16>
      %c0_17 = arith.constant 0 : index
      %c0_18 = arith.constant 0 : index
      %22 = vector.load %arg7[%c0_17, %c0_18] : memref<16x256xbf16, #tpu.memory_space<vmem>>, vector<16x256xbf16>
      tpu.vector_store %arg7[%c0_17, %c0_18], %21 {strides = array<i32>} : memref<16x256xbf16, #tpu.memory_space<vmem>>, vector<16x256xbf16>,
    } else {
    }
    return
  }
  func.func @transform_0(%arg0: i32, %arg1: i32, %arg2: i32) -> (i32, i32) {
    %c0_i32 = arith.constant 0 : i32
    return %arg0, %arg2 : i32, i32
  }
  func.func @transform_1(%arg0: i32, %arg1: i32, %arg2: i32) -> (i32, i32) {
    %c0_i32 = arith.constant 0 : i32
    return %arg2, %arg1 : i32, i32
  }
  func.func @transform_2(%arg0: i32, %arg1: i32, %arg2: i32) -> (i32, i32) {
    %c0_i32 = arith.constant 0 : i32
    %c0_i32_0 = arith.constant 0 : i32
    return %c0_i32, %arg1 : i32, i32
  }
  func.func @transform_3(%arg0: i32, %arg1: i32, %arg2: i32) -> (i32, i32) {
    %c0_i32 = arith.constant 0 : i32
    %c0_i32_0 = arith.constant 0 : i32
    return %c0_i32, %arg1 : i32, i32
  }
  func.func @transform_4(%arg0: i32, %arg1: i32, %arg2: i32) -> (i32, i32) {
    %c0_i32 = arith.constant 0 : i32
    return %arg0, %arg1 : i32, i32
  }
}

module attributes {stable_mosaic.version = 11 : i64} {
  func.func @_mm_res_kernel(%arg0: i32, %arg1: i32, %arg2: i32, %arg3: memref<16x384xbf16, #tpu.memory_space<vmem>>, %arg4: memref<384x256xbf16, #tpu.memory_space<vmem>>, %arg5: memref<1x256xf32, #tpu.memory_space<vmem>>, %arg6: memref<1x256xf32, #tpu.memory_space<vmem>>, %arg7: memref<16x256xbf16, #tpu.memory_space<vmem>>, %arg8: memref<16x256xbf16, #tpu.memory_space<vmem>>, %arg9: memref<16x256xf32, #tpu.memory_space<vmem>>) attributes {dimension_semantics = [#tpu.dimension_semantics<parallel>, #tpu.dimension_semantics<parallel>, #tpu.dimension_semantics<arbitrary>], iteration_bounds = array<i64: 1, 1, 6>, scalar_prefetch = 0 : i64, scratch_operands = 1 : i64, tpu.core_type = #tpu.core_type<tc>, window_params = [{transform_indices = @transform_0, window_bounds = array<i64: 16, 384>}, {transform_indices = @transform_1, window_bounds = array<i64: 384, 256>}, {transform_indices = @transform_2, window_bounds = array<i64: 1, 256>}, {transform_indices = @transform_3, window_bounds = array<i64: 1, 256>}, {transform_indices = @transform_4, window_bounds = array<i64: 16, 256>}, {transform_indices = @transform_5, window_bounds = array<i64: 16, 256>}]} {
    %c0_i32 = arith.constant 0 : i32
    %0 = arith.cmpi eq, %arg2, %c0_i32 : i32
    %1 = arith.extui %0 : i1 to i32
    %c0_i32_0 = arith.constant 0 : i32
    %2 = arith.cmpi ne, %1, %c0_i32_0 : i32
    scf.if %2 {
      %cst_9 = arith.constant 0.000000e+00 : f32
      %12 = vector.broadcast %cst_9 : f32 to vector<16x256xf32>
      %c0_10 = arith.constant 0 : index
      %c0_11 = arith.constant 0 : index
      %13 = vector.load %arg9[%c0_10, %c0_11] : memref<16x256xf32, #tpu.memory_space<vmem>>, vector<16x256xf32>
      tpu.vector_store %arg9[%c0_10, %c0_11], %12 {strides = array<i32>} : memref<16x256xf32, #tpu.memory_space<vmem>>, vector<16x256xf32>,
    } else {
    }
    %c0 = arith.constant 0 : index
    %c0_1 = arith.constant 0 : index
    %3 = vector.load %arg9[%c0, %c0_1] : memref<16x256xf32, #tpu.memory_space<vmem>>, vector<16x256xf32>
    %c0_2 = arith.constant 0 : index
    %c0_3 = arith.constant 0 : index
    %4 = vector.load %arg3[%c0_2, %c0_3] : memref<16x384xbf16, #tpu.memory_space<vmem>>, vector<16x384xbf16>
    %c0_4 = arith.constant 0 : index
    %c0_5 = arith.constant 0 : index
    %5 = vector.load %arg4[%c0_4, %c0_5] : memref<384x256xbf16, #tpu.memory_space<vmem>>, vector<384x256xbf16>
    %cst = arith.constant dense<0.000000e+00> : vector<16x256xf32>
    %6 = tpu.matmul %4, %5, %cst {dimension_numbers = #tpu.dot_dimension_numbers<[1], [0], [0], [1], [0, 0, 1, 1], [], []>} : vector<16x384xbf16>, vector<384x256xbf16>, vector<16x256xf32> -> vector<16x256xf32>
    %7 = arith.addf %3, %6 : vector<16x256xf32>
    %c0_6 = arith.constant 0 : index
    %c0_7 = arith.constant 0 : index
    %8 = vector.load %arg9[%c0_6, %c0_7] : memref<16x256xf32, #tpu.memory_space<vmem>>, vector<16x256xf32>
    tpu.vector_store %arg9[%c0_6, %c0_7], %7 {strides = array<i32>} : memref<16x256xf32, #tpu.memory_space<vmem>>, vector<16x256xf32>,
    %c5_i32 = arith.constant 5 : i32
    %9 = arith.cmpi eq, %arg2, %c5_i32 : i32
    %10 = arith.extui %9 : i1 to i32
    %c0_i32_8 = arith.constant 0 : i32
    %11 = arith.cmpi ne, %10, %c0_i32_8 : i32
    scf.if %11 {
      %c0_9 = arith.constant 0 : index
      %c0_10 = arith.constant 0 : index
      %12 = vector.load %arg9[%c0_9, %c0_10] : memref<16x256xf32, #tpu.memory_space<vmem>>, vector<16x256xf32>
      %c0_11 = arith.constant 0 : index
      %c0_12 = arith.constant 0 : index
      %13 = vector.load %arg5[%c0_11, %c0_12] : memref<1x256xf32, #tpu.memory_space<vmem>>, vector<1x256xf32>
      %14 = vector.broadcast %13 : vector<1x256xf32> to vector<16x256xf32>
      %15 = arith.mulf %12, %14 : vector<16x256xf32>
      %c0_13 = arith.constant 0 : index
      %c0_14 = arith.constant 0 : index
      %16 = vector.load %arg6[%c0_13, %c0_14] : memref<1x256xf32, #tpu.memory_space<vmem>>, vector<1x256xf32>
      %17 = vector.broadcast %16 : vector<1x256xf32> to vector<16x256xf32>
      %18 = arith.addf %15, %17 : vector<16x256xf32>
      %c0_15 = arith.constant 0 : index
      %c0_16 = arith.constant 0 : index
      %19 = vector.load %arg7[%c0_15, %c0_16] : memref<16x256xbf16, #tpu.memory_space<vmem>>, vector<16x256xbf16>
      %20 = arith.extf %19 : vector<16x256xbf16> to vector<16x256xf32>
      %21 = arith.addf %18, %20 : vector<16x256xf32>
      %cst_17 = arith.constant 0.000000e+00 : f32
      %22 = vector.broadcast %cst_17 : f32 to vector<16x256xf32>
      %23 = arith.maximumf %21, %22 : vector<16x256xf32>
      %24 = arith.truncf %23 : vector<16x256xf32> to vector<16x256xbf16>
      %c0_18 = arith.constant 0 : index
      %c0_19 = arith.constant 0 : index
      %25 = vector.load %arg8[%c0_18, %c0_19] : memref<16x256xbf16, #tpu.memory_space<vmem>>, vector<16x256xbf16>
      tpu.vector_store %arg8[%c0_18, %c0_19], %24 {strides = array<i32>} : memref<16x256xbf16, #tpu.memory_space<vmem>>, vector<16x256xbf16>,
    } else {
    }
    return
  }
  func.func @transform_0(%arg0: i32, %arg1: i32, %arg2: i32) -> (i32, i32) {
    %c0_i32 = arith.constant 0 : i32
    return %arg0, %arg2 : i32, i32
  }
  func.func @transform_1(%arg0: i32, %arg1: i32, %arg2: i32) -> (i32, i32) {
    %c0_i32 = arith.constant 0 : i32
    return %arg2, %arg1 : i32, i32
  }
  func.func @transform_2(%arg0: i32, %arg1: i32, %arg2: i32) -> (i32, i32) {
    %c0_i32 = arith.constant 0 : i32
    %c0_i32_0 = arith.constant 0 : i32
    return %c0_i32, %arg1 : i32, i32
  }
  func.func @transform_3(%arg0: i32, %arg1: i32, %arg2: i32) -> (i32, i32) {
    %c0_i32 = arith.constant 0 : i32
    %c0_i32_0 = arith.constant 0 : i32
    return %c0_i32, %arg1 : i32, i32
  }
  func.func @transform_4(%arg0: i32, %arg1: i32, %arg2: i32) -> (i32, i32) {
    %c0_i32 = arith.constant 0 : i32
    return %arg0, %arg1 : i32, i32
  }
  func.func @transform_5(%arg0: i32, %arg1: i32, %arg2: i32) -> (i32, i32) {
    %c0_i32 = arith.constant 0 : i32
    return %arg0, %arg1 : i32, i32
  }
}

module attributes {stable_mosaic.version = 11 : i64} {
  func.func @_mm_kernel(%arg0: i32, %arg1: i32, %arg2: i32, %arg3: memref<16x128xbf16, #tpu.memory_space<vmem>>, %arg4: memref<128x256xbf16, #tpu.memory_space<vmem>>, %arg5: memref<1x256xf32, #tpu.memory_space<vmem>>, %arg6: memref<1x256xf32, #tpu.memory_space<vmem>>, %arg7: memref<16x256xbf16, #tpu.memory_space<vmem>>, %arg8: memref<16x256xf32, #tpu.memory_space<vmem>>) attributes {dimension_semantics = [#tpu.dimension_semantics<parallel>, #tpu.dimension_semantics<parallel>, #tpu.dimension_semantics<arbitrary>], iteration_bounds = array<i64: 1, 1, 1>, scalar_prefetch = 0 : i64, scratch_operands = 1 : i64, tpu.core_type = #tpu.core_type<tc>, window_params = [{transform_indices = @transform_0, window_bounds = array<i64: 16, 128>}, {transform_indices = @transform_1, window_bounds = array<i64: 128, 256>}, {transform_indices = @transform_2, window_bounds = array<i64: 1, 256>}, {transform_indices = @transform_3, window_bounds = array<i64: 1, 256>}, {transform_indices = @transform_4, window_bounds = array<i64: 16, 256>}]} {
    %c0_i32 = arith.constant 0 : i32
    %0 = arith.cmpi eq, %arg2, %c0_i32 : i32
    %1 = arith.extui %0 : i1 to i32
    %c0_i32_0 = arith.constant 0 : i32
    %2 = arith.cmpi ne, %1, %c0_i32_0 : i32
    scf.if %2 {
      %cst_10 = arith.constant 0.000000e+00 : f32
      %12 = vector.broadcast %cst_10 : f32 to vector<16x256xf32>
      %c0_11 = arith.constant 0 : index
      %c0_12 = arith.constant 0 : index
      %13 = vector.load %arg8[%c0_11, %c0_12] : memref<16x256xf32, #tpu.memory_space<vmem>>, vector<16x256xf32>
      tpu.vector_store %arg8[%c0_11, %c0_12], %12 {strides = array<i32>} : memref<16x256xf32, #tpu.memory_space<vmem>>, vector<16x256xf32>,
    } else {
    }
    %c0 = arith.constant 0 : index
    %c0_1 = arith.constant 0 : index
    %3 = vector.load %arg8[%c0, %c0_1] : memref<16x256xf32, #tpu.memory_space<vmem>>, vector<16x256xf32>
    %c0_2 = arith.constant 0 : index
    %c0_3 = arith.constant 0 : index
    %4 = vector.load %arg3[%c0_2, %c0_3] : memref<16x128xbf16, #tpu.memory_space<vmem>>, vector<16x128xbf16>
    %c0_4 = arith.constant 0 : index
    %c0_5 = arith.constant 0 : index
    %5 = vector.load %arg4[%c0_4, %c0_5] : memref<128x256xbf16, #tpu.memory_space<vmem>>, vector<128x256xbf16>
    %cst = arith.constant dense<0.000000e+00> : vector<16x256xf32>
    %6 = tpu.matmul %4, %5, %cst {dimension_numbers = #tpu.dot_dimension_numbers<[1], [0], [0], [1], [0, 0, 1, 1], [], []>} : vector<16x128xbf16>, vector<128x256xbf16>, vector<16x256xf32> -> vector<16x256xf32>
    %7 = arith.addf %3, %6 : vector<16x256xf32>
    %c0_6 = arith.constant 0 : index
    %c0_7 = arith.constant 0 : index
    %8 = vector.load %arg8[%c0_6, %c0_7] : memref<16x256xf32, #tpu.memory_space<vmem>>, vector<16x256xf32>
    tpu.vector_store %arg8[%c0_6, %c0_7], %7 {strides = array<i32>} : memref<16x256xf32, #tpu.memory_space<vmem>>, vector<16x256xf32>,
    %c0_i32_8 = arith.constant 0 : i32
    %9 = arith.cmpi eq, %arg2, %c0_i32_8 : i32
    %10 = arith.extui %9 : i1 to i32
    %c0_i32_9 = arith.constant 0 : i32
    %11 = arith.cmpi ne, %10, %c0_i32_9 : i32
    scf.if %11 {
      %c0_10 = arith.constant 0 : index
      %c0_11 = arith.constant 0 : index
      %12 = vector.load %arg8[%c0_10, %c0_11] : memref<16x256xf32, #tpu.memory_space<vmem>>, vector<16x256xf32>
      %c0_12 = arith.constant 0 : index
      %c0_13 = arith.constant 0 : index
      %13 = vector.load %arg5[%c0_12, %c0_13] : memref<1x256xf32, #tpu.memory_space<vmem>>, vector<1x256xf32>
      %14 = vector.broadcast %13 : vector<1x256xf32> to vector<16x256xf32>
      %15 = arith.mulf %12, %14 : vector<16x256xf32>
      %c0_14 = arith.constant 0 : index
      %c0_15 = arith.constant 0 : index
      %16 = vector.load %arg6[%c0_14, %c0_15] : memref<1x256xf32, #tpu.memory_space<vmem>>, vector<1x256xf32>
      %17 = vector.broadcast %16 : vector<1x256xf32> to vector<16x256xf32>
      %18 = arith.addf %15, %17 : vector<16x256xf32>
      %19 = arith.truncf %18 : vector<16x256xf32> to vector<16x256xbf16>
      %c0_16 = arith.constant 0 : index
      %c0_17 = arith.constant 0 : index
      %20 = vector.load %arg7[%c0_16, %c0_17] : memref<16x256xbf16, #tpu.memory_space<vmem>>, vector<16x256xbf16>
      tpu.vector_store %arg7[%c0_16, %c0_17], %19 {strides = array<i32>} : memref<16x256xbf16, #tpu.memory_space<vmem>>, vector<16x256xbf16>,
    } else {
    }
    return
  }
  func.func @transform_0(%arg0: i32, %arg1: i32, %arg2: i32) -> (i32, i32) {
    %c0_i32 = arith.constant 0 : i32
    return %arg0, %arg2 : i32, i32
  }
  func.func @transform_1(%arg0: i32, %arg1: i32, %arg2: i32) -> (i32, i32) {
    %c0_i32 = arith.constant 0 : i32
    return %arg2, %arg1 : i32, i32
  }
  func.func @transform_2(%arg0: i32, %arg1: i32, %arg2: i32) -> (i32, i32) {
    %c0_i32 = arith.constant 0 : i32
    %c0_i32_0 = arith.constant 0 : i32
    return %c0_i32, %arg1 : i32, i32
  }
  func.func @transform_3(%arg0: i32, %arg1: i32, %arg2: i32) -> (i32, i32) {
    %c0_i32 = arith.constant 0 : i32
    %c0_i32_0 = arith.constant 0 : i32
    return %c0_i32, %arg1 : i32, i32
  }
  func.func @transform_4(%arg0: i32, %arg1: i32, %arg2: i32) -> (i32, i32) {
    %c0_i32 = arith.constant 0 : i32
    return %arg0, %arg1 : i32, i32
  }
}

module attributes {stable_mosaic.version = 11 : i64} {
  func.func @_mm_kernel(%arg0: i32, %arg1: i32, %arg2: i32, %arg3: memref<16x384xbf16, #tpu.memory_space<vmem>>, %arg4: memref<384x256xbf16, #tpu.memory_space<vmem>>, %arg5: memref<1x256xf32, #tpu.memory_space<vmem>>, %arg6: memref<1x256xf32, #tpu.memory_space<vmem>>, %arg7: memref<16x256xbf16, #tpu.memory_space<vmem>>, %arg8: memref<16x256xf32, #tpu.memory_space<vmem>>) attributes {dimension_semantics = [#tpu.dimension_semantics<parallel>, #tpu.dimension_semantics<parallel>, #tpu.dimension_semantics<arbitrary>], iteration_bounds = array<i64: 1, 1, 6>, scalar_prefetch = 0 : i64, scratch_operands = 1 : i64, tpu.core_type = #tpu.core_type<tc>, window_params = [{transform_indices = @transform_0, window_bounds = array<i64: 16, 384>}, {transform_indices = @transform_1, window_bounds = array<i64: 384, 256>}, {transform_indices = @transform_2, window_bounds = array<i64: 1, 256>}, {transform_indices = @transform_3, window_bounds = array<i64: 1, 256>}, {transform_indices = @transform_4, window_bounds = array<i64: 16, 256>}]} {
    %c0_i32 = arith.constant 0 : i32
    %0 = arith.cmpi eq, %arg2, %c0_i32 : i32
    %1 = arith.extui %0 : i1 to i32
    %c0_i32_0 = arith.constant 0 : i32
    %2 = arith.cmpi ne, %1, %c0_i32_0 : i32
    scf.if %2 {
      %cst_9 = arith.constant 0.000000e+00 : f32
      %12 = vector.broadcast %cst_9 : f32 to vector<16x256xf32>
      %c0_10 = arith.constant 0 : index
      %c0_11 = arith.constant 0 : index
      %13 = vector.load %arg8[%c0_10, %c0_11] : memref<16x256xf32, #tpu.memory_space<vmem>>, vector<16x256xf32>
      tpu.vector_store %arg8[%c0_10, %c0_11], %12 {strides = array<i32>} : memref<16x256xf32, #tpu.memory_space<vmem>>, vector<16x256xf32>,
    } else {
    }
    %c0 = arith.constant 0 : index
    %c0_1 = arith.constant 0 : index
    %3 = vector.load %arg8[%c0, %c0_1] : memref<16x256xf32, #tpu.memory_space<vmem>>, vector<16x256xf32>
    %c0_2 = arith.constant 0 : index
    %c0_3 = arith.constant 0 : index
    %4 = vector.load %arg3[%c0_2, %c0_3] : memref<16x384xbf16, #tpu.memory_space<vmem>>, vector<16x384xbf16>
    %c0_4 = arith.constant 0 : index
    %c0_5 = arith.constant 0 : index
    %5 = vector.load %arg4[%c0_4, %c0_5] : memref<384x256xbf16, #tpu.memory_space<vmem>>, vector<384x256xbf16>
    %cst = arith.constant dense<0.000000e+00> : vector<16x256xf32>
    %6 = tpu.matmul %4, %5, %cst {dimension_numbers = #tpu.dot_dimension_numbers<[1], [0], [0], [1], [0, 0, 1, 1], [], []>} : vector<16x384xbf16>, vector<384x256xbf16>, vector<16x256xf32> -> vector<16x256xf32>
    %7 = arith.addf %3, %6 : vector<16x256xf32>
    %c0_6 = arith.constant 0 : index
    %c0_7 = arith.constant 0 : index
    %8 = vector.load %arg8[%c0_6, %c0_7] : memref<16x256xf32, #tpu.memory_space<vmem>>, vector<16x256xf32>
    tpu.vector_store %arg8[%c0_6, %c0_7], %7 {strides = array<i32>} : memref<16x256xf32, #tpu.memory_space<vmem>>, vector<16x256xf32>,
    %c5_i32 = arith.constant 5 : i32
    %9 = arith.cmpi eq, %arg2, %c5_i32 : i32
    %10 = arith.extui %9 : i1 to i32
    %c0_i32_8 = arith.constant 0 : i32
    %11 = arith.cmpi ne, %10, %c0_i32_8 : i32
    scf.if %11 {
      %c0_9 = arith.constant 0 : index
      %c0_10 = arith.constant 0 : index
      %12 = vector.load %arg8[%c0_9, %c0_10] : memref<16x256xf32, #tpu.memory_space<vmem>>, vector<16x256xf32>
      %c0_11 = arith.constant 0 : index
      %c0_12 = arith.constant 0 : index
      %13 = vector.load %arg5[%c0_11, %c0_12] : memref<1x256xf32, #tpu.memory_space<vmem>>, vector<1x256xf32>
      %14 = vector.broadcast %13 : vector<1x256xf32> to vector<16x256xf32>
      %15 = arith.mulf %12, %14 : vector<16x256xf32>
      %c0_13 = arith.constant 0 : index
      %c0_14 = arith.constant 0 : index
      %16 = vector.load %arg6[%c0_13, %c0_14] : memref<1x256xf32, #tpu.memory_space<vmem>>, vector<1x256xf32>
      %17 = vector.broadcast %16 : vector<1x256xf32> to vector<16x256xf32>
      %18 = arith.addf %15, %17 : vector<16x256xf32>
      %cst_15 = arith.constant 0.000000e+00 : f32
      %19 = vector.broadcast %cst_15 : f32 to vector<16x256xf32>
      %20 = arith.maximumf %18, %19 : vector<16x256xf32>
      %21 = arith.truncf %20 : vector<16x256xf32> to vector<16x256xbf16>
      %c0_16 = arith.constant 0 : index
      %c0_17 = arith.constant 0 : index
      %22 = vector.load %arg7[%c0_16, %c0_17] : memref<16x256xbf16, #tpu.memory_space<vmem>>, vector<16x256xbf16>
      tpu.vector_store %arg7[%c0_16, %c0_17], %21 {strides = array<i32>} : memref<16x256xbf16, #tpu.memory_space<vmem>>, vector<16x256xbf16>,
    } else {
    }
    return
  }
  func.func @transform_0(%arg0: i32, %arg1: i32, %arg2: i32) -> (i32, i32) {
    %c0_i32 = arith.constant 0 : i32
    return %arg0, %arg2 : i32, i32
  }
  func.func @transform_1(%arg0: i32, %arg1: i32, %arg2: i32) -> (i32, i32) {
    %c0_i32 = arith.constant 0 : i32
    return %arg2, %arg1 : i32, i32
  }
  func.func @transform_2(%arg0: i32, %arg1: i32, %arg2: i32) -> (i32, i32) {
    %c0_i32 = arith.constant 0 : i32
    %c0_i32_0 = arith.constant 0 : i32
    return %c0_i32, %arg1 : i32, i32
  }
  func.func @transform_3(%arg0: i32, %arg1: i32, %arg2: i32) -> (i32, i32) {
    %c0_i32 = arith.constant 0 : i32
    %c0_i32_0 = arith.constant 0 : i32
    return %c0_i32, %arg1 : i32, i32
  }
  func.func @transform_4(%arg0: i32, %arg1: i32, %arg2: i32) -> (i32, i32) {
    %c0_i32 = arith.constant 0 : i32
    return %arg0, %arg1 : i32, i32
  }
}

module attributes {stable_mosaic.version = 11 : i64} {
  func.func @_mm_kernel(%arg0: i32, %arg1: i32, %arg2: i32, %arg3: memref<16x384xbf16, #tpu.memory_space<vmem>>, %arg4: memref<384x256xbf16, #tpu.memory_space<vmem>>, %arg5: memref<1x256xf32, #tpu.memory_space<vmem>>, %arg6: memref<1x256xf32, #tpu.memory_space<vmem>>, %arg7: memref<16x256xbf16, #tpu.memory_space<vmem>>, %arg8: memref<16x256xf32, #tpu.memory_space<vmem>>) attributes {dimension_semantics = [#tpu.dimension_semantics<parallel>, #tpu.dimension_semantics<parallel>, #tpu.dimension_semantics<arbitrary>], iteration_bounds = array<i64: 1, 2, 6>, scalar_prefetch = 0 : i64, scratch_operands = 1 : i64, tpu.core_type = #tpu.core_type<tc>, window_params = [{transform_indices = @transform_0, window_bounds = array<i64: 16, 384>}, {transform_indices = @transform_1, window_bounds = array<i64: 384, 256>}, {transform_indices = @transform_2, window_bounds = array<i64: 1, 256>}, {transform_indices = @transform_3, window_bounds = array<i64: 1, 256>}, {transform_indices = @transform_4, window_bounds = array<i64: 16, 256>}]} {
    %c0_i32 = arith.constant 0 : i32
    %0 = arith.cmpi eq, %arg2, %c0_i32 : i32
    %1 = arith.extui %0 : i1 to i32
    %c0_i32_0 = arith.constant 0 : i32
    %2 = arith.cmpi ne, %1, %c0_i32_0 : i32
    scf.if %2 {
      %cst_9 = arith.constant 0.000000e+00 : f32
      %12 = vector.broadcast %cst_9 : f32 to vector<16x256xf32>
      %c0_10 = arith.constant 0 : index
      %c0_11 = arith.constant 0 : index
      %13 = vector.load %arg8[%c0_10, %c0_11] : memref<16x256xf32, #tpu.memory_space<vmem>>, vector<16x256xf32>
      tpu.vector_store %arg8[%c0_10, %c0_11], %12 {strides = array<i32>} : memref<16x256xf32, #tpu.memory_space<vmem>>, vector<16x256xf32>,
    } else {
    }
    %c0 = arith.constant 0 : index
    %c0_1 = arith.constant 0 : index
    %3 = vector.load %arg8[%c0, %c0_1] : memref<16x256xf32, #tpu.memory_space<vmem>>, vector<16x256xf32>
    %c0_2 = arith.constant 0 : index
    %c0_3 = arith.constant 0 : index
    %4 = vector.load %arg3[%c0_2, %c0_3] : memref<16x384xbf16, #tpu.memory_space<vmem>>, vector<16x384xbf16>
    %c0_4 = arith.constant 0 : index
    %c0_5 = arith.constant 0 : index
    %5 = vector.load %arg4[%c0_4, %c0_5] : memref<384x256xbf16, #tpu.memory_space<vmem>>, vector<384x256xbf16>
    %cst = arith.constant dense<0.000000e+00> : vector<16x256xf32>
    %6 = tpu.matmul %4, %5, %cst {dimension_numbers = #tpu.dot_dimension_numbers<[1], [0], [0], [1], [0, 0, 1, 1], [], []>} : vector<16x384xbf16>, vector<384x256xbf16>, vector<16x256xf32> -> vector<16x256xf32>
    %7 = arith.addf %3, %6 : vector<16x256xf32>
    %c0_6 = arith.constant 0 : index
    %c0_7 = arith.constant 0 : index
    %8 = vector.load %arg8[%c0_6, %c0_7] : memref<16x256xf32, #tpu.memory_space<vmem>>, vector<16x256xf32>
    tpu.vector_store %arg8[%c0_6, %c0_7], %7 {strides = array<i32>} : memref<16x256xf32, #tpu.memory_space<vmem>>, vector<16x256xf32>,
    %c5_i32 = arith.constant 5 : i32
    %9 = arith.cmpi eq, %arg2, %c5_i32 : i32
    %10 = arith.extui %9 : i1 to i32
    %c0_i32_8 = arith.constant 0 : i32
    %11 = arith.cmpi ne, %10, %c0_i32_8 : i32
    scf.if %11 {
      %c0_9 = arith.constant 0 : index
      %c0_10 = arith.constant 0 : index
      %12 = vector.load %arg8[%c0_9, %c0_10] : memref<16x256xf32, #tpu.memory_space<vmem>>, vector<16x256xf32>
      %c0_11 = arith.constant 0 : index
      %c0_12 = arith.constant 0 : index
      %13 = vector.load %arg5[%c0_11, %c0_12] : memref<1x256xf32, #tpu.memory_space<vmem>>, vector<1x256xf32>
      %14 = vector.broadcast %13 : vector<1x256xf32> to vector<16x256xf32>
      %15 = arith.mulf %12, %14 : vector<16x256xf32>
      %c0_13 = arith.constant 0 : index
      %c0_14 = arith.constant 0 : index
      %16 = vector.load %arg6[%c0_13, %c0_14] : memref<1x256xf32, #tpu.memory_space<vmem>>, vector<1x256xf32>
      %17 = vector.broadcast %16 : vector<1x256xf32> to vector<16x256xf32>
      %18 = arith.addf %15, %17 : vector<16x256xf32>
      %cst_15 = arith.constant 0.000000e+00 : f32
      %19 = vector.broadcast %cst_15 : f32 to vector<16x256xf32>
      %20 = arith.maximumf %18, %19 : vector<16x256xf32>
      %21 = arith.truncf %20 : vector<16x256xf32> to vector<16x256xbf16>
      %c0_16 = arith.constant 0 : index
      %c0_17 = arith.constant 0 : index
      %22 = vector.load %arg7[%c0_16, %c0_17] : memref<16x256xbf16, #tpu.memory_space<vmem>>, vector<16x256xbf16>
      tpu.vector_store %arg7[%c0_16, %c0_17], %21 {strides = array<i32>} : memref<16x256xbf16, #tpu.memory_space<vmem>>, vector<16x256xbf16>,
    } else {
    }
    return
  }
  func.func @transform_0(%arg0: i32, %arg1: i32, %arg2: i32) -> (i32, i32) {
    %c0_i32 = arith.constant 0 : i32
    return %arg0, %arg2 : i32, i32
  }
  func.func @transform_1(%arg0: i32, %arg1: i32, %arg2: i32) -> (i32, i32) {
    %c0_i32 = arith.constant 0 : i32
    return %arg2, %arg1 : i32, i32
  }
  func.func @transform_2(%arg0: i32, %arg1: i32, %arg2: i32) -> (i32, i32) {
    %c0_i32 = arith.constant 0 : i32
    %c0_i32_0 = arith.constant 0 : i32
    return %c0_i32, %arg1 : i32, i32
  }
  func.func @transform_3(%arg0: i32, %arg1: i32, %arg2: i32) -> (i32, i32) {
    %c0_i32 = arith.constant 0 : i32
    %c0_i32_0 = arith.constant 0 : i32
    return %c0_i32, %arg1 : i32, i32
  }
  func.func @transform_4(%arg0: i32, %arg1: i32, %arg2: i32) -> (i32, i32) {
    %c0_i32 = arith.constant 0 : i32
    return %arg0, %arg1 : i32, i32
  }
}

module attributes {stable_mosaic.version = 11 : i64} {
  func.func @_mm_kernel(%arg0: i32, %arg1: i32, %arg2: i32, %arg3: memref<16x256xbf16, #tpu.memory_space<vmem>>, %arg4: memref<256x256xbf16, #tpu.memory_space<vmem>>, %arg5: memref<1x256xf32, #tpu.memory_space<vmem>>, %arg6: memref<1x256xf32, #tpu.memory_space<vmem>>, %arg7: memref<16x256xbf16, #tpu.memory_space<vmem>>, %arg8: memref<16x256xf32, #tpu.memory_space<vmem>>) attributes {dimension_semantics = [#tpu.dimension_semantics<parallel>, #tpu.dimension_semantics<parallel>, #tpu.dimension_semantics<arbitrary>], iteration_bounds = array<i64: 1, 2, 1>, scalar_prefetch = 0 : i64, scratch_operands = 1 : i64, tpu.core_type = #tpu.core_type<tc>, window_params = [{transform_indices = @transform_0, window_bounds = array<i64: 16, 256>}, {transform_indices = @transform_1, window_bounds = array<i64: 256, 256>}, {transform_indices = @transform_2, window_bounds = array<i64: 1, 256>}, {transform_indices = @transform_3, window_bounds = array<i64: 1, 256>}, {transform_indices = @transform_4, window_bounds = array<i64: 16, 256>}]} {
    %c0_i32 = arith.constant 0 : i32
    %0 = arith.cmpi eq, %arg2, %c0_i32 : i32
    %1 = arith.extui %0 : i1 to i32
    %c0_i32_0 = arith.constant 0 : i32
    %2 = arith.cmpi ne, %1, %c0_i32_0 : i32
    scf.if %2 {
      %cst_10 = arith.constant 0.000000e+00 : f32
      %12 = vector.broadcast %cst_10 : f32 to vector<16x256xf32>
      %c0_11 = arith.constant 0 : index
      %c0_12 = arith.constant 0 : index
      %13 = vector.load %arg8[%c0_11, %c0_12] : memref<16x256xf32, #tpu.memory_space<vmem>>, vector<16x256xf32>
      tpu.vector_store %arg8[%c0_11, %c0_12], %12 {strides = array<i32>} : memref<16x256xf32, #tpu.memory_space<vmem>>, vector<16x256xf32>,
    } else {
    }
    %c0 = arith.constant 0 : index
    %c0_1 = arith.constant 0 : index
    %3 = vector.load %arg8[%c0, %c0_1] : memref<16x256xf32, #tpu.memory_space<vmem>>, vector<16x256xf32>
    %c0_2 = arith.constant 0 : index
    %c0_3 = arith.constant 0 : index
    %4 = vector.load %arg3[%c0_2, %c0_3] : memref<16x256xbf16, #tpu.memory_space<vmem>>, vector<16x256xbf16>
    %c0_4 = arith.constant 0 : index
    %c0_5 = arith.constant 0 : index
    %5 = vector.load %arg4[%c0_4, %c0_5] : memref<256x256xbf16, #tpu.memory_space<vmem>>, vector<256x256xbf16>
    %cst = arith.constant dense<0.000000e+00> : vector<16x256xf32>
    %6 = tpu.matmul %4, %5, %cst {dimension_numbers = #tpu.dot_dimension_numbers<[1], [0], [0], [1], [0, 0, 1, 1], [], []>} : vector<16x256xbf16>, vector<256x256xbf16>, vector<16x256xf32> -> vector<16x256xf32>
    %7 = arith.addf %3, %6 : vector<16x256xf32>
    %c0_6 = arith.constant 0 : index
    %c0_7 = arith.constant 0 : index
    %8 = vector.load %arg8[%c0_6, %c0_7] : memref<16x256xf32, #tpu.memory_space<vmem>>, vector<16x256xf32>
    tpu.vector_store %arg8[%c0_6, %c0_7], %7 {strides = array<i32>} : memref<16x256xf32, #tpu.memory_space<vmem>>, vector<16x256xf32>,
    %c0_i32_8 = arith.constant 0 : i32
    %9 = arith.cmpi eq, %arg2, %c0_i32_8 : i32
    %10 = arith.extui %9 : i1 to i32
    %c0_i32_9 = arith.constant 0 : i32
    %11 = arith.cmpi ne, %10, %c0_i32_9 : i32
    scf.if %11 {
      %c0_10 = arith.constant 0 : index
      %c0_11 = arith.constant 0 : index
      %12 = vector.load %arg8[%c0_10, %c0_11] : memref<16x256xf32, #tpu.memory_space<vmem>>, vector<16x256xf32>
      %c0_12 = arith.constant 0 : index
      %c0_13 = arith.constant 0 : index
      %13 = vector.load %arg5[%c0_12, %c0_13] : memref<1x256xf32, #tpu.memory_space<vmem>>, vector<1x256xf32>
      %14 = vector.broadcast %13 : vector<1x256xf32> to vector<16x256xf32>
      %15 = arith.mulf %12, %14 : vector<16x256xf32>
      %c0_14 = arith.constant 0 : index
      %c0_15 = arith.constant 0 : index
      %16 = vector.load %arg6[%c0_14, %c0_15] : memref<1x256xf32, #tpu.memory_space<vmem>>, vector<1x256xf32>
      %17 = vector.broadcast %16 : vector<1x256xf32> to vector<16x256xf32>
      %18 = arith.addf %15, %17 : vector<16x256xf32>
      %19 = arith.truncf %18 : vector<16x256xf32> to vector<16x256xbf16>
      %c0_16 = arith.constant 0 : index
      %c0_17 = arith.constant 0 : index
      %20 = vector.load %arg7[%c0_16, %c0_17] : memref<16x256xbf16, #tpu.memory_space<vmem>>, vector<16x256xbf16>
      tpu.vector_store %arg7[%c0_16, %c0_17], %19 {strides = array<i32>} : memref<16x256xbf16, #tpu.memory_space<vmem>>, vector<16x256xbf16>,
    } else {
    }
    return
  }
  func.func @transform_0(%arg0: i32, %arg1: i32, %arg2: i32) -> (i32, i32) {
    %c0_i32 = arith.constant 0 : i32
    return %arg0, %arg2 : i32, i32
  }
  func.func @transform_1(%arg0: i32, %arg1: i32, %arg2: i32) -> (i32, i32) {
    %c0_i32 = arith.constant 0 : i32
    return %arg2, %arg1 : i32, i32
  }
  func.func @transform_2(%arg0: i32, %arg1: i32, %arg2: i32) -> (i32, i32) {
    %c0_i32 = arith.constant 0 : i32
    %c0_i32_0 = arith.constant 0 : i32
    return %c0_i32, %arg1 : i32, i32
  }
  func.func @transform_3(%arg0: i32, %arg1: i32, %arg2: i32) -> (i32, i32) {
    %c0_i32 = arith.constant 0 : i32
    %c0_i32_0 = arith.constant 0 : i32
    return %c0_i32, %arg1 : i32, i32
  }
  func.func @transform_4(%arg0: i32, %arg1: i32, %arg2: i32) -> (i32, i32) {
    %c0_i32 = arith.constant 0 : i32
    return %arg0, %arg1 : i32, i32
  }
}

module attributes {stable_mosaic.version = 11 : i64} {
  func.func @_mm_res_kernel(%arg0: i32, %arg1: i32, %arg2: i32, %arg3: memref<16x512xbf16, #tpu.memory_space<vmem>>, %arg4: memref<512x256xbf16, #tpu.memory_space<vmem>>, %arg5: memref<1x256xf32, #tpu.memory_space<vmem>>, %arg6: memref<1x256xf32, #tpu.memory_space<vmem>>, %arg7: memref<16x256xbf16, #tpu.memory_space<vmem>>, %arg8: memref<16x256xbf16, #tpu.memory_space<vmem>>, %arg9: memref<16x256xf32, #tpu.memory_space<vmem>>) attributes {dimension_semantics = [#tpu.dimension_semantics<parallel>, #tpu.dimension_semantics<parallel>, #tpu.dimension_semantics<arbitrary>], iteration_bounds = array<i64: 1, 2, 9>, scalar_prefetch = 0 : i64, scratch_operands = 1 : i64, tpu.core_type = #tpu.core_type<tc>, window_params = [{transform_indices = @transform_0, window_bounds = array<i64: 16, 512>}, {transform_indices = @transform_1, window_bounds = array<i64: 512, 256>}, {transform_indices = @transform_2, window_bounds = array<i64: 1, 256>}, {transform_indices = @transform_3, window_bounds = array<i64: 1, 256>}, {transform_indices = @transform_4, window_bounds = array<i64: 16, 256>}, {transform_indices = @transform_5, window_bounds = array<i64: 16, 256>}]} {
    %c0_i32 = arith.constant 0 : i32
    %0 = arith.cmpi eq, %arg2, %c0_i32 : i32
    %1 = arith.extui %0 : i1 to i32
    %c0_i32_0 = arith.constant 0 : i32
    %2 = arith.cmpi ne, %1, %c0_i32_0 : i32
    scf.if %2 {
      %cst_9 = arith.constant 0.000000e+00 : f32
      %12 = vector.broadcast %cst_9 : f32 to vector<16x256xf32>
      %c0_10 = arith.constant 0 : index
      %c0_11 = arith.constant 0 : index
      %13 = vector.load %arg9[%c0_10, %c0_11] : memref<16x256xf32, #tpu.memory_space<vmem>>, vector<16x256xf32>
      tpu.vector_store %arg9[%c0_10, %c0_11], %12 {strides = array<i32>} : memref<16x256xf32, #tpu.memory_space<vmem>>, vector<16x256xf32>,
    } else {
    }
    %c0 = arith.constant 0 : index
    %c0_1 = arith.constant 0 : index
    %3 = vector.load %arg9[%c0, %c0_1] : memref<16x256xf32, #tpu.memory_space<vmem>>, vector<16x256xf32>
    %c0_2 = arith.constant 0 : index
    %c0_3 = arith.constant 0 : index
    %4 = vector.load %arg3[%c0_2, %c0_3] : memref<16x512xbf16, #tpu.memory_space<vmem>>, vector<16x512xbf16>
    %c0_4 = arith.constant 0 : index
    %c0_5 = arith.constant 0 : index
    %5 = vector.load %arg4[%c0_4, %c0_5] : memref<512x256xbf16, #tpu.memory_space<vmem>>, vector<512x256xbf16>
    %cst = arith.constant dense<0.000000e+00> : vector<16x256xf32>
    %6 = tpu.matmul %4, %5, %cst {dimension_numbers = #tpu.dot_dimension_numbers<[1], [0], [0], [1], [0, 0, 1, 1], [], []>} : vector<16x512xbf16>, vector<512x256xbf16>, vector<16x256xf32> -> vector<16x256xf32>
    %7 = arith.addf %3, %6 : vector<16x256xf32>
    %c0_6 = arith.constant 0 : index
    %c0_7 = arith.constant 0 : index
    %8 = vector.load %arg9[%c0_6, %c0_7] : memref<16x256xf32, #tpu.memory_space<vmem>>, vector<16x256xf32>
    tpu.vector_store %arg9[%c0_6, %c0_7], %7 {strides = array<i32>} : memref<16x256xf32, #tpu.memory_space<vmem>>, vector<16x256xf32>,
    %c8_i32 = arith.constant 8 : i32
    %9 = arith.cmpi eq, %arg2, %c8_i32 : i32
    %10 = arith.extui %9 : i1 to i32
    %c0_i32_8 = arith.constant 0 : i32
    %11 = arith.cmpi ne, %10, %c0_i32_8 : i32
    scf.if %11 {
      %c0_9 = arith.constant 0 : index
      %c0_10 = arith.constant 0 : index
      %12 = vector.load %arg9[%c0_9, %c0_10] : memref<16x256xf32, #tpu.memory_space<vmem>>, vector<16x256xf32>
      %c0_11 = arith.constant 0 : index
      %c0_12 = arith.constant 0 : index
      %13 = vector.load %arg5[%c0_11, %c0_12] : memref<1x256xf32, #tpu.memory_space<vmem>>, vector<1x256xf32>
      %14 = vector.broadcast %13 : vector<1x256xf32> to vector<16x256xf32>
      %15 = arith.mulf %12, %14 : vector<16x256xf32>
      %c0_13 = arith.constant 0 : index
      %c0_14 = arith.constant 0 : index
      %16 = vector.load %arg6[%c0_13, %c0_14] : memref<1x256xf32, #tpu.memory_space<vmem>>, vector<1x256xf32>
      %17 = vector.broadcast %16 : vector<1x256xf32> to vector<16x256xf32>
      %18 = arith.addf %15, %17 : vector<16x256xf32>
      %c0_15 = arith.constant 0 : index
      %c0_16 = arith.constant 0 : index
      %19 = vector.load %arg7[%c0_15, %c0_16] : memref<16x256xbf16, #tpu.memory_space<vmem>>, vector<16x256xbf16>
      %20 = arith.extf %19 : vector<16x256xbf16> to vector<16x256xf32>
      %21 = arith.addf %18, %20 : vector<16x256xf32>
      %cst_17 = arith.constant 0.000000e+00 : f32
      %22 = vector.broadcast %cst_17 : f32 to vector<16x256xf32>
      %23 = arith.maximumf %21, %22 : vector<16x256xf32>
      %24 = arith.truncf %23 : vector<16x256xf32> to vector<16x256xbf16>
      %c0_18 = arith.constant 0 : index
      %c0_19 = arith.constant 0 : index
      %25 = vector.load %arg8[%c0_18, %c0_19] : memref<16x256xbf16, #tpu.memory_space<vmem>>, vector<16x256xbf16>
      tpu.vector_store %arg8[%c0_18, %c0_19], %24 {strides = array<i32>} : memref<16x256xbf16, #tpu.memory_space<vmem>>, vector<16x256xbf16>,
    } else {
    }
    return
  }
  func.func @transform_0(%arg0: i32, %arg1: i32, %arg2: i32) -> (i32, i32) {
    %c0_i32 = arith.constant 0 : i32
    return %arg0, %arg2 : i32, i32
  }
  func.func @transform_1(%arg0: i32, %arg1: i32, %arg2: i32) -> (i32, i32) {
    %c0_i32 = arith.constant 0 : i32
    return %arg2, %arg1 : i32, i32
  }
  func.func @transform_2(%arg0: i32, %arg1: i32, %arg2: i32) -> (i32, i32) {
    %c0_i32 = arith.constant 0 : i32
    %c0_i32_0 = arith.constant 0 : i32
    return %c0_i32, %arg1 : i32, i32
  }
  func.func @transform_3(%arg0: i32, %arg1: i32, %arg2: i32) -> (i32, i32) {
    %c0_i32 = arith.constant 0 : i32
    %c0_i32_0 = arith.constant 0 : i32
    return %c0_i32, %arg1 : i32, i32
  }
  func.func @transform_4(%arg0: i32, %arg1: i32, %arg2: i32) -> (i32, i32) {
    %c0_i32 = arith.constant 0 : i32
    return %arg0, %arg1 : i32, i32
  }
  func.func @transform_5(%arg0: i32, %arg1: i32, %arg2: i32) -> (i32, i32) {
    %c0_i32 = arith.constant 0 : i32
    return %arg0, %arg1 : i32, i32
  }
}

module attributes {stable_mosaic.version = 11 : i64} {
  func.func @_mm_kernel(%arg0: i32, %arg1: i32, %arg2: i32, %arg3: memref<16x512xbf16, #tpu.memory_space<vmem>>, %arg4: memref<512x256xbf16, #tpu.memory_space<vmem>>, %arg5: memref<1x256xf32, #tpu.memory_space<vmem>>, %arg6: memref<1x256xf32, #tpu.memory_space<vmem>>, %arg7: memref<16x256xbf16, #tpu.memory_space<vmem>>, %arg8: memref<16x256xf32, #tpu.memory_space<vmem>>) attributes {dimension_semantics = [#tpu.dimension_semantics<parallel>, #tpu.dimension_semantics<parallel>, #tpu.dimension_semantics<arbitrary>], iteration_bounds = array<i64: 1, 2, 9>, scalar_prefetch = 0 : i64, scratch_operands = 1 : i64, tpu.core_type = #tpu.core_type<tc>, window_params = [{transform_indices = @transform_0, window_bounds = array<i64: 16, 512>}, {transform_indices = @transform_1, window_bounds = array<i64: 512, 256>}, {transform_indices = @transform_2, window_bounds = array<i64: 1, 256>}, {transform_indices = @transform_3, window_bounds = array<i64: 1, 256>}, {transform_indices = @transform_4, window_bounds = array<i64: 16, 256>}]} {
    %c0_i32 = arith.constant 0 : i32
    %0 = arith.cmpi eq, %arg2, %c0_i32 : i32
    %1 = arith.extui %0 : i1 to i32
    %c0_i32_0 = arith.constant 0 : i32
    %2 = arith.cmpi ne, %1, %c0_i32_0 : i32
    scf.if %2 {
      %cst_9 = arith.constant 0.000000e+00 : f32
      %12 = vector.broadcast %cst_9 : f32 to vector<16x256xf32>
      %c0_10 = arith.constant 0 : index
      %c0_11 = arith.constant 0 : index
      %13 = vector.load %arg8[%c0_10, %c0_11] : memref<16x256xf32, #tpu.memory_space<vmem>>, vector<16x256xf32>
      tpu.vector_store %arg8[%c0_10, %c0_11], %12 {strides = array<i32>} : memref<16x256xf32, #tpu.memory_space<vmem>>, vector<16x256xf32>,
    } else {
    }
    %c0 = arith.constant 0 : index
    %c0_1 = arith.constant 0 : index
    %3 = vector.load %arg8[%c0, %c0_1] : memref<16x256xf32, #tpu.memory_space<vmem>>, vector<16x256xf32>
    %c0_2 = arith.constant 0 : index
    %c0_3 = arith.constant 0 : index
    %4 = vector.load %arg3[%c0_2, %c0_3] : memref<16x512xbf16, #tpu.memory_space<vmem>>, vector<16x512xbf16>
    %c0_4 = arith.constant 0 : index
    %c0_5 = arith.constant 0 : index
    %5 = vector.load %arg4[%c0_4, %c0_5] : memref<512x256xbf16, #tpu.memory_space<vmem>>, vector<512x256xbf16>
    %cst = arith.constant dense<0.000000e+00> : vector<16x256xf32>
    %6 = tpu.matmul %4, %5, %cst {dimension_numbers = #tpu.dot_dimension_numbers<[1], [0], [0], [1], [0, 0, 1, 1], [], []>} : vector<16x512xbf16>, vector<512x256xbf16>, vector<16x256xf32> -> vector<16x256xf32>
    %7 = arith.addf %3, %6 : vector<16x256xf32>
    %c0_6 = arith.constant 0 : index
    %c0_7 = arith.constant 0 : index
    %8 = vector.load %arg8[%c0_6, %c0_7] : memref<16x256xf32, #tpu.memory_space<vmem>>, vector<16x256xf32>
    tpu.vector_store %arg8[%c0_6, %c0_7], %7 {strides = array<i32>} : memref<16x256xf32, #tpu.memory_space<vmem>>, vector<16x256xf32>,
    %c8_i32 = arith.constant 8 : i32
    %9 = arith.cmpi eq, %arg2, %c8_i32 : i32
    %10 = arith.extui %9 : i1 to i32
    %c0_i32_8 = arith.constant 0 : i32
    %11 = arith.cmpi ne, %10, %c0_i32_8 : i32
    scf.if %11 {
      %c0_9 = arith.constant 0 : index
      %c0_10 = arith.constant 0 : index
      %12 = vector.load %arg8[%c0_9, %c0_10] : memref<16x256xf32, #tpu.memory_space<vmem>>, vector<16x256xf32>
      %c0_11 = arith.constant 0 : index
      %c0_12 = arith.constant 0 : index
      %13 = vector.load %arg5[%c0_11, %c0_12] : memref<1x256xf32, #tpu.memory_space<vmem>>, vector<1x256xf32>
      %14 = vector.broadcast %13 : vector<1x256xf32> to vector<16x256xf32>
      %15 = arith.mulf %12, %14 : vector<16x256xf32>
      %c0_13 = arith.constant 0 : index
      %c0_14 = arith.constant 0 : index
      %16 = vector.load %arg6[%c0_13, %c0_14] : memref<1x256xf32, #tpu.memory_space<vmem>>, vector<1x256xf32>
      %17 = vector.broadcast %16 : vector<1x256xf32> to vector<16x256xf32>
      %18 = arith.addf %15, %17 : vector<16x256xf32>
      %cst_15 = arith.constant 0.000000e+00 : f32
      %19 = vector.broadcast %cst_15 : f32 to vector<16x256xf32>
      %20 = arith.maximumf %18, %19 : vector<16x256xf32>
      %21 = arith.truncf %20 : vector<16x256xf32> to vector<16x256xbf16>
      %c0_16 = arith.constant 0 : index
      %c0_17 = arith.constant 0 : index
      %22 = vector.load %arg7[%c0_16, %c0_17] : memref<16x256xbf16, #tpu.memory_space<vmem>>, vector<16x256xbf16>
      tpu.vector_store %arg7[%c0_16, %c0_17], %21 {strides = array<i32>} : memref<16x256xbf16, #tpu.memory_space<vmem>>, vector<16x256xbf16>,
    } else {
    }
    return
  }
  func.func @transform_0(%arg0: i32, %arg1: i32, %arg2: i32) -> (i32, i32) {
    %c0_i32 = arith.constant 0 : i32
    return %arg0, %arg2 : i32, i32
  }
  func.func @transform_1(%arg0: i32, %arg1: i32, %arg2: i32) -> (i32, i32) {
    %c0_i32 = arith.constant 0 : i32
    return %arg2, %arg1 : i32, i32
  }
  func.func @transform_2(%arg0: i32, %arg1: i32, %arg2: i32) -> (i32, i32) {
    %c0_i32 = arith.constant 0 : i32
    %c0_i32_0 = arith.constant 0 : i32
    return %c0_i32, %arg1 : i32, i32
  }
  func.func @transform_3(%arg0: i32, %arg1: i32, %arg2: i32) -> (i32, i32) {
    %c0_i32 = arith.constant 0 : i32
    %c0_i32_0 = arith.constant 0 : i32
    return %c0_i32, %arg1 : i32, i32
  }
  func.func @transform_4(%arg0: i32, %arg1: i32, %arg2: i32) -> (i32, i32) {
    %c0_i32 = arith.constant 0 : i32
    return %arg0, %arg1 : i32, i32
  }
}

module attributes {stable_mosaic.version = 11 : i64} {
  func.func @_mean_reduce_kernel(%arg0: i32, %arg1: memref<2x1x512xbf16, #tpu.memory_space<vmem>>, %arg2: memref<2x512xf32, #tpu.memory_space<vmem>>) attributes {dimension_semantics = [#tpu.dimension_semantics<arbitrary>], iteration_bounds = array<i64: 1>, scalar_prefetch = 0 : i64, scratch_operands = 0 : i64, tpu.core_type = #tpu.core_type<tc>, window_params = [{pipeline_mode = #tpu.pipeline_mode<synchronous>, transform_indices = @transform_0, window_bounds = array<i64: 2, 1, 512>}, {pipeline_mode = #tpu.pipeline_mode<synchronous>, transform_indices = @transform_1, window_bounds = array<i64: 2, 512>}]} {
    %c0 = arith.constant 0 : index
    %c0_0 = arith.constant 0 : index
    %c0_1 = arith.constant 0 : index
    %0 = vector.load %arg1[%c0, %c0_0, %c0_1] : memref<2x1x512xbf16, #tpu.memory_space<vmem>>, vector<2x1x512xbf16>
    %1 = arith.extf %0 : vector<2x1x512xbf16> to vector<2x1x512xf32>
    %cst = arith.constant dense<0.000000e+00> : vector<2x512xf32>
    %2 = vector.multi_reduction <add>, %1, %cst [1] : vector<2x1x512xf32> to vector<2x512xf32>
    %cst_2 = arith.constant 1.000000e+00 : f32
    %3 = vector.broadcast %cst_2 : f32 to vector<2x512xf32>
    %4 = arith.divf %2, %3 : vector<2x512xf32>
    %c0_3 = arith.constant 0 : index
    %c0_4 = arith.constant 0 : index
    %5 = vector.load %arg2[%c0_3, %c0_4] : memref<2x512xf32, #tpu.memory_space<vmem>>, vector<2x512xf32>
    tpu.vector_store %arg2[%c0_3, %c0_4], %4 {strides = array<i32>} : memref<2x512xf32, #tpu.memory_space<vmem>>, vector<2x512xf32>,
    return
  }
  func.func @transform_0(%arg0: i32) -> (i32, i32, i32) {
    %c0_i32 = arith.constant 0 : i32
    %c0_i32_0 = arith.constant 0 : i32
    %c0_i32_1 = arith.constant 0 : i32
    %c0_i32_2 = arith.constant 0 : i32
    return %c0_i32, %c0_i32_0, %c0_i32_1 : i32, i32, i32
  }
  func.func @transform_1(%arg0: i32) -> (i32, i32) {
    %c0_i32 = arith.constant 0 : i32
    %c0_i32_0 = arith.constant 0 : i32
    %c0_i32_1 = arith.constant 0 : i32
    return %c0_i32, %c0_i32_0 : i32, i32
  }
}

module attributes {stable_mosaic.version = 11 : i64} {
  func.func @_mm_kernel(%arg0: i32, %arg1: i32, %arg2: i32, %arg3: memref<16x512xbf16, #tpu.memory_space<vmem>>, %arg4: memref<512x256xbf16, #tpu.memory_space<vmem>>, %arg5: memref<1x256xf32, #tpu.memory_space<vmem>>, %arg6: memref<1x256xf32, #tpu.memory_space<vmem>>, %arg7: memref<16x256xbf16, #tpu.memory_space<vmem>>, %arg8: memref<16x256xf32, #tpu.memory_space<vmem>>) attributes {dimension_semantics = [#tpu.dimension_semantics<parallel>, #tpu.dimension_semantics<parallel>, #tpu.dimension_semantics<arbitrary>], iteration_bounds = array<i64: 1, 2, 1>, scalar_prefetch = 0 : i64, scratch_operands = 1 : i64, tpu.core_type = #tpu.core_type<tc>, window_params = [{transform_indices = @transform_0, window_bounds = array<i64: 16, 512>}, {transform_indices = @transform_1, window_bounds = array<i64: 512, 256>}, {transform_indices = @transform_2, window_bounds = array<i64: 1, 256>}, {transform_indices = @transform_3, window_bounds = array<i64: 1, 256>}, {transform_indices = @transform_4, window_bounds = array<i64: 16, 256>}]} {
    %c0_i32 = arith.constant 0 : i32
    %0 = arith.cmpi eq, %arg2, %c0_i32 : i32
    %1 = arith.extui %0 : i1 to i32
    %c0_i32_0 = arith.constant 0 : i32
    %2 = arith.cmpi ne, %1, %c0_i32_0 : i32
    scf.if %2 {
      %cst_10 = arith.constant 0.000000e+00 : f32
      %12 = vector.broadcast %cst_10 : f32 to vector<16x256xf32>
      %c0_11 = arith.constant 0 : index
      %c0_12 = arith.constant 0 : index
      %13 = vector.load %arg8[%c0_11, %c0_12] : memref<16x256xf32, #tpu.memory_space<vmem>>, vector<16x256xf32>
      tpu.vector_store %arg8[%c0_11, %c0_12], %12 {strides = array<i32>} : memref<16x256xf32, #tpu.memory_space<vmem>>, vector<16x256xf32>,
    } else {
    }
    %c0 = arith.constant 0 : index
    %c0_1 = arith.constant 0 : index
    %3 = vector.load %arg8[%c0, %c0_1] : memref<16x256xf32, #tpu.memory_space<vmem>>, vector<16x256xf32>
    %c0_2 = arith.constant 0 : index
    %c0_3 = arith.constant 0 : index
    %4 = vector.load %arg3[%c0_2, %c0_3] : memref<16x512xbf16, #tpu.memory_space<vmem>>, vector<16x512xbf16>
    %c0_4 = arith.constant 0 : index
    %c0_5 = arith.constant 0 : index
    %5 = vector.load %arg4[%c0_4, %c0_5] : memref<512x256xbf16, #tpu.memory_space<vmem>>, vector<512x256xbf16>
    %cst = arith.constant dense<0.000000e+00> : vector<16x256xf32>
    %6 = tpu.matmul %4, %5, %cst {dimension_numbers = #tpu.dot_dimension_numbers<[1], [0], [0], [1], [0, 0, 1, 1], [], []>} : vector<16x512xbf16>, vector<512x256xbf16>, vector<16x256xf32> -> vector<16x256xf32>
    %7 = arith.addf %3, %6 : vector<16x256xf32>
    %c0_6 = arith.constant 0 : index
    %c0_7 = arith.constant 0 : index
    %8 = vector.load %arg8[%c0_6, %c0_7] : memref<16x256xf32, #tpu.memory_space<vmem>>, vector<16x256xf32>
    tpu.vector_store %arg8[%c0_6, %c0_7], %7 {strides = array<i32>} : memref<16x256xf32, #tpu.memory_space<vmem>>, vector<16x256xf32>,
    %c0_i32_8 = arith.constant 0 : i32
    %9 = arith.cmpi eq, %arg2, %c0_i32_8 : i32
    %10 = arith.extui %9 : i1 to i32
    %c0_i32_9 = arith.constant 0 : i32
    %11 = arith.cmpi ne, %10, %c0_i32_9 : i32
    scf.if %11 {
      %c0_10 = arith.constant 0 : index
      %c0_11 = arith.constant 0 : index
      %12 = vector.load %arg8[%c0_10, %c0_11] : memref<16x256xf32, #tpu.memory_space<vmem>>, vector<16x256xf32>
      %c0_12 = arith.constant 0 : index
      %c0_13 = arith.constant 0 : index
      %13 = vector.load %arg5[%c0_12, %c0_13] : memref<1x256xf32, #tpu.memory_space<vmem>>, vector<1x256xf32>
      %14 = vector.broadcast %13 : vector<1x256xf32> to vector<16x256xf32>
      %15 = arith.mulf %12, %14 : vector<16x256xf32>
      %c0_14 = arith.constant 0 : index
      %c0_15 = arith.constant 0 : index
      %16 = vector.load %arg6[%c0_14, %c0_15] : memref<1x256xf32, #tpu.memory_space<vmem>>, vector<1x256xf32>
      %17 = vector.broadcast %16 : vector<1x256xf32> to vector<16x256xf32>
      %18 = arith.addf %15, %17 : vector<16x256xf32>
      %cst_16 = arith.constant 0.000000e+00 : f32
      %19 = vector.broadcast %cst_16 : f32 to vector<16x256xf32>
      %20 = arith.maximumf %18, %19 : vector<16x256xf32>
      %21 = arith.truncf %20 : vector<16x256xf32> to vector<16x256xbf16>
      %c0_17 = arith.constant 0 : index
      %c0_18 = arith.constant 0 : index
      %22 = vector.load %arg7[%c0_17, %c0_18] : memref<16x256xbf16, #tpu.memory_space<vmem>>, vector<16x256xbf16>
      tpu.vector_store %arg7[%c0_17, %c0_18], %21 {strides = array<i32>} : memref<16x256xbf16, #tpu.memory_space<vmem>>, vector<16x256xbf16>,
    } else {
    }
    return
  }
  func.func @transform_0(%arg0: i32, %arg1: i32, %arg2: i32) -> (i32, i32) {
    %c0_i32 = arith.constant 0 : i32
    return %arg0, %arg2 : i32, i32
  }
  func.func @transform_1(%arg0: i32, %arg1: i32, %arg2: i32) -> (i32, i32) {
    %c0_i32 = arith.constant 0 : i32
    return %arg2, %arg1 : i32, i32
  }
  func.func @transform_2(%arg0: i32, %arg1: i32, %arg2: i32) -> (i32, i32) {
    %c0_i32 = arith.constant 0 : i32
    %c0_i32_0 = arith.constant 0 : i32
    return %c0_i32, %arg1 : i32, i32
  }
  func.func @transform_3(%arg0: i32, %arg1: i32, %arg2: i32) -> (i32, i32) {
    %c0_i32 = arith.constant 0 : i32
    %c0_i32_0 = arith.constant 0 : i32
    return %c0_i32, %arg1 : i32, i32
  }
  func.func @transform_4(%arg0: i32, %arg1: i32, %arg2: i32) -> (i32, i32) {
    %c0_i32 = arith.constant 0 : i32
    return %arg0, %arg1 : i32, i32
  }
}

module attributes {stable_mosaic.version = 11 : i64} {
  func.func @_mm_kernel(%arg0: i32, %arg1: i32, %arg2: i32, %arg3: memref<16x512xbf16, #tpu.memory_space<vmem>>, %arg4: memref<512x128xbf16, #tpu.memory_space<vmem>>, %arg5: memref<1x128xf32, #tpu.memory_space<vmem>>, %arg6: memref<1x128xf32, #tpu.memory_space<vmem>>, %arg7: memref<16x128xbf16, #tpu.memory_space<vmem>>, %arg8: memref<16x128xf32, #tpu.memory_space<vmem>>) attributes {dimension_semantics = [#tpu.dimension_semantics<parallel>, #tpu.dimension_semantics<parallel>, #tpu.dimension_semantics<arbitrary>], iteration_bounds = array<i64: 1, 1, 1>, scalar_prefetch = 0 : i64, scratch_operands = 1 : i64, tpu.core_type = #tpu.core_type<tc>, window_params = [{transform_indices = @transform_0, window_bounds = array<i64: 16, 512>}, {transform_indices = @transform_1, window_bounds = array<i64: 512, 128>}, {transform_indices = @transform_2, window_bounds = array<i64: 1, 128>}, {transform_indices = @transform_3, window_bounds = array<i64: 1, 128>}, {transform_indices = @transform_4, window_bounds = array<i64: 16, 128>}]} {
    %c0_i32 = arith.constant 0 : i32
    %0 = arith.cmpi eq, %arg2, %c0_i32 : i32
    %1 = arith.extui %0 : i1 to i32
    %c0_i32_0 = arith.constant 0 : i32
    %2 = arith.cmpi ne, %1, %c0_i32_0 : i32
    scf.if %2 {
      %cst_10 = arith.constant 0.000000e+00 : f32
      %12 = vector.broadcast %cst_10 : f32 to vector<16x128xf32>
      %c0_11 = arith.constant 0 : index
      %c0_12 = arith.constant 0 : index
      %13 = vector.load %arg8[%c0_11, %c0_12] : memref<16x128xf32, #tpu.memory_space<vmem>>, vector<16x128xf32>
      tpu.vector_store %arg8[%c0_11, %c0_12], %12 {strides = array<i32>} : memref<16x128xf32, #tpu.memory_space<vmem>>, vector<16x128xf32>,
    } else {
    }
    %c0 = arith.constant 0 : index
    %c0_1 = arith.constant 0 : index
    %3 = vector.load %arg8[%c0, %c0_1] : memref<16x128xf32, #tpu.memory_space<vmem>>, vector<16x128xf32>
    %c0_2 = arith.constant 0 : index
    %c0_3 = arith.constant 0 : index
    %4 = vector.load %arg3[%c0_2, %c0_3] : memref<16x512xbf16, #tpu.memory_space<vmem>>, vector<16x512xbf16>
    %c0_4 = arith.constant 0 : index
    %c0_5 = arith.constant 0 : index
    %5 = vector.load %arg4[%c0_4, %c0_5] : memref<512x128xbf16, #tpu.memory_space<vmem>>, vector<512x128xbf16>
    %cst = arith.constant dense<0.000000e+00> : vector<16x128xf32>
    %6 = tpu.matmul %4, %5, %cst {dimension_numbers = #tpu.dot_dimension_numbers<[1], [0], [0], [1], [0, 0, 1, 1], [], []>} : vector<16x512xbf16>, vector<512x128xbf16>, vector<16x128xf32> -> vector<16x128xf32>
    %7 = arith.addf %3, %6 : vector<16x128xf32>
    %c0_6 = arith.constant 0 : index
    %c0_7 = arith.constant 0 : index
    %8 = vector.load %arg8[%c0_6, %c0_7] : memref<16x128xf32, #tpu.memory_space<vmem>>, vector<16x128xf32>
    tpu.vector_store %arg8[%c0_6, %c0_7], %7 {strides = array<i32>} : memref<16x128xf32, #tpu.memory_space<vmem>>, vector<16x128xf32>,
    %c0_i32_8 = arith.constant 0 : i32
    %9 = arith.cmpi eq, %arg2, %c0_i32_8 : i32
    %10 = arith.extui %9 : i1 to i32
    %c0_i32_9 = arith.constant 0 : i32
    %11 = arith.cmpi ne, %10, %c0_i32_9 : i32
    scf.if %11 {
      %c0_10 = arith.constant 0 : index
      %c0_11 = arith.constant 0 : index
      %12 = vector.load %arg8[%c0_10, %c0_11] : memref<16x128xf32, #tpu.memory_space<vmem>>, vector<16x128xf32>
      %c0_12 = arith.constant 0 : index
      %c0_13 = arith.constant 0 : index
      %13 = vector.load %arg5[%c0_12, %c0_13] : memref<1x128xf32, #tpu.memory_space<vmem>>, vector<1x128xf32>
      %14 = vector.broadcast %13 : vector<1x128xf32> to vector<16x128xf32>
      %15 = arith.mulf %12, %14 : vector<16x128xf32>
      %c0_14 = arith.constant 0 : index
      %c0_15 = arith.constant 0 : index
      %16 = vector.load %arg6[%c0_14, %c0_15] : memref<1x128xf32, #tpu.memory_space<vmem>>, vector<1x128xf32>
      %17 = vector.broadcast %16 : vector<1x128xf32> to vector<16x128xf32>
      %18 = arith.addf %15, %17 : vector<16x128xf32>
      %19 = arith.truncf %18 : vector<16x128xf32> to vector<16x128xbf16>
      %c0_16 = arith.constant 0 : index
      %c0_17 = arith.constant 0 : index
      %20 = vector.load %arg7[%c0_16, %c0_17] : memref<16x128xbf16, #tpu.memory_space<vmem>>, vector<16x128xbf16>
      tpu.vector_store %arg7[%c0_16, %c0_17], %19 {strides = array<i32>} : memref<16x128xbf16, #tpu.memory_space<vmem>>, vector<16x128xbf16>,
    } else {
    }
    return
  }
  func.func @transform_0(%arg0: i32, %arg1: i32, %arg2: i32) -> (i32, i32) {
    %c0_i32 = arith.constant 0 : i32
    return %arg0, %arg2 : i32, i32
  }
  func.func @transform_1(%arg0: i32, %arg1: i32, %arg2: i32) -> (i32, i32) {
    %c0_i32 = arith.constant 0 : i32
    return %arg2, %arg1 : i32, i32
  }
  func.func @transform_2(%arg0: i32, %arg1: i32, %arg2: i32) -> (i32, i32) {
    %c0_i32 = arith.constant 0 : i32
    %c0_i32_0 = arith.constant 0 : i32
    return %c0_i32, %arg1 : i32, i32
  }
  func.func @transform_3(%arg0: i32, %arg1: i32, %arg2: i32) -> (i32, i32) {
    %c0_i32 = arith.constant 0 : i32
    %c0_i32_0 = arith.constant 0 : i32
    return %c0_i32, %arg1 : i32, i32
  }
  func.func @transform_4(%arg0: i32, %arg1: i32, %arg2: i32) -> (i32, i32) {
    %c0_i32 = arith.constant 0 : i32
    return %arg0, %arg1 : i32, i32
  }
}

module attributes {stable_mosaic.version = 11 : i64} {
  func.func @_mm_kernel(%arg0: i32, %arg1: i32, %arg2: i32, %arg3: memref<16x128xbf16, #tpu.memory_space<vmem>>, %arg4: memref<128x128xbf16, #tpu.memory_space<vmem>>, %arg5: memref<1x128xf32, #tpu.memory_space<vmem>>, %arg6: memref<1x128xf32, #tpu.memory_space<vmem>>, %arg7: memref<16x128xf32, #tpu.memory_space<vmem>>, %arg8: memref<16x128xf32, #tpu.memory_space<vmem>>) attributes {dimension_semantics = [#tpu.dimension_semantics<parallel>, #tpu.dimension_semantics<parallel>, #tpu.dimension_semantics<arbitrary>], iteration_bounds = array<i64: 1, 1, 1>, scalar_prefetch = 0 : i64, scratch_operands = 1 : i64, tpu.core_type = #tpu.core_type<tc>, window_params = [{transform_indices = @transform_0, window_bounds = array<i64: 16, 128>}, {transform_indices = @transform_1, window_bounds = array<i64: 128, 128>}, {transform_indices = @transform_2, window_bounds = array<i64: 1, 128>}, {transform_indices = @transform_3, window_bounds = array<i64: 1, 128>}, {transform_indices = @transform_4, window_bounds = array<i64: 16, 128>}]} {
    %c0_i32 = arith.constant 0 : i32
    %0 = arith.cmpi eq, %arg2, %c0_i32 : i32
    %1 = arith.extui %0 : i1 to i32
    %c0_i32_0 = arith.constant 0 : i32
    %2 = arith.cmpi ne, %1, %c0_i32_0 : i32
    scf.if %2 {
      %cst_10 = arith.constant 0.000000e+00 : f32
      %12 = vector.broadcast %cst_10 : f32 to vector<16x128xf32>
      %c0_11 = arith.constant 0 : index
      %c0_12 = arith.constant 0 : index
      %13 = vector.load %arg8[%c0_11, %c0_12] : memref<16x128xf32, #tpu.memory_space<vmem>>, vector<16x128xf32>
      tpu.vector_store %arg8[%c0_11, %c0_12], %12 {strides = array<i32>} : memref<16x128xf32, #tpu.memory_space<vmem>>, vector<16x128xf32>,
    } else {
    }
    %c0 = arith.constant 0 : index
    %c0_1 = arith.constant 0 : index
    %3 = vector.load %arg8[%c0, %c0_1] : memref<16x128xf32, #tpu.memory_space<vmem>>, vector<16x128xf32>
    %c0_2 = arith.constant 0 : index
    %c0_3 = arith.constant 0 : index
    %4 = vector.load %arg3[%c0_2, %c0_3] : memref<16x128xbf16, #tpu.memory_space<vmem>>, vector<16x128xbf16>
    %c0_4 = arith.constant 0 : index
    %c0_5 = arith.constant 0 : index
    %5 = vector.load %arg4[%c0_4, %c0_5] : memref<128x128xbf16, #tpu.memory_space<vmem>>, vector<128x128xbf16>
    %cst = arith.constant dense<0.000000e+00> : vector<16x128xf32>
    %6 = tpu.matmul %4, %5, %cst {dimension_numbers = #tpu.dot_dimension_numbers<[1], [0], [0], [1], [0, 0, 1, 1], [], []>} : vector<16x128xbf16>, vector<128x128xbf16>, vector<16x128xf32> -> vector<16x128xf32>
    %7 = arith.addf %3, %6 : vector<16x128xf32>
    %c0_6 = arith.constant 0 : index
    %c0_7 = arith.constant 0 : index
    %8 = vector.load %arg8[%c0_6, %c0_7] : memref<16x128xf32, #tpu.memory_space<vmem>>, vector<16x128xf32>
    tpu.vector_store %arg8[%c0_6, %c0_7], %7 {strides = array<i32>} : memref<16x128xf32, #tpu.memory_space<vmem>>, vector<16x128xf32>,
    %c0_i32_8 = arith.constant 0 : i32
    %9 = arith.cmpi eq, %arg2, %c0_i32_8 : i32
    %10 = arith.extui %9 : i1 to i32
    %c0_i32_9 = arith.constant 0 : i32
    %11 = arith.cmpi ne, %10, %c0_i32_9 : i32
    scf.if %11 {
      %c0_10 = arith.constant 0 : index
      %c0_11 = arith.constant 0 : index
      %12 = vector.load %arg8[%c0_10, %c0_11] : memref<16x128xf32, #tpu.memory_space<vmem>>, vector<16x128xf32>
      %c0_12 = arith.constant 0 : index
      %c0_13 = arith.constant 0 : index
      %13 = vector.load %arg5[%c0_12, %c0_13] : memref<1x128xf32, #tpu.memory_space<vmem>>, vector<1x128xf32>
      %14 = vector.broadcast %13 : vector<1x128xf32> to vector<16x128xf32>
      %15 = arith.mulf %12, %14 : vector<16x128xf32>
      %c0_14 = arith.constant 0 : index
      %c0_15 = arith.constant 0 : index
      %16 = vector.load %arg6[%c0_14, %c0_15] : memref<1x128xf32, #tpu.memory_space<vmem>>, vector<1x128xf32>
      %17 = vector.broadcast %16 : vector<1x128xf32> to vector<16x128xf32>
      %18 = arith.addf %15, %17 : vector<16x128xf32>
      %c0_16 = arith.constant 0 : index
      %c0_17 = arith.constant 0 : index
      %19 = vector.load %arg7[%c0_16, %c0_17] : memref<16x128xf32, #tpu.memory_space<vmem>>, vector<16x128xf32>
      tpu.vector_store %arg7[%c0_16, %c0_17], %18 {strides = array<i32>} : memref<16x128xf32, #tpu.memory_space<vmem>>, vector<16x128xf32>,
    } else {
    }
    return
  }
  func.func @transform_0(%arg0: i32, %arg1: i32, %arg2: i32) -> (i32, i32) {
    %c0_i32 = arith.constant 0 : i32
    return %arg0, %arg2 : i32, i32
  }
  func.func @transform_1(%arg0: i32, %arg1: i32, %arg2: i32) -> (i32, i32) {
    %c0_i32 = arith.constant 0 : i32
    return %arg2, %arg1 : i32, i32
  }
  func.func @transform_2(%arg0: i32, %arg1: i32, %arg2: i32) -> (i32, i32) {
    %c0_i32 = arith.constant 0 : i32
    %c0_i32_0 = arith.constant 0 : i32
    return %c0_i32, %arg1 : i32, i32
  }
  func.func @transform_3(%arg0: i32, %arg1: i32, %arg2: i32) -> (i32, i32) {
    %c0_i32 = arith.constant 0 : i32
    %c0_i32_0 = arith.constant 0 : i32
    return %c0_i32, %arg1 : i32, i32
  }
  func.func @transform_4(%arg0: i32, %arg1: i32, %arg2: i32) -> (i32, i32) {
    %c0_i32 = arith.constant 0 : i32
    return %arg0, %arg1 : i32, i32
  }
}

</mosaic_0001>

<bundles_post_ra>
// kernel: resnet18_baseline_forward.25
= control target key start
LH: loop header
LB: loop body
LE: loop exit
PB: predicated region body
PF: predicated region fallthrough
CT: control target
= control target key end

     0   :  { %s1843_s15 = smov 0   ;;  %s1845_s16 = smov 0   ;;  %s2054_s0 = inlined_call_operand.vmem [shape: bf16[512,256], index: 0, kind: input, shape index: {}]   ;;  %s2055_s1 = inlined_call_operand.vmem [shape: bf16[256,128], index: 1, kind: input, shape index: {}]   ;;  %s2056_s2 = inlined_call_operand.vmem [shape: f32[1,128], index: 2, kind: input, shape index: {}]   ;;  %s2057_s3 = inlined_call_operand.vmem [shape: f32[1,128], index: 3, kind: input, shape index: {}]   ;;  %s2058_s4 = inlined_call_operand.vmem [shape: bf16[512,128], index: 4, kind: output, shape index: {}]  }
   0x1   :  { %s1847_s17 = smov 0  }
   0x2 LB: > { %s33_s18 = sadd.s32 1, %s1812_s16  ;;  %p1360_p0 = scmp.ge.s32.totalorder %s1816_s17, 1  ;;  %s1816_s17 = sphi %s1847_s17, %s14_s17   ;;  %s1812_s16 = sphi %s1845_s16, %s2060_s16   ;;  %s1808_s15 = sphi %s1843_s15, %s2059_s15  }
   0x3   : > { %p35_p1 = scmp.ge.s32.totalorder %s33_s18, 2  ;;  %p224_p2 = scmp.lt.s32.totalorder %s1816_s17, 3 }
   0x5   : > { %s2062_s18 = smov (%p35_p1, %s33_s18), 0  ;;  %p225_p3 = pnand %p1360_p0, %p224_p2 }
   0x6   : > { %v1730_v0 = vld [vmem:[%s2055_s1 + $0x40] sm:$0xff] (!%p225_p3)   ;;  %s1361_s21 = sshll.u32 (!%p225_p3), %s1808_s15, 5  ;;  %v1732_v2 = vld [vmem:[%s2055_s1 + $0x48] sm:$0xff] (!%p225_p3)   ;;  %v1734_v4 = vld [vmem:[%s2055_s1 + $0x50] sm:$0xff] (!%p225_p3)  }
   0x7   : > { %228 = sbr.rel (%p225_p3) target bundleno = 322 (0x142), region = 36  ;;  %v1731_v1 = vld [vmem:[%s2055_s1] sm:$0xff] (!%p225_p3)   ;;  %1578 = vmatprep.subr.bf16.mxu0 (!%p225_p3), %v1730_v0  ;;  %1690 = vmatprep.subr.bf16.mxu1 (!%p225_p3), %v1730_v0  ;;  %v1733_v3 = vld [vmem:[%s2055_s1 + $0x8] sm:$0xff] (!%p225_p3)   ;;  %p274_p4 = scmp.lt.s32.totalorder (!%p225_p3), %s1361_s21, 63  ;;  %v1735_v5 = vld [vmem:[%s2055_s1 + $0x10] sm:$0xff] (!%p225_p3)  }
   0x8   : > { %1579 = vmatpush3.bf16.msra.mxu0 (!%p225_p3), %v1731_v1  ;;  %1698 = vmatpush3.bf16.msra.mxu1 (!%p225_p3), %v1731_v1  ;;  %v1736_v6 = vld [vmem:[%s2055_s1 + $0x58] sm:$0xff] (!%p225_p3)   ;;  %v1738_v8 = vld [vmem:[%s2055_s1 + $0x60] sm:$0xff] (!%p225_p3)   ;;  %v1740_v10 = vld [vmem:[%s2055_s1 + $0x68] sm:$0xff] (!%p225_p3)  }
   0x9   : > { %1580 = vmatprep.subr.bf16.mxu0 (!%p225_p3), %v1732_v2  ;;  %1691 = vmatprep.subr.bf16.mxu1 (!%p225_p3), %v1732_v2  ;;  %v1737_v7 = vld [vmem:[%s2055_s1 + $0x18] sm:$0xff] (!%p225_p3)   ;;  %v1739_v9 = vld [vmem:[%s2055_s1 + $0x20] sm:$0xff] (!%p225_p3)   ;;  %v1741_v13 = vld [vmem:[%s2055_s1 + $0x28] sm:$0xff] (!%p225_p3)  }
   0xa   : > { %v1742_v14 = vld [vmem:[%s2055_s1 + $0x70] sm:$0xff] (!%p225_p3)   ;;  %v1744_v16 = vld [vmem:[%s2055_s1 + $0x78] sm:$0xff] (!%p225_p3)   ;;  %v1952_v51 = vld [vmem:[%s2056_s2] ss:$0 sm:$0xff] (!%p225_p3) }
   0xb   : > { %v1743_v15 = vld [vmem:[%s2055_s1 + $0x30] sm:$0xff] (!%p225_p3)   ;;  %v1745_v17 = vld [vmem:[%s2055_s1 + $0x38] sm:$0xff] (!%p225_p3)   ;;  %v1957_v57 = vld [vmem:[%s2057_s3] ss:$0 sm:$0xff] (!%p225_p3) }
   0xc   : > { %1581 = vmatpush3.bf16.msra.mxu0 (!%p225_p3), %v1733_v3  ;;  %1699 = vmatpush3.bf16.msra.mxu1 (!%p225_p3), %v1733_v3 }
   0xd   : > { %1582 = vmatprep.subr.bf16.mxu0 (!%p225_p3), %v1734_v4  ;;  %1692 = vmatprep.subr.bf16.mxu1 (!%p225_p3), %v1734_v4 }
   0xe   : > { %s2064_s21 = smov (!%p274_p4, %s1361_s21), 63 }
   0xf   : > { %s1450_s10 = sshll.u32 %s2064_s21, 3  ;;  %s1365_s12 = sshll.u32 %s2064_s21, 2 }
  0x10   : > { %1583 = vmatpush3.bf16.msra.mxu0 %v1735_v5  ;;  %1700 = vmatpush3.bf16.msra.mxu1 %v1735_v5  ;;  %s1894_s15 = scalar_lea.vmem %s2054_s0, %s1450_s10  ;;  %s1971_s21 = scalar_lea.vmem %s2058_s4, %s1365_s12 }
  0x11   : > { %1584 = vmatprep.subr.bf16.mxu0 %v1736_v6  ;;  %1693 = vmatprep.subr.bf16.mxu1 %v1736_v6  ;;  %v1748_v11 = vld [vmem:[%s1894_s15 + $0x4] ss:$8 sps:$4 sm:$0xff]   ;;  %v1746_v18 = vld [vmem:[%s1894_s15] ss:$8 sps:$4 sm:$0xff]   ;;  %v1752_v20 = vld [vmem:[%s1894_s15 + $0x14] ss:$8 sps:$4 sm:$0xff]  }
  0x12   : > { %v1751_v12 = vld [vmem:[%s1894_s15 + $0x84] ss:$8 sps:$4 sm:$0xff]   ;;  %729 = vmatprep.mubr.bf16.mxu0 %v1748_v11  ;;  %v1749_v19 = vld [vmem:[%s1894_s15 + $0x80] ss:$8 sps:$4 sm:$0xff]   ;;  %v1754_v21 = vld [vmem:[%s1894_s15 + $0x94] ss:$8 sps:$4 sm:$0xff]  }
  0x13   : > { %793 = vmatprep.mubr.bf16.mxu1 %v1751_v12  ;;  %v1756_v22 = vld [vmem:[%s1894_s15 + $0x10] ss:$8 sps:$4 sm:$0xff]   ;;  %v1758_v24 = vld [vmem:[%s1894_s15 + $0x24] ss:$8 sps:$4 sm:$0xff]   ;;  %v1762_v26 = vld [vmem:[%s1894_s15 + $0x20] ss:$8 sps:$4 sm:$0xff]  }
  0x14   : > { %1585 = vmatpush3.bf16.msra.mxu0 %v1737_v7  ;;  %1701 = vmatpush3.bf16.msra.mxu1 %v1737_v7  ;;  %v1757_v23 = vld [vmem:[%s1894_s15 + $0x90] ss:$8 sps:$4 sm:$0xff]   ;;  %v1760_v25 = vld [vmem:[%s1894_s15 + $0xa4] ss:$8 sps:$4 sm:$0xff]   ;;  %v1763_v27 = vld [vmem:[%s1894_s15 + $0xa0] ss:$8 sps:$4 sm:$0xff]  }
  0x15   : > { %1586 = vmatprep.subr.bf16.mxu0 %v1738_v8  ;;  %1694 = vmatprep.subr.bf16.mxu1 %v1738_v8  ;;  %v1764_v28 = vld [vmem:[%s1894_s15 + $0x34] ss:$8 sps:$4 sm:$0xff]   ;;  %v1768_v30 = vld [vmem:[%s1894_s15 + $0x30] ss:$8 sps:$4 sm:$0xff]   ;;  %v1770_v32 = vld [vmem:[%s1894_s15 + $0x44] ss:$8 sps:$4 sm:$0xff]  }
  0x16   : > { %v1766_v29 = vld [vmem:[%s1894_s15 + $0xb4] ss:$8 sps:$4 sm:$0xff]   ;;  %v1769_v31 = vld [vmem:[%s1894_s15 + $0xb0] ss:$8 sps:$4 sm:$0xff]   ;;  %v1772_v33 = vld [vmem:[%s1894_s15 + $0xc4] ss:$8 sps:$4 sm:$0xff]  }
  0x17   : > { %v1774_v34 = vld [vmem:[%s1894_s15 + $0x40] ss:$8 sps:$4 sm:$0xff]   ;;  %v1776_v36 = vld [vmem:[%s1894_s15 + $0x54] ss:$8 sps:$4 sm:$0xff]   ;;  %v1780_v38 = vld [vmem:[%s1894_s15 + $0x50] ss:$8 sps:$4 sm:$0xff]  }
  0x18   : > { %1587 = vmatpush3.bf16.msra.mxu0 %v1739_v9  ;;  %1702 = vmatpush3.bf16.msra.mxu1 %v1739_v9  ;;  %v1775_v35 = vld [vmem:[%s1894_s15 + $0xc0] ss:$8 sps:$4 sm:$0xff]   ;;  %v1778_v37 = vld [vmem:[%s1894_s15 + $0xd4] ss:$8 sps:$4 sm:$0xff]   ;;  %v1781_v39 = vld [vmem:[%s1894_s15 + $0xd0] ss:$8 sps:$4 sm:$0xff]  }
  0x19   : > { %1588 = vmatprep.subr.bf16.mxu0 %v1740_v10  ;;  %1695 = vmatprep.subr.bf16.mxu1 %v1740_v10  ;;  %v1782_v40 = vld [vmem:[%s1894_s15 + $0x64] ss:$8 sps:$4 sm:$0xff]   ;;  %v1786_v42 = vld [vmem:[%s1894_s15 + $0x60] ss:$8 sps:$4 sm:$0xff]   ;;  %v1788_v44 = vld [vmem:[%s1894_s15 + $0x74] ss:$8 sps:$4 sm:$0xff]  }
  0x1a   : > { %v1784_v41 = vld [vmem:[%s1894_s15 + $0xe4] ss:$8 sps:$4 sm:$0xff]   ;;  %v1787_v43 = vld [vmem:[%s1894_s15 + $0xe0] ss:$8 sps:$4 sm:$0xff]   ;;  %v1790_v45 = vld [vmem:[%s1894_s15 + $0xf4] ss:$8 sps:$4 sm:$0xff]  }
  0x1b   : > { %v1792_v46 = vld [vmem:[%s1894_s15 + $0x70] ss:$8 sps:$4 sm:$0xff]  }
  0x1c   : > { %1589 = vmatpush3.bf16.msra.mxu0 %v1741_v13  ;;  %1703 = vmatpush3.bf16.msra.mxu1 %v1741_v13  ;;  %v1793_v47 = vld [vmem:[%s1894_s15 + $0xf0] ss:$8 sps:$4 sm:$0xff]  }
  0x1d   : > { %1590 = vmatprep.subr.bf16.mxu0 %v1742_v14  ;;  %1696 = vmatprep.subr.bf16.mxu1 %v1742_v14 }
  0x20   : > { %1591 = vmatpush3.bf16.msra.mxu0 %v1743_v15  ;;  %1704 = vmatpush3.bf16.msra.mxu1 %v1743_v15 }
  0x21   : > { %1592 = vmatprep.subr.bf16.mxu0 %v1744_v16  ;;  %1697 = vmatprep.subr.bf16.mxu1 %v1744_v16 }
  0x24   : > { %1593 = vmatpush3.bf16.msra.mxu0 %v1745_v17  ;;  %1705 = vmatpush3.bf16.msra.mxu1 %v1745_v17 }
  0x27   : > { %730 = vmatmul.mubr.bf16.vlgmr.msra.gmra.mrb[0].mxu0 %v1746_v18  ;;  %794 = vmatmul.mubr.bf16.vlgmr.msra.gmra.mrb[0].mxu1 %v1749_v19 }
  0x28   : > { %737 = vmatprep.mubr.bf16.mxu0 %v1752_v20  ;;  %801 = vmatprep.mubr.bf16.mxu1 %v1754_v21 }
  0x2f   : > { %738 = vmatmul.mubr.bf16.gmra.mrb[4].mxu0 %v1756_v22  ;;  %802 = vmatmul.mubr.bf16.gmra.mrb[4].mxu1 %v1757_v23 }
  0x30   : > { %745 = vmatprep.mubr.bf16.mxu0 %v1758_v24  ;;  %809 = vmatprep.mubr.bf16.mxu1 %v1760_v25 }
  0x37   : > { %746 = vmatmul.mubr.bf16.gmra.mrb[8].mxu0 %v1762_v26  ;;  %810 = vmatmul.mubr.bf16.gmra.mrb[8].mxu1 %v1763_v27 }
  0x38   : > { %753 = vmatprep.mubr.bf16.mxu0 %v1764_v28  ;;  %817 = vmatprep.mubr.bf16.mxu1 %v1766_v29 }
  0x3f   : > { %754 = vmatmul.mubr.bf16.gmra.mrb[12].mxu0 %v1768_v30  ;;  %818 = vmatmul.mubr.bf16.gmra.mrb[12].mxu1 %v1769_v31 }
  0x40   : > { %761 = vmatprep.mubr.bf16.mxu0 %v1770_v32  ;;  %825 = vmatprep.mubr.bf16.mxu1 %v1772_v33 }
  0x47   : > { %762 = vmatmul.mubr.bf16.gmra.mrb[16].mxu0 %v1774_v34  ;;  %826 = vmatmul.mubr.bf16.gmra.mrb[16].mxu1 %v1775_v35 }
  0x48   : > { %769 = vmatprep.mubr.bf16.mxu0 %v1776_v36  ;;  %833 = vmatprep.mubr.bf16.mxu1 %v1778_v37 }
  0x4f   : > { %770 = vmatmul.mubr.bf16.gmra.mrb[20].mxu0 %v1780_v38  ;;  %834 = vmatmul.mubr.bf16.gmra.mrb[20].mxu1 %v1781_v39 }
  0x50   : > { %777 = vmatprep.mubr.bf16.mxu0 %v1782_v40  ;;  %841 = vmatprep.mubr.bf16.mxu1 %v1784_v41 }
  0x57   : > { %778 = vmatmul.mubr.bf16.gmra.mrb[24].mxu0 %v1786_v42  ;;  %842 = vmatmul.mubr.bf16.gmra.mrb[24].mxu1 %v1787_v43 }
  0x58   : > { %785 = vmatprep.mubr.bf16.mxu0 %v1788_v44  ;;  %849 = vmatprep.mubr.bf16.mxu1 %v1790_v45 }
  0x5f   : > { %786 = vmatmul.mubr.bf16.gmra.mrb[28].mxu0 %v1792_v46  ;;  %850 = vmatmul.mubr.bf16.gmra.mrb[28].mxu1 %v1793_v47 }
  0xfa   : > { %v1594_v48 = vpop.f32.mrb[0].mxu0  ;;  %v1642_v49 = vpop.f32.mrb[0].mxu1 }
  0xfb   : > { %v1595_v50 = vpop.f32.mrb[1].mxu0  ;;  %v1643_v52 = vpop.f32.mrb[1].mxu1 }
  0xfc   : > { %v1596_v53 = vadd.f32 %v1595_v50, %v1594_v48  ;;  %v1644_v54 = vadd.f32 %v1643_v52, %v1642_v49  ;;  %v1597_v55 = vpop.f32.mrb[2].mxu0  ;;  %v1645_v56 = vpop.f32.mrb[2].mxu1 }
  0xfd   : > { %v1598_v58 = vpop.f32.mrb[3].mxu0  ;;  %v1646_v59 = vpop.f32.mrb[3].mxu1 }
  0xfe   : > { %v964_v60 = vmul.f32 %v1596_v53, %v1952_v51  ;;  %v980_v61 = vmul.f32 %v1644_v54, %v1952_v51  ;;  %v1599_v62 = vadd.f32 %v1598_v58, %v1597_v55  ;;  %v1647_v63 = vadd.f32 %v1646_v59, %v1645_v56 }
 0x100   : > { %v1003_v0 = vadd.f32 %v1957_v57, %v964_v60  ;;  %v1019_v1 = vadd.f32 %v1957_v57, %v980_v61  ;;  %v965_v2 = vmul.f32 %v1599_v62, %v1952_v51  ;;  %v981_v3 = vmul.f32 %v1647_v63, %v1952_v51 }
 0x102   : > { %v1004_v4 = vadd.f32 %v1957_v57, %v965_v2  ;;  %v1020_v5 = vadd.f32 %v1957_v57, %v981_v3  ;;  %v1600_v6 = vpop.f32.mrb[4].mxu0  ;;  %v1648_v7 = vpop.f32.mrb[4].mxu1  ;;  %v1035_v8 = vmax.f32 %v1003_v0, 0.0  ;;  %v1051_v9 = vmax.f32 %v1019_v1, 0.0 }
 0x103   : > { %v1601_v10 = vpop.f32.mrb[5].mxu0  ;;  %v1649_v11 = vpop.f32.mrb[5].mxu1 }
 0x104   : > { %v1036_v12 = vmax.f32 %v1004_v4, 0.0  ;;  %v1052_v13 = vmax.f32 %v1020_v5, 0.0  ;;  %v1602_v14 = vadd.f32 %v1601_v10, %v1600_v6  ;;  %v1650_v15 = vadd.f32 %v1649_v11, %v1648_v7  ;;  %v1603_v16 = vpop.f32.mrb[6].mxu0  ;;  %v1651_v17 = vpop.f32.mrb[6].mxu1 }
 0x105   : > { %v1604_v18 = vpop.f32.mrb[7].mxu0  ;;  %v1652_v19 = vpop.f32.mrb[7].mxu1 }
 0x106   : > { %v1486_v20 = vpack.c.bf16 %v1036_v12, %v1035_v8  ;;  %v1526_v21 = vpack.c.bf16 %v1052_v13, %v1051_v9  ;;  %v966_v22 = vmul.f32 %v1602_v14, %v1952_v51  ;;  %v982_v23 = vmul.f32 %v1650_v15, %v1952_v51 }
 0x107   : > { %v1605_v24 = vadd.f32 %v1604_v18, %v1603_v16  ;;  %v1653_v25 = vadd.f32 %v1652_v19, %v1651_v17 }
 0x108   : > { %1487 = vst [vmem:[%s1971_s21] sm:$0xff] %v1486_v20   ;;  %1570 = vst [vmem:[%s1971_s21 + $0x40] sm:$0xff] %v1526_v21   ;;  %v1005_v26 = vadd.f32 %v1957_v57, %v966_v22  ;;  %v1021_v27 = vadd.f32 %v1957_v57, %v982_v23 }
 0x109   : > { %v967_v28 = vmul.f32 %v1605_v24, %v1952_v51  ;;  %v983_v29 = vmul.f32 %v1653_v25, %v1952_v51 }
 0x10a   : > { %v1606_v30 = vpop.f32.mrb[8].mxu0  ;;  %v1654_v31 = vpop.f32.mrb[8].mxu1  ;;  %v1037_v40 = vmax.f32 %v1005_v26, 0.0  ;;  %v1053_v41 = vmax.f32 %v1021_v27, 0.0 }
 0x10b   : > { %v1006_v32 = vadd.f32 %v1957_v57, %v967_v28  ;;  %v1022_v33 = vadd.f32 %v1957_v57, %v983_v29  ;;  %v1607_v34 = vpop.f32.mrb[9].mxu0  ;;  %v1655_v35 = vpop.f32.mrb[9].mxu1 }
 0x10c   : > { %v1608_v36 = vadd.f32 %v1607_v34, %v1606_v30  ;;  %v1656_v37 = vadd.f32 %v1655_v35, %v1654_v31  ;;  %v1609_v38 = vpop.f32.mrb[10].mxu0  ;;  %v1657_v39 = vpop.f32.mrb[10].mxu1 }
 0x10d   : > { %v1038_v42 = vmax.f32 %v1006_v32, 0.0  ;;  %v1054_v43 = vmax.f32 %v1022_v33, 0.0  ;;  %v1610_v44 = vpop.f32.mrb[11].mxu0  ;;  %v1658_v45 = vpop.f32.mrb[11].mxu1 }
 0x10e   : > { %v968_v46 = vmul.f32 %v1608_v36, %v1952_v51  ;;  %v984_v47 = vmul.f32 %v1656_v37, %v1952_v51  ;;  %v1611_v48 = vadd.f32 %v1610_v44, %v1609_v38  ;;  %v1659_v49 = vadd.f32 %v1658_v45, %v1657_v39 }
 0x10f   : > { %v1491_v50 = vpack.c.bf16 %v1038_v42, %v1037_v40  ;;  %v1531_v52 = vpack.c.bf16 %v1054_v43, %v1053_v41 }
 0x110   : > { %v1007_v53 = vadd.f32 %v1957_v57, %v968_v46  ;;  %v1023_v54 = vadd.f32 %v1957_v57, %v984_v47  ;;  %v969_v55 = vmul.f32 %v1611_v48, %v1952_v51  ;;  %v985_v56 = vmul.f32 %v1659_v49, %v1952_v51 }
 0x111   : > { %1563 = vst [vmem:[%s1971_s21 + $0x8] sm:$0xff] %v1491_v50   ;;  %1571 = vst [vmem:[%s1971_s21 + $0x48] sm:$0xff] %v1531_v52  }
 0x112   : > { %v1008_v58 = vadd.f32 %v1957_v57, %v969_v55  ;;  %v1024_v59 = vadd.f32 %v1957_v57, %v985_v56  ;;  %v1612_v60 = vpop.f32.mrb[12].mxu0  ;;  %v1660_v61 = vpop.f32.mrb[12].mxu1  ;;  %v1039_v62 = vmax.f32 %v1007_v53, 0.0  ;;  %v1055_v63 = vmax.f32 %v1023_v54, 0.0 }
 0x113   : > { %v1613_v0 = vpop.f32.mrb[13].mxu0  ;;  %v1661_v1 = vpop.f32.mrb[13].mxu1 }
 0x114   : > { %v1040_v2 = vmax.f32 %v1008_v58, 0.0  ;;  %v1056_v3 = vmax.f32 %v1024_v59, 0.0  ;;  %v1614_v4 = vadd.f32 %v1613_v0, %v1612_v60  ;;  %v1662_v5 = vadd.f32 %v1661_v1, %v1660_v61  ;;  %v1615_v6 = vpop.f32.mrb[14].mxu0  ;;  %v1663_v7 = vpop.f32.mrb[14].mxu1 }
 0x115   : > { %v1616_v8 = vpop.f32.mrb[15].mxu0  ;;  %v1664_v9 = vpop.f32.mrb[15].mxu1 }
 0x116   : > { %v1496_v10 = vpack.c.bf16 %v1040_v2, %v1039_v62  ;;  %v1536_v11 = vpack.c.bf16 %v1056_v3, %v1055_v63  ;;  %v970_v12 = vmul.f32 %v1614_v4, %v1952_v51  ;;  %v986_v13 = vmul.f32 %v1662_v5, %v1952_v51 }
 0x117   : > { %v1617_v14 = vadd.f32 %v1616_v8, %v1615_v6  ;;  %v1665_v15 = vadd.f32 %v1664_v9, %v1663_v7 }
 0x118   : > { %1564 = vst [vmem:[%s1971_s21 + $0x10] sm:$0xff] %v1496_v10   ;;  %1572 = vst [vmem:[%s1971_s21 + $0x50] sm:$0xff] %v1536_v11   ;;  %v1009_v16 = vadd.f32 %v1957_v57, %v970_v12  ;;  %v1025_v17 = vadd.f32 %v1957_v57, %v986_v13 }
 0x119   : > { %v971_v18 = vmul.f32 %v1617_v14, %v1952_v51  ;;  %v987_v19 = vmul.f32 %v1665_v15, %v1952_v51 }
 0x11a   : > { %v1618_v20 = vpop.f32.mrb[16].mxu0  ;;  %v1666_v21 = vpop.f32.mrb[16].mxu1  ;;  %v1041_v30 = vmax.f32 %v1009_v16, 0.0  ;;  %v1057_v31 = vmax.f32 %v1025_v17, 0.0 }
 0x11b   : > { %v1010_v22 = vadd.f32 %v1957_v57, %v971_v18  ;;  %v1026_v23 = vadd.f32 %v1957_v57, %v987_v19  ;;  %v1619_v24 = vpop.f32.mrb[17].mxu0  ;;  %v1667_v25 = vpop.f32.mrb[17].mxu1 }
 0x11c   : > { %v1620_v26 = vadd.f32 %v1619_v24, %v1618_v20  ;;  %v1668_v27 = vadd.f32 %v1667_v25, %v1666_v21  ;;  %v1621_v28 = vpop.f32.mrb[18].mxu0  ;;  %v1669_v29 = vpop.f32.mrb[18].mxu1 }
 0x11d   : > { %v1042_v32 = vmax.f32 %v1010_v22, 0.0  ;;  %v1058_v33 = vmax.f32 %v1026_v23, 0.0  ;;  %v1622_v34 = vpop.f32.mrb[19].mxu0  ;;  %v1670_v35 = vpop.f32.mrb[19].mxu1 }
 0x11e   : > { %v972_v36 = vmul.f32 %v1620_v26, %v1952_v51  ;;  %v988_v37 = vmul.f32 %v1668_v27, %v1952_v51  ;;  %v1623_v38 = vadd.f32 %v1622_v34, %v1621_v28  ;;  %v1671_v39 = vadd.f32 %v1670_v35, %v1669_v29 }
 0x11f   : > { %v1501_v40 = vpack.c.bf16 %v1042_v32, %v1041_v30  ;;  %v1541_v41 = vpack.c.bf16 %v1058_v33, %v1057_v31 }
 0x120   : > { %v1011_v42 = vadd.f32 %v1957_v57, %v972_v36  ;;  %v1027_v43 = vadd.f32 %v1957_v57, %v988_v37  ;;  %v973_v44 = vmul.f32 %v1623_v38, %v1952_v51  ;;  %v989_v45 = vmul.f32 %v1671_v39, %v1952_v51 }
 0x121   : > { %1565 = vst [vmem:[%s1971_s21 + $0x18] sm:$0xff] %v1501_v40   ;;  %1573 = vst [vmem:[%s1971_s21 + $0x58] sm:$0xff] %v1541_v41  }
 0x122   : > { %v1012_v46 = vadd.f32 %v1957_v57, %v973_v44  ;;  %v1028_v47 = vadd.f32 %v1957_v57, %v989_v45  ;;  %v1624_v48 = vpop.f32.mrb[20].mxu0  ;;  %v1672_v49 = vpop.f32.mrb[20].mxu1  ;;  %v1043_v50 = vmax.f32 %v1011_v42, 0.0  ;;  %v1059_v52 = vmax.f32 %v1027_v43, 0.0 }
 0x123   : > { %v1625_v53 = vpop.f32.mrb[21].mxu0  ;;  %v1673_v54 = vpop.f32.mrb[21].mxu1 }
 0x124   : > { %v1044_v55 = vmax.f32 %v1012_v46, 0.0  ;;  %v1060_v56 = vmax.f32 %v1028_v47, 0.0  ;;  %v1626_v58 = vadd.f32 %v1625_v53, %v1624_v48  ;;  %v1674_v59 = vadd.f32 %v1673_v54, %v1672_v49  ;;  %v1627_v60 = vpop.f32.mrb[22].mxu0  ;;  %v1675_v61 = vpop.f32.mrb[22].mxu1 }
 0x125   : > { %v1628_v62 = vpop.f32.mrb[23].mxu0  ;;  %v1676_v63 = vpop.f32.mrb[23].mxu1 }
 0x126   : > { %v1506_v0 = vpack.c.bf16 %v1044_v55, %v1043_v50  ;;  %v1546_v1 = vpack.c.bf16 %v1060_v56, %v1059_v52  ;;  %v974_v2 = vmul.f32 %v1626_v58, %v1952_v51  ;;  %v990_v3 = vmul.f32 %v1674_v59, %v1952_v51 }
 0x127   : > { %v1629_v4 = vadd.f32 %v1628_v62, %v1627_v60  ;;  %v1677_v5 = vadd.f32 %v1676_v63, %v1675_v61 }
 0x128   : > { %1566 = vst [vmem:[%s1971_s21 + $0x20] sm:$0xff] %v1506_v0   ;;  %1574 = vst [vmem:[%s1971_s21 + $0x60] sm:$0xff] %v1546_v1   ;;  %v1013_v6 = vadd.f32 %v1957_v57, %v974_v2  ;;  %v1029_v7 = vadd.f32 %v1957_v57, %v990_v3 }
 0x129   : > { %v975_v8 = vmul.f32 %v1629_v4, %v1952_v51  ;;  %v991_v9 = vmul.f32 %v1677_v5, %v1952_v51 }
 0x12a   : > { %v1630_v10 = vpop.f32.mrb[24].mxu0  ;;  %v1678_v11 = vpop.f32.mrb[24].mxu1  ;;  %v1045_v20 = vmax.f32 %v1013_v6, 0.0  ;;  %v1061_v21 = vmax.f32 %v1029_v7, 0.0 }
 0x12b   : > { %v1014_v12 = vadd.f32 %v1957_v57, %v975_v8  ;;  %v1030_v13 = vadd.f32 %v1957_v57, %v991_v9  ;;  %v1631_v14 = vpop.f32.mrb[25].mxu0  ;;  %v1679_v15 = vpop.f32.mrb[25].mxu1 }
 0x12c   : > { %v1632_v16 = vadd.f32 %v1631_v14, %v1630_v10  ;;  %v1680_v17 = vadd.f32 %v1679_v15, %v1678_v11  ;;  %v1633_v18 = vpop.f32.mrb[26].mxu0  ;;  %v1681_v19 = vpop.f32.mrb[26].mxu1 }
 0x12d   : > { %v1046_v22 = vmax.f32 %v1014_v12, 0.0  ;;  %v1062_v23 = vmax.f32 %v1030_v13, 0.0  ;;  %v1634_v24 = vpop.f32.mrb[27].mxu0  ;;  %v1682_v25 = vpop.f32.mrb[27].mxu1 }
 0x12e   : > { %v976_v26 = vmul.f32 %v1632_v16, %v1952_v51  ;;  %v992_v27 = vmul.f32 %v1680_v17, %v1952_v51  ;;  %v1635_v28 = vadd.f32 %v1634_v24, %v1633_v18  ;;  %v1683_v29 = vadd.f32 %v1682_v25, %v1681_v19 }
 0x12f   : > { %v1511_v30 = vpack.c.bf16 %v1046_v22, %v1045_v20  ;;  %v1551_v31 = vpack.c.bf16 %v1062_v23, %v1061_v21 }
 0x130   : > { %v1015_v32 = vadd.f32 %v1957_v57, %v976_v26  ;;  %v1031_v33 = vadd.f32 %v1957_v57, %v992_v27  ;;  %v977_v34 = vmul.f32 %v1635_v28, %v1952_v51  ;;  %v993_v35 = vmul.f32 %v1683_v29, %v1952_v51 }
 0x131   : > { %1567 = vst [vmem:[%s1971_s21 + $0x28] sm:$0xff] %v1511_v30   ;;  %1575 = vst [vmem:[%s1971_s21 + $0x68] sm:$0xff] %v1551_v31  }
 0x132   : > { %v1016_v36 = vadd.f32 %v1957_v57, %v977_v34  ;;  %v1032_v37 = vadd.f32 %v1957_v57, %v993_v35  ;;  %v1636_v38 = vpop.f32.mrb[28].mxu0  ;;  %v1684_v39 = vpop.f32.mrb[28].mxu1  ;;  %v1047_v40 = vmax.f32 %v1015_v32, 0.0  ;;  %v1063_v41 = vmax.f32 %v1031_v33, 0.0 }
 0x133   : > { %v1637_v42 = vpop.f32.mrb[29].mxu0  ;;  %v1685_v43 = vpop.f32.mrb[29].mxu1 }
 0x134   : > { %v1048_v44 = vmax.f32 %v1016_v36, 0.0  ;;  %v1064_v45 = vmax.f32 %v1032_v37, 0.0  ;;  %v1638_v46 = vadd.f32 %v1637_v42, %v1636_v38  ;;  %v1686_v47 = vadd.f32 %v1685_v43, %v1684_v39  ;;  %v1639_v48 = vpop.f32.mrb[30].mxu0  ;;  %v1687_v49 = vpop.f32.mrb[30].mxu1 }
 0x135   : > { %v1640_v50 = vpop.f32.mrb[31].mxu0  ;;  %v1688_v52 = vpop.f32.mrb[31].mxu1 }
 0x136   : > { %v1516_v53 = vpack.c.bf16 %v1048_v44, %v1047_v40  ;;  %v1556_v54 = vpack.c.bf16 %v1064_v45, %v1063_v41  ;;  %v978_v55 = vmul.f32 %v1638_v46, %v1952_v51  ;;  %v994_v56 = vmul.f32 %v1686_v47, %v1952_v51 }
 0x137   : > { %v1641_v58 = vadd.f32 %v1640_v50, %v1639_v48  ;;  %v1689_v59 = vadd.f32 %v1688_v52, %v1687_v49 }
 0x138   : > { %1568 = vst [vmem:[%s1971_s21 + $0x30] sm:$0xff] %v1516_v53   ;;  %1576 = vst [vmem:[%s1971_s21 + $0x70] sm:$0xff] %v1556_v54   ;;  %v1017_v60 = vadd.f32 %v1957_v57, %v978_v55  ;;  %v1033_v61 = vadd.f32 %v1957_v57, %v994_v56 }
 0x139   : > { %v979_v62 = vmul.f32 %v1641_v58, %v1952_v51  ;;  %v995_v63 = vmul.f32 %v1689_v59, %v1952_v51 }
 0x13a   : > { %v1049_v2 = vmax.f32 %v1017_v60, 0.0  ;;  %v1065_v3 = vmax.f32 %v1033_v61, 0.0 }
 0x13b   : > { %v1018_v0 = vadd.f32 %v1957_v57, %v979_v62  ;;  %v1034_v1 = vadd.f32 %v1957_v57, %v995_v63 }
 0x13d   : > { %v1050_v4 = vmax.f32 %v1018_v0, 0.0  ;;  %v1066_v5 = vmax.f32 %v1034_v1, 0.0 }
 0x13f   : > { %v1521_v6 = vpack.c.bf16 %v1050_v4, %v1049_v2  ;;  %v1561_v7 = vpack.c.bf16 %v1066_v5, %v1065_v3 }
 0x141   : > { %1569 = vst [vmem:[%s1971_s21 + $0x38] sm:$0xff] %v1521_v6   ;;  %1577 = vst [vmem:[%s1971_s21 + $0x78] sm:$0xff] %v1561_v7  }
 0x142 PF: > { %s14_s17 = sadd.s32 1, %s1816_s17   ;;  %s2059_s15 = smov %s1812_s16 }
 0x143   : > { %p11_p5 = scmp.ge.s32.totalorder %s14_s17, 4   ;;  %s2060_s16 = smov %s2062_s18 }
 0x145   :  { %13 = sbr.rel (!%p11_p5) target bundleno = 2 (0x2), region = 83 }

// kernel: resnet18_baseline_forward.26
= control target key start
LH: loop header
LB: loop body
LE: loop exit
PB: predicated region body
PF: predicated region fallthrough
CT: control target
= control target key end

     0   :  { %vm153_vm0 = vcmask 1043456   ;;  %s1400_s0 = inlined_call_operand.vmem [shape: bf16[9,128,128], index: 0, kind: input, shape index: {}]   ;;  %s1401_s1 = inlined_call_operand.vmem [shape: bf16[128,128], index: 1, kind: output, shape index: {}]  }
   0x1   :  { %v9_v0 = vld [vmem:[%s1400_s0] sm:$0xf]  ;;  %v10_v3 = vld [vmem:[%s1400_s0 + $0x4] sm:$0xf]  ;;  %v11_v39 = vld [vmem:[%s1400_s0 + $0x8] sm:$0xf] }
   0x2   :  { %v25_v1 = vld [vmem:[%s1400_s0 + $0x40] sm:$0xf]  ;;  %v26_v4 = vld [vmem:[%s1400_s0 + $0x44] sm:$0xf]  ;;  %v156_v7 = vsel %vm153_vm0, %v9_v0, 4286644096 }
   0x3   :  { %v41_v2 = vld [vmem:[%s1400_s0 + $0x80] sm:$0xf]  ;;  %v42_v5 = vld [vmem:[%s1400_s0 + $0x84] sm:$0xf]  ;;  %v159_v8 = vsel %vm153_vm0, %v25_v1, 4286644096 }
   0x4   :  { %v57_v6 = vld [vmem:[%s1400_s0 + $0xc0] sm:$0xf]  ;;  %v163_v9 = vsel %vm153_vm0, %v41_v2, 4286644096  ;;  %v161_v11 = vmax.bf16 %v159_v8, %v156_v7  ;;  %v58_v12 = vld [vmem:[%s1400_s0 + $0xc4] sm:$0xf] }
   0x5   :  { %v73_v10 = vld [vmem:[%s1400_s0 + $0x100] sm:$0xf]  ;;  %v167_v14 = vsel %vm153_vm0, %v57_v6, 4286644096  ;;  %v191_v16 = vsel %vm153_vm0, %v10_v3, 4286644096 }
   0x6   :  { %v89_v13 = vld [vmem:[%s1400_s0 + $0x140] sm:$0xf]  ;;  %v165_v15 = vmax.bf16 %v163_v9, %v161_v11  ;;  %v194_v17 = vsel %vm153_vm0, %v26_v4, 4286644096  ;;  %v198_v18 = vsel %vm153_vm0, %v42_v5, 4286644096 }
   0x7   :  { %v74_v19 = vld [vmem:[%s1400_s0 + $0x104] sm:$0xf]  ;;  %v171_v20 = vsel %vm153_vm0, %v73_v10, 4286644096  ;;  %v196_v21 = vmax.bf16 %v194_v17, %v191_v16  ;;  %v105_v23 = vld [vmem:[%s1400_s0 + $0x180] sm:$0xf] }
   0x8   :  { %v90_v22 = vld [vmem:[%s1400_s0 + $0x144] sm:$0xf]  ;;  %v169_v24 = vmax.bf16 %v167_v14, %v165_v15  ;;  %v202_v25 = vsel %vm153_vm0, %v58_v12, 4286644096  ;;  %v175_v27 = vsel %vm153_vm0, %v89_v13, 4286644096 }
   0x9   :  { %v106_v26 = vld [vmem:[%s1400_s0 + $0x184] sm:$0xf]  ;;  %v200_v28 = vmax.bf16 %v198_v18, %v196_v21  ;;  %v121_v29 = vld [vmem:[%s1400_s0 + $0x1c0] sm:$0xf]  ;;  %v206_v32 = vsel %vm153_vm0, %v74_v19, 4286644096 }
   0xa   :  { %v137_v30 = vld [vmem:[%s1400_s0 + $0x200] sm:$0xf]  ;;  %v173_v31 = vmax.bf16 %v171_v20, %v169_v24  ;;  %v122_v33 = vld [vmem:[%s1400_s0 + $0x1c4] sm:$0xf]  ;;  %v179_v34 = vsel %vm153_vm0, %v105_v23, 4286644096 }
   0xb   :  { %v204_v35 = vmax.bf16 %v202_v25, %v200_v28  ;;  %v210_v36 = vsel %vm153_vm0, %v90_v22, 4286644096  ;;  %v138_v37 = vld [vmem:[%s1400_s0 + $0x204] sm:$0xf]  ;;  %v27_v40 = vld [vmem:[%s1400_s0 + $0x48] sm:$0xf] }
   0xc   :  { %v177_v38 = vmax.bf16 %v175_v27, %v173_v31  ;;  %v43_v41 = vld [vmem:[%s1400_s0 + $0x88] sm:$0xf]  ;;  %v183_v42 = vsel %vm153_vm0, %v121_v29, 4286644096  ;;  %v187_v43 = vsel %vm153_vm0, %v137_v30, 4286644096 }
   0xd   :  { %v208_v44 = vmax.bf16 %v206_v32, %v204_v35  ;;  %v214_v45 = vsel %vm153_vm0, %v106_v26, 4286644096  ;;  %v12_v47 = vld [vmem:[%s1400_s0 + $0xc] sm:$0xf]  ;;  %v59_v48 = vld [vmem:[%s1400_s0 + $0xc8] sm:$0xf] }
   0xe   :  { %v181_v46 = vmax.bf16 %v179_v34, %v177_v38  ;;  %v75_v49 = vld [vmem:[%s1400_s0 + $0x108] sm:$0xf]  ;;  %v226_v51 = vsel %vm153_vm0, %v11_v39, 4286644096  ;;  %v229_v52 = vsel %vm153_vm0, %v27_v40, 4286644096 }
   0xf   :  { %v212_v50 = vmax.bf16 %v210_v36, %v208_v44  ;;  %v233_v53 = vsel %vm153_vm0, %v43_v41, 4286644096  ;;  %v218_v55 = vsel %vm153_vm0, %v122_v33, 4286644096  ;;  %v28_v56 = vld [vmem:[%s1400_s0 + $0x4c] sm:$0xf]  ;;  %v231_v58 = vmax.bf16 %v229_v52, %v226_v51 }
  0x10   :  { %v185_v54 = vmax.bf16 %v183_v42, %v181_v46  ;;  %v44_v57 = vld [vmem:[%s1400_s0 + $0x8c] sm:$0xf]  ;;  %v222_v60 = vsel %vm153_vm0, %v138_v37, 4286644096  ;;  %v237_v62 = vsel %vm153_vm0, %v59_v48, 4286644096 }
  0x11   :  { %v216_v59 = vmax.bf16 %v214_v45, %v212_v50  ;;  %v60_v61 = vld [vmem:[%s1400_s0 + $0xcc] sm:$0xf]  ;;  %v91_v63 = vld [vmem:[%s1400_s0 + $0x148] sm:$0xf]  ;;  %v235_v0 = vmax.bf16 %v233_v53, %v231_v58  ;;  %v241_v1 = vsel %vm153_vm0, %v75_v49, 4286644096 }
  0x12   :  { %v261_v2 = vsel %vm153_vm0, %v12_v47, 4286644096  ;;  %v189_v3 = vmax.bf16 %v187_v43, %v185_v54  ;;  %v264_v5 = vsel %vm153_vm0, %v28_v56, 4286644096  ;;  %v268_v6 = vsel %vm153_vm0, %v44_v57, 4286644096 }
  0x13   :  { %v220_v4 = vmax.bf16 %v218_v55, %v216_v59  ;;  %v76_v7 = vld [vmem:[%s1400_s0 + $0x10c] sm:$0xf]  ;;  %v107_v8 = vld [vmem:[%s1400_s0 + $0x188] sm:$0xf]  ;;  %v239_v9 = vmax.bf16 %v237_v62, %v235_v0  ;;  %v266_v10 = vmax.bf16 %v264_v5, %v261_v2  ;;  %v245_v12 = vsel %vm153_vm0, %v91_v63, 4286644096 }
  0x14   :  { %v272_v13 = vsel %vm153_vm0, %v60_v61, 4286644096  ;;  %v92_v14 = vld [vmem:[%s1400_s0 + $0x14c] sm:$0xf]  ;;  %v123_v16 = vld [vmem:[%s1400_s0 + $0x1c8] sm:$0xf] }
  0x15   :  { %v224_v11 = vmax.bf16 %v222_v60, %v220_v4  ;;  %v108_v15 = vld [vmem:[%s1400_s0 + $0x18c] sm:$0xf]  ;;  %v243_v17 = vmax.bf16 %v241_v1, %v239_v9  ;;  %v270_v18 = vmax.bf16 %v268_v6, %v266_v10  ;;  %v139_v20 = vld [vmem:[%s1400_s0 + $0x208] sm:$0xf]  ;;  %v249_v21 = vsel %vm153_vm0, %v107_v8, 4286644096 }
  0x16   :  { %v276_v22 = vsel %vm153_vm0, %v76_v7, 4286644096  ;;  %v124_v23 = vld [vmem:[%s1400_s0 + $0x1cc] sm:$0xf]  ;;  %v13_v26 = vld [vmem:[%s1400_s0 + $0x10] sm:$0xf] }
  0x17   :  { %v775_v19 = vcombine.low %v189_v3, %v224_v11  ;;  %v247_v24 = vmax.bf16 %v245_v12, %v243_v17  ;;  %v274_v25 = vmax.bf16 %v272_v13, %v270_v18  ;;  %v29_v27 = vld [vmem:[%s1400_s0 + $0x50] sm:$0xf]  ;;  %v140_v29 = vld [vmem:[%s1400_s0 + $0x20c] sm:$0xf]  ;;  %v253_v30 = vsel %vm153_vm0, %v123_v16, 4286644096 }
  0x18   :  { %v45_v28 = vld [vmem:[%s1400_s0 + $0x90] sm:$0xf]  ;;  %v280_v31 = vsel %vm153_vm0, %v92_v14, 4286644096  ;;  %v257_v33 = vsel %vm153_vm0, %v139_v20, 4286644096 }
  0x19   :  { %739 = vst [vmem:[%s1401_s1] sm:$0xff] %v775_v19   ;;  %v251_v32 = vmax.bf16 %v249_v21, %v247_v24  ;;  %v278_v34 = vmax.bf16 %v276_v22, %v274_v25  ;;  %v284_v35 = vsel %vm153_vm0, %v108_v15, 4286644096  ;;  %v61_v36 = vld [vmem:[%s1400_s0 + $0xd0] sm:$0xf]  ;;  %v296_v37 = vsel %vm153_vm0, %v13_v26, 4286644096 }
  0x1a   :  { %v299_v38 = vsel %vm153_vm0, %v29_v27, 4286644096  ;;  %v303_v39 = vsel %vm153_vm0, %v45_v28, 4286644096  ;;  %v14_v42 = vld [vmem:[%s1400_s0 + $0x14] sm:$0xf] }
  0x1b   :  { %v255_v40 = vmax.bf16 %v253_v30, %v251_v32  ;;  %v282_v41 = vmax.bf16 %v280_v31, %v278_v34  ;;  %v30_v43 = vld [vmem:[%s1400_s0 + $0x54] sm:$0xf]  ;;  %v77_v44 = vld [vmem:[%s1400_s0 + $0x110] sm:$0xf]  ;;  %v301_v45 = vmax.bf16 %v299_v38, %v296_v37  ;;  %v288_v46 = vsel %vm153_vm0, %v124_v23, 4286644096 }
  0x1c   :  { %v46_v47 = vld [vmem:[%s1400_s0 + $0x94] sm:$0xf]  ;;  %v307_v48 = vsel %vm153_vm0, %v61_v36, 4286644096  ;;  %v292_v50 = vsel %vm153_vm0, %v140_v29, 4286644096 }
  0x1d   :  { %v286_v49 = vmax.bf16 %v284_v35, %v282_v41  ;;  %v62_v51 = vld [vmem:[%s1400_s0 + $0xd4] sm:$0xf]  ;;  %v93_v52 = vld [vmem:[%s1400_s0 + $0x150] sm:$0xf]  ;;  %v305_v53 = vmax.bf16 %v303_v39, %v301_v45  ;;  %v259_v54 = vmax.bf16 %v257_v33, %v255_v40  ;;  %v311_v55 = vsel %vm153_vm0, %v77_v44, 4286644096 }
  0x1e   :  { %v331_v56 = vsel %vm153_vm0, %v14_v42, 4286644096  ;;  %v334_v57 = vsel %vm153_vm0, %v30_v43, 4286644096  ;;  %v78_v59 = vld [vmem:[%s1400_s0 + $0x114] sm:$0xf] }
  0x1f   :  { %v290_v58 = vmax.bf16 %v288_v46, %v286_v49  ;;  %v109_v60 = vld [vmem:[%s1400_s0 + $0x190] sm:$0xf]  ;;  %v309_v61 = vmax.bf16 %v307_v48, %v305_v53  ;;  %v336_v62 = vmax.bf16 %v334_v57, %v331_v56  ;;  %v338_v63 = vsel %vm153_vm0, %v46_v47, 4286644096  ;;  %v94_v3 = vld [vmem:[%s1400_s0 + $0x154] sm:$0xf] }
  0x20   :  { %v315_v0 = vsel %vm153_vm0, %v93_v52, 4286644096  ;;  %v342_v1 = vsel %vm153_vm0, %v62_v51, 4286644096  ;;  %v110_v4 = vld [vmem:[%s1400_s0 + $0x194] sm:$0xf] }
  0x21   :  { %v294_v2 = vmax.bf16 %v292_v50, %v290_v58  ;;  %v125_v5 = vld [vmem:[%s1400_s0 + $0x1d0] sm:$0xf]  ;;  %v313_v6 = vmax.bf16 %v311_v55, %v309_v61  ;;  %v340_v7 = vmax.bf16 %v338_v63, %v336_v62  ;;  %v319_v9 = vsel %vm153_vm0, %v109_v60, 4286644096  ;;  %v126_v12 = vld [vmem:[%s1400_s0 + $0x1d4] sm:$0xf] }
  0x22   :  { %v141_v8 = vld [vmem:[%s1400_s0 + $0x210] sm:$0xf]  ;;  %v346_v10 = vsel %vm153_vm0, %v78_v59, 4286644096  ;;  %v15_v15 = vld [vmem:[%s1400_s0 + $0x18] sm:$0xf] }
  0x23   :  { %v776_v11 = vcombine.low %v259_v54, %v294_v2  ;;  %v317_v13 = vmax.bf16 %v315_v0, %v313_v6  ;;  %v344_v14 = vmax.bf16 %v342_v1, %v340_v7  ;;  %v31_v16 = vld [vmem:[%s1400_s0 + $0x58] sm:$0xf]  ;;  %v142_v18 = vld [vmem:[%s1400_s0 + $0x214] sm:$0xf]  ;;  %v323_v19 = vsel %vm153_vm0, %v125_v5, 4286644096 }
  0x24   :  { %v47_v17 = vld [vmem:[%s1400_s0 + $0x98] sm:$0xf]  ;;  %v350_v20 = vsel %vm153_vm0, %v94_v3, 4286644096  ;;  %v354_v23 = vsel %vm153_vm0, %v110_v4, 4286644096 }
  0x25   :  { %777 = vst [vmem:[%s1401_s1 + $0x8] sm:$0xff] %v776_v11   ;;  %v321_v21 = vmax.bf16 %v319_v9, %v317_v13  ;;  %v348_v22 = vmax.bf16 %v346_v10, %v344_v14  ;;  %v16_v24 = vld [vmem:[%s1400_s0 + $0x1c] sm:$0xf]  ;;  %v63_v25 = vld [vmem:[%s1400_s0 + $0xd8] sm:$0xf] }
  0x26   :  { %v366_v26 = vsel %vm153_vm0, %v15_v15, 4286644096  ;;  %v369_v27 = vsel %vm153_vm0, %v31_v16, 4286644096  ;;  %v373_v28 = vsel %vm153_vm0, %v47_v17, 4286644096 }
  0x27   :  { %v325_v29 = vmax.bf16 %v323_v19, %v321_v21  ;;  %v327_v30 = vsel %vm153_vm0, %v141_v8, 4286644096  ;;  %v352_v31 = vmax.bf16 %v350_v20, %v348_v22  ;;  %v32_v32 = vld [vmem:[%s1400_s0 + $0x5c] sm:$0xf]  ;;  %v79_v33 = vld [vmem:[%s1400_s0 + $0x118] sm:$0xf]  ;;  %v371_v34 = vmax.bf16 %v369_v27, %v366_v26 }
  0x28   :  { %v358_v35 = vsel %vm153_vm0, %v126_v12, 4286644096  ;;  %v48_v36 = vld [vmem:[%s1400_s0 + $0x9c] sm:$0xf]  ;;  %v377_v37 = vsel %vm153_vm0, %v63_v25, 4286644096 }
  0x29   :  { %v356_v38 = vmax.bf16 %v354_v23, %v352_v31  ;;  %v362_v39 = vsel %vm153_vm0, %v142_v18, 4286644096  ;;  %v64_v40 = vld [vmem:[%s1400_s0 + $0xdc] sm:$0xf]  ;;  %v95_v41 = vld [vmem:[%s1400_s0 + $0x158] sm:$0xf]  ;;  %v375_v42 = vmax.bf16 %v373_v28, %v371_v34  ;;  %v329_v43 = vmax.bf16 %v327_v30, %v325_v29 }
  0x2a   :  { %v381_v44 = vsel %vm153_vm0, %v79_v33, 4286644096  ;;  %v401_v45 = vsel %vm153_vm0, %v16_v24, 4286644096  ;;  %v404_v46 = vsel %vm153_vm0, %v32_v32, 4286644096 }
  0x2b   :  { %v360_v47 = vmax.bf16 %v358_v35, %v356_v38  ;;  %v80_v48 = vld [vmem:[%s1400_s0 + $0x11c] sm:$0xf]  ;;  %v111_v49 = vld [vmem:[%s1400_s0 + $0x198] sm:$0xf]  ;;  %v379_v50 = vmax.bf16 %v377_v37, %v375_v42  ;;  %v406_v51 = vmax.bf16 %v404_v46, %v401_v45  ;;  %v408_v52 = vsel %vm153_vm0, %v48_v36, 4286644096 }
  0x2c   :  { %v385_v53 = vsel %vm153_vm0, %v95_v41, 4286644096  ;;  %v412_v54 = vsel %vm153_vm0, %v64_v40, 4286644096  ;;  %v96_v56 = vld [vmem:[%s1400_s0 + $0x15c] sm:$0xf] }
  0x2d   :  { %v364_v55 = vmax.bf16 %v362_v39, %v360_v47  ;;  %v112_v57 = vld [vmem:[%s1400_s0 + $0x19c] sm:$0xf]  ;;  %v127_v58 = vld [vmem:[%s1400_s0 + $0x1d8] sm:$0xf]  ;;  %v383_v59 = vmax.bf16 %v381_v44, %v379_v50  ;;  %v410_v60 = vmax.bf16 %v408_v52, %v406_v51  ;;  %v389_v62 = vsel %vm153_vm0, %v111_v49, 4286644096 }
  0x2e   :  { %v143_v61 = vld [vmem:[%s1400_s0 + $0x218] sm:$0xf]  ;;  %v416_v63 = vsel %vm153_vm0, %v80_v48, 4286644096  ;;  %v128_v1 = vld [vmem:[%s1400_s0 + $0x1dc] sm:$0xf] }
  0x2f   :  { %v778_v0 = vcombine.low %v329_v43, %v364_v55  ;;  %v387_v2 = vmax.bf16 %v385_v53, %v383_v59  ;;  %v414_v3 = vmax.bf16 %v412_v54, %v410_v60  ;;  %v17_v4 = vld [vmem:[%s1400_s0 + $0x20] sm:$0xf]  ;;  %v144_v7 = vld [vmem:[%s1400_s0 + $0x21c] sm:$0xf]  ;;  %v393_v8 = vsel %vm153_vm0, %v127_v58, 4286644096 }
  0x30   :  { %v33_v5 = vld [vmem:[%s1400_s0 + $0x60] sm:$0xf]  ;;  %v420_v9 = vsel %vm153_vm0, %v96_v56, 4286644096  ;;  %v424_v12 = vsel %vm153_vm0, %v112_v57, 4286644096 }
  0x31   :  { %v49_v6 = vld [vmem:[%s1400_s0 + $0xa0] sm:$0xf]  ;;  %779 = vst [vmem:[%s1401_s1 + $0x10] sm:$0xff] %v778_v0   ;;  %v391_v10 = vmax.bf16 %v389_v62, %v387_v2  ;;  %v418_v11 = vmax.bf16 %v416_v63, %v414_v3  ;;  %v18_v13 = vld [vmem:[%s1400_s0 + $0x24] sm:$0xf] }
  0x32   :  { %v65_v14 = vld [vmem:[%s1400_s0 + $0xe0] sm:$0xf]  ;;  %v436_v15 = vsel %vm153_vm0, %v17_v4, 4286644096  ;;  %v439_v16 = vsel %vm153_vm0, %v33_v5, 4286644096 }
  0x33   :  { %v443_v17 = vsel %vm153_vm0, %v49_v6, 4286644096  ;;  %v395_v18 = vmax.bf16 %v393_v8, %v391_v10  ;;  %v397_v19 = vsel %vm153_vm0, %v143_v61, 4286644096  ;;  %v422_v20 = vmax.bf16 %v420_v9, %v418_v11  ;;  %v34_v21 = vld [vmem:[%s1400_s0 + $0x64] sm:$0xf] }
  0x34   :  { %v81_v22 = vld [vmem:[%s1400_s0 + $0x120] sm:$0xf]  ;;  %v441_v23 = vmax.bf16 %v439_v16, %v436_v15  ;;  %v428_v24 = vsel %vm153_vm0, %v128_v1, 4286644096  ;;  %v50_v25 = vld [vmem:[%s1400_s0 + $0xa4] sm:$0xf] }
  0x35   :  { %v447_v26 = vsel %vm153_vm0, %v65_v14, 4286644096  ;;  %v426_v27 = vmax.bf16 %v424_v12, %v422_v20  ;;  %v432_v28 = vsel %vm153_vm0, %v144_v7, 4286644096  ;;  %v66_v29 = vld [vmem:[%s1400_s0 + $0xe4] sm:$0xf]  ;;  %v399_v32 = vmax.bf16 %v397_v19, %v395_v18 }
  0x36   :  { %v97_v30 = vld [vmem:[%s1400_s0 + $0x160] sm:$0xf]  ;;  %v445_v31 = vmax.bf16 %v443_v17, %v441_v23  ;;  %v451_v33 = vsel %vm153_vm0, %v81_v22, 4286644096  ;;  %v471_v34 = vsel %vm153_vm0, %v18_v13, 4286644096 }
  0x37   :  { %v474_v35 = vsel %vm153_vm0, %v34_v21, 4286644096  ;;  %v430_v36 = vmax.bf16 %v428_v24, %v426_v27  ;;  %v82_v37 = vld [vmem:[%s1400_s0 + $0x124] sm:$0xf]  ;;  %v113_v38 = vld [vmem:[%s1400_s0 + $0x1a0] sm:$0xf] }
  0x38   :  { %v449_v39 = vmax.bf16 %v447_v26, %v445_v31  ;;  %v476_v40 = vmax.bf16 %v474_v35, %v471_v34  ;;  %v478_v41 = vsel %vm153_vm0, %v50_v25, 4286644096  ;;  %v455_v42 = vsel %vm153_vm0, %v97_v30, 4286644096  ;;  %v98_v45 = vld [vmem:[%s1400_s0 + $0x164] sm:$0xf] }
  0x39   :  { %v482_v43 = vsel %vm153_vm0, %v66_v29, 4286644096  ;;  %v434_v44 = vmax.bf16 %v432_v28, %v430_v36  ;;  %v114_v46 = vld [vmem:[%s1400_s0 + $0x1a4] sm:$0xf]  ;;  %v129_v47 = vld [vmem:[%s1400_s0 + $0x1e0] sm:$0xf] }
  0x3a   :  { %v453_v48 = vmax.bf16 %v451_v33, %v449_v39  ;;  %v480_v49 = vmax.bf16 %v478_v41, %v476_v40  ;;  %v145_v50 = vld [vmem:[%s1400_s0 + $0x220] sm:$0xf]  ;;  %v459_v51 = vsel %vm153_vm0, %v113_v38, 4286644096  ;;  %v486_v52 = vsel %vm153_vm0, %v82_v37, 4286644096 }
  0x3b   :  { %v780_v53 = vcombine.low %v399_v32, %v434_v44  ;;  %v130_v54 = vld [vmem:[%s1400_s0 + $0x1e4] sm:$0xf]  ;;  %v19_v57 = vld [vmem:[%s1400_s0 + $0x28] sm:$0xf]  ;;  %v463_v61 = vsel %vm153_vm0, %v129_v47, 4286644096 }
  0x3c   :  { %v457_v55 = vmax.bf16 %v455_v42, %v453_v48  ;;  %v484_v56 = vmax.bf16 %v482_v43, %v480_v49  ;;  %v35_v58 = vld [vmem:[%s1400_s0 + $0x68] sm:$0xf]  ;;  %v146_v60 = vld [vmem:[%s1400_s0 + $0x224] sm:$0xf]  ;;  %v490_v62 = vsel %vm153_vm0, %v98_v45, 4286644096 }
  0x3d   :  { %v51_v59 = vld [vmem:[%s1400_s0 + $0xa8] sm:$0xf]  ;;  %781 = vst [vmem:[%s1401_s1 + $0x18] sm:$0xff] %v780_v53   ;;  %v494_v1 = vsel %vm153_vm0, %v114_v46, 4286644096 }
  0x3e   :  { %v461_v63 = vmax.bf16 %v459_v51, %v457_v55  ;;  %v488_v0 = vmax.bf16 %v486_v52, %v484_v56  ;;  %v20_v2 = vld [vmem:[%s1400_s0 + $0x2c] sm:$0xf]  ;;  %v67_v3 = vld [vmem:[%s1400_s0 + $0xe8] sm:$0xf]  ;;  %v506_v4 = vsel %vm153_vm0, %v19_v57, 4286644096 }
  0x3f   :  { %v509_v5 = vsel %vm153_vm0, %v35_v58, 4286644096  ;;  %v513_v6 = vsel %vm153_vm0, %v51_v59, 4286644096  ;;  %v467_v8 = vsel %vm153_vm0, %v145_v50, 4286644096 }
  0x40   :  { %v465_v7 = vmax.bf16 %v463_v61, %v461_v63  ;;  %v492_v9 = vmax.bf16 %v490_v62, %v488_v0  ;;  %v36_v10 = vld [vmem:[%s1400_s0 + $0x6c] sm:$0xf]  ;;  %v83_v11 = vld [vmem:[%s1400_s0 + $0x128] sm:$0xf]  ;;  %v511_v12 = vmax.bf16 %v509_v5, %v506_v4  ;;  %v498_v13 = vsel %vm153_vm0, %v130_v54, 4286644096 }
  0x41   :  { %v52_v14 = vld [vmem:[%s1400_s0 + $0xac] sm:$0xf]  ;;  %v517_v15 = vsel %vm153_vm0, %v67_v3, 4286644096  ;;  %v502_v17 = vsel %vm153_vm0, %v146_v60, 4286644096 }
  0x42   :  { %v496_v16 = vmax.bf16 %v494_v1, %v492_v9  ;;  %v68_v18 = vld [vmem:[%s1400_s0 + $0xec] sm:$0xf]  ;;  %v99_v19 = vld [vmem:[%s1400_s0 + $0x168] sm:$0xf]  ;;  %v515_v20 = vmax.bf16 %v513_v6, %v511_v12  ;;  %v469_v21 = vmax.bf16 %v467_v8, %v465_v7  ;;  %v521_v22 = vsel %vm153_vm0, %v83_v11, 4286644096 }
  0x43   :  { %v541_v23 = vsel %vm153_vm0, %v20_v2, 4286644096  ;;  %v544_v24 = vsel %vm153_vm0, %v36_v10, 4286644096  ;;  %v84_v26 = vld [vmem:[%s1400_s0 + $0x12c] sm:$0xf] }
  0x44   :  { %v500_v25 = vmax.bf16 %v498_v13, %v496_v16  ;;  %v115_v27 = vld [vmem:[%s1400_s0 + $0x1a8] sm:$0xf]  ;;  %v519_v28 = vmax.bf16 %v517_v15, %v515_v20  ;;  %v546_v29 = vmax.bf16 %v544_v24, %v541_v23  ;;  %v548_v30 = vsel %vm153_vm0, %v52_v14, 4286644096  ;;  %v100_v34 = vld [vmem:[%s1400_s0 + $0x16c] sm:$0xf] }
  0x45   :  { %v525_v31 = vsel %vm153_vm0, %v99_v19, 4286644096  ;;  %v552_v32 = vsel %vm153_vm0, %v68_v18, 4286644096  ;;  %v116_v35 = vld [vmem:[%s1400_s0 + $0x1ac] sm:$0xf] }
  0x46   :  { %v504_v33 = vmax.bf16 %v502_v17, %v500_v25  ;;  %v131_v36 = vld [vmem:[%s1400_s0 + $0x1e8] sm:$0xf]  ;;  %v523_v37 = vmax.bf16 %v521_v22, %v519_v28  ;;  %v550_v38 = vmax.bf16 %v548_v30, %v546_v29  ;;  %v529_v40 = vsel %vm153_vm0, %v115_v27, 4286644096  ;;  %v132_v43 = vld [vmem:[%s1400_s0 + $0x1ec] sm:$0xf] }
  0x47   :  { %v147_v39 = vld [vmem:[%s1400_s0 + $0x228] sm:$0xf]  ;;  %v556_v41 = vsel %vm153_vm0, %v84_v26, 4286644096  ;;  %v21_v46 = vld [vmem:[%s1400_s0 + $0x30] sm:$0xf] }
  0x48   :  { %v782_v42 = vcombine.low %v469_v21, %v504_v33  ;;  %v527_v44 = vmax.bf16 %v525_v31, %v523_v37  ;;  %v554_v45 = vmax.bf16 %v552_v32, %v550_v38  ;;  %v37_v47 = vld [vmem:[%s1400_s0 + $0x70] sm:$0xf]  ;;  %v148_v49 = vld [vmem:[%s1400_s0 + $0x22c] sm:$0xf]  ;;  %v533_v50 = vsel %vm153_vm0, %v131_v36, 4286644096 }
  0x49   :  { %v53_v48 = vld [vmem:[%s1400_s0 + $0xb0] sm:$0xf]  ;;  %v560_v51 = vsel %vm153_vm0, %v100_v34, 4286644096  ;;  %v564_v54 = vsel %vm153_vm0, %v116_v35, 4286644096 }
  0x4a   :  { %783 = vst [vmem:[%s1401_s1 + $0x20] sm:$0xff] %v782_v42   ;;  %v531_v52 = vmax.bf16 %v529_v40, %v527_v44  ;;  %v558_v53 = vmax.bf16 %v556_v41, %v554_v45  ;;  %v22_v55 = vld [vmem:[%s1400_s0 + $0x34] sm:$0xf]  ;;  %v69_v56 = vld [vmem:[%s1400_s0 + $0xf0] sm:$0xf] }
  0x4b   :  { %v576_v57 = vsel %vm153_vm0, %v21_v46, 4286644096  ;;  %v579_v58 = vsel %vm153_vm0, %v37_v47, 4286644096  ;;  %v583_v59 = vsel %vm153_vm0, %v53_v48, 4286644096 }
  0x4c   :  { %v535_v60 = vmax.bf16 %v533_v50, %v531_v52  ;;  %v537_v61 = vsel %vm153_vm0, %v147_v39, 4286644096  ;;  %v562_v62 = vmax.bf16 %v560_v51, %v558_v53  ;;  %v38_v63 = vld [vmem:[%s1400_s0 + $0x74] sm:$0xf]  ;;  %v85_v0 = vld [vmem:[%s1400_s0 + $0x130] sm:$0xf]  ;;  %v581_v1 = vmax.bf16 %v579_v58, %v576_v57 }
  0x4d   :  { %v568_v2 = vsel %vm153_vm0, %v132_v43, 4286644096  ;;  %v54_v3 = vld [vmem:[%s1400_s0 + $0xb4] sm:$0xf]  ;;  %v587_v4 = vsel %vm153_vm0, %v69_v56, 4286644096 }
  0x4e   :  { %v566_v5 = vmax.bf16 %v564_v54, %v562_v62  ;;  %v572_v6 = vsel %vm153_vm0, %v148_v49, 4286644096  ;;  %v70_v7 = vld [vmem:[%s1400_s0 + $0xf4] sm:$0xf]  ;;  %v101_v8 = vld [vmem:[%s1400_s0 + $0x170] sm:$0xf]  ;;  %v585_v9 = vmax.bf16 %v583_v59, %v581_v1  ;;  %v539_v10 = vmax.bf16 %v537_v61, %v535_v60 }
  0x4f   :  { %v591_v11 = vsel %vm153_vm0, %v85_v0, 4286644096  ;;  %v611_v12 = vsel %vm153_vm0, %v22_v55, 4286644096  ;;  %v614_v13 = vsel %vm153_vm0, %v38_v63, 4286644096 }
  0x50   :  { %v570_v14 = vmax.bf16 %v568_v2, %v566_v5  ;;  %v86_v15 = vld [vmem:[%s1400_s0 + $0x134] sm:$0xf]  ;;  %v117_v16 = vld [vmem:[%s1400_s0 + $0x1b0] sm:$0xf]  ;;  %v589_v17 = vmax.bf16 %v587_v4, %v585_v9  ;;  %v616_v18 = vmax.bf16 %v614_v13, %v611_v12  ;;  %v618_v19 = vsel %vm153_vm0, %v54_v3, 4286644096 }
  0x51   :  { %v595_v20 = vsel %vm153_vm0, %v101_v8, 4286644096  ;;  %v622_v21 = vsel %vm153_vm0, %v70_v7, 4286644096  ;;  %v102_v23 = vld [vmem:[%s1400_s0 + $0x174] sm:$0xf] }
  0x52   :  { %v574_v22 = vmax.bf16 %v572_v6, %v570_v14  ;;  %v118_v24 = vld [vmem:[%s1400_s0 + $0x1b4] sm:$0xf]  ;;  %v133_v25 = vld [vmem:[%s1400_s0 + $0x1f0] sm:$0xf]  ;;  %v593_v26 = vmax.bf16 %v591_v11, %v589_v17  ;;  %v620_v27 = vmax.bf16 %v618_v19, %v616_v18  ;;  %v599_v29 = vsel %vm153_vm0, %v117_v16, 4286644096 }
  0x53   :  { %v149_v28 = vld [vmem:[%s1400_s0 + $0x230] sm:$0xf]  ;;  %v626_v30 = vsel %vm153_vm0, %v86_v15, 4286644096  ;;  %v134_v32 = vld [vmem:[%s1400_s0 + $0x1f4] sm:$0xf] }
  0x54   :  { %v784_v31 = vcombine.low %v539_v10, %v574_v22  ;;  %v597_v33 = vmax.bf16 %v595_v20, %v593_v26  ;;  %v624_v34 = vmax.bf16 %v622_v21, %v620_v27  ;;  %v23_v35 = vld [vmem:[%s1400_s0 + $0x38] sm:$0xf]  ;;  %v150_v38 = vld [vmem:[%s1400_s0 + $0x234] sm:$0xf]  ;;  %v603_v39 = vsel %vm153_vm0, %v133_v25, 4286644096 }
  0x55   :  { %v39_v36 = vld [vmem:[%s1400_s0 + $0x78] sm:$0xf]  ;;  %v630_v40 = vsel %vm153_vm0, %v102_v23, 4286644096  ;;  %v634_v43 = vsel %vm153_vm0, %v118_v24, 4286644096 }
  0x56   :  { %v55_v37 = vld [vmem:[%s1400_s0 + $0xb8] sm:$0xf]  ;;  %785 = vst [vmem:[%s1401_s1 + $0x28] sm:$0xff] %v784_v31   ;;  %v601_v41 = vmax.bf16 %v599_v29, %v597_v33  ;;  %v628_v42 = vmax.bf16 %v626_v30, %v624_v34  ;;  %v24_v44 = vld [vmem:[%s1400_s0 + $0x3c] sm:$0xf] }
  0x57   :  { %v71_v45 = vld [vmem:[%s1400_s0 + $0xf8] sm:$0xf]  ;;  %v646_v46 = vsel %vm153_vm0, %v23_v35, 4286644096  ;;  %v649_v47 = vsel %vm153_vm0, %v39_v36, 4286644096 }
  0x58   :  { %v653_v48 = vsel %vm153_vm0, %v55_v37, 4286644096  ;;  %v605_v49 = vmax.bf16 %v603_v39, %v601_v41  ;;  %v607_v50 = vsel %vm153_vm0, %v149_v28, 4286644096  ;;  %v632_v51 = vmax.bf16 %v630_v40, %v628_v42  ;;  %v40_v52 = vld [vmem:[%s1400_s0 + $0x7c] sm:$0xf] }
  0x59   :  { %v87_v53 = vld [vmem:[%s1400_s0 + $0x138] sm:$0xf]  ;;  %v651_v54 = vmax.bf16 %v649_v47, %v646_v46  ;;  %v638_v55 = vsel %vm153_vm0, %v134_v32, 4286644096  ;;  %v56_v56 = vld [vmem:[%s1400_s0 + $0xbc] sm:$0xf] }
  0x5a   :  { %v657_v57 = vsel %vm153_vm0, %v71_v45, 4286644096  ;;  %v636_v58 = vmax.bf16 %v634_v43, %v632_v51  ;;  %v642_v59 = vsel %vm153_vm0, %v150_v38, 4286644096  ;;  %v72_v60 = vld [vmem:[%s1400_s0 + $0xfc] sm:$0xf]  ;;  %v609_v63 = vmax.bf16 %v607_v50, %v605_v49 }
  0x5b   :  { %v103_v61 = vld [vmem:[%s1400_s0 + $0x178] sm:$0xf]  ;;  %v655_v62 = vmax.bf16 %v653_v48, %v651_v54  ;;  %v661_v0 = vsel %vm153_vm0, %v87_v53, 4286644096  ;;  %v681_v1 = vsel %vm153_vm0, %v24_v44, 4286644096 }
  0x5c   :  { %v684_v2 = vsel %vm153_vm0, %v40_v52, 4286644096  ;;  %v640_v3 = vmax.bf16 %v638_v55, %v636_v58  ;;  %v88_v4 = vld [vmem:[%s1400_s0 + $0x13c] sm:$0xf]  ;;  %v119_v5 = vld [vmem:[%s1400_s0 + $0x1b8] sm:$0xf] }
  0x5d   :  { %v659_v6 = vmax.bf16 %v657_v57, %v655_v62  ;;  %v686_v7 = vmax.bf16 %v684_v2, %v681_v1  ;;  %v688_v8 = vsel %vm153_vm0, %v56_v56, 4286644096  ;;  %v665_v9 = vsel %vm153_vm0, %v103_v61, 4286644096  ;;  %v104_v12 = vld [vmem:[%s1400_s0 + $0x17c] sm:$0xf] }
  0x5e   :  { %v692_v10 = vsel %vm153_vm0, %v72_v60, 4286644096  ;;  %v644_v11 = vmax.bf16 %v642_v59, %v640_v3  ;;  %v135_v13 = vld [vmem:[%s1400_s0 + $0x1f8] sm:$0xf]  ;;  %v669_v16 = vsel %vm153_vm0, %v119_v5, 4286644096 }
  0x5f   :  { %v663_v14 = vmax.bf16 %v661_v0, %v659_v6  ;;  %v690_v15 = vmax.bf16 %v688_v8, %v686_v7  ;;  %v696_v17 = vsel %vm153_vm0, %v88_v4, 4286644096  ;;  %v120_v19 = vld [vmem:[%s1400_s0 + $0x1bc] sm:$0xf]  ;;  %v673_v22 = vsel %vm153_vm0, %v135_v13, 4286644096 }
  0x60   :  { %v786_v18 = vcombine.low %v609_v63, %v644_v11  ;;  %v700_v23 = vsel %vm153_vm0, %v104_v12, 4286644096  ;;  %v136_v24 = vld [vmem:[%s1400_s0 + $0x1fc] sm:$0xf]  ;;  %v151_v25 = vld [vmem:[%s1400_s0 + $0x238] sm:$0xf] }
  0x61   :  { %v667_v20 = vmax.bf16 %v665_v9, %v663_v14  ;;  %v694_v21 = vmax.bf16 %v692_v10, %v690_v15  ;;  %v704_v28 = vsel %vm153_vm0, %v120_v19, 4286644096  ;;  %v152_v29 = vld [vmem:[%s1400_s0 + $0x23c] sm:$0xf]  ;;  %v677_v32 = vsel %vm153_vm0, %v151_v25, 4286644096 }
  0x62   :  { %787 = vst [vmem:[%s1401_s1 + $0x30] sm:$0xff] %v786_v18   ;;  %v708_v33 = vsel %vm153_vm0, %v136_v24, 4286644096  ;;  %v712_v35 = vsel %vm153_vm0, %v152_v29, 4286644096 }
  0x63   :  { %v671_v26 = vmax.bf16 %v669_v16, %v667_v20  ;;  %v698_v27 = vmax.bf16 %v696_v17, %v694_v21 }
  0x65   :  { %v675_v30 = vmax.bf16 %v673_v22, %v671_v26  ;;  %v702_v31 = vmax.bf16 %v700_v23, %v698_v27 }
  0x67   :  { %v706_v34 = vmax.bf16 %v704_v28, %v702_v31  ;;  %v679_v36 = vmax.bf16 %v677_v32, %v675_v30 }
  0x69   :  { %v710_v37 = vmax.bf16 %v708_v33, %v706_v34 }
  0x6b   :  { %v714_v38 = vmax.bf16 %v712_v35, %v710_v37 }
  0x6d   :  { %v788_v39 = vcombine.low %v679_v36, %v714_v38 }
  0x6f   :  { %789 = vst [vmem:[%s1401_s1 + $0x38] sm:$0xff] %v788_v39  }

// kernel: resnet18_baseline_forward.27
= control target key start
LH: loop header
LB: loop body
LE: loop exit
PB: predicated region body
PF: predicated region fallthrough
CT: control target
= control target key end

     0   :  { %s1934_s1 = inlined_call_operand.vmem [shape: bf16[640,128], index: 1, kind: input, shape index: {}]   ;;  %s1935_s0 = inlined_call_operand.vmem [shape: bf16[128,640], index: 0, kind: input, shape index: {}]   ;;  %s1936_s2 = inlined_call_operand.vmem [shape: f32[1,128], index: 2, kind: input, shape index: {}]   ;;  %s1937_s3 = inlined_call_operand.vmem [shape: f32[1,128], index: 3, kind: input, shape index: {}]   ;;  %s1938_s4 = inlined_call_operand.vmem [shape: bf16[128,128], index: 4, kind: output, shape index: {}]  }
   0x1   :  { %v1471_v0 = vld [vmem:[%s1934_s1 + $0x40] sm:$0xff]   ;;  %v1475_v4 = vld [vmem:[%s1934_s1 + $0x48] sm:$0xff]   ;;  %v1479_v8 = vld [vmem:[%s1934_s1 + $0x50] sm:$0xff]  }
   0x2   :  { %v1472_v1 = vld [vmem:[%s1934_s1 + $0xc0] sm:$0xff]   ;;  %1279 = vmatprep.subr.bf16.mxu0 %v1471_v0  ;;  %v1476_v5 = vld [vmem:[%s1934_s1 + $0xc8] sm:$0xff]   ;;  %v1480_v9 = vld [vmem:[%s1934_s1 + $0xd0] sm:$0xff]  }
   0x3   :  { %v1473_v2 = vld [vmem:[%s1934_s1] sm:$0xff]   ;;  %1343 = vmatprep.subr.bf16.mxu1 %v1472_v1  ;;  %v1477_v6 = vld [vmem:[%s1934_s1 + $0x8] sm:$0xff]   ;;  %v1481_v10 = vld [vmem:[%s1934_s1 + $0x10] sm:$0xff]  }
   0x4   :  { %v1474_v3 = vld [vmem:[%s1934_s1 + $0x80] sm:$0xff]   ;;  %1280 = vmatpush3.bf16.msra.mxu0 %v1473_v2  ;;  %v1478_v7 = vld [vmem:[%s1934_s1 + $0x88] sm:$0xff]   ;;  %v1482_v11 = vld [vmem:[%s1934_s1 + $0x90] sm:$0xff]  }
   0x5   :  { %1344 = vmatpush3.bf16.msra.mxu1 %v1474_v3  ;;  %1281 = vmatprep.subr.bf16.mxu0 %v1475_v4  ;;  %v1483_v12 = vld [vmem:[%s1934_s1 + $0x58] sm:$0xff]   ;;  %v1487_v16 = vld [vmem:[%s1934_s1 + $0x60] sm:$0xff]   ;;  %v1491_v20 = vld [vmem:[%s1934_s1 + $0x68] sm:$0xff]  }
   0x6   :  { %1345 = vmatprep.subr.bf16.mxu1 %v1476_v5  ;;  %v1484_v13 = vld [vmem:[%s1934_s1 + $0xd8] sm:$0xff]   ;;  %v1488_v17 = vld [vmem:[%s1934_s1 + $0xe0] sm:$0xff]   ;;  %v1492_v21 = vld [vmem:[%s1934_s1 + $0xe8] sm:$0xff]  }
   0x7   :  { %v1485_v14 = vld [vmem:[%s1934_s1 + $0x18] sm:$0xff]   ;;  %v1489_v18 = vld [vmem:[%s1934_s1 + $0x20] sm:$0xff]   ;;  %v1493_v22 = vld [vmem:[%s1934_s1 + $0x28] sm:$0xff]  }
   0x8   :  { %1282 = vmatpush3.bf16.msra.mxu0 %v1477_v6  ;;  %v1486_v15 = vld [vmem:[%s1934_s1 + $0x98] sm:$0xff]   ;;  %v1490_v19 = vld [vmem:[%s1934_s1 + $0xa0] sm:$0xff]   ;;  %v1494_v23 = vld [vmem:[%s1934_s1 + $0xa8] sm:$0xff]  }
   0x9   :  { %1346 = vmatpush3.bf16.msra.mxu1 %v1478_v7  ;;  %1283 = vmatprep.subr.bf16.mxu0 %v1479_v8  ;;  %v1495_v24 = vld [vmem:[%s1934_s1 + $0x70] sm:$0xff]   ;;  %v1499_v28 = vld [vmem:[%s1934_s1 + $0x78] sm:$0xff]   ;;  %v1508_v35 = vld [vmem:[%s1935_s0 + $0xc] ss:$20 sps:$4 sm:$0xff]  }
   0xa   :  { %1347 = vmatprep.subr.bf16.mxu1 %v1480_v9  ;;  %v1496_v25 = vld [vmem:[%s1934_s1 + $0xf0] sm:$0xff]   ;;  %v1500_v29 = vld [vmem:[%s1934_s1 + $0xf8] sm:$0xff]   ;;  %v1509_v36 = vld [vmem:[%s1934_s1 + $0x100] sm:$0xff]   ;;  %759 = vmatprep.mubr.bf16.mxu1 %v1508_v35 }
   0xb   :  { %v1497_v26 = vld [vmem:[%s1934_s1 + $0x30] sm:$0xff]   ;;  %v1501_v30 = vld [vmem:[%s1934_s1 + $0x38] sm:$0xff]   ;;  %v1510_v37 = vld [vmem:[%s1935_s0 + $0x2c] ss:$20 sps:$4 sm:$0xff]  }
   0xc   :  { %1284 = vmatpush3.bf16.msra.mxu0 %v1481_v10  ;;  %v1498_v27 = vld [vmem:[%s1934_s1 + $0xb0] sm:$0xff]   ;;  %v1502_v31 = vld [vmem:[%s1934_s1 + $0xb8] sm:$0xff]   ;;  %v1516_v39 = vld [vmem:[%s1934_s1 + $0x108] sm:$0xff]  }
   0xd   :  { %1348 = vmatpush3.bf16.msra.mxu1 %v1482_v11  ;;  %1285 = vmatprep.subr.bf16.mxu0 %v1483_v12  ;;  %v1503_v32 = vld [vmem:[%s1935_s0] ss:$20 sps:$4 sm:$0xff]   ;;  %v1505_v33 = vld [vmem:[%s1935_s0 + $0x4] ss:$20 sps:$4 sm:$0xff]   ;;  %v1506_v34 = vld [vmem:[%s1935_s0 + $0x8] ss:$20 sps:$4 sm:$0xff]  }
   0xe   :  { %1349 = vmatprep.subr.bf16.mxu1 %v1484_v13  ;;  %662 = vmatprep.mubr.bf16.mxu0 %v1505_v33  ;;  %v1512_v38 = vld [vmem:[%s1935_s0 + $0x34] ss:$20 sps:$4 sm:$0xff]   ;;  %v1515_v41 = vld [vmem:[%s1935_s0 + $0x30] ss:$20 sps:$4 sm:$0xff]   ;;  %v1530_v45 = vld [vmem:[%s1934_s1 + $0x118] sm:$0xff]  }
   0xf   :  { %v1514_v40 = vld [vmem:[%s1935_s0 + $0x28] ss:$20 sps:$4 sm:$0xff]   ;;  %v1523_v44 = vld [vmem:[%s1934_s1 + $0x110] sm:$0xff]   ;;  %v1522_v47 = vld [vmem:[%s1935_s0 + $0x58] ss:$20 sps:$4 sm:$0xff]  }
  0x10   :  { %1286 = vmatpush3.bf16.msra.mxu0 %v1485_v14  ;;  %v1517_v42 = vld [vmem:[%s1935_s0 + $0x54] ss:$20 sps:$4 sm:$0xff]   ;;  %v1519_v43 = vld [vmem:[%s1935_s0 + $0x5c] ss:$20 sps:$4 sm:$0xff]   ;;  %v1526_v49 = vld [vmem:[%s1935_s0 + $0x84] ss:$20 sps:$4 sm:$0xff]  }
  0x11   :  { %1350 = vmatpush3.bf16.msra.mxu1 %v1486_v15  ;;  %1287 = vmatprep.subr.bf16.mxu0 %v1487_v16  ;;  %v1521_v46 = vld [vmem:[%s1935_s0 + $0x50] ss:$20 sps:$4 sm:$0xff]   ;;  %v1544_v51 = vld [vmem:[%s1934_s1 + $0x128] sm:$0xff]   ;;  %v1529_v53 = vld [vmem:[%s1935_s0 + $0x80] ss:$20 sps:$4 sm:$0xff]  }
  0x12   :  { %1351 = vmatprep.subr.bf16.mxu1 %v1488_v17  ;;  %v1524_v48 = vld [vmem:[%s1935_s0 + $0x7c] ss:$20 sps:$4 sm:$0xff]   ;;  %v1537_v50 = vld [vmem:[%s1934_s1 + $0x120] sm:$0xff]   ;;  %v1528_v52 = vld [vmem:[%s1935_s0 + $0x78] ss:$20 sps:$4 sm:$0xff]  }
  0x13   :  { %v1531_v54 = vld [vmem:[%s1935_s0 + $0xa4] ss:$20 sps:$4 sm:$0xff]   ;;  %v1551_v55 = vld [vmem:[%s1934_s1 + $0x130] sm:$0xff]   ;;  %v1533_v56 = vld [vmem:[%s1935_s0 + $0xac] ss:$20 sps:$4 sm:$0xff]  }
  0x14   :  { %1288 = vmatpush3.bf16.msra.mxu0 %v1489_v18  ;;  %v1558_v57 = vld [vmem:[%s1934_s1 + $0x138] sm:$0xff]   ;;  %v1535_v58 = vld [vmem:[%s1935_s0 + $0xa0] ss:$20 sps:$4 sm:$0xff]   ;;  %v1543_v63 = vld [vmem:[%s1935_s0 + $0xd0] ss:$20 sps:$4 sm:$0xff]  }
  0x15   :  { %1352 = vmatpush3.bf16.msra.mxu1 %v1490_v19  ;;  %1289 = vmatprep.subr.bf16.mxu0 %v1491_v20  ;;  %v1536_v59 = vld [vmem:[%s1935_s0 + $0xa8] ss:$20 sps:$4 sm:$0xff]   ;;  %v1538_v60 = vld [vmem:[%s1935_s0 + $0xcc] ss:$20 sps:$4 sm:$0xff]   ;;  %v1549_v2 = vld [vmem:[%s1935_s0 + $0xf0] ss:$20 sps:$4 sm:$0xff]  }
  0x16   :  { %1353 = vmatprep.subr.bf16.mxu1 %v1492_v21  ;;  %v1540_v61 = vld [vmem:[%s1935_s0 + $0xd4] ss:$20 sps:$4 sm:$0xff]   ;;  %v1547_v1 = vld [vmem:[%s1935_s0 + $0xfc] ss:$20 sps:$4 sm:$0xff]   ;;  %v1550_v3 = vld [vmem:[%s1935_s0 + $0xf8] ss:$20 sps:$4 sm:$0xff]  }
  0x17   :  { %v1542_v62 = vld [vmem:[%s1935_s0 + $0xc8] ss:$20 sps:$4 sm:$0xff]   ;;  %v1554_v5 = vld [vmem:[%s1935_s0 + $0x124] ss:$20 sps:$4 sm:$0xff]   ;;  %v1557_v7 = vld [vmem:[%s1935_s0 + $0x120] ss:$20 sps:$4 sm:$0xff]  }
  0x18   :  { %1290 = vmatpush3.bf16.msra.mxu0 %v1493_v22  ;;  %v1545_v0 = vld [vmem:[%s1935_s0 + $0xf4] ss:$20 sps:$4 sm:$0xff]   ;;  %v1552_v4 = vld [vmem:[%s1935_s0 + $0x11c] ss:$20 sps:$4 sm:$0xff]   ;;  %v1556_v6 = vld [vmem:[%s1935_s0 + $0x118] ss:$20 sps:$4 sm:$0xff]  }
  0x19   :  { %1354 = vmatpush3.bf16.msra.mxu1 %v1494_v23  ;;  %1291 = vmatprep.subr.bf16.mxu0 %v1495_v24  ;;  %v1559_v8 = vld [vmem:[%s1935_s0 + $0x10] ss:$20 sps:$4 sm:$0xff]   ;;  %v1561_v10 = vld [vmem:[%s1935_s0 + $0x38] ss:$20 sps:$4 sm:$0xff]   ;;  %v1563_v12 = vld [vmem:[%s1935_s0 + $0x60] ss:$20 sps:$4 sm:$0xff]  }
  0x1a   :  { %1355 = vmatprep.subr.bf16.mxu1 %v1496_v25  ;;  %v1560_v9 = vld [vmem:[%s1935_s0 + $0xb0] ss:$20 sps:$4 sm:$0xff]   ;;  %v1562_v11 = vld [vmem:[%s1935_s0 + $0xd8] ss:$20 sps:$4 sm:$0xff]   ;;  %v1564_v13 = vld [vmem:[%s1935_s0 + $0x100] ss:$20 sps:$4 sm:$0xff]  }
  0x1b   :  { %v1565_v14 = vld [vmem:[%s1935_s0 + $0x88] ss:$20 sps:$4 sm:$0xff]  }
  0x1c   :  { %1292 = vmatpush3.bf16.msra.mxu0 %v1497_v26  ;;  %v1566_v15 = vld [vmem:[%s1935_s0 + $0x128] ss:$20 sps:$4 sm:$0xff]  }
  0x1d   :  { %1356 = vmatpush3.bf16.msra.mxu1 %v1498_v27  ;;  %1293 = vmatprep.subr.bf16.mxu0 %v1499_v28 }
  0x1e   :  { %1357 = vmatprep.subr.bf16.mxu1 %v1500_v29 }
  0x20   :  { %1294 = vmatpush3.bf16.msra.mxu0 %v1501_v30 }
  0x21   :  { %1358 = vmatpush3.bf16.msra.mxu1 %v1502_v31  ;;  %1423 = vmatprep.subr.bf16.mxu0 %v1509_v36 }
  0x22   :  { %1455 = vmatprep.subr.bf16.mxu1 %v1509_v36 }
  0x23   :  { %663 = vmatmul.mubr.bf16.vlgmr.msra.gmra.mrb[0].mxu0 %v1503_v32 }
  0x24   :  { %760 = vmatmul.mubr.bf16.vlgmr.msra.gmra.mrb[0].mxu1 %v1506_v34  ;;  %1424 = vmatpush3.bf16.msra.mxu0 %v1509_v36 }
  0x25   :  { %1463 = vmatpush3.bf16.msra.mxu1 %v1509_v36  ;;  %670 = vmatprep.mubr.bf16.mxu0 %v1510_v37 }
  0x26   :  { %767 = vmatprep.mubr.bf16.mxu1 %v1512_v38  ;;  %1425 = vmatprep.subr.bf16.mxu0 %v1516_v39 }
  0x27   :  { %1456 = vmatprep.subr.bf16.mxu1 %v1516_v39 }
  0x28   :  { %1426 = vmatpush3.bf16.msra.mxu0 %v1516_v39 }
  0x29   :  { %1464 = vmatpush3.bf16.msra.mxu1 %v1516_v39  ;;  %1427 = vmatprep.subr.bf16.mxu0 %v1523_v44 }
  0x2a   :  { %1457 = vmatprep.subr.bf16.mxu1 %v1523_v44 }
  0x2b   :  { %671 = vmatmul.mubr.bf16.gmra.mrb[4].mxu0 %v1514_v40 }
  0x2c   :  { %768 = vmatmul.mubr.bf16.gmra.mrb[4].mxu1 %v1515_v41  ;;  %678 = vmatprep.mubr.bf16.mxu0 %v1517_v42 }
  0x2d   :  { %775 = vmatprep.mubr.bf16.mxu1 %v1519_v43  ;;  %1428 = vmatpush3.bf16.msra.mxu0 %v1523_v44 }
  0x2e   :  { %1465 = vmatpush3.bf16.msra.mxu1 %v1523_v44  ;;  %1429 = vmatprep.subr.bf16.mxu0 %v1530_v45 }
  0x2f   :  { %1458 = vmatprep.subr.bf16.mxu1 %v1530_v45 }
  0x31   :  { %1430 = vmatpush3.bf16.msra.mxu0 %v1530_v45 }
  0x32   :  { %1466 = vmatpush3.bf16.msra.mxu1 %v1530_v45  ;;  %1431 = vmatprep.subr.bf16.mxu0 %v1537_v50 }
  0x33   :  { %679 = vmatmul.mubr.bf16.gmra.mrb[8].mxu0 %v1521_v46  ;;  %1459 = vmatprep.subr.bf16.mxu1 %v1537_v50 }
  0x34   :  { %776 = vmatmul.mubr.bf16.gmra.mrb[8].mxu1 %v1522_v47  ;;  %686 = vmatprep.mubr.bf16.mxu0 %v1524_v48 }
  0x35   :  { %783 = vmatprep.mubr.bf16.mxu1 %v1526_v49  ;;  %1432 = vmatpush3.bf16.msra.mxu0 %v1537_v50 }
  0x36   :  { %1467 = vmatpush3.bf16.msra.mxu1 %v1537_v50  ;;  %1433 = vmatprep.subr.bf16.mxu0 %v1544_v51 }
  0x37   :  { %1460 = vmatprep.subr.bf16.mxu1 %v1544_v51 }
  0x39   :  { %1434 = vmatpush3.bf16.msra.mxu0 %v1544_v51 }
  0x3a   :  { %1468 = vmatpush3.bf16.msra.mxu1 %v1544_v51  ;;  %1435 = vmatprep.subr.bf16.mxu0 %v1551_v55 }
  0x3b   :  { %687 = vmatmul.mubr.bf16.gmra.mrb[12].mxu0 %v1528_v52  ;;  %1461 = vmatprep.subr.bf16.mxu1 %v1551_v55 }
  0x3c   :  { %784 = vmatmul.mubr.bf16.gmra.mrb[12].mxu1 %v1529_v53  ;;  %694 = vmatprep.mubr.bf16.mxu0 %v1531_v54 }
  0x3d   :  { %791 = vmatprep.mubr.bf16.mxu1 %v1533_v56  ;;  %1436 = vmatpush3.bf16.msra.mxu0 %v1551_v55 }
  0x3e   :  { %1469 = vmatpush3.bf16.msra.mxu1 %v1551_v55  ;;  %1437 = vmatprep.subr.bf16.mxu0 %v1558_v57 }
  0x3f   :  { %1462 = vmatprep.subr.bf16.mxu1 %v1558_v57 }
  0x41   :  { %1438 = vmatpush3.bf16.msra.mxu0 %v1558_v57 }
  0x42   :  { %1470 = vmatpush3.bf16.msra.mxu1 %v1558_v57 }
  0x43   :  { %695 = vmatmul.mubr.bf16.gmra.mrb[16].mxu0 %v1535_v58 }
  0x44   :  { %792 = vmatmul.mubr.bf16.gmra.mrb[16].mxu1 %v1536_v59  ;;  %702 = vmatprep.mubr.bf16.mxu0 %v1538_v60 }
  0x45   :  { %799 = vmatprep.mubr.bf16.mxu1 %v1540_v61 }
  0x4b   :  { %703 = vmatmul.mubr.bf16.gmra.mrb[20].mxu0 %v1542_v62 }
  0x4c   :  { %800 = vmatmul.mubr.bf16.gmra.mrb[20].mxu1 %v1543_v63  ;;  %710 = vmatprep.mubr.bf16.mxu0 %v1545_v0 }
  0x4d   :  { %807 = vmatprep.mubr.bf16.mxu1 %v1547_v1 }
  0x53   :  { %711 = vmatmul.mubr.bf16.gmra.mrb[24].mxu0 %v1549_v2 }
  0x54   :  { %808 = vmatmul.mubr.bf16.gmra.mrb[24].mxu1 %v1550_v3  ;;  %718 = vmatprep.mubr.bf16.mxu0 %v1552_v4 }
  0x55   :  { %815 = vmatprep.mubr.bf16.mxu1 %v1554_v5 }
  0x5b   :  { %719 = vmatmul.mubr.bf16.gmra.mrb[28].mxu0 %v1556_v6 }
  0x5c   :  { %816 = vmatmul.mubr.bf16.gmra.mrb[28].mxu1 %v1557_v7  ;;  %1439 = vmatprep.mubr.bf16.mxu0 %v1559_v8 }
  0x5d   :  { %1447 = vmatprep.mubr.bf16.mxu1 %v1560_v9 }
  0x63   :  { %1440 = vmatmul.mubr.bf16.vlgmr.msra.gmra.mrb[32].mxu0 %v1561_v10 }
  0x64   :  { %1448 = vmatmul.mubr.bf16.vlgmr.msra.gmra.mrb[32].mxu1 %v1562_v11  ;;  %1443 = vmatprep.mubr.bf16.mxu0 %v1563_v12 }
  0x65   :  { %1451 = vmatprep.mubr.bf16.mxu1 %v1564_v13 }
  0x6b   :  { %1444 = vmatmul.mubr.bf16.gmra.mrb[36].mxu0 %v1565_v14 }
  0x6c   :  { %1452 = vmatmul.mubr.bf16.gmra.mrb[36].mxu1 %v1566_v15 }
  0xf6   :  { %v1295_v16 = vpop.f32.mrb[0].mxu0 }
  0xf7   :  { %v1359_v17 = vpop.f32.mrb[0].mxu1  ;;  %v1296_v18 = vpop.f32.mrb[1].mxu0 }
  0xf8   :  { %v1297_v19 = vadd.f32 %v1296_v18, %v1295_v16  ;;  %v1360_v20 = vpop.f32.mrb[1].mxu1  ;;  %v1298_v21 = vpop.f32.mrb[2].mxu0 }
  0xf9   :  { %v1361_v22 = vadd.f32 %v1360_v20, %v1359_v17  ;;  %v1362_v23 = vpop.f32.mrb[2].mxu1  ;;  %v1299_v24 = vpop.f32.mrb[3].mxu0 }
  0xfa   :  { %v1300_v25 = vadd.f32 %v1299_v24, %v1298_v21  ;;  %v1363_v26 = vpop.f32.mrb[3].mxu1 }
  0xfb   :  { %v1364_v27 = vadd.f32 %v1363_v26, %v1362_v23  ;;  %v1832_v28 = vadd.f32 %v1361_v22, %v1297_v19 }
  0xfd   :  { %v1834_v29 = vadd.f32 %v1364_v27, %v1300_v25 }
  0xfe   :  { %v1301_v30 = vpop.f32.mrb[4].mxu0 }
  0xff   :  { %v1365_v31 = vpop.f32.mrb[4].mxu1  ;;  %v1302_v32 = vpop.f32.mrb[5].mxu0 }
 0x100   :  { %v1303_v33 = vadd.f32 %v1302_v32, %v1301_v30  ;;  %v1366_v34 = vpop.f32.mrb[5].mxu1  ;;  %v1304_v35 = vpop.f32.mrb[6].mxu0 }
 0x101   :  { %v1367_v36 = vadd.f32 %v1366_v34, %v1365_v31  ;;  %v1368_v37 = vpop.f32.mrb[6].mxu1  ;;  %v1305_v38 = vpop.f32.mrb[7].mxu0 }
 0x102   :  { %v1306_v39 = vadd.f32 %v1305_v38, %v1304_v35  ;;  %v1369_v40 = vpop.f32.mrb[7].mxu1 }
 0x103   :  { %v1370_v41 = vadd.f32 %v1369_v40, %v1368_v37  ;;  %v1836_v42 = vadd.f32 %v1367_v36, %v1303_v33 }
 0x105   :  { %v1838_v43 = vadd.f32 %v1370_v41, %v1306_v39 }
 0x106   :  { %v1307_v44 = vpop.f32.mrb[8].mxu0 }
 0x107   :  { %v1371_v45 = vpop.f32.mrb[8].mxu1  ;;  %v1308_v46 = vpop.f32.mrb[9].mxu0 }
 0x108   :  { %v1309_v47 = vadd.f32 %v1308_v46, %v1307_v44  ;;  %v1372_v48 = vpop.f32.mrb[9].mxu1  ;;  %v1310_v49 = vpop.f32.mrb[10].mxu0 }
 0x109   :  { %v1373_v50 = vadd.f32 %v1372_v48, %v1371_v45  ;;  %v1374_v51 = vpop.f32.mrb[10].mxu1  ;;  %v1311_v52 = vpop.f32.mrb[11].mxu0 }
 0x10a   :  { %v1312_v53 = vadd.f32 %v1311_v52, %v1310_v49  ;;  %v1375_v54 = vpop.f32.mrb[11].mxu1 }
 0x10b   :  { %v1376_v55 = vadd.f32 %v1375_v54, %v1374_v51  ;;  %v1840_v56 = vadd.f32 %v1373_v50, %v1309_v47 }
 0x10d   :  { %v1842_v57 = vadd.f32 %v1376_v55, %v1312_v53 }
 0x10e   :  { %v1313_v58 = vpop.f32.mrb[12].mxu0 }
 0x10f   :  { %v1377_v59 = vpop.f32.mrb[12].mxu1  ;;  %v1314_v60 = vpop.f32.mrb[13].mxu0 }
 0x110   :  { %v1315_v61 = vadd.f32 %v1314_v60, %v1313_v58  ;;  %v1378_v62 = vpop.f32.mrb[13].mxu1  ;;  %v1316_v63 = vpop.f32.mrb[14].mxu0 }
 0x111   :  { %v1379_v0 = vadd.f32 %v1378_v62, %v1377_v59  ;;  %v1380_v1 = vpop.f32.mrb[14].mxu1  ;;  %v1317_v2 = vpop.f32.mrb[15].mxu0 }
 0x112   :  { %v1318_v3 = vadd.f32 %v1317_v2, %v1316_v63  ;;  %v1381_v4 = vpop.f32.mrb[15].mxu1 }
 0x113   :  { %v1382_v5 = vadd.f32 %v1381_v4, %v1380_v1  ;;  %v1844_v6 = vadd.f32 %v1379_v0, %v1315_v61 }
 0x115   :  { %v1846_v7 = vadd.f32 %v1382_v5, %v1318_v3 }
 0x116   :  { %v1319_v8 = vpop.f32.mrb[16].mxu0 }
 0x117   :  { %v1383_v9 = vpop.f32.mrb[16].mxu1  ;;  %v1320_v10 = vpop.f32.mrb[17].mxu0 }
 0x118   :  { %v1321_v11 = vadd.f32 %v1320_v10, %v1319_v8  ;;  %v1384_v12 = vpop.f32.mrb[17].mxu1  ;;  %v1322_v13 = vpop.f32.mrb[18].mxu0 }
 0x119   :  { %v1385_v14 = vadd.f32 %v1384_v12, %v1383_v9  ;;  %v1386_v15 = vpop.f32.mrb[18].mxu1  ;;  %v1323_v16 = vpop.f32.mrb[19].mxu0  ;;  %v1859_v9 = vld [vmem:[%s1936_s2] ss:$0 sm:$0xff] }
 0x11a   :  { %v1324_v17 = vadd.f32 %v1323_v16, %v1322_v13  ;;  %v1387_v18 = vpop.f32.mrb[19].mxu1  ;;  %v1865_v13 = vld [vmem:[%s1937_s3] ss:$0 sm:$0xff] }
 0x11b   :  { %v1388_v19 = vadd.f32 %v1387_v18, %v1386_v15  ;;  %v794_v20 = vadd.f32 %v1385_v14, %v1321_v11 }
 0x11d   :  { %v1848_v21 = vadd.f32 %v1388_v19, %v1324_v17 }
 0x11e   :  { %v1325_v22 = vpop.f32.mrb[20].mxu0 }
 0x11f   :  { %v1389_v23 = vpop.f32.mrb[20].mxu1  ;;  %v1326_v24 = vpop.f32.mrb[21].mxu0 }
 0x120   :  { %v1327_v25 = vadd.f32 %v1326_v24, %v1325_v22  ;;  %v1390_v26 = vpop.f32.mrb[21].mxu1  ;;  %v1328_v27 = vpop.f32.mrb[22].mxu0 }
 0x121   :  { %v1391_v30 = vadd.f32 %v1390_v26, %v1389_v23  ;;  %v1392_v31 = vpop.f32.mrb[22].mxu1  ;;  %v1329_v32 = vpop.f32.mrb[23].mxu0 }
 0x122   :  { %v1330_v33 = vadd.f32 %v1329_v32, %v1328_v27  ;;  %v1393_v34 = vpop.f32.mrb[23].mxu1 }
 0x123   :  { %v1394_v35 = vadd.f32 %v1393_v34, %v1392_v31  ;;  %v802_v36 = vadd.f32 %v1391_v30, %v1327_v25 }
 0x125   :  { %v805_v37 = vadd.f32 %v1394_v35, %v1330_v33 }
 0x126   :  { %v1331_v38 = vpop.f32.mrb[24].mxu0 }
 0x127   :  { %v1395_v39 = vpop.f32.mrb[24].mxu1  ;;  %v1332_v40 = vpop.f32.mrb[25].mxu0 }
 0x128   :  { %v1333_v41 = vadd.f32 %v1332_v40, %v1331_v38  ;;  %v1396_v44 = vpop.f32.mrb[25].mxu1  ;;  %v1334_v45 = vpop.f32.mrb[26].mxu0 }
 0x129   :  { %v1397_v46 = vadd.f32 %v1396_v44, %v1395_v39  ;;  %v1398_v47 = vpop.f32.mrb[26].mxu1  ;;  %v1335_v48 = vpop.f32.mrb[27].mxu0 }
 0x12a   :  { %v1336_v49 = vadd.f32 %v1335_v48, %v1334_v45  ;;  %v1399_v50 = vpop.f32.mrb[27].mxu1 }
 0x12b   :  { %v1400_v51 = vadd.f32 %v1399_v50, %v1398_v47  ;;  %v1850_v52 = vadd.f32 %v1397_v46, %v1333_v41 }
 0x12d   :  { %v1852_v53 = vadd.f32 %v1400_v51, %v1336_v49 }
 0x12e   :  { %v1337_v54 = vpop.f32.mrb[28].mxu0 }
 0x12f   :  { %v1401_v55 = vpop.f32.mrb[28].mxu1  ;;  %v1338_v58 = vpop.f32.mrb[29].mxu0 }
 0x130   :  { %v1339_v59 = vadd.f32 %v1338_v58, %v1337_v54  ;;  %v1402_v60 = vpop.f32.mrb[29].mxu1  ;;  %v1340_v61 = vpop.f32.mrb[30].mxu0 }
 0x131   :  { %v1403_v62 = vadd.f32 %v1402_v60, %v1401_v55  ;;  %v1404_v63 = vpop.f32.mrb[30].mxu1  ;;  %v1341_v0 = vpop.f32.mrb[31].mxu0 }
 0x132   :  { %v1342_v1 = vadd.f32 %v1341_v0, %v1340_v61  ;;  %v1405_v2 = vpop.f32.mrb[31].mxu1 }
 0x133   :  { %v1406_v3 = vadd.f32 %v1405_v2, %v1404_v63  ;;  %v818_v4 = vadd.f32 %v1403_v62, %v1339_v59 }
 0x135   :  { %v1854_v5 = vadd.f32 %v1406_v3, %v1342_v1 }
 0x136   :  { %v1441_v8 = vpop.f32.mrb[32].mxu0 }
 0x137   :  { %v867_v10 = vadd.f32 %v1441_v8, %v1836_v42  ;;  %v1449_v11 = vpop.f32.mrb[32].mxu1  ;;  %v858_v12 = vpop.f32.mrb[33].mxu0 }
 0x138   :  { %v899_v14 = vadd.f32 %v1449_v11, %v802_v36  ;;  %v859_v15 = vadd.f32 %v858_v12, %v1832_v28  ;;  %v890_v16 = vpop.f32.mrb[33].mxu1  ;;  %v1442_v17 = vpop.f32.mrb[34].mxu0 }
 0x139   :  { %v981_v18 = vmul.f32 %v1859_v9, %v867_v10  ;;  %v891_v19 = vadd.f32 %v890_v16, %v794_v20  ;;  %v870_v22 = vadd.f32 %v1442_v17, %v1838_v43  ;;  %v1450_v23 = vpop.f32.mrb[34].mxu1  ;;  %v861_v24 = vpop.f32.mrb[35].mxu0 }
 0x13a   :  { %v989_v42 = vmul.f32 %v1859_v9, %v899_v14  ;;  %v979_v25 = vmul.f32 %v1859_v9, %v859_v15  ;;  %v902_v26 = vadd.f32 %v1450_v23, %v805_v37  ;;  %v862_v27 = vadd.f32 %v861_v24, %v1834_v29  ;;  %v893_v30 = vpop.f32.mrb[35].mxu1 }
 0x13b   :  { %v1004_v31 = vadd.f32 %v1865_v13, %v981_v18  ;;  %v987_v28 = vmul.f32 %v1859_v9, %v891_v19  ;;  %v982_v32 = vmul.f32 %v1859_v9, %v870_v22  ;;  %v894_v20 = vadd.f32 %v893_v30, %v1848_v21 }
 0x13c   :  { %v1012_v43 = vadd.f32 %v1865_v13, %v989_v42  ;;  %v1002_v33 = vadd.f32 %v1865_v13, %v979_v25  ;;  %v990_v34 = vmul.f32 %v1859_v9, %v902_v26  ;;  %v980_v35 = vmul.f32 %v1859_v9, %v862_v27 }
 0x13d   :  { %v1020_v36 = vmax.f32 %v1004_v31, 0.0  ;;  %v1010_v29 = vadd.f32 %v1865_v13, %v987_v28  ;;  %v1005_v37 = vadd.f32 %v1865_v13, %v982_v32  ;;  %v988_v38 = vmul.f32 %v1859_v9, %v894_v20 }
 0x13e   :  { %v1028_v39 = vmax.f32 %v1012_v43, 0.0  ;;  %v1018_v40 = vmax.f32 %v1002_v33, 0.0  ;;  %v1013_v41 = vadd.f32 %v1865_v13, %v990_v34  ;;  %v1003_v21 = vadd.f32 %v1865_v13, %v980_v35  ;;  %v1445_v44 = vpop.f32.mrb[36].mxu0 }
 0x13f   :  { %v1026_v45 = vmax.f32 %v1010_v29, 0.0  ;;  %v1021_v46 = vmax.f32 %v1005_v37, 0.0  ;;  %v1011_v47 = vadd.f32 %v1865_v13, %v988_v38  ;;  %v883_v48 = vadd.f32 %v1445_v44, %v1844_v6  ;;  %v1453_v49 = vpop.f32.mrb[36].mxu1  ;;  %v874_v50 = vpop.f32.mrb[37].mxu0 }
 0x140   :  { %v1029_v51 = vmax.f32 %v1013_v41, 0.0  ;;  %v1019_v54 = vmax.f32 %v1003_v21, 0.0  ;;  %v915_v55 = vadd.f32 %v1453_v49, %v818_v4  ;;  %v875_v58 = vadd.f32 %v874_v50, %v1840_v56  ;;  %v906_v59 = vpop.f32.mrb[37].mxu1  ;;  %v1446_v60 = vpop.f32.mrb[38].mxu0 }
 0x141   :  { %v1240_v61 = vpack.c.bf16 %v1021_v46, %v1020_v36  ;;  %v1027_v62 = vmax.f32 %v1011_v47, 0.0  ;;  %v985_v63 = vmul.f32 %v1859_v9, %v883_v48  ;;  %v907_v0 = vadd.f32 %v906_v59, %v1850_v52  ;;  %v1454_v1 = vpop.f32.mrb[38].mxu1  ;;  %v877_v2 = vpop.f32.mrb[39].mxu0 }
 0x142   :  { %v1260_v3 = vpack.c.bf16 %v1029_v51, %v1028_v39  ;;  %v1235_v8 = vpack.c.bf16 %v1019_v54, %v1018_v40  ;;  %v993_v6 = vmul.f32 %v1859_v9, %v915_v55  ;;  %v983_v10 = vmul.f32 %v1859_v9, %v875_v58  ;;  %v909_v11 = vpop.f32.mrb[39].mxu1 }
 0x143   :  { %1272 = vst [vmem:[%s1938_s4 + $0x8] sm:$0xff] %v1240_v61   ;;  %v1255_v56 = vpack.c.bf16 %v1027_v62, %v1026_v45  ;;  %v991_v4 = vmul.f32 %v1859_v9, %v907_v0  ;;  %v886_v12 = vadd.f32 %v1446_v60, %v1846_v7  ;;  %v918_v52 = vadd.f32 %v1454_v1, %v1854_v5 }
 0x144   :  { %1276 = vst [vmem:[%s1938_s4 + $0x28] sm:$0xff] %v1260_v3   ;;  %1236 = vst [vmem:[%s1938_s4] sm:$0xff] %v1235_v8   ;;  %v878_v14 = vadd.f32 %v877_v2, %v1842_v57  ;;  %v1008_v15 = vadd.f32 %v1865_v13, %v985_v63  ;;  %v910_v16 = vadd.f32 %v909_v11, %v1852_v53 }
 0x145   :  { %1275 = vst [vmem:[%s1938_s4 + $0x20] sm:$0xff] %v1255_v56   ;;  %v986_v7 = vmul.f32 %v1859_v9, %v886_v12  ;;  %v1016_v17 = vadd.f32 %v1865_v13, %v993_v6  ;;  %v1006_v18 = vadd.f32 %v1865_v13, %v983_v10  ;;  %v994_v19 = vmul.f32 %v1859_v9, %v918_v52 }
 0x146   :  { %v984_v5 = vmul.f32 %v1859_v9, %v878_v14  ;;  %v1014_v57 = vadd.f32 %v1865_v13, %v991_v4  ;;  %v992_v23 = vmul.f32 %v1859_v9, %v910_v16  ;;  %v1024_v25 = vmax.f32 %v1008_v15, 0.0 }
 0x147   :  { %v1009_v22 = vadd.f32 %v1865_v13, %v986_v7  ;;  %v1017_v24 = vadd.f32 %v1865_v13, %v994_v19  ;;  %v1032_v27 = vmax.f32 %v1016_v17, 0.0  ;;  %v1022_v30 = vmax.f32 %v1006_v18, 0.0 }
 0x148   :  { %v1007_v42 = vadd.f32 %v1865_v13, %v984_v5  ;;  %v1015_v26 = vadd.f32 %v1865_v13, %v992_v23  ;;  %v1030_v32 = vmax.f32 %v1014_v57, 0.0 }
 0x149   :  { %v1025_v53 = vmax.f32 %v1009_v22, 0.0  ;;  %v1033_v31 = vmax.f32 %v1017_v24, 0.0 }
 0x14a   :  { %v1023_v28 = vmax.f32 %v1007_v42, 0.0  ;;  %v1031_v43 = vmax.f32 %v1015_v26, 0.0 }
 0x14b   :  { %v1250_v20 = vpack.c.bf16 %v1025_v53, %v1024_v25  ;;  %v1270_v33 = vpack.c.bf16 %v1033_v31, %v1032_v27 }
 0x14c   :  { %v1245_v34 = vpack.c.bf16 %v1023_v28, %v1022_v30  ;;  %v1265_v9 = vpack.c.bf16 %v1031_v43, %v1030_v32 }
 0x14d   :  { %1274 = vst [vmem:[%s1938_s4 + $0x18] sm:$0xff] %v1250_v20   ;;  %1278 = vst [vmem:[%s1938_s4 + $0x38] sm:$0xff] %v1270_v33  }
 0x14e   :  { %1273 = vst [vmem:[%s1938_s4 + $0x10] sm:$0xff] %v1245_v34   ;;  %1277 = vst [vmem:[%s1938_s4 + $0x30] sm:$0xff] %v1265_v9  }

// kernel: resnet18_baseline_forward.28
= control target key start
LH: loop header
LB: loop body
LE: loop exit
PB: predicated region body
PF: predicated region fallthrough
CT: control target
= control target key end

     0   :  { %s2102_s1 = inlined_call_operand.vmem [shape: bf16[640,128], index: 1, kind: input, shape index: {}]   ;;  %s2103_s0 = inlined_call_operand.vmem [shape: bf16[128,640], index: 0, kind: input, shape index: {}]   ;;  %s2104_s4 = inlined_call_operand.vmem [shape: bf16[128,128], index: 4, kind: input, shape index: {}]   ;;  %s2105_s2 = inlined_call_operand.vmem [shape: f32[1,128], index: 2, kind: input, shape index: {}]   ;;  %s2106_s3 = inlined_call_operand.vmem [shape: f32[1,128], index: 3, kind: input, shape index: {}]   ;;  %s2107_s5 = inlined_call_operand.vmem [shape: bf16[128,128], index: 5, kind: output, shape index: {}]  }
   0x1   :  { %v1561_v0 = vld [vmem:[%s2102_s1 + $0x40] sm:$0xff]   ;;  %v1565_v4 = vld [vmem:[%s2102_s1 + $0x48] sm:$0xff]   ;;  %v1569_v8 = vld [vmem:[%s2102_s1 + $0x50] sm:$0xff]  }
   0x2   :  { %v1562_v1 = vld [vmem:[%s2102_s1 + $0xc0] sm:$0xff]   ;;  %1369 = vmatprep.subr.bf16.mxu0 %v1561_v0  ;;  %v1566_v5 = vld [vmem:[%s2102_s1 + $0xc8] sm:$0xff]   ;;  %v1570_v9 = vld [vmem:[%s2102_s1 + $0xd0] sm:$0xff]  }
   0x3   :  { %v1563_v2 = vld [vmem:[%s2102_s1] sm:$0xff]   ;;  %1433 = vmatprep.subr.bf16.mxu1 %v1562_v1  ;;  %v1567_v6 = vld [vmem:[%s2102_s1 + $0x8] sm:$0xff]   ;;  %v1571_v10 = vld [vmem:[%s2102_s1 + $0x10] sm:$0xff]  }
   0x4   :  { %v1564_v3 = vld [vmem:[%s2102_s1 + $0x80] sm:$0xff]   ;;  %1370 = vmatpush3.bf16.msra.mxu0 %v1563_v2  ;;  %v1568_v7 = vld [vmem:[%s2102_s1 + $0x88] sm:$0xff]   ;;  %v1572_v11 = vld [vmem:[%s2102_s1 + $0x90] sm:$0xff]  }
   0x5   :  { %1434 = vmatpush3.bf16.msra.mxu1 %v1564_v3  ;;  %1371 = vmatprep.subr.bf16.mxu0 %v1565_v4  ;;  %v1573_v12 = vld [vmem:[%s2102_s1 + $0x58] sm:$0xff]   ;;  %v1577_v16 = vld [vmem:[%s2102_s1 + $0x60] sm:$0xff]   ;;  %v1581_v20 = vld [vmem:[%s2102_s1 + $0x68] sm:$0xff]  }
   0x6   :  { %1435 = vmatprep.subr.bf16.mxu1 %v1566_v5  ;;  %v1574_v13 = vld [vmem:[%s2102_s1 + $0xd8] sm:$0xff]   ;;  %v1578_v17 = vld [vmem:[%s2102_s1 + $0xe0] sm:$0xff]   ;;  %v1582_v21 = vld [vmem:[%s2102_s1 + $0xe8] sm:$0xff]  }
   0x7   :  { %v1575_v14 = vld [vmem:[%s2102_s1 + $0x18] sm:$0xff]   ;;  %v1579_v18 = vld [vmem:[%s2102_s1 + $0x20] sm:$0xff]   ;;  %v1583_v22 = vld [vmem:[%s2102_s1 + $0x28] sm:$0xff]  }
   0x8   :  { %1372 = vmatpush3.bf16.msra.mxu0 %v1567_v6  ;;  %v1576_v15 = vld [vmem:[%s2102_s1 + $0x98] sm:$0xff]   ;;  %v1580_v19 = vld [vmem:[%s2102_s1 + $0xa0] sm:$0xff]   ;;  %v1584_v23 = vld [vmem:[%s2102_s1 + $0xa8] sm:$0xff]  }
   0x9   :  { %1436 = vmatpush3.bf16.msra.mxu1 %v1568_v7  ;;  %1373 = vmatprep.subr.bf16.mxu0 %v1569_v8  ;;  %v1585_v24 = vld [vmem:[%s2102_s1 + $0x70] sm:$0xff]   ;;  %v1589_v28 = vld [vmem:[%s2102_s1 + $0x78] sm:$0xff]   ;;  %v1598_v35 = vld [vmem:[%s2103_s0 + $0xc] ss:$20 sps:$4 sm:$0xff]  }
   0xa   :  { %1437 = vmatprep.subr.bf16.mxu1 %v1570_v9  ;;  %v1586_v25 = vld [vmem:[%s2102_s1 + $0xf0] sm:$0xff]   ;;  %v1590_v29 = vld [vmem:[%s2102_s1 + $0xf8] sm:$0xff]   ;;  %v1599_v36 = vld [vmem:[%s2102_s1 + $0x100] sm:$0xff]   ;;  %762 = vmatprep.mubr.bf16.mxu1 %v1598_v35 }
   0xb   :  { %v1587_v26 = vld [vmem:[%s2102_s1 + $0x30] sm:$0xff]   ;;  %v1591_v30 = vld [vmem:[%s2102_s1 + $0x38] sm:$0xff]   ;;  %v1600_v37 = vld [vmem:[%s2103_s0 + $0x2c] ss:$20 sps:$4 sm:$0xff]  }
   0xc   :  { %1374 = vmatpush3.bf16.msra.mxu0 %v1571_v10  ;;  %v1588_v27 = vld [vmem:[%s2102_s1 + $0xb0] sm:$0xff]   ;;  %v1592_v31 = vld [vmem:[%s2102_s1 + $0xb8] sm:$0xff]   ;;  %v1606_v39 = vld [vmem:[%s2102_s1 + $0x108] sm:$0xff]  }
   0xd   :  { %1438 = vmatpush3.bf16.msra.mxu1 %v1572_v11  ;;  %1375 = vmatprep.subr.bf16.mxu0 %v1573_v12  ;;  %v1593_v32 = vld [vmem:[%s2103_s0] ss:$20 sps:$4 sm:$0xff]   ;;  %v1595_v33 = vld [vmem:[%s2103_s0 + $0x4] ss:$20 sps:$4 sm:$0xff]   ;;  %v1596_v34 = vld [vmem:[%s2103_s0 + $0x8] ss:$20 sps:$4 sm:$0xff]  }
   0xe   :  { %1439 = vmatprep.subr.bf16.mxu1 %v1574_v13  ;;  %665 = vmatprep.mubr.bf16.mxu0 %v1595_v33  ;;  %v1602_v38 = vld [vmem:[%s2103_s0 + $0x34] ss:$20 sps:$4 sm:$0xff]   ;;  %v1605_v41 = vld [vmem:[%s2103_s0 + $0x30] ss:$20 sps:$4 sm:$0xff]   ;;  %v1620_v45 = vld [vmem:[%s2102_s1 + $0x118] sm:$0xff]  }
   0xf   :  { %v1604_v40 = vld [vmem:[%s2103_s0 + $0x28] ss:$20 sps:$4 sm:$0xff]   ;;  %v1613_v44 = vld [vmem:[%s2102_s1 + $0x110] sm:$0xff]   ;;  %v1612_v47 = vld [vmem:[%s2103_s0 + $0x58] ss:$20 sps:$4 sm:$0xff]  }
  0x10   :  { %1376 = vmatpush3.bf16.msra.mxu0 %v1575_v14  ;;  %v1607_v42 = vld [vmem:[%s2103_s0 + $0x54] ss:$20 sps:$4 sm:$0xff]   ;;  %v1609_v43 = vld [vmem:[%s2103_s0 + $0x5c] ss:$20 sps:$4 sm:$0xff]   ;;  %v1616_v49 = vld [vmem:[%s2103_s0 + $0x84] ss:$20 sps:$4 sm:$0xff]  }
  0x11   :  { %1440 = vmatpush3.bf16.msra.mxu1 %v1576_v15  ;;  %1377 = vmatprep.subr.bf16.mxu0 %v1577_v16  ;;  %v1611_v46 = vld [vmem:[%s2103_s0 + $0x50] ss:$20 sps:$4 sm:$0xff]   ;;  %v1634_v51 = vld [vmem:[%s2102_s1 + $0x128] sm:$0xff]   ;;  %v1619_v53 = vld [vmem:[%s2103_s0 + $0x80] ss:$20 sps:$4 sm:$0xff]  }
  0x12   :  { %1441 = vmatprep.subr.bf16.mxu1 %v1578_v17  ;;  %v1614_v48 = vld [vmem:[%s2103_s0 + $0x7c] ss:$20 sps:$4 sm:$0xff]   ;;  %v1627_v50 = vld [vmem:[%s2102_s1 + $0x120] sm:$0xff]   ;;  %v1618_v52 = vld [vmem:[%s2103_s0 + $0x78] ss:$20 sps:$4 sm:$0xff]  }
  0x13   :  { %v1621_v54 = vld [vmem:[%s2103_s0 + $0xa4] ss:$20 sps:$4 sm:$0xff]   ;;  %v1641_v55 = vld [vmem:[%s2102_s1 + $0x130] sm:$0xff]   ;;  %v1623_v56 = vld [vmem:[%s2103_s0 + $0xac] ss:$20 sps:$4 sm:$0xff]  }
  0x14   :  { %1378 = vmatpush3.bf16.msra.mxu0 %v1579_v18  ;;  %v1648_v57 = vld [vmem:[%s2102_s1 + $0x138] sm:$0xff]   ;;  %v1625_v58 = vld [vmem:[%s2103_s0 + $0xa0] ss:$20 sps:$4 sm:$0xff]   ;;  %v1633_v63 = vld [vmem:[%s2103_s0 + $0xd0] ss:$20 sps:$4 sm:$0xff]  }
  0x15   :  { %1442 = vmatpush3.bf16.msra.mxu1 %v1580_v19  ;;  %1379 = vmatprep.subr.bf16.mxu0 %v1581_v20  ;;  %v1626_v59 = vld [vmem:[%s2103_s0 + $0xa8] ss:$20 sps:$4 sm:$0xff]   ;;  %v1628_v60 = vld [vmem:[%s2103_s0 + $0xcc] ss:$20 sps:$4 sm:$0xff]   ;;  %v1639_v2 = vld [vmem:[%s2103_s0 + $0xf0] ss:$20 sps:$4 sm:$0xff]  }
  0x16   :  { %1443 = vmatprep.subr.bf16.mxu1 %v1582_v21  ;;  %v1630_v61 = vld [vmem:[%s2103_s0 + $0xd4] ss:$20 sps:$4 sm:$0xff]   ;;  %v1637_v1 = vld [vmem:[%s2103_s0 + $0xfc] ss:$20 sps:$4 sm:$0xff]   ;;  %v1640_v3 = vld [vmem:[%s2103_s0 + $0xf8] ss:$20 sps:$4 sm:$0xff]  }
  0x17   :  { %v1632_v62 = vld [vmem:[%s2103_s0 + $0xc8] ss:$20 sps:$4 sm:$0xff]   ;;  %v1644_v5 = vld [vmem:[%s2103_s0 + $0x124] ss:$20 sps:$4 sm:$0xff]   ;;  %v1647_v7 = vld [vmem:[%s2103_s0 + $0x120] ss:$20 sps:$4 sm:$0xff]  }
  0x18   :  { %1380 = vmatpush3.bf16.msra.mxu0 %v1583_v22  ;;  %v1635_v0 = vld [vmem:[%s2103_s0 + $0xf4] ss:$20 sps:$4 sm:$0xff]   ;;  %v1642_v4 = vld [vmem:[%s2103_s0 + $0x11c] ss:$20 sps:$4 sm:$0xff]   ;;  %v1646_v6 = vld [vmem:[%s2103_s0 + $0x118] ss:$20 sps:$4 sm:$0xff]  }
  0x19   :  { %1444 = vmatpush3.bf16.msra.mxu1 %v1584_v23  ;;  %1381 = vmatprep.subr.bf16.mxu0 %v1585_v24  ;;  %v1649_v8 = vld [vmem:[%s2103_s0 + $0x10] ss:$20 sps:$4 sm:$0xff]   ;;  %v1651_v10 = vld [vmem:[%s2103_s0 + $0x38] ss:$20 sps:$4 sm:$0xff]   ;;  %v1653_v12 = vld [vmem:[%s2103_s0 + $0x60] ss:$20 sps:$4 sm:$0xff]  }
  0x1a   :  { %1445 = vmatprep.subr.bf16.mxu1 %v1586_v25  ;;  %v1650_v9 = vld [vmem:[%s2103_s0 + $0xb0] ss:$20 sps:$4 sm:$0xff]   ;;  %v1652_v11 = vld [vmem:[%s2103_s0 + $0xd8] ss:$20 sps:$4 sm:$0xff]   ;;  %v1654_v13 = vld [vmem:[%s2103_s0 + $0x100] ss:$20 sps:$4 sm:$0xff]  }
  0x1b   :  { %v1655_v14 = vld [vmem:[%s2103_s0 + $0x88] ss:$20 sps:$4 sm:$0xff]  }
  0x1c   :  { %1382 = vmatpush3.bf16.msra.mxu0 %v1587_v26  ;;  %v1656_v15 = vld [vmem:[%s2103_s0 + $0x128] ss:$20 sps:$4 sm:$0xff]  }
  0x1d   :  { %1446 = vmatpush3.bf16.msra.mxu1 %v1588_v27  ;;  %1383 = vmatprep.subr.bf16.mxu0 %v1589_v28 }
  0x1e   :  { %1447 = vmatprep.subr.bf16.mxu1 %v1590_v29 }
  0x20   :  { %1384 = vmatpush3.bf16.msra.mxu0 %v1591_v30 }
  0x21   :  { %1448 = vmatpush3.bf16.msra.mxu1 %v1592_v31  ;;  %1513 = vmatprep.subr.bf16.mxu0 %v1599_v36 }
  0x22   :  { %1545 = vmatprep.subr.bf16.mxu1 %v1599_v36 }
  0x23   :  { %666 = vmatmul.mubr.bf16.vlgmr.msra.gmra.mrb[0].mxu0 %v1593_v32 }
  0x24   :  { %763 = vmatmul.mubr.bf16.vlgmr.msra.gmra.mrb[0].mxu1 %v1596_v34  ;;  %1514 = vmatpush3.bf16.msra.mxu0 %v1599_v36 }
  0x25   :  { %1553 = vmatpush3.bf16.msra.mxu1 %v1599_v36  ;;  %673 = vmatprep.mubr.bf16.mxu0 %v1600_v37 }
  0x26   :  { %770 = vmatprep.mubr.bf16.mxu1 %v1602_v38  ;;  %1515 = vmatprep.subr.bf16.mxu0 %v1606_v39 }
  0x27   :  { %1546 = vmatprep.subr.bf16.mxu1 %v1606_v39 }
  0x28   :  { %1516 = vmatpush3.bf16.msra.mxu0 %v1606_v39 }
  0x29   :  { %1554 = vmatpush3.bf16.msra.mxu1 %v1606_v39  ;;  %1517 = vmatprep.subr.bf16.mxu0 %v1613_v44 }
  0x2a   :  { %1547 = vmatprep.subr.bf16.mxu1 %v1613_v44 }
  0x2b   :  { %674 = vmatmul.mubr.bf16.gmra.mrb[4].mxu0 %v1604_v40 }
  0x2c   :  { %771 = vmatmul.mubr.bf16.gmra.mrb[4].mxu1 %v1605_v41  ;;  %681 = vmatprep.mubr.bf16.mxu0 %v1607_v42 }
  0x2d   :  { %778 = vmatprep.mubr.bf16.mxu1 %v1609_v43  ;;  %1518 = vmatpush3.bf16.msra.mxu0 %v1613_v44 }
  0x2e   :  { %1555 = vmatpush3.bf16.msra.mxu1 %v1613_v44  ;;  %1519 = vmatprep.subr.bf16.mxu0 %v1620_v45 }
  0x2f   :  { %1548 = vmatprep.subr.bf16.mxu1 %v1620_v45 }
  0x31   :  { %1520 = vmatpush3.bf16.msra.mxu0 %v1620_v45 }
  0x32   :  { %1556 = vmatpush3.bf16.msra.mxu1 %v1620_v45  ;;  %1521 = vmatprep.subr.bf16.mxu0 %v1627_v50 }
  0x33   :  { %682 = vmatmul.mubr.bf16.gmra.mrb[8].mxu0 %v1611_v46  ;;  %1549 = vmatprep.subr.bf16.mxu1 %v1627_v50 }
  0x34   :  { %779 = vmatmul.mubr.bf16.gmra.mrb[8].mxu1 %v1612_v47  ;;  %689 = vmatprep.mubr.bf16.mxu0 %v1614_v48 }
  0x35   :  { %786 = vmatprep.mubr.bf16.mxu1 %v1616_v49  ;;  %1522 = vmatpush3.bf16.msra.mxu0 %v1627_v50 }
  0x36   :  { %1557 = vmatpush3.bf16.msra.mxu1 %v1627_v50  ;;  %1523 = vmatprep.subr.bf16.mxu0 %v1634_v51 }
  0x37   :  { %1550 = vmatprep.subr.bf16.mxu1 %v1634_v51 }
  0x39   :  { %1524 = vmatpush3.bf16.msra.mxu0 %v1634_v51 }
  0x3a   :  { %1558 = vmatpush3.bf16.msra.mxu1 %v1634_v51  ;;  %1525 = vmatprep.subr.bf16.mxu0 %v1641_v55 }
  0x3b   :  { %690 = vmatmul.mubr.bf16.gmra.mrb[12].mxu0 %v1618_v52  ;;  %1551 = vmatprep.subr.bf16.mxu1 %v1641_v55 }
  0x3c   :  { %787 = vmatmul.mubr.bf16.gmra.mrb[12].mxu1 %v1619_v53  ;;  %697 = vmatprep.mubr.bf16.mxu0 %v1621_v54 }
  0x3d   :  { %794 = vmatprep.mubr.bf16.mxu1 %v1623_v56  ;;  %1526 = vmatpush3.bf16.msra.mxu0 %v1641_v55 }
  0x3e   :  { %1559 = vmatpush3.bf16.msra.mxu1 %v1641_v55  ;;  %1527 = vmatprep.subr.bf16.mxu0 %v1648_v57 }
  0x3f   :  { %1552 = vmatprep.subr.bf16.mxu1 %v1648_v57 }
  0x41   :  { %1528 = vmatpush3.bf16.msra.mxu0 %v1648_v57 }
  0x42   :  { %1560 = vmatpush3.bf16.msra.mxu1 %v1648_v57 }
  0x43   :  { %698 = vmatmul.mubr.bf16.gmra.mrb[16].mxu0 %v1625_v58 }
  0x44   :  { %795 = vmatmul.mubr.bf16.gmra.mrb[16].mxu1 %v1626_v59  ;;  %705 = vmatprep.mubr.bf16.mxu0 %v1628_v60 }
  0x45   :  { %802 = vmatprep.mubr.bf16.mxu1 %v1630_v61 }
  0x4b   :  { %706 = vmatmul.mubr.bf16.gmra.mrb[20].mxu0 %v1632_v62 }
  0x4c   :  { %803 = vmatmul.mubr.bf16.gmra.mrb[20].mxu1 %v1633_v63  ;;  %713 = vmatprep.mubr.bf16.mxu0 %v1635_v0 }
  0x4d   :  { %810 = vmatprep.mubr.bf16.mxu1 %v1637_v1 }
  0x53   :  { %714 = vmatmul.mubr.bf16.gmra.mrb[24].mxu0 %v1639_v2 }
  0x54   :  { %811 = vmatmul.mubr.bf16.gmra.mrb[24].mxu1 %v1640_v3  ;;  %721 = vmatprep.mubr.bf16.mxu0 %v1642_v4 }
  0x55   :  { %818 = vmatprep.mubr.bf16.mxu1 %v1644_v5 }
  0x5b   :  { %722 = vmatmul.mubr.bf16.gmra.mrb[28].mxu0 %v1646_v6 }
  0x5c   :  { %819 = vmatmul.mubr.bf16.gmra.mrb[28].mxu1 %v1647_v7  ;;  %1529 = vmatprep.mubr.bf16.mxu0 %v1649_v8 }
  0x5d   :  { %1537 = vmatprep.mubr.bf16.mxu1 %v1650_v9 }
  0x63   :  { %1530 = vmatmul.mubr.bf16.vlgmr.msra.gmra.mrb[32].mxu0 %v1651_v10 }
  0x64   :  { %1538 = vmatmul.mubr.bf16.vlgmr.msra.gmra.mrb[32].mxu1 %v1652_v11  ;;  %1533 = vmatprep.mubr.bf16.mxu0 %v1653_v12 }
  0x65   :  { %1541 = vmatprep.mubr.bf16.mxu1 %v1654_v13 }
  0x6b   :  { %1534 = vmatmul.mubr.bf16.gmra.mrb[36].mxu0 %v1655_v14 }
  0x6c   :  { %1542 = vmatmul.mubr.bf16.gmra.mrb[36].mxu1 %v1656_v15 }
  0xf6   :  { %v1385_v16 = vpop.f32.mrb[0].mxu0 }
  0xf7   :  { %v1449_v17 = vpop.f32.mrb[0].mxu1  ;;  %v1386_v18 = vpop.f32.mrb[1].mxu0 }
  0xf8   :  { %v1387_v19 = vadd.f32 %v1386_v18, %v1385_v16  ;;  %v1450_v20 = vpop.f32.mrb[1].mxu1  ;;  %v1388_v21 = vpop.f32.mrb[2].mxu0 }
  0xf9   :  { %v1451_v22 = vadd.f32 %v1450_v20, %v1449_v17  ;;  %v1452_v23 = vpop.f32.mrb[2].mxu1  ;;  %v1389_v24 = vpop.f32.mrb[3].mxu0 }
  0xfa   :  { %v1390_v25 = vadd.f32 %v1389_v24, %v1388_v21  ;;  %v1453_v26 = vpop.f32.mrb[3].mxu1 }
  0xfb   :  { %v1454_v27 = vadd.f32 %v1453_v26, %v1452_v23  ;;  %v1927_v28 = vadd.f32 %v1451_v22, %v1387_v19 }
  0xfd   :  { %v1929_v29 = vadd.f32 %v1454_v27, %v1390_v25 }
  0xfe   :  { %v1391_v30 = vpop.f32.mrb[4].mxu0 }
  0xff   :  { %v1455_v31 = vpop.f32.mrb[4].mxu1  ;;  %v1392_v32 = vpop.f32.mrb[5].mxu0 }
 0x100   :  { %v1393_v33 = vadd.f32 %v1392_v32, %v1391_v30  ;;  %v1456_v34 = vpop.f32.mrb[5].mxu1  ;;  %v1394_v35 = vpop.f32.mrb[6].mxu0 }
 0x101   :  { %v1457_v36 = vadd.f32 %v1456_v34, %v1455_v31  ;;  %v1458_v37 = vpop.f32.mrb[6].mxu1  ;;  %v1395_v38 = vpop.f32.mrb[7].mxu0 }
 0x102   :  { %v1396_v39 = vadd.f32 %v1395_v38, %v1394_v35  ;;  %v1459_v40 = vpop.f32.mrb[7].mxu1 }
 0x103   :  { %v1460_v41 = vadd.f32 %v1459_v40, %v1458_v37  ;;  %v1931_v42 = vadd.f32 %v1457_v36, %v1393_v33 }
 0x105   :  { %v1933_v43 = vadd.f32 %v1460_v41, %v1396_v39 }
 0x106   :  { %v1397_v44 = vpop.f32.mrb[8].mxu0 }
 0x107   :  { %v1461_v45 = vpop.f32.mrb[8].mxu1  ;;  %v1398_v46 = vpop.f32.mrb[9].mxu0 }
 0x108   :  { %v1399_v47 = vadd.f32 %v1398_v46, %v1397_v44  ;;  %v1462_v48 = vpop.f32.mrb[9].mxu1  ;;  %v1400_v49 = vpop.f32.mrb[10].mxu0 }
 0x109   :  { %v1463_v50 = vadd.f32 %v1462_v48, %v1461_v45  ;;  %v1464_v51 = vpop.f32.mrb[10].mxu1  ;;  %v1401_v52 = vpop.f32.mrb[11].mxu0 }
 0x10a   :  { %v1402_v53 = vadd.f32 %v1401_v52, %v1400_v49  ;;  %v1465_v54 = vpop.f32.mrb[11].mxu1 }
 0x10b   :  { %v1466_v55 = vadd.f32 %v1465_v54, %v1464_v51  ;;  %v1935_v56 = vadd.f32 %v1463_v50, %v1399_v47 }
 0x10d   :  { %v1937_v57 = vadd.f32 %v1466_v55, %v1402_v53 }
 0x10e   :  { %v1403_v58 = vpop.f32.mrb[12].mxu0 }
 0x10f   :  { %v1467_v59 = vpop.f32.mrb[12].mxu1  ;;  %v1404_v60 = vpop.f32.mrb[13].mxu0 }
 0x110   :  { %v1405_v61 = vadd.f32 %v1404_v60, %v1403_v58  ;;  %v1468_v62 = vpop.f32.mrb[13].mxu1  ;;  %v1406_v63 = vpop.f32.mrb[14].mxu0 }
 0x111   :  { %v1469_v0 = vadd.f32 %v1468_v62, %v1467_v59  ;;  %v1470_v1 = vpop.f32.mrb[14].mxu1  ;;  %v1407_v2 = vpop.f32.mrb[15].mxu0 }
 0x112   :  { %v1408_v3 = vadd.f32 %v1407_v2, %v1406_v63  ;;  %v1471_v4 = vpop.f32.mrb[15].mxu1 }
 0x113   :  { %v1472_v5 = vadd.f32 %v1471_v4, %v1470_v1  ;;  %v1939_v6 = vadd.f32 %v1469_v0, %v1405_v61  ;;  %v1961_v4 = vld [vmem:[%s2104_s4 + $0x28] sm:$0xff]  }
 0x115   :  { %v1941_v7 = vadd.f32 %v1472_v5, %v1408_v3  ;;  %v1956_v3 = vld [vmem:[%s2104_s4 + $0x8] sm:$0xff]  }
 0x116   :  { %v1409_v8 = vpop.f32.mrb[16].mxu0 }
 0x117   :  { %v1473_v9 = vpop.f32.mrb[16].mxu1  ;;  %v1410_v10 = vpop.f32.mrb[17].mxu0 }
 0x118   :  { %v1411_v11 = vadd.f32 %v1410_v10, %v1409_v8  ;;  %v1474_v12 = vpop.f32.mrb[17].mxu1  ;;  %v1412_v13 = vpop.f32.mrb[18].mxu0  ;;  %v1966_v8 = vld [vmem:[%s2104_s4] sm:$0xff]  }
 0x119   :  { %v1475_v14 = vadd.f32 %v1474_v12, %v1473_v9  ;;  %v1476_v15 = vpop.f32.mrb[18].mxu1  ;;  %v1413_v16 = vpop.f32.mrb[19].mxu0  ;;  %v1971_v9 = vld [vmem:[%s2104_s4 + $0x20] sm:$0xff]   ;;  %v1289_v12 = vunpack.c.l.bf16 %v1956_v3 }
 0x11a   :  { %v1414_v17 = vadd.f32 %v1413_v16, %v1412_v13  ;;  %v1477_v18 = vpop.f32.mrb[19].mxu1  ;;  %v1305_v13 = vunpack.c.l.bf16 %v1961_v4 }
 0x11b   :  { %v1478_v19 = vadd.f32 %v1477_v18, %v1476_v15  ;;  %v1943_v20 = vadd.f32 %v1475_v14, %v1411_v11  ;;  %v1978_v11 = vld [vmem:[%s2104_s4 + $0x18] sm:$0xff]   ;;  %v1990_v15 = vld [vmem:[%s2104_s4 + $0x10] sm:$0xff]   ;;  %v1997_v18 = vld [vmem:[%s2105_s2] ss:$0 sm:$0xff] }
 0x11c   :  { %v1985_v14 = vld [vmem:[%s2104_s4 + $0x38] sm:$0xff]  }
 0x11d   :  { %v1945_v21 = vadd.f32 %v1478_v19, %v1414_v17  ;;  %v1285_v19 = vunpack.c.l.bf16 %v1966_v8 }
 0x11e   :  { %v1415_v22 = vpop.f32.mrb[20].mxu0 }
 0x11f   :  { %v1479_v23 = vpop.f32.mrb[20].mxu1  ;;  %v1416_v24 = vpop.f32.mrb[21].mxu0 }
 0x120   :  { %v1417_v25 = vadd.f32 %v1416_v24, %v1415_v22  ;;  %v1480_v26 = vpop.f32.mrb[21].mxu1  ;;  %v1418_v27 = vpop.f32.mrb[22].mxu0  ;;  %v1301_v22 = vunpack.c.l.bf16 %v1971_v9  ;;  %v1306_v24 = vunpack.c.h.bf16 %v1961_v4 }
 0x121   :  { %v1481_v30 = vadd.f32 %v1480_v26, %v1479_v23  ;;  %v1482_v31 = vpop.f32.mrb[22].mxu1  ;;  %v1419_v32 = vpop.f32.mrb[23].mxu0  ;;  %v1290_v23 = vunpack.c.h.bf16 %v1956_v3 }
 0x122   :  { %v1420_v33 = vadd.f32 %v1419_v32, %v1418_v27  ;;  %v1483_v34 = vpop.f32.mrb[23].mxu1  ;;  %v1302_v32 = vunpack.c.h.bf16 %v1971_v9 }
 0x123   :  { %v1484_v35 = vadd.f32 %v1483_v34, %v1482_v31  ;;  %v805_v36 = vadd.f32 %v1481_v30, %v1417_v25  ;;  %v2006_v25 = vld [vmem:[%s2104_s4 + $0x30] sm:$0xff]   ;;  %v1286_v31 = vunpack.c.h.bf16 %v1966_v8  ;;  %v2015_v34 = vld [vmem:[%s2106_s3] ss:$0 sm:$0xff] }
 0x125   :  { %v1947_v37 = vadd.f32 %v1484_v35, %v1420_v33  ;;  %v1297_v33 = vunpack.c.l.bf16 %v1978_v11 }
 0x126   :  { %v1421_v38 = vpop.f32.mrb[24].mxu0 }
 0x127   :  { %v1485_v39 = vpop.f32.mrb[24].mxu1  ;;  %v1422_v40 = vpop.f32.mrb[25].mxu0 }
 0x128   :  { %v1423_v41 = vadd.f32 %v1422_v40, %v1421_v38  ;;  %v1486_v44 = vpop.f32.mrb[25].mxu1  ;;  %v1424_v45 = vpop.f32.mrb[26].mxu0 }
 0x129   :  { %v1487_v46 = vadd.f32 %v1486_v44, %v1485_v39  ;;  %v1488_v47 = vpop.f32.mrb[26].mxu1  ;;  %v1425_v48 = vpop.f32.mrb[27].mxu0 }
 0x12a   :  { %v1426_v49 = vadd.f32 %v1425_v48, %v1424_v45  ;;  %v1489_v50 = vpop.f32.mrb[27].mxu1 }
 0x12b   :  { %v1490_v51 = vadd.f32 %v1489_v50, %v1488_v47  ;;  %v1949_v52 = vadd.f32 %v1487_v46, %v1423_v41  ;;  %v1293_v41 = vunpack.c.l.bf16 %v1990_v15 }
 0x12d   :  { %v1951_v53 = vadd.f32 %v1490_v51, %v1426_v49  ;;  %v1309_v49 = vunpack.c.l.bf16 %v2006_v25 }
 0x12e   :  { %v1427_v54 = vpop.f32.mrb[28].mxu0 }
 0x12f   :  { %v1491_v55 = vpop.f32.mrb[28].mxu1  ;;  %v1428_v58 = vpop.f32.mrb[29].mxu0 }
 0x130   :  { %v1429_v59 = vadd.f32 %v1428_v58, %v1427_v54  ;;  %v1492_v60 = vpop.f32.mrb[29].mxu1  ;;  %v1430_v61 = vpop.f32.mrb[30].mxu0 }
 0x131   :  { %v1493_v62 = vadd.f32 %v1492_v60, %v1491_v55  ;;  %v1494_v63 = vpop.f32.mrb[30].mxu1  ;;  %v1431_v0 = vpop.f32.mrb[31].mxu0 }
 0x132   :  { %v1432_v1 = vadd.f32 %v1431_v0, %v1430_v61  ;;  %v1495_v2 = vpop.f32.mrb[31].mxu1 }
 0x133   :  { %v1496_v5 = vadd.f32 %v1495_v2, %v1494_v63  ;;  %v1973_v10 = vadd.f32 %v1493_v62, %v1429_v59 }
 0x135   :  { %v1992_v16 = vadd.f32 %v1496_v5, %v1432_v1 }
 0x136   :  { %v1531_v17 = vpop.f32.mrb[32].mxu0 }
 0x137   :  { %v870_v26 = vadd.f32 %v1531_v17, %v1931_v42  ;;  %v1539_v27 = vpop.f32.mrb[32].mxu1  ;;  %v861_v30 = vpop.f32.mrb[33].mxu0  ;;  %v1313_v42 = vunpack.c.l.bf16 %v1985_v14 }
 0x138   :  { %v902_v35 = vadd.f32 %v1539_v27, %v805_v36  ;;  %v862_v38 = vadd.f32 %v861_v30, %v1927_v28  ;;  %v893_v39 = vpop.f32.mrb[33].mxu1  ;;  %v1532_v40 = vpop.f32.mrb[34].mxu0 }
 0x139   :  { %v984_v44 = vmul.f32 %v1997_v18, %v870_v26  ;;  %v894_v45 = vadd.f32 %v893_v39, %v1943_v20  ;;  %v873_v46 = vadd.f32 %v1532_v40, %v1933_v43  ;;  %v1540_v47 = vpop.f32.mrb[34].mxu1  ;;  %v864_v48 = vpop.f32.mrb[35].mxu0 }
 0x13a   :  { %v992_v36 = vmul.f32 %v1997_v18, %v902_v35  ;;  %v982_v28 = vmul.f32 %v1997_v18, %v862_v38  ;;  %v905_v50 = vadd.f32 %v1540_v47, %v1947_v37  ;;  %v865_v51 = vadd.f32 %v864_v48, %v1929_v29  ;;  %v896_v54 = vpop.f32.mrb[35].mxu1 }
 0x13b   :  { %v1007_v55 = vadd.f32 %v2015_v34, %v984_v44  ;;  %v990_v58 = vmul.f32 %v1997_v18, %v894_v45  ;;  %v985_v20 = vmul.f32 %v1997_v18, %v873_v46  ;;  %v897_v43 = vadd.f32 %v896_v54, %v1945_v21 }
 0x13c   :  { %v1015_v59 = vadd.f32 %v2015_v34, %v992_v36  ;;  %v1005_v60 = vadd.f32 %v2015_v34, %v982_v28  ;;  %v993_v61 = vmul.f32 %v1997_v18, %v905_v50  ;;  %v983_v62 = vmul.f32 %v1997_v18, %v865_v51 }
 0x13d   :  { %v1055_v37 = vadd.f32 %v1289_v12, %v1007_v55  ;;  %v1013_v29 = vadd.f32 %v2015_v34, %v990_v58  ;;  %v1008_v63 = vadd.f32 %v2015_v34, %v985_v20  ;;  %v991_v0 = vmul.f32 %v1997_v18, %v897_v43 }
 0x13e   :  { %v1063_v1 = vadd.f32 %v1305_v13, %v1015_v59  ;;  %v1053_v2 = vadd.f32 %v1285_v19, %v1005_v60  ;;  %v1016_v3 = vadd.f32 %v2015_v34, %v993_v61  ;;  %v1006_v21 = vadd.f32 %v2015_v34, %v983_v62  ;;  %v1535_v4 = vpop.f32.mrb[36].mxu0 }
 0x13f   :  { %v1071_v5 = vmax.f32 %v1055_v37, 0.0  ;;  %v1061_v8 = vadd.f32 %v1301_v22, %v1013_v29  ;;  %v1056_v9 = vadd.f32 %v1290_v23, %v1008_v63  ;;  %v1014_v17 = vadd.f32 %v2015_v34, %v991_v0  ;;  %v1543_v26 = vpop.f32.mrb[36].mxu1  ;;  %v877_v12 = vpop.f32.mrb[37].mxu0 }
 0x140   :  { %v1079_v27 = vmax.f32 %v1063_v1, 0.0  ;;  %v1069_v30 = vmax.f32 %v1053_v2, 0.0  ;;  %v1064_v35 = vadd.f32 %v1306_v24, %v1016_v3  ;;  %v1054_v38 = vadd.f32 %v1286_v31, %v1006_v21  ;;  %v909_v39 = vpop.f32.mrb[37].mxu1  ;;  %v1536_v40 = vpop.f32.mrb[38].mxu0 }
 0x141   :  { %v1077_v13 = vmax.f32 %v1061_v8, 0.0  ;;  %v1072_v19 = vmax.f32 %v1056_v9, 0.0  ;;  %v1062_v44 = vadd.f32 %v1302_v32, %v1014_v17  ;;  %v886_v45 = vadd.f32 %v1535_v4, %v1939_v6  ;;  %v1544_v46 = vpop.f32.mrb[38].mxu1  ;;  %v880_v47 = vpop.f32.mrb[39].mxu0 }
 0x142   :  { %v1080_v48 = vmax.f32 %v1064_v35, 0.0  ;;  %v1070_v22 = vmax.f32 %v1054_v38, 0.0  ;;  %v918_v23 = vadd.f32 %v1543_v26, %v1973_v10  ;;  %v878_v36 = vadd.f32 %v877_v12, %v1935_v56  ;;  %v912_v28 = vpop.f32.mrb[39].mxu1 }
 0x143   :  { %v1323_v50 = vpack.c.bf16 %v1072_v19, %v1071_v5  ;;  %v1078_v51 = vmax.f32 %v1062_v44, 0.0  ;;  %v988_v24 = vmul.f32 %v1997_v18, %v886_v45  ;;  %v910_v31 = vadd.f32 %v909_v39, %v1949_v52 }
 0x144   :  { %v1343_v54 = vpack.c.bf16 %v1080_v48, %v1079_v27  ;;  %v1318_v55 = vpack.c.bf16 %v1070_v22, %v1069_v30  ;;  %v996_v32 = vmul.f32 %v1997_v18, %v918_v23  ;;  %v986_v6 = vmul.f32 %v1997_v18, %v878_v36 }
 0x145   :  { %1362 = vst [vmem:[%s2107_s5 + $0x8] sm:$0xff] %v1323_v50   ;;  %v1338_v10 = vpack.c.bf16 %v1078_v51, %v1077_v13  ;;  %v1011_v56 = vadd.f32 %v2015_v34, %v988_v24  ;;  %v994_v58 = vmul.f32 %v1997_v18, %v910_v31  ;;  %v889_v20 = vadd.f32 %v1536_v40, %v1941_v7 }
 0x146   :  { %1366 = vst [vmem:[%s2107_s5 + $0x28] sm:$0xff] %v1343_v54   ;;  %1319 = vst [vmem:[%s2107_s5] sm:$0xff] %v1318_v55   ;;  %v1019_v52 = vadd.f32 %v2015_v34, %v996_v32  ;;  %v1009_v43 = vadd.f32 %v2015_v34, %v986_v6  ;;  %v921_v59 = vadd.f32 %v1544_v46, %v1992_v16  ;;  %v1298_v62 = vunpack.c.h.bf16 %v1978_v11 }
 0x147   :  { %v881_v60 = vadd.f32 %v880_v47, %v1937_v57  ;;  %1365 = vst [vmem:[%s2107_s5 + $0x20] sm:$0xff] %v1338_v10   ;;  %v1017_v7 = vadd.f32 %v2015_v34, %v994_v58  ;;  %v989_v61 = vmul.f32 %v1997_v18, %v889_v20  ;;  %v913_v37 = vadd.f32 %v912_v28, %v1951_v53 }
 0x148   :  { %v997_v29 = vmul.f32 %v1997_v18, %v921_v59  ;;  %v1314_v63 = vunpack.c.h.bf16 %v1985_v14  ;;  %v1294_v57 = vunpack.c.h.bf16 %v1990_v15  ;;  %v1059_v0 = vadd.f32 %v1297_v33, %v1011_v56 }
 0x149   :  { %v987_v16 = vmul.f32 %v1997_v18, %v881_v60  ;;  %v1012_v1 = vadd.f32 %v2015_v34, %v989_v61  ;;  %v995_v2 = vmul.f32 %v1997_v18, %v913_v37  ;;  %v1310_v3 = vunpack.c.h.bf16 %v2006_v25 }
 0x14a   :  { %v1067_v53 = vadd.f32 %v1313_v42, %v1019_v52  ;;  %v1057_v21 = vadd.f32 %v1293_v41, %v1009_v43  ;;  %v1020_v4 = vadd.f32 %v2015_v34, %v997_v29  ;;  %v1065_v11 = vadd.f32 %v1309_v49, %v1017_v7 }
 0x14b   :  { %v1010_v5 = vadd.f32 %v2015_v34, %v987_v16  ;;  %v1060_v33 = vadd.f32 %v1298_v62, %v1012_v1  ;;  %v1018_v8 = vadd.f32 %v2015_v34, %v995_v2  ;;  %v1075_v17 = vmax.f32 %v1059_v0, 0.0 }
 0x14c   :  { %v1068_v9 = vadd.f32 %v1314_v63, %v1020_v4  ;;  %v1083_v14 = vmax.f32 %v1067_v53, 0.0  ;;  %v1073_v42 = vmax.f32 %v1057_v21, 0.0  ;;  %v1081_v41 = vmax.f32 %v1065_v11, 0.0 }
 0x14d   :  { %v1058_v18 = vadd.f32 %v1294_v57, %v1010_v5  ;;  %v1076_v26 = vmax.f32 %v1060_v33, 0.0  ;;  %v1066_v12 = vadd.f32 %v1310_v3, %v1018_v8 }
 0x14e   :  { %v1084_v27 = vmax.f32 %v1068_v9, 0.0 }
 0x14f   :  { %v1074_v15 = vmax.f32 %v1058_v18, 0.0  ;;  %v1333_v30 = vpack.c.bf16 %v1076_v26, %v1075_v17  ;;  %v1082_v35 = vmax.f32 %v1066_v12, 0.0 }
 0x150   :  { %v1353_v38 = vpack.c.bf16 %v1084_v27, %v1083_v14 }
 0x151   :  { %v1328_v39 = vpack.c.bf16 %v1074_v15, %v1073_v42  ;;  %1364 = vst [vmem:[%s2107_s5 + $0x18] sm:$0xff] %v1333_v30   ;;  %v1348_v25 = vpack.c.bf16 %v1082_v35, %v1081_v41 }
 0x152   :  { %1368 = vst [vmem:[%s2107_s5 + $0x38] sm:$0xff] %v1353_v38  }
 0x153   :  { %1363 = vst [vmem:[%s2107_s5 + $0x10] sm:$0xff] %v1328_v39   ;;  %1367 = vst [vmem:[%s2107_s5 + $0x30] sm:$0xff] %v1348_v25  }

// kernel: resnet18_baseline_forward.31
= control target key start
LH: loop header
LB: loop body
LE: loop exit
PB: predicated region body
PF: predicated region fallthrough
CT: control target
= control target key end

     0   :  { %s1024_s1 = inlined_call_operand.vmem [shape: bf16[640,128], index: 1, kind: input, shape index: {}]   ;;  %s1025_s0 = inlined_call_operand.vmem [shape: bf16[32,640], index: 0, kind: input, shape index: {}]   ;;  %s1026_s2 = inlined_call_operand.vmem [shape: f32[1,128], index: 2, kind: input, shape index: {}]   ;;  %s1027_s3 = inlined_call_operand.vmem [shape: f32[1,128], index: 3, kind: input, shape index: {}]   ;;  %s1028_s4 = inlined_call_operand.vmem [shape: bf16[32,128], index: 4, kind: output, shape index: {}]  }
   0x1   :  { %v783_v0 = vld [vmem:[%s1024_s1 + $0x40] sm:$0xff]   ;;  %v787_v4 = vld [vmem:[%s1024_s1 + $0x48] sm:$0xff]   ;;  %v791_v8 = vld [vmem:[%s1024_s1 + $0x50] sm:$0xff]  }
   0x2   :  { %v784_v1 = vld [vmem:[%s1024_s1 + $0xc0] sm:$0xff]   ;;  %697 = vmatprep.subr.bf16.mxu0 %v783_v0  ;;  %v788_v5 = vld [vmem:[%s1024_s1 + $0xc8] sm:$0xff]   ;;  %v792_v9 = vld [vmem:[%s1024_s1 + $0xd0] sm:$0xff]  }
   0x3   :  { %v785_v2 = vld [vmem:[%s1024_s1] sm:$0xff]   ;;  %725 = vmatprep.subr.bf16.mxu1 %v784_v1  ;;  %v789_v6 = vld [vmem:[%s1024_s1 + $0x8] sm:$0xff]   ;;  %v793_v10 = vld [vmem:[%s1024_s1 + $0x10] sm:$0xff]  }
   0x4   :  { %v786_v3 = vld [vmem:[%s1024_s1 + $0x80] sm:$0xff]   ;;  %698 = vmatpush3.bf16.msra.mxu0 %v785_v2  ;;  %v790_v7 = vld [vmem:[%s1024_s1 + $0x88] sm:$0xff]   ;;  %v794_v11 = vld [vmem:[%s1024_s1 + $0x90] sm:$0xff]  }
   0x5   :  { %726 = vmatpush3.bf16.msra.mxu1 %v786_v3  ;;  %699 = vmatprep.subr.bf16.mxu0 %v787_v4  ;;  %v795_v12 = vld [vmem:[%s1024_s1 + $0x58] sm:$0xff]   ;;  %v799_v16 = vld [vmem:[%s1024_s1 + $0x60] sm:$0xff]   ;;  %v803_v20 = vld [vmem:[%s1024_s1 + $0x68] sm:$0xff]  }
   0x6   :  { %727 = vmatprep.subr.bf16.mxu1 %v788_v5  ;;  %v796_v13 = vld [vmem:[%s1024_s1 + $0xd8] sm:$0xff]   ;;  %v800_v17 = vld [vmem:[%s1024_s1 + $0xe0] sm:$0xff]   ;;  %v804_v21 = vld [vmem:[%s1024_s1 + $0xe8] sm:$0xff]  }
   0x7   :  { %v797_v14 = vld [vmem:[%s1024_s1 + $0x18] sm:$0xff]   ;;  %v801_v18 = vld [vmem:[%s1024_s1 + $0x20] sm:$0xff]   ;;  %v805_v22 = vld [vmem:[%s1024_s1 + $0x28] sm:$0xff]  }
   0x8   :  { %700 = vmatpush3.bf16.msra.mxu0 %v789_v6  ;;  %v798_v15 = vld [vmem:[%s1024_s1 + $0x98] sm:$0xff]   ;;  %v802_v19 = vld [vmem:[%s1024_s1 + $0xa0] sm:$0xff]   ;;  %v806_v23 = vld [vmem:[%s1024_s1 + $0xa8] sm:$0xff]  }
   0x9   :  { %728 = vmatpush3.bf16.msra.mxu1 %v790_v7  ;;  %701 = vmatprep.subr.bf16.mxu0 %v791_v8  ;;  %v807_v24 = vld [vmem:[%s1024_s1 + $0x70] sm:$0xff]   ;;  %v811_v28 = vld [vmem:[%s1024_s1 + $0x78] sm:$0xff]   ;;  %v820_v35 = vld [vmem:[%s1025_s0 + $0xc] ss:$20 sps:$4 sm:$0xff]  }
   0xa   :  { %729 = vmatprep.subr.bf16.mxu1 %v792_v9  ;;  %v808_v25 = vld [vmem:[%s1024_s1 + $0xf0] sm:$0xff]   ;;  %v812_v29 = vld [vmem:[%s1024_s1 + $0xf8] sm:$0xff]   ;;  %v821_v36 = vld [vmem:[%s1024_s1 + $0x100] sm:$0xff]   ;;  %495 = vmatprep.mubr.bf16.mxu1 %v820_v35 }
   0xb   :  { %v809_v26 = vld [vmem:[%s1024_s1 + $0x30] sm:$0xff]   ;;  %v813_v30 = vld [vmem:[%s1024_s1 + $0x38] sm:$0xff]   ;;  %v822_v37 = vld [vmem:[%s1024_s1 + $0x108] sm:$0xff]  }
   0xc   :  { %702 = vmatpush3.bf16.msra.mxu0 %v793_v10  ;;  %v810_v27 = vld [vmem:[%s1024_s1 + $0xb0] sm:$0xff]   ;;  %v814_v31 = vld [vmem:[%s1024_s1 + $0xb8] sm:$0xff]   ;;  %v826_v39 = vld [vmem:[%s1025_s0 + $0x2c] ss:$20 sps:$4 sm:$0xff]  }
   0xd   :  { %730 = vmatpush3.bf16.msra.mxu1 %v794_v11  ;;  %703 = vmatprep.subr.bf16.mxu0 %v795_v12  ;;  %v815_v32 = vld [vmem:[%s1025_s0] ss:$20 sps:$4 sm:$0xff]   ;;  %v817_v33 = vld [vmem:[%s1025_s0 + $0x4] ss:$20 sps:$4 sm:$0xff]   ;;  %v818_v34 = vld [vmem:[%s1025_s0 + $0x8] ss:$20 sps:$4 sm:$0xff]  }
   0xe   :  { %731 = vmatprep.subr.bf16.mxu1 %v796_v13  ;;  %446 = vmatprep.mubr.bf16.mxu0 %v817_v33  ;;  %v823_v38 = vld [vmem:[%s1024_s1 + $0x110] sm:$0xff]   ;;  %v824_v41 = vld [vmem:[%s1024_s1 + $0x118] sm:$0xff]   ;;  %v825_v45 = vld [vmem:[%s1024_s1 + $0x120] sm:$0xff]  }
   0xf   :  { %v828_v40 = vld [vmem:[%s1025_s0 + $0x34] ss:$20 sps:$4 sm:$0xff]   ;;  %v832_v43 = vld [vmem:[%s1025_s0 + $0x30] ss:$20 sps:$4 sm:$0xff]   ;;  %v834_v48 = vld [vmem:[%s1024_s1 + $0x138] sm:$0xff]  }
  0x10   :  { %704 = vmatpush3.bf16.msra.mxu0 %v797_v14  ;;  %v831_v42 = vld [vmem:[%s1025_s0 + $0x28] ss:$20 sps:$4 sm:$0xff]   ;;  %v835_v44 = vld [vmem:[%s1025_s0 + $0x10] ss:$20 sps:$4 sm:$0xff]   ;;  %v836_v49 = vld [vmem:[%s1025_s0 + $0x38] ss:$20 sps:$4 sm:$0xff]  }
  0x11   :  { %732 = vmatpush3.bf16.msra.mxu1 %v798_v15  ;;  %705 = vmatprep.subr.bf16.mxu0 %v799_v16  ;;  %v830_v46 = vld [vmem:[%s1024_s1 + $0x128] sm:$0xff]   ;;  %v833_v47 = vld [vmem:[%s1024_s1 + $0x130] sm:$0xff]   ;;  %v676_v15 = vld [vmem:[%s1026_s2] ss:$0 sm:$0xff] }
  0x12   :  { %733 = vmatprep.subr.bf16.mxu1 %v800_v17 }
  0x14   :  { %706 = vmatpush3.bf16.msra.mxu0 %v801_v18  ;;  %v677_v18 = vld [vmem:[%s1027_s3] ss:$0 sm:$0xff] }
  0x15   :  { %734 = vmatpush3.bf16.msra.mxu1 %v802_v19  ;;  %707 = vmatprep.subr.bf16.mxu0 %v803_v20 }
  0x16   :  { %735 = vmatprep.subr.bf16.mxu1 %v804_v21 }
  0x18   :  { %708 = vmatpush3.bf16.msra.mxu0 %v805_v22 }
  0x19   :  { %736 = vmatpush3.bf16.msra.mxu1 %v806_v23  ;;  %709 = vmatprep.subr.bf16.mxu0 %v807_v24 }
  0x1a   :  { %737 = vmatprep.subr.bf16.mxu1 %v808_v25 }
  0x1c   :  { %710 = vmatpush3.bf16.msra.mxu0 %v809_v26 }
  0x1d   :  { %738 = vmatpush3.bf16.msra.mxu1 %v810_v27  ;;  %711 = vmatprep.subr.bf16.mxu0 %v811_v28 }
  0x1e   :  { %739 = vmatprep.subr.bf16.mxu1 %v812_v29 }
  0x20   :  { %712 = vmatpush3.bf16.msra.mxu0 %v813_v30 }
  0x21   :  { %740 = vmatpush3.bf16.msra.mxu1 %v814_v31  ;;  %763 = vmatprep.subr.bf16.mxu0 %v821_v36 }
  0x23   :  { %447 = vmatmul.mubr.bf16.vlgmr.msra.gmra.mrb[0].mxu0 %v815_v32 }
  0x24   :  { %496 = vmatmul.mubr.bf16.vlgmr.msra.gmra.mrb[0].mxu1 %v818_v34  ;;  %764 = vmatpush3.bf16.msra.mxu0 %v821_v36 }
  0x25   :  { %765 = vmatprep.subr.bf16.mxu0 %v822_v37  ;;  %454 = vmatprep.mubr.bf16.mxu0 %v826_v39 }
  0x26   :  { %503 = vmatprep.mubr.bf16.mxu1 %v828_v40 }
  0x28   :  { %766 = vmatpush3.bf16.msra.mxu0 %v822_v37 }
  0x29   :  { %767 = vmatprep.subr.bf16.mxu0 %v823_v38 }
  0x2b   :  { %455 = vmatmul.mubr.bf16.gmra.mrb[4].mxu0 %v831_v42 }
  0x2c   :  { %504 = vmatmul.mubr.bf16.gmra.mrb[4].mxu1 %v832_v43  ;;  %768 = vmatpush3.bf16.msra.mxu0 %v823_v38 }
  0x2d   :  { %769 = vmatprep.subr.bf16.mxu0 %v824_v41  ;;  %779 = vmatprep.mubr.bf16.mxu0 %v835_v44 }
  0x30   :  { %770 = vmatpush3.bf16.msra.mxu0 %v824_v41 }
  0x31   :  { %771 = vmatprep.subr.bf16.mxu0 %v825_v45 }
  0x34   :  { %772 = vmatpush3.bf16.msra.mxu0 %v825_v45 }
  0x35   :  { %773 = vmatprep.subr.bf16.mxu0 %v830_v46 }
  0x38   :  { %774 = vmatpush3.bf16.msra.mxu0 %v830_v46 }
  0x39   :  { %775 = vmatprep.subr.bf16.mxu0 %v833_v47 }
  0x3c   :  { %776 = vmatpush3.bf16.msra.mxu0 %v833_v47 }
  0x3d   :  { %777 = vmatprep.subr.bf16.mxu0 %v834_v48 }
  0x40   :  { %778 = vmatpush3.bf16.msra.mxu0 %v834_v48 }
  0x43   :  { %780 = vmatmul.mubr.bf16.vlgmr.msra.gmra.mrb[8].mxu0 %v836_v49 }
  0xf6   :  { %v713_v50 = vpop.f32.mrb[0].mxu0 }
  0xf7   :  { %v741_v51 = vpop.f32.mrb[0].mxu1  ;;  %v714_v52 = vpop.f32.mrb[1].mxu0 }
  0xf8   :  { %v715_v53 = vadd.f32 %v714_v52, %v713_v50  ;;  %v742_v54 = vpop.f32.mrb[1].mxu1  ;;  %v716_v55 = vpop.f32.mrb[2].mxu0 }
  0xf9   :  { %v743_v56 = vadd.f32 %v742_v54, %v741_v51  ;;  %v744_v57 = vpop.f32.mrb[2].mxu1  ;;  %v717_v58 = vpop.f32.mrb[3].mxu0 }
  0xfa   :  { %v718_v59 = vadd.f32 %v717_v58, %v716_v55  ;;  %v745_v60 = vpop.f32.mrb[3].mxu1 }
  0xfb   :  { %v746_v61 = vadd.f32 %v745_v60, %v744_v57  ;;  %v498_v62 = vadd.f32 %v743_v56, %v715_v53 }
  0xfd   :  { %v501_v63 = vadd.f32 %v746_v61, %v718_v59 }
  0xfe   :  { %v719_v0 = vpop.f32.mrb[4].mxu0 }
  0xff   :  { %v747_v1 = vpop.f32.mrb[4].mxu1  ;;  %v720_v2 = vpop.f32.mrb[5].mxu0 }
 0x100   :  { %v721_v3 = vadd.f32 %v720_v2, %v719_v0  ;;  %v748_v4 = vpop.f32.mrb[5].mxu1  ;;  %v722_v5 = vpop.f32.mrb[6].mxu0 }
 0x101   :  { %v749_v6 = vadd.f32 %v748_v4, %v747_v1  ;;  %v750_v7 = vpop.f32.mrb[6].mxu1  ;;  %v723_v8 = vpop.f32.mrb[7].mxu0 }
 0x102   :  { %v724_v9 = vadd.f32 %v723_v8, %v722_v5  ;;  %v751_v10 = vpop.f32.mrb[7].mxu1 }
 0x103   :  { %v752_v11 = vadd.f32 %v751_v10, %v750_v7  ;;  %v506_v12 = vadd.f32 %v749_v6, %v721_v3 }
 0x105   :  { %v509_v13 = vadd.f32 %v752_v11, %v724_v9 }
 0x116   :  { %v781_v14 = vpop.f32.mrb[8].mxu0 }
 0x117   :  { %v555_v16 = vadd.f32 %v781_v14, %v506_v12  ;;  %v546_v17 = vpop.f32.mrb[9].mxu0 }
 0x118   :  { %v547_v19 = vadd.f32 %v546_v17, %v498_v62  ;;  %v782_v20 = vpop.f32.mrb[10].mxu0 }
 0x119   :  { %v585_v21 = vmul.f32 %v676_v15, %v555_v16  ;;  %v558_v22 = vadd.f32 %v782_v20, %v509_v13  ;;  %v549_v23 = vpop.f32.mrb[11].mxu0 }
 0x11a   :  { %v583_v24 = vmul.f32 %v676_v15, %v547_v19  ;;  %v550_v25 = vadd.f32 %v549_v23, %v501_v63 }
 0x11b   :  { %v596_v26 = vadd.f32 %v677_v18, %v585_v21  ;;  %v586_v27 = vmul.f32 %v676_v15, %v558_v22 }
 0x11c   :  { %v594_v28 = vadd.f32 %v677_v18, %v583_v24  ;;  %v584_v29 = vmul.f32 %v676_v15, %v550_v25 }
 0x11d   :  { %v597_v30 = vadd.f32 %v677_v18, %v586_v27  ;;  %v600_v32 = vmax.f32 %v596_v26, 0.0 }
 0x11e   :  { %v595_v31 = vadd.f32 %v677_v18, %v584_v29  ;;  %v598_v34 = vmax.f32 %v594_v28, 0.0 }
 0x11f   :  { %v601_v33 = vmax.f32 %v597_v30, 0.0 }
 0x120   :  { %v599_v35 = vmax.f32 %v595_v31, 0.0 }
 0x121   :  { %v694_v36 = vpack.c.bf16 %v601_v33, %v600_v32 }
 0x122   :  { %v689_v37 = vpack.c.bf16 %v599_v35, %v598_v34 }
 0x123   :  { %696 = vst [vmem:[%s1028_s4 + $0x8] sm:$0xff] %v694_v36  }
 0x124   :  { %690 = vst [vmem:[%s1028_s4] sm:$0xff] %v689_v37  }

// kernel: resnet18_baseline_forward.32
= control target key start
LH: loop header
LB: loop body
LE: loop exit
PB: predicated region body
PF: predicated region fallthrough
CT: control target
= control target key end

     0   :  { %s358_s1 = inlined_call_operand.vmem [shape: bf16[128,128], index: 1, kind: input, shape index: {}]   ;;  %s359_s0 = inlined_call_operand.vmem [shape: bf16[32,128], index: 0, kind: input, shape index: {}]   ;;  %s360_s2 = inlined_call_operand.vmem [shape: f32[1,128], index: 2, kind: input, shape index: {}]   ;;  %s361_s3 = inlined_call_operand.vmem [shape: f32[1,128], index: 3, kind: input, shape index: {}]   ;;  %s362_s4 = inlined_call_operand.vmem [shape: bf16[32,128], index: 4, kind: output, shape index: {}]  }
   0x1   :  { %v281_v0 = vld [vmem:[%s358_s1] sm:$0xff]   ;;  %v282_v1 = vld [vmem:[%s358_s1 + $0x8] sm:$0xff]   ;;  %v283_v2 = vld [vmem:[%s358_s1 + $0x10] sm:$0xff]  }
   0x2   :  { %261 = vmatprep.subr.bf16.mxu0 %v281_v0  ;;  %v284_v3 = vld [vmem:[%s358_s1 + $0x18] sm:$0xff]   ;;  %v289_v4 = vld [vmem:[%s359_s0] sm:$0xff]   ;;  %v286_v6 = vld [vmem:[%s358_s1 + $0x28] sm:$0xff]  }
   0x3   :  { %262 = vmatpush3.bf16.msra.mxu0 %v281_v0  ;;  %277 = vmatprep.mubr.bf16.mxu0 %v289_v4  ;;  %v285_v5 = vld [vmem:[%s358_s1 + $0x20] sm:$0xff]   ;;  %v287_v7 = vld [vmem:[%s358_s1 + $0x30] sm:$0xff]   ;;  %v288_v8 = vld [vmem:[%s358_s1 + $0x38] sm:$0xff]  }
   0x4   :  { %263 = vmatprep.subr.bf16.mxu0 %v282_v1  ;;  %v290_v9 = vld [vmem:[%s359_s0 + $0x8] sm:$0xff]   ;;  %v230_v10 = vld [vmem:[%s360_s2] ss:$0 sm:$0xff] }
   0x5   :  { %v231_v14 = vld [vmem:[%s361_s3] ss:$0 sm:$0xff] }
   0x7   :  { %264 = vmatpush3.bf16.msra.mxu0 %v282_v1 }
   0x8   :  { %265 = vmatprep.subr.bf16.mxu0 %v283_v2 }
   0xb   :  { %266 = vmatpush3.bf16.msra.mxu0 %v283_v2 }
   0xc   :  { %267 = vmatprep.subr.bf16.mxu0 %v284_v3 }
   0xf   :  { %268 = vmatpush3.bf16.msra.mxu0 %v284_v3 }
  0x10   :  { %269 = vmatprep.subr.bf16.mxu0 %v285_v5 }
  0x13   :  { %270 = vmatpush3.bf16.msra.mxu0 %v285_v5 }
  0x14   :  { %271 = vmatprep.subr.bf16.mxu0 %v286_v6 }
  0x17   :  { %272 = vmatpush3.bf16.msra.mxu0 %v286_v6 }
  0x18   :  { %273 = vmatprep.subr.bf16.mxu0 %v287_v7 }
  0x1b   :  { %274 = vmatpush3.bf16.msra.mxu0 %v287_v7 }
  0x1c   :  { %275 = vmatprep.subr.bf16.mxu0 %v288_v8 }
  0x1f   :  { %276 = vmatpush3.bf16.msra.mxu0 %v288_v8 }
  0x22   :  { %278 = vmatmul.mubr.bf16.vlgmr.msra.gmra.mrb[0].mxu0 %v290_v9 }
  0xf5   :  { %v279_v11 = vpop.f32.mrb[0].mxu0 }
  0xf6   :  { %v183_v12 = vmul.f32 %v279_v11, %v230_v10  ;;  %v144_v13 = vpop.f32.mrb[1].mxu0 }
  0xf7   :  { %v181_v15 = vmul.f32 %v230_v10, %v144_v13  ;;  %v280_v16 = vpop.f32.mrb[2].mxu0 }
  0xf8   :  { %v184_v17 = vmul.f32 %v280_v16, %v230_v10  ;;  %v147_v18 = vpop.f32.mrb[3].mxu0  ;;  %v194_v20 = vadd.f32 %v231_v14, %v183_v12 }
  0xf9   :  { %v182_v19 = vmul.f32 %v230_v10, %v147_v18  ;;  %v192_v22 = vadd.f32 %v231_v14, %v181_v15 }
  0xfa   :  { %v195_v21 = vadd.f32 %v231_v14, %v184_v17 }
  0xfb   :  { %v193_v23 = vadd.f32 %v231_v14, %v182_v19 }
  0xfc   :  { %v248_v24 = vpack.c.bf16 %v195_v21, %v194_v20 }
  0xfd   :  { %v243_v25 = vpack.c.bf16 %v193_v23, %v192_v22 }
  0xfe   :  { %250 = vst [vmem:[%s362_s4 + $0x8] sm:$0xff] %v248_v24  }
  0xff   :  { %244 = vst [vmem:[%s362_s4] sm:$0xff] %v243_v25  }

// kernel: resnet18_baseline_forward.33
= control target key start
LH: loop header
LB: loop body
LE: loop exit
PB: predicated region body
PF: predicated region fallthrough
CT: control target
= control target key end

     0   :  { %s1721_s1 = inlined_call_operand.vmem [shape: bf16[1152,128], index: 1, kind: input, shape index: {}]   ;;  %s1722_s0 = inlined_call_operand.vmem [shape: bf16[32,1152], index: 0, kind: input, shape index: {}]   ;;  %s1723_s2 = inlined_call_operand.vmem [shape: f32[1,128], index: 2, kind: input, shape index: {}]   ;;  %s1724_s4 = inlined_call_operand.vmem [shape: bf16[32,128], index: 4, kind: input, shape index: {}]   ;;  %s1725_s3 = inlined_call_operand.vmem [shape: f32[1,128], index: 3, kind: input, shape index: {}]   ;;  %s1726_s5 = inlined_call_operand.vmem [shape: bf16[32,128], index: 5, kind: output, shape index: {}]  }
   0x1   :  { %v1305_v0 = vld [vmem:[%s1721_s1 + $0x40] sm:$0xff]   ;;  %v1309_v4 = vld [vmem:[%s1721_s1 + $0x48] sm:$0xff]   ;;  %v1313_v8 = vld [vmem:[%s1721_s1 + $0x50] sm:$0xff]  }
   0x2   :  { %v1306_v1 = vld [vmem:[%s1721_s1 + $0xc0] sm:$0xff]   ;;  %1163 = vmatprep.subr.bf16.mxu0 %v1305_v0  ;;  %v1310_v5 = vld [vmem:[%s1721_s1 + $0xc8] sm:$0xff]   ;;  %v1314_v9 = vld [vmem:[%s1721_s1 + $0xd0] sm:$0xff]  }
   0x3   :  { %v1307_v2 = vld [vmem:[%s1721_s1] sm:$0xff]   ;;  %1191 = vmatprep.subr.bf16.mxu1 %v1306_v1  ;;  %v1311_v6 = vld [vmem:[%s1721_s1 + $0x8] sm:$0xff]   ;;  %v1315_v10 = vld [vmem:[%s1721_s1 + $0x10] sm:$0xff]  }
   0x4   :  { %v1308_v3 = vld [vmem:[%s1721_s1 + $0x80] sm:$0xff]   ;;  %1164 = vmatpush3.bf16.msra.mxu0 %v1307_v2  ;;  %v1312_v7 = vld [vmem:[%s1721_s1 + $0x88] sm:$0xff]   ;;  %v1316_v11 = vld [vmem:[%s1721_s1 + $0x90] sm:$0xff]  }
   0x5   :  { %1192 = vmatpush3.bf16.msra.mxu1 %v1308_v3  ;;  %1165 = vmatprep.subr.bf16.mxu0 %v1309_v4  ;;  %v1317_v12 = vld [vmem:[%s1721_s1 + $0x58] sm:$0xff]   ;;  %v1321_v16 = vld [vmem:[%s1721_s1 + $0x60] sm:$0xff]   ;;  %v1325_v20 = vld [vmem:[%s1721_s1 + $0x68] sm:$0xff]  }
   0x6   :  { %1193 = vmatprep.subr.bf16.mxu1 %v1310_v5  ;;  %v1318_v13 = vld [vmem:[%s1721_s1 + $0xd8] sm:$0xff]   ;;  %v1322_v17 = vld [vmem:[%s1721_s1 + $0xe0] sm:$0xff]   ;;  %v1326_v21 = vld [vmem:[%s1721_s1 + $0xe8] sm:$0xff]  }
   0x7   :  { %v1319_v14 = vld [vmem:[%s1721_s1 + $0x18] sm:$0xff]   ;;  %v1323_v18 = vld [vmem:[%s1721_s1 + $0x20] sm:$0xff]   ;;  %v1327_v22 = vld [vmem:[%s1721_s1 + $0x28] sm:$0xff]  }
   0x8   :  { %1166 = vmatpush3.bf16.msra.mxu0 %v1311_v6  ;;  %v1320_v15 = vld [vmem:[%s1721_s1 + $0x98] sm:$0xff]   ;;  %v1324_v19 = vld [vmem:[%s1721_s1 + $0xa0] sm:$0xff]   ;;  %v1328_v23 = vld [vmem:[%s1721_s1 + $0xa8] sm:$0xff]  }
   0x9   :  { %1194 = vmatpush3.bf16.msra.mxu1 %v1312_v7  ;;  %1167 = vmatprep.subr.bf16.mxu0 %v1313_v8  ;;  %v1329_v24 = vld [vmem:[%s1721_s1 + $0x70] sm:$0xff]   ;;  %v1333_v28 = vld [vmem:[%s1721_s1 + $0x78] sm:$0xff]   ;;  %v1337_v32 = vld [vmem:[%s1722_s0] ss:$36 sps:$4 sm:$0xff]  }
   0xa   :  { %1195 = vmatprep.subr.bf16.mxu1 %v1314_v9  ;;  %v1330_v25 = vld [vmem:[%s1721_s1 + $0xf0] sm:$0xff]   ;;  %v1334_v29 = vld [vmem:[%s1721_s1 + $0xf8] sm:$0xff]   ;;  %v1339_v33 = vld [vmem:[%s1722_s0 + $0x4] ss:$36 sps:$4 sm:$0xff]  }
   0xb   :  { %v1331_v26 = vld [vmem:[%s1721_s1 + $0x30] sm:$0xff]   ;;  %v1335_v30 = vld [vmem:[%s1721_s1 + $0x38] sm:$0xff]   ;;  %v1340_v34 = vld [vmem:[%s1722_s0 + $0x8] ss:$36 sps:$4 sm:$0xff]   ;;  %753 = vmatprep.mubr.bf16.mxu0 %v1339_v33 }
   0xc   :  { %1168 = vmatpush3.bf16.msra.mxu0 %v1315_v10  ;;  %v1332_v27 = vld [vmem:[%s1721_s1 + $0xb0] sm:$0xff]   ;;  %v1336_v31 = vld [vmem:[%s1721_s1 + $0xb8] sm:$0xff]   ;;  %v1343_v36 = vld [vmem:[%s1721_s1 + $0x140] sm:$0xff]  }
   0xd   :  { %1196 = vmatpush3.bf16.msra.mxu1 %v1316_v11  ;;  %1169 = vmatprep.subr.bf16.mxu0 %v1317_v12  ;;  %v1342_v35 = vld [vmem:[%s1722_s0 + $0xc] ss:$36 sps:$4 sm:$0xff]   ;;  %v1344_v37 = vld [vmem:[%s1721_s1 + $0x100] sm:$0xff]   ;;  %v1355_v48 = vld [vmem:[%s1721_s1 + $0x158] sm:$0xff]  }
   0xe   :  { %1197 = vmatprep.subr.bf16.mxu1 %v1318_v13  ;;  %802 = vmatprep.mubr.bf16.mxu1 %v1342_v35  ;;  %v1345_v38 = vld [vmem:[%s1721_s1 + $0x1c0] sm:$0xff]   ;;  %v1347_v40 = vld [vmem:[%s1721_s1 + $0x148] sm:$0xff]   ;;  %v1351_v44 = vld [vmem:[%s1721_s1 + $0x150] sm:$0xff]  }
   0xf   :  { %v1346_v39 = vld [vmem:[%s1721_s1 + $0x180] sm:$0xff]   ;;  %v1348_v41 = vld [vmem:[%s1721_s1 + $0x108] sm:$0xff]   ;;  %v1352_v45 = vld [vmem:[%s1721_s1 + $0x110] sm:$0xff]  }
  0x10   :  { %1170 = vmatpush3.bf16.msra.mxu0 %v1319_v14  ;;  %v1349_v42 = vld [vmem:[%s1721_s1 + $0x1c8] sm:$0xff]   ;;  %v1353_v46 = vld [vmem:[%s1721_s1 + $0x1d0] sm:$0xff]   ;;  %v1356_v49 = vld [vmem:[%s1721_s1 + $0x118] sm:$0xff]  }
  0x11   :  { %1198 = vmatpush3.bf16.msra.mxu1 %v1320_v15  ;;  %1171 = vmatprep.subr.bf16.mxu0 %v1321_v16  ;;  %v1350_v43 = vld [vmem:[%s1721_s1 + $0x188] sm:$0xff]   ;;  %v1354_v47 = vld [vmem:[%s1721_s1 + $0x190] sm:$0xff]   ;;  %v1357_v50 = vld [vmem:[%s1721_s1 + $0x1d8] sm:$0xff]  }
  0x12   :  { %1199 = vmatprep.subr.bf16.mxu1 %v1322_v17  ;;  %v1358_v51 = vld [vmem:[%s1721_s1 + $0x198] sm:$0xff]   ;;  %v1359_v52 = vld [vmem:[%s1721_s1 + $0x160] sm:$0xff]   ;;  %v1363_v56 = vld [vmem:[%s1721_s1 + $0x168] sm:$0xff]  }
  0x13   :  { %v1360_v53 = vld [vmem:[%s1721_s1 + $0x120] sm:$0xff]   ;;  %v1364_v57 = vld [vmem:[%s1722_s0 + $0x4c] ss:$36 sps:$4 sm:$0xff]   ;;  %v1366_v58 = vld [vmem:[%s1722_s0 + $0x54] ss:$36 sps:$4 sm:$0xff]  }
  0x14   :  { %1172 = vmatpush3.bf16.msra.mxu0 %v1323_v18  ;;  %v1361_v54 = vld [vmem:[%s1721_s1 + $0x1e0] sm:$0xff]   ;;  %v1368_v59 = vld [vmem:[%s1721_s1 + $0x128] sm:$0xff]   ;;  %v1370_v61 = vld [vmem:[%s1722_s0 + $0x50] ss:$36 sps:$4 sm:$0xff]  }
  0x15   :  { %1200 = vmatpush3.bf16.msra.mxu1 %v1324_v19  ;;  %1173 = vmatprep.subr.bf16.mxu0 %v1325_v20  ;;  %v1362_v55 = vld [vmem:[%s1721_s1 + $0x1a0] sm:$0xff]   ;;  %v1369_v60 = vld [vmem:[%s1722_s0 + $0x48] ss:$36 sps:$4 sm:$0xff]   ;;  %v1373_v0 = vld [vmem:[%s1721_s1 + $0x170] sm:$0xff]  }
  0x16   :  { %1201 = vmatprep.subr.bf16.mxu1 %v1326_v21  ;;  %v1371_v62 = vld [vmem:[%s1721_s1 + $0x1e8] sm:$0xff]   ;;  %v1374_v1 = vld [vmem:[%s1721_s1 + $0x130] sm:$0xff]   ;;  %v1377_v4 = vld [vmem:[%s1721_s1 + $0x178] sm:$0xff]  }
  0x17   :  { %v1372_v63 = vld [vmem:[%s1721_s1 + $0x1a8] sm:$0xff]   ;;  %v1375_v2 = vld [vmem:[%s1721_s1 + $0x1f0] sm:$0xff]   ;;  %v1378_v5 = vld [vmem:[%s1721_s1 + $0x138] sm:$0xff]  }
  0x18   :  { %1174 = vmatpush3.bf16.msra.mxu0 %v1327_v22  ;;  %v1376_v3 = vld [vmem:[%s1721_s1 + $0x1b0] sm:$0xff]   ;;  %v1379_v6 = vld [vmem:[%s1721_s1 + $0x1f8] sm:$0xff]   ;;  %v1384_v10 = vld [vmem:[%s1721_s1 + $0x200] sm:$0xff]  }
  0x19   :  { %1202 = vmatpush3.bf16.msra.mxu1 %v1328_v23  ;;  %1175 = vmatprep.subr.bf16.mxu0 %v1329_v24  ;;  %v1380_v7 = vld [vmem:[%s1722_s0 + $0x10] ss:$36 sps:$4 sm:$0xff]   ;;  %v1383_v9 = vld [vmem:[%s1721_s1 + $0x1b8] sm:$0xff]   ;;  %v1388_v13 = vld [vmem:[%s1721_s1 + $0x208] sm:$0xff]  }
  0x1a   :  { %1203 = vmatprep.subr.bf16.mxu1 %v1330_v25  ;;  %v1382_v8 = vld [vmem:[%s1722_s0 + $0x14] ss:$36 sps:$4 sm:$0xff]   ;;  %v1387_v12 = vld [vmem:[%s1722_s0 + $0x1c] ss:$36 sps:$4 sm:$0xff]   ;;  %v1393_v17 = vld [vmem:[%s1722_s0 + $0x64] ss:$36 sps:$4 sm:$0xff]  }
  0x1b   :  { %v1385_v11 = vld [vmem:[%s1722_s0 + $0x18] ss:$36 sps:$4 sm:$0xff]   ;;  %v1392_v16 = vld [vmem:[%s1721_s1 + $0x210] sm:$0xff]   ;;  %v1395_v18 = vld [vmem:[%s1722_s0 + $0x60] ss:$36 sps:$4 sm:$0xff]  }
  0x1c   :  { %1176 = vmatpush3.bf16.msra.mxu0 %v1331_v26  ;;  %v1389_v14 = vld [vmem:[%s1722_s0 + $0x5c] ss:$36 sps:$4 sm:$0xff]   ;;  %v1398_v22 = vld [vmem:[%s1721_s1 + $0x228] sm:$0xff]   ;;  %v1399_v23 = vld [vmem:[%s1721_s1 + $0x230] sm:$0xff]  }
  0x1d   :  { %1204 = vmatpush3.bf16.msra.mxu1 %v1332_v27  ;;  %1177 = vmatprep.subr.bf16.mxu0 %v1333_v28  ;;  %v1391_v15 = vld [vmem:[%s1722_s0 + $0x58] ss:$36 sps:$4 sm:$0xff]   ;;  %v1397_v20 = vld [vmem:[%s1721_s1 + $0x220] sm:$0xff]   ;;  %v1402_v25 = vld [vmem:[%s1722_s0 + $0x68] ss:$36 sps:$4 sm:$0xff]  }
  0x1e   :  { %1205 = vmatprep.subr.bf16.mxu1 %v1334_v29  ;;  %v1396_v19 = vld [vmem:[%s1721_s1 + $0x218] sm:$0xff]   ;;  %v1401_v21 = vld [vmem:[%s1722_s0 + $0x20] ss:$36 sps:$4 sm:$0xff]  }
  0x1f   :  { %v1400_v24 = vld [vmem:[%s1721_s1 + $0x238] sm:$0xff]  }
  0x20   :  { %1178 = vmatpush3.bf16.msra.mxu0 %v1335_v30 }
  0x21   :  { %1206 = vmatpush3.bf16.msra.mxu1 %v1336_v31  ;;  %1219 = vmatprep.subr.bf16.mxu0 %v1343_v36 }
  0x22   :  { %1247 = vmatprep.subr.bf16.mxu1 %v1345_v38 }
  0x23   :  { %754 = vmatmul.mubr.bf16.vlgmr.msra.gmra.mrb[0].mxu0 %v1337_v32 }
  0x24   :  { %803 = vmatmul.mubr.bf16.vlgmr.msra.gmra.mrb[0].mxu1 %v1340_v34  ;;  %1220 = vmatpush3.bf16.msra.mxu0 %v1344_v37 }
  0x25   :  { %1248 = vmatpush3.bf16.msra.mxu1 %v1346_v39  ;;  %1221 = vmatprep.subr.bf16.mxu0 %v1347_v40 }
  0x26   :  { %1249 = vmatprep.subr.bf16.mxu1 %v1349_v42  ;;  %761 = vmatprep.mubr.bf16.mxu0 %v1364_v57 }
  0x27   :  { %810 = vmatprep.mubr.bf16.mxu1 %v1366_v58 }
  0x28   :  { %1222 = vmatpush3.bf16.msra.mxu0 %v1348_v41 }
  0x29   :  { %1250 = vmatpush3.bf16.msra.mxu1 %v1350_v43  ;;  %1223 = vmatprep.subr.bf16.mxu0 %v1351_v44 }
  0x2a   :  { %1251 = vmatprep.subr.bf16.mxu1 %v1353_v46 }
  0x2b   :  { %762 = vmatmul.mubr.bf16.gmra.mrb[4].mxu0 %v1369_v60 }
  0x2c   :  { %1224 = vmatpush3.bf16.msra.mxu0 %v1352_v45  ;;  %811 = vmatmul.mubr.bf16.gmra.mrb[4].mxu1 %v1370_v61 }
  0x2d   :  { %1252 = vmatpush3.bf16.msra.mxu1 %v1354_v47  ;;  %1225 = vmatprep.subr.bf16.mxu0 %v1355_v48 }
  0x2e   :  { %1253 = vmatprep.subr.bf16.mxu1 %v1357_v50  ;;  %851 = vmatprep.mubr.bf16.mxu0 %v1382_v8 }
  0x2f   :  { %900 = vmatprep.mubr.bf16.mxu1 %v1387_v12 }
  0x30   :  { %1226 = vmatpush3.bf16.msra.mxu0 %v1356_v49 }
  0x31   :  { %1254 = vmatpush3.bf16.msra.mxu1 %v1358_v51  ;;  %1227 = vmatprep.subr.bf16.mxu0 %v1359_v52 }
  0x32   :  { %1255 = vmatprep.subr.bf16.mxu1 %v1361_v54 }
  0x34   :  { %1228 = vmatpush3.bf16.msra.mxu0 %v1360_v53 }
  0x35   :  { %1256 = vmatpush3.bf16.msra.mxu1 %v1362_v55  ;;  %1229 = vmatprep.subr.bf16.mxu0 %v1363_v56 }
  0x36   :  { %1257 = vmatprep.subr.bf16.mxu1 %v1371_v62 }
  0x38   :  { %1230 = vmatpush3.bf16.msra.mxu0 %v1368_v59 }
  0x39   :  { %1258 = vmatpush3.bf16.msra.mxu1 %v1372_v63  ;;  %1231 = vmatprep.subr.bf16.mxu0 %v1373_v0 }
  0x3a   :  { %1259 = vmatprep.subr.bf16.mxu1 %v1375_v2 }
  0x3c   :  { %1232 = vmatpush3.bf16.msra.mxu0 %v1374_v1 }
  0x3d   :  { %1260 = vmatpush3.bf16.msra.mxu1 %v1376_v3  ;;  %1233 = vmatprep.subr.bf16.mxu0 %v1377_v4 }
  0x3e   :  { %1261 = vmatprep.subr.bf16.mxu1 %v1379_v6 }
  0x40   :  { %1234 = vmatpush3.bf16.msra.mxu0 %v1378_v5 }
  0x41   :  { %1262 = vmatpush3.bf16.msra.mxu1 %v1383_v9  ;;  %1285 = vmatprep.subr.bf16.mxu0 %v1384_v10 }
  0x43   :  { %852 = vmatmul.mubr.bf16.vlgmr.msra.gmra.mrb[8].mxu0 %v1380_v7 }
  0x44   :  { %1286 = vmatpush3.bf16.msra.mxu0 %v1384_v10  ;;  %901 = vmatmul.mubr.bf16.vlgmr.msra.gmra.mrb[8].mxu1 %v1385_v11 }
  0x45   :  { %1287 = vmatprep.subr.bf16.mxu0 %v1388_v13  ;;  %859 = vmatprep.mubr.bf16.mxu0 %v1389_v14 }
  0x46   :  { %908 = vmatprep.mubr.bf16.mxu1 %v1393_v17 }
  0x48   :  { %1288 = vmatpush3.bf16.msra.mxu0 %v1388_v13 }
  0x49   :  { %1289 = vmatprep.subr.bf16.mxu0 %v1392_v16 }
  0x4b   :  { %860 = vmatmul.mubr.bf16.gmra.mrb[12].mxu0 %v1391_v15 }
  0x4c   :  { %1290 = vmatpush3.bf16.msra.mxu0 %v1392_v16  ;;  %909 = vmatmul.mubr.bf16.gmra.mrb[12].mxu1 %v1395_v18 }
  0x4d   :  { %1291 = vmatprep.subr.bf16.mxu0 %v1396_v19  ;;  %1301 = vmatprep.mubr.bf16.mxu0 %v1401_v21 }
  0x50   :  { %1292 = vmatpush3.bf16.msra.mxu0 %v1396_v19 }
  0x51   :  { %1293 = vmatprep.subr.bf16.mxu0 %v1397_v20 }
  0x54   :  { %1294 = vmatpush3.bf16.msra.mxu0 %v1397_v20 }
  0x55   :  { %1295 = vmatprep.subr.bf16.mxu0 %v1398_v22 }
  0x58   :  { %1296 = vmatpush3.bf16.msra.mxu0 %v1398_v22 }
  0x59   :  { %1297 = vmatprep.subr.bf16.mxu0 %v1399_v23 }
  0x5c   :  { %1298 = vmatpush3.bf16.msra.mxu0 %v1399_v23  ;;  %v1133_v23 = vld [vmem:[%s1723_s2] ss:$0 sm:$0xff] }
  0x5d   :  { %1299 = vmatprep.subr.bf16.mxu0 %v1400_v24 }
  0x60   :  { %1300 = vmatpush3.bf16.msra.mxu0 %v1400_v24  ;;  %v1161_v24 = vld [vmem:[%s1724_s4 + $0x8] sm:$0xff]  }
  0x63   :  { %1302 = vmatmul.mubr.bf16.vlgmr.msra.gmra.mrb[16].mxu0 %v1402_v25 }
  0xf6   :  { %v1179_v26 = vpop.f32.mrb[0].mxu0 }
  0xf7   :  { %v1207_v27 = vpop.f32.mrb[0].mxu1  ;;  %v1180_v28 = vpop.f32.mrb[1].mxu0 }
  0xf8   :  { %v1181_v29 = vadd.f32 %v1180_v28, %v1179_v26  ;;  %v1208_v30 = vpop.f32.mrb[1].mxu1  ;;  %v1182_v31 = vpop.f32.mrb[2].mxu0  ;;  %v1134_v28 = vld [vmem:[%s1725_s3] ss:$0 sm:$0xff] }
  0xf9   :  { %v1209_v32 = vadd.f32 %v1208_v30, %v1207_v27  ;;  %v1210_v33 = vpop.f32.mrb[2].mxu1  ;;  %v1183_v34 = vpop.f32.mrb[3].mxu0  ;;  %v1144_v27 = vld [vmem:[%s1724_s4] sm:$0xff]  }
  0xfa   :  { %v1184_v35 = vadd.f32 %v1183_v34, %v1182_v31  ;;  %v1211_v36 = vpop.f32.mrb[3].mxu1 }
  0xfb   :  { %v805_v37 = vadd.f32 %v1209_v32, %v1181_v29  ;;  %v1212_v38 = vadd.f32 %v1211_v36, %v1210_v33  ;;  %v1149_v32 = vunpack.c.l.bf16 %v1161_v24  ;;  %v1145_v36 = vunpack.c.l.bf16 %v1144_v27 }
  0xfd   :  { %v808_v39 = vadd.f32 %v1212_v38, %v1184_v35 }
  0xfe   :  { %v1185_v40 = vpop.f32.mrb[4].mxu0 }
  0xff   :  { %v1213_v41 = vpop.f32.mrb[4].mxu1  ;;  %v1186_v42 = vpop.f32.mrb[5].mxu0 }
 0x100   :  { %v1214_v43 = vpop.f32.mrb[5].mxu1  ;;  %v1187_v44 = vadd.f32 %v1186_v42, %v1185_v40  ;;  %v1188_v46 = vpop.f32.mrb[6].mxu0  ;;  %v1150_v40 = vunpack.c.h.bf16 %v1161_v24 }
 0x101   :  { %v1215_v45 = vadd.f32 %v1214_v43, %v1213_v41  ;;  %v1216_v47 = vpop.f32.mrb[6].mxu1  ;;  %v1189_v48 = vpop.f32.mrb[7].mxu0  ;;  %v1146_v43 = vunpack.c.h.bf16 %v1144_v27 }
 0x102   :  { %v1217_v49 = vpop.f32.mrb[7].mxu1  ;;  %v1190_v51 = vadd.f32 %v1189_v48, %v1188_v46 }
 0x103   :  { %v813_v50 = vadd.f32 %v1215_v45, %v1187_v44  ;;  %v1218_v52 = vadd.f32 %v1217_v49, %v1216_v47 }
 0x105   :  { %v816_v53 = vadd.f32 %v1218_v52, %v1190_v51 }
 0x116   :  { %v1235_v54 = vpop.f32.mrb[8].mxu0 }
 0x117   :  { %v1236_v55 = vpop.f32.mrb[9].mxu0  ;;  %v1263_v58 = vpop.f32.mrb[8].mxu1 }
 0x118   :  { %v1237_v56 = vadd.f32 %v1236_v55, %v1235_v54  ;;  %v1238_v57 = vpop.f32.mrb[10].mxu0  ;;  %v1264_v62 = vpop.f32.mrb[9].mxu1 }
 0x119   :  { %v1239_v59 = vpop.f32.mrb[11].mxu0  ;;  %v1265_v63 = vadd.f32 %v1264_v62, %v1263_v58  ;;  %v1266_v0 = vpop.f32.mrb[10].mxu1 }
 0x11a   :  { %v854_v60 = vadd.f32 %v1237_v56, %v805_v37  ;;  %v1240_v61 = vadd.f32 %v1239_v59, %v1238_v57  ;;  %v1267_v2 = vpop.f32.mrb[11].mxu1 }
 0x11b   :  { %v1268_v3 = vadd.f32 %v1267_v2, %v1266_v0 }
 0x11c   :  { %v857_v1 = vadd.f32 %v1240_v61, %v808_v39  ;;  %v903_v4 = vadd.f32 %v1265_v63, %v854_v60 }
 0x11e   :  { %v1241_v5 = vpop.f32.mrb[12].mxu0  ;;  %v906_v7 = vadd.f32 %v1268_v3, %v857_v1 }
 0x11f   :  { %v1242_v6 = vpop.f32.mrb[13].mxu0  ;;  %v1269_v10 = vpop.f32.mrb[12].mxu1 }
 0x120   :  { %v1243_v8 = vadd.f32 %v1242_v6, %v1241_v5  ;;  %v1244_v9 = vpop.f32.mrb[14].mxu0  ;;  %v1270_v14 = vpop.f32.mrb[13].mxu1 }
 0x121   :  { %v1245_v11 = vpop.f32.mrb[15].mxu0  ;;  %v1271_v15 = vadd.f32 %v1270_v14, %v1269_v10  ;;  %v1272_v16 = vpop.f32.mrb[14].mxu1 }
 0x122   :  { %v862_v12 = vadd.f32 %v1243_v8, %v813_v50  ;;  %v1246_v13 = vadd.f32 %v1245_v11, %v1244_v9  ;;  %v1273_v18 = vpop.f32.mrb[15].mxu1 }
 0x123   :  { %v1274_v19 = vadd.f32 %v1273_v18, %v1272_v16 }
 0x124   :  { %v865_v17 = vadd.f32 %v1246_v13, %v816_v53  ;;  %v911_v20 = vadd.f32 %v1271_v15, %v862_v12 }
 0x126   :  { %v914_v21 = vadd.f32 %v1274_v19, %v865_v17 }
 0x136   :  { %v1303_v22 = vpop.f32.mrb[16].mxu0 }
 0x137   :  { %v960_v25 = vadd.f32 %v1303_v22, %v911_v20  ;;  %v951_v26 = vpop.f32.mrb[17].mxu0 }
 0x138   :  { %v952_v29 = vadd.f32 %v951_v26, %v903_v4  ;;  %v1304_v30 = vpop.f32.mrb[18].mxu0 }
 0x139   :  { %v990_v31 = vmul.f32 %v1133_v23, %v960_v25  ;;  %v963_v33 = vadd.f32 %v1304_v30, %v914_v21  ;;  %v954_v34 = vpop.f32.mrb[19].mxu0 }
 0x13a   :  { %v988_v35 = vmul.f32 %v1133_v23, %v952_v29  ;;  %v955_v37 = vadd.f32 %v954_v34, %v906_v7 }
 0x13b   :  { %v1001_v38 = vadd.f32 %v1134_v28, %v990_v31  ;;  %v991_v39 = vmul.f32 %v1133_v23, %v963_v33 }
 0x13c   :  { %v999_v41 = vadd.f32 %v1134_v28, %v988_v35  ;;  %v989_v42 = vmul.f32 %v1133_v23, %v955_v37 }
 0x13d   :  { %v1013_v44 = vadd.f32 %v1149_v32, %v1001_v38  ;;  %v1002_v45 = vadd.f32 %v1134_v28, %v991_v39 }
 0x13e   :  { %v1011_v46 = vadd.f32 %v1145_v36, %v999_v41  ;;  %v1000_v47 = vadd.f32 %v1134_v28, %v989_v42 }
 0x13f   :  { %v1014_v48 = vadd.f32 %v1150_v40, %v1002_v45  ;;  %v1017_v50 = vmax.f32 %v1013_v44, 0.0 }
 0x140   :  { %v1012_v49 = vadd.f32 %v1146_v43, %v1000_v47  ;;  %v1015_v52 = vmax.f32 %v1011_v46, 0.0 }
 0x141   :  { %v1018_v51 = vmax.f32 %v1014_v48, 0.0 }
 0x142   :  { %v1016_v53 = vmax.f32 %v1012_v49, 0.0 }
 0x143   :  { %v1159_v54 = vpack.c.bf16 %v1018_v51, %v1017_v50 }
 0x144   :  { %v1154_v55 = vpack.c.bf16 %v1016_v53, %v1015_v52 }
 0x145   :  { %1162 = vst [vmem:[%s1726_s5 + $0x8] sm:$0xff] %v1159_v54  }
 0x146   :  { %1155 = vst [vmem:[%s1726_s5] sm:$0xff] %v1154_v55  }

// kernel: resnet18_baseline_forward.34
= control target key start
LH: loop header
LB: loop body
LE: loop exit
PB: predicated region body
PF: predicated region fallthrough
CT: control target
= control target key end

     0   :  { %s1686_s1 = inlined_call_operand.vmem [shape: bf16[1152,128], index: 1, kind: input, shape index: {}]   ;;  %s1687_s0 = inlined_call_operand.vmem [shape: bf16[32,1152], index: 0, kind: input, shape index: {}]   ;;  %s1688_s2 = inlined_call_operand.vmem [shape: f32[1,128], index: 2, kind: input, shape index: {}]   ;;  %s1689_s3 = inlined_call_operand.vmem [shape: f32[1,128], index: 3, kind: input, shape index: {}]   ;;  %s1690_s4 = inlined_call_operand.vmem [shape: bf16[32,128], index: 4, kind: output, shape index: {}]  }
   0x1   :  { %v1281_v0 = vld [vmem:[%s1686_s1 + $0x40] sm:$0xff]   ;;  %v1285_v4 = vld [vmem:[%s1686_s1 + $0x48] sm:$0xff]   ;;  %v1289_v8 = vld [vmem:[%s1686_s1 + $0x50] sm:$0xff]  }
   0x2   :  { %v1282_v1 = vld [vmem:[%s1686_s1 + $0xc0] sm:$0xff]   ;;  %1139 = vmatprep.subr.bf16.mxu0 %v1281_v0  ;;  %v1286_v5 = vld [vmem:[%s1686_s1 + $0xc8] sm:$0xff]   ;;  %v1290_v9 = vld [vmem:[%s1686_s1 + $0xd0] sm:$0xff]  }
   0x3   :  { %v1283_v2 = vld [vmem:[%s1686_s1] sm:$0xff]   ;;  %1167 = vmatprep.subr.bf16.mxu1 %v1282_v1  ;;  %v1287_v6 = vld [vmem:[%s1686_s1 + $0x8] sm:$0xff]   ;;  %v1291_v10 = vld [vmem:[%s1686_s1 + $0x10] sm:$0xff]  }
   0x4   :  { %v1284_v3 = vld [vmem:[%s1686_s1 + $0x80] sm:$0xff]   ;;  %1140 = vmatpush3.bf16.msra.mxu0 %v1283_v2  ;;  %v1288_v7 = vld [vmem:[%s1686_s1 + $0x88] sm:$0xff]   ;;  %v1292_v11 = vld [vmem:[%s1686_s1 + $0x90] sm:$0xff]  }
   0x5   :  { %1168 = vmatpush3.bf16.msra.mxu1 %v1284_v3  ;;  %1141 = vmatprep.subr.bf16.mxu0 %v1285_v4  ;;  %v1293_v12 = vld [vmem:[%s1686_s1 + $0x58] sm:$0xff]   ;;  %v1297_v16 = vld [vmem:[%s1686_s1 + $0x60] sm:$0xff]   ;;  %v1301_v20 = vld [vmem:[%s1686_s1 + $0x68] sm:$0xff]  }
   0x6   :  { %1169 = vmatprep.subr.bf16.mxu1 %v1286_v5  ;;  %v1294_v13 = vld [vmem:[%s1686_s1 + $0xd8] sm:$0xff]   ;;  %v1298_v17 = vld [vmem:[%s1686_s1 + $0xe0] sm:$0xff]   ;;  %v1302_v21 = vld [vmem:[%s1686_s1 + $0xe8] sm:$0xff]  }
   0x7   :  { %v1295_v14 = vld [vmem:[%s1686_s1 + $0x18] sm:$0xff]   ;;  %v1299_v18 = vld [vmem:[%s1686_s1 + $0x20] sm:$0xff]   ;;  %v1303_v22 = vld [vmem:[%s1686_s1 + $0x28] sm:$0xff]  }
   0x8   :  { %1142 = vmatpush3.bf16.msra.mxu0 %v1287_v6  ;;  %v1296_v15 = vld [vmem:[%s1686_s1 + $0x98] sm:$0xff]   ;;  %v1300_v19 = vld [vmem:[%s1686_s1 + $0xa0] sm:$0xff]   ;;  %v1304_v23 = vld [vmem:[%s1686_s1 + $0xa8] sm:$0xff]  }
   0x9   :  { %1170 = vmatpush3.bf16.msra.mxu1 %v1288_v7  ;;  %1143 = vmatprep.subr.bf16.mxu0 %v1289_v8  ;;  %v1305_v24 = vld [vmem:[%s1686_s1 + $0x70] sm:$0xff]   ;;  %v1309_v28 = vld [vmem:[%s1686_s1 + $0x78] sm:$0xff]   ;;  %v1313_v32 = vld [vmem:[%s1687_s0] ss:$36 sps:$4 sm:$0xff]  }
   0xa   :  { %1171 = vmatprep.subr.bf16.mxu1 %v1290_v9  ;;  %v1306_v25 = vld [vmem:[%s1686_s1 + $0xf0] sm:$0xff]   ;;  %v1310_v29 = vld [vmem:[%s1686_s1 + $0xf8] sm:$0xff]   ;;  %v1315_v33 = vld [vmem:[%s1687_s0 + $0x4] ss:$36 sps:$4 sm:$0xff]  }
   0xb   :  { %v1307_v26 = vld [vmem:[%s1686_s1 + $0x30] sm:$0xff]   ;;  %v1311_v30 = vld [vmem:[%s1686_s1 + $0x38] sm:$0xff]   ;;  %v1316_v34 = vld [vmem:[%s1687_s0 + $0x8] ss:$36 sps:$4 sm:$0xff]   ;;  %750 = vmatprep.mubr.bf16.mxu0 %v1315_v33 }
   0xc   :  { %1144 = vmatpush3.bf16.msra.mxu0 %v1291_v10  ;;  %v1308_v27 = vld [vmem:[%s1686_s1 + $0xb0] sm:$0xff]   ;;  %v1312_v31 = vld [vmem:[%s1686_s1 + $0xb8] sm:$0xff]   ;;  %v1319_v36 = vld [vmem:[%s1686_s1 + $0x140] sm:$0xff]  }
   0xd   :  { %1172 = vmatpush3.bf16.msra.mxu1 %v1292_v11  ;;  %1145 = vmatprep.subr.bf16.mxu0 %v1293_v12  ;;  %v1318_v35 = vld [vmem:[%s1687_s0 + $0xc] ss:$36 sps:$4 sm:$0xff]   ;;  %v1320_v37 = vld [vmem:[%s1686_s1 + $0x100] sm:$0xff]   ;;  %v1331_v48 = vld [vmem:[%s1686_s1 + $0x158] sm:$0xff]  }
   0xe   :  { %1173 = vmatprep.subr.bf16.mxu1 %v1294_v13  ;;  %799 = vmatprep.mubr.bf16.mxu1 %v1318_v35  ;;  %v1321_v38 = vld [vmem:[%s1686_s1 + $0x1c0] sm:$0xff]   ;;  %v1323_v40 = vld [vmem:[%s1686_s1 + $0x148] sm:$0xff]   ;;  %v1327_v44 = vld [vmem:[%s1686_s1 + $0x150] sm:$0xff]  }
   0xf   :  { %v1322_v39 = vld [vmem:[%s1686_s1 + $0x180] sm:$0xff]   ;;  %v1324_v41 = vld [vmem:[%s1686_s1 + $0x108] sm:$0xff]   ;;  %v1328_v45 = vld [vmem:[%s1686_s1 + $0x110] sm:$0xff]  }
  0x10   :  { %1146 = vmatpush3.bf16.msra.mxu0 %v1295_v14  ;;  %v1325_v42 = vld [vmem:[%s1686_s1 + $0x1c8] sm:$0xff]   ;;  %v1329_v46 = vld [vmem:[%s1686_s1 + $0x1d0] sm:$0xff]   ;;  %v1332_v49 = vld [vmem:[%s1686_s1 + $0x118] sm:$0xff]  }
  0x11   :  { %1174 = vmatpush3.bf16.msra.mxu1 %v1296_v15  ;;  %1147 = vmatprep.subr.bf16.mxu0 %v1297_v16  ;;  %v1326_v43 = vld [vmem:[%s1686_s1 + $0x188] sm:$0xff]   ;;  %v1330_v47 = vld [vmem:[%s1686_s1 + $0x190] sm:$0xff]   ;;  %v1333_v50 = vld [vmem:[%s1686_s1 + $0x1d8] sm:$0xff]  }
  0x12   :  { %1175 = vmatprep.subr.bf16.mxu1 %v1298_v17  ;;  %v1334_v51 = vld [vmem:[%s1686_s1 + $0x198] sm:$0xff]   ;;  %v1335_v52 = vld [vmem:[%s1686_s1 + $0x160] sm:$0xff]   ;;  %v1339_v56 = vld [vmem:[%s1686_s1 + $0x168] sm:$0xff]  }
  0x13   :  { %v1336_v53 = vld [vmem:[%s1686_s1 + $0x120] sm:$0xff]   ;;  %v1340_v57 = vld [vmem:[%s1687_s0 + $0x4c] ss:$36 sps:$4 sm:$0xff]   ;;  %v1342_v58 = vld [vmem:[%s1687_s0 + $0x54] ss:$36 sps:$4 sm:$0xff]  }
  0x14   :  { %1148 = vmatpush3.bf16.msra.mxu0 %v1299_v18  ;;  %v1337_v54 = vld [vmem:[%s1686_s1 + $0x1e0] sm:$0xff]   ;;  %v1344_v59 = vld [vmem:[%s1686_s1 + $0x128] sm:$0xff]   ;;  %v1346_v61 = vld [vmem:[%s1687_s0 + $0x50] ss:$36 sps:$4 sm:$0xff]  }
  0x15   :  { %1176 = vmatpush3.bf16.msra.mxu1 %v1300_v19  ;;  %1149 = vmatprep.subr.bf16.mxu0 %v1301_v20  ;;  %v1338_v55 = vld [vmem:[%s1686_s1 + $0x1a0] sm:$0xff]   ;;  %v1345_v60 = vld [vmem:[%s1687_s0 + $0x48] ss:$36 sps:$4 sm:$0xff]   ;;  %v1349_v0 = vld [vmem:[%s1686_s1 + $0x170] sm:$0xff]  }
  0x16   :  { %1177 = vmatprep.subr.bf16.mxu1 %v1302_v21  ;;  %v1347_v62 = vld [vmem:[%s1686_s1 + $0x1e8] sm:$0xff]   ;;  %v1350_v1 = vld [vmem:[%s1686_s1 + $0x130] sm:$0xff]   ;;  %v1353_v4 = vld [vmem:[%s1686_s1 + $0x178] sm:$0xff]  }
  0x17   :  { %v1348_v63 = vld [vmem:[%s1686_s1 + $0x1a8] sm:$0xff]   ;;  %v1351_v2 = vld [vmem:[%s1686_s1 + $0x1f0] sm:$0xff]   ;;  %v1354_v5 = vld [vmem:[%s1686_s1 + $0x138] sm:$0xff]  }
  0x18   :  { %1150 = vmatpush3.bf16.msra.mxu0 %v1303_v22  ;;  %v1352_v3 = vld [vmem:[%s1686_s1 + $0x1b0] sm:$0xff]   ;;  %v1355_v6 = vld [vmem:[%s1686_s1 + $0x1f8] sm:$0xff]   ;;  %v1360_v10 = vld [vmem:[%s1686_s1 + $0x200] sm:$0xff]  }
  0x19   :  { %1178 = vmatpush3.bf16.msra.mxu1 %v1304_v23  ;;  %1151 = vmatprep.subr.bf16.mxu0 %v1305_v24  ;;  %v1356_v7 = vld [vmem:[%s1687_s0 + $0x10] ss:$36 sps:$4 sm:$0xff]   ;;  %v1359_v9 = vld [vmem:[%s1686_s1 + $0x1b8] sm:$0xff]   ;;  %v1364_v13 = vld [vmem:[%s1686_s1 + $0x208] sm:$0xff]  }
  0x1a   :  { %1179 = vmatprep.subr.bf16.mxu1 %v1306_v25  ;;  %v1358_v8 = vld [vmem:[%s1687_s0 + $0x14] ss:$36 sps:$4 sm:$0xff]   ;;  %v1363_v12 = vld [vmem:[%s1687_s0 + $0x1c] ss:$36 sps:$4 sm:$0xff]   ;;  %v1369_v17 = vld [vmem:[%s1687_s0 + $0x64] ss:$36 sps:$4 sm:$0xff]  }
  0x1b   :  { %v1361_v11 = vld [vmem:[%s1687_s0 + $0x18] ss:$36 sps:$4 sm:$0xff]   ;;  %v1368_v16 = vld [vmem:[%s1686_s1 + $0x210] sm:$0xff]   ;;  %v1371_v18 = vld [vmem:[%s1687_s0 + $0x60] ss:$36 sps:$4 sm:$0xff]  }
  0x1c   :  { %1152 = vmatpush3.bf16.msra.mxu0 %v1307_v26  ;;  %v1365_v14 = vld [vmem:[%s1687_s0 + $0x5c] ss:$36 sps:$4 sm:$0xff]   ;;  %v1374_v22 = vld [vmem:[%s1686_s1 + $0x228] sm:$0xff]   ;;  %v1375_v23 = vld [vmem:[%s1686_s1 + $0x230] sm:$0xff]  }
  0x1d   :  { %1180 = vmatpush3.bf16.msra.mxu1 %v1308_v27  ;;  %1153 = vmatprep.subr.bf16.mxu0 %v1309_v28  ;;  %v1367_v15 = vld [vmem:[%s1687_s0 + $0x58] ss:$36 sps:$4 sm:$0xff]   ;;  %v1373_v20 = vld [vmem:[%s1686_s1 + $0x220] sm:$0xff]   ;;  %v1378_v25 = vld [vmem:[%s1687_s0 + $0x68] ss:$36 sps:$4 sm:$0xff]  }
  0x1e   :  { %1181 = vmatprep.subr.bf16.mxu1 %v1310_v29  ;;  %v1372_v19 = vld [vmem:[%s1686_s1 + $0x218] sm:$0xff]   ;;  %v1377_v21 = vld [vmem:[%s1687_s0 + $0x20] ss:$36 sps:$4 sm:$0xff]  }
  0x1f   :  { %v1376_v24 = vld [vmem:[%s1686_s1 + $0x238] sm:$0xff]  }
  0x20   :  { %1154 = vmatpush3.bf16.msra.mxu0 %v1311_v30 }
  0x21   :  { %1182 = vmatpush3.bf16.msra.mxu1 %v1312_v31  ;;  %1195 = vmatprep.subr.bf16.mxu0 %v1319_v36 }
  0x22   :  { %1223 = vmatprep.subr.bf16.mxu1 %v1321_v38 }
  0x23   :  { %751 = vmatmul.mubr.bf16.vlgmr.msra.gmra.mrb[0].mxu0 %v1313_v32 }
  0x24   :  { %800 = vmatmul.mubr.bf16.vlgmr.msra.gmra.mrb[0].mxu1 %v1316_v34  ;;  %1196 = vmatpush3.bf16.msra.mxu0 %v1320_v37 }
  0x25   :  { %1224 = vmatpush3.bf16.msra.mxu1 %v1322_v39  ;;  %1197 = vmatprep.subr.bf16.mxu0 %v1323_v40 }
  0x26   :  { %1225 = vmatprep.subr.bf16.mxu1 %v1325_v42  ;;  %758 = vmatprep.mubr.bf16.mxu0 %v1340_v57 }
  0x27   :  { %807 = vmatprep.mubr.bf16.mxu1 %v1342_v58 }
  0x28   :  { %1198 = vmatpush3.bf16.msra.mxu0 %v1324_v41 }
  0x29   :  { %1226 = vmatpush3.bf16.msra.mxu1 %v1326_v43  ;;  %1199 = vmatprep.subr.bf16.mxu0 %v1327_v44 }
  0x2a   :  { %1227 = vmatprep.subr.bf16.mxu1 %v1329_v46 }
  0x2b   :  { %759 = vmatmul.mubr.bf16.gmra.mrb[4].mxu0 %v1345_v60 }
  0x2c   :  { %1200 = vmatpush3.bf16.msra.mxu0 %v1328_v45  ;;  %808 = vmatmul.mubr.bf16.gmra.mrb[4].mxu1 %v1346_v61 }
  0x2d   :  { %1228 = vmatpush3.bf16.msra.mxu1 %v1330_v47  ;;  %1201 = vmatprep.subr.bf16.mxu0 %v1331_v48 }
  0x2e   :  { %1229 = vmatprep.subr.bf16.mxu1 %v1333_v50  ;;  %848 = vmatprep.mubr.bf16.mxu0 %v1358_v8 }
  0x2f   :  { %897 = vmatprep.mubr.bf16.mxu1 %v1363_v12 }
  0x30   :  { %1202 = vmatpush3.bf16.msra.mxu0 %v1332_v49 }
  0x31   :  { %1230 = vmatpush3.bf16.msra.mxu1 %v1334_v51  ;;  %1203 = vmatprep.subr.bf16.mxu0 %v1335_v52 }
  0x32   :  { %1231 = vmatprep.subr.bf16.mxu1 %v1337_v54 }
  0x34   :  { %1204 = vmatpush3.bf16.msra.mxu0 %v1336_v53 }
  0x35   :  { %1232 = vmatpush3.bf16.msra.mxu1 %v1338_v55  ;;  %1205 = vmatprep.subr.bf16.mxu0 %v1339_v56 }
  0x36   :  { %1233 = vmatprep.subr.bf16.mxu1 %v1347_v62 }
  0x38   :  { %1206 = vmatpush3.bf16.msra.mxu0 %v1344_v59 }
  0x39   :  { %1234 = vmatpush3.bf16.msra.mxu1 %v1348_v63  ;;  %1207 = vmatprep.subr.bf16.mxu0 %v1349_v0 }
  0x3a   :  { %1235 = vmatprep.subr.bf16.mxu1 %v1351_v2 }
  0x3c   :  { %1208 = vmatpush3.bf16.msra.mxu0 %v1350_v1 }
  0x3d   :  { %1236 = vmatpush3.bf16.msra.mxu1 %v1352_v3  ;;  %1209 = vmatprep.subr.bf16.mxu0 %v1353_v4 }
  0x3e   :  { %1237 = vmatprep.subr.bf16.mxu1 %v1355_v6 }
  0x40   :  { %1210 = vmatpush3.bf16.msra.mxu0 %v1354_v5 }
  0x41   :  { %1238 = vmatpush3.bf16.msra.mxu1 %v1359_v9  ;;  %1261 = vmatprep.subr.bf16.mxu0 %v1360_v10 }
  0x43   :  { %849 = vmatmul.mubr.bf16.vlgmr.msra.gmra.mrb[8].mxu0 %v1356_v7 }
  0x44   :  { %1262 = vmatpush3.bf16.msra.mxu0 %v1360_v10  ;;  %898 = vmatmul.mubr.bf16.vlgmr.msra.gmra.mrb[8].mxu1 %v1361_v11 }
  0x45   :  { %1263 = vmatprep.subr.bf16.mxu0 %v1364_v13  ;;  %856 = vmatprep.mubr.bf16.mxu0 %v1365_v14 }
  0x46   :  { %905 = vmatprep.mubr.bf16.mxu1 %v1369_v17 }
  0x48   :  { %1264 = vmatpush3.bf16.msra.mxu0 %v1364_v13 }
  0x49   :  { %1265 = vmatprep.subr.bf16.mxu0 %v1368_v16 }
  0x4b   :  { %857 = vmatmul.mubr.bf16.gmra.mrb[12].mxu0 %v1367_v15 }
  0x4c   :  { %1266 = vmatpush3.bf16.msra.mxu0 %v1368_v16  ;;  %906 = vmatmul.mubr.bf16.gmra.mrb[12].mxu1 %v1371_v18 }
  0x4d   :  { %1267 = vmatprep.subr.bf16.mxu0 %v1372_v19  ;;  %1277 = vmatprep.mubr.bf16.mxu0 %v1377_v21 }
  0x50   :  { %1268 = vmatpush3.bf16.msra.mxu0 %v1372_v19 }
  0x51   :  { %1269 = vmatprep.subr.bf16.mxu0 %v1373_v20 }
  0x54   :  { %1270 = vmatpush3.bf16.msra.mxu0 %v1373_v20 }
  0x55   :  { %1271 = vmatprep.subr.bf16.mxu0 %v1374_v22 }
  0x58   :  { %1272 = vmatpush3.bf16.msra.mxu0 %v1374_v22 }
  0x59   :  { %1273 = vmatprep.subr.bf16.mxu0 %v1375_v23 }
  0x5c   :  { %1274 = vmatpush3.bf16.msra.mxu0 %v1375_v23  ;;  %v1118_v23 = vld [vmem:[%s1688_s2] ss:$0 sm:$0xff] }
  0x5d   :  { %1275 = vmatprep.subr.bf16.mxu0 %v1376_v24 }
  0x60   :  { %1276 = vmatpush3.bf16.msra.mxu0 %v1376_v24 }
  0x63   :  { %1278 = vmatmul.mubr.bf16.vlgmr.msra.gmra.mrb[16].mxu0 %v1378_v25 }
  0xf6   :  { %v1155_v26 = vpop.f32.mrb[0].mxu0 }
  0xf7   :  { %v1183_v27 = vpop.f32.mrb[0].mxu1  ;;  %v1156_v28 = vpop.f32.mrb[1].mxu0 }
  0xf8   :  { %v1157_v29 = vadd.f32 %v1156_v28, %v1155_v26  ;;  %v1184_v30 = vpop.f32.mrb[1].mxu1  ;;  %v1158_v31 = vpop.f32.mrb[2].mxu0  ;;  %v1119_v26 = vld [vmem:[%s1689_s3] ss:$0 sm:$0xff] }
  0xf9   :  { %v1185_v32 = vadd.f32 %v1184_v30, %v1183_v27  ;;  %v1186_v33 = vpop.f32.mrb[2].mxu1  ;;  %v1159_v34 = vpop.f32.mrb[3].mxu0 }
  0xfa   :  { %v1160_v35 = vadd.f32 %v1159_v34, %v1158_v31  ;;  %v1187_v36 = vpop.f32.mrb[3].mxu1 }
  0xfb   :  { %v802_v37 = vadd.f32 %v1185_v32, %v1157_v29  ;;  %v1188_v38 = vadd.f32 %v1187_v36, %v1186_v33 }
  0xfd   :  { %v805_v39 = vadd.f32 %v1188_v38, %v1160_v35 }
  0xfe   :  { %v1161_v40 = vpop.f32.mrb[4].mxu0 }
  0xff   :  { %v1189_v41 = vpop.f32.mrb[4].mxu1  ;;  %v1162_v42 = vpop.f32.mrb[5].mxu0 }
 0x100   :  { %v1190_v43 = vpop.f32.mrb[5].mxu1  ;;  %v1163_v44 = vadd.f32 %v1162_v42, %v1161_v40  ;;  %v1164_v46 = vpop.f32.mrb[6].mxu0 }
 0x101   :  { %v1191_v45 = vadd.f32 %v1190_v43, %v1189_v41  ;;  %v1192_v47 = vpop.f32.mrb[6].mxu1  ;;  %v1165_v48 = vpop.f32.mrb[7].mxu0 }
 0x102   :  { %v1193_v49 = vpop.f32.mrb[7].mxu1  ;;  %v1166_v51 = vadd.f32 %v1165_v48, %v1164_v46 }
 0x103   :  { %v810_v50 = vadd.f32 %v1191_v45, %v1163_v44  ;;  %v1194_v52 = vadd.f32 %v1193_v49, %v1192_v47 }
 0x105   :  { %v813_v53 = vadd.f32 %v1194_v52, %v1166_v51 }
 0x116   :  { %v1211_v54 = vpop.f32.mrb[8].mxu0 }
 0x117   :  { %v1212_v55 = vpop.f32.mrb[9].mxu0  ;;  %v1239_v58 = vpop.f32.mrb[8].mxu1 }
 0x118   :  { %v1213_v56 = vadd.f32 %v1212_v55, %v1211_v54  ;;  %v1214_v57 = vpop.f32.mrb[10].mxu0  ;;  %v1240_v62 = vpop.f32.mrb[9].mxu1 }
 0x119   :  { %v1215_v59 = vpop.f32.mrb[11].mxu0  ;;  %v1241_v63 = vadd.f32 %v1240_v62, %v1239_v58  ;;  %v1242_v0 = vpop.f32.mrb[10].mxu1 }
 0x11a   :  { %v851_v60 = vadd.f32 %v1213_v56, %v802_v37  ;;  %v1216_v61 = vadd.f32 %v1215_v59, %v1214_v57  ;;  %v1243_v2 = vpop.f32.mrb[11].mxu1 }
 0x11b   :  { %v1244_v3 = vadd.f32 %v1243_v2, %v1242_v0 }
 0x11c   :  { %v854_v1 = vadd.f32 %v1216_v61, %v805_v39  ;;  %v900_v4 = vadd.f32 %v1241_v63, %v851_v60 }
 0x11e   :  { %v1217_v5 = vpop.f32.mrb[12].mxu0  ;;  %v903_v7 = vadd.f32 %v1244_v3, %v854_v1 }
 0x11f   :  { %v1218_v6 = vpop.f32.mrb[13].mxu0  ;;  %v1245_v10 = vpop.f32.mrb[12].mxu1 }
 0x120   :  { %v1219_v8 = vadd.f32 %v1218_v6, %v1217_v5  ;;  %v1220_v9 = vpop.f32.mrb[14].mxu0  ;;  %v1246_v14 = vpop.f32.mrb[13].mxu1 }
 0x121   :  { %v1221_v11 = vpop.f32.mrb[15].mxu0  ;;  %v1247_v15 = vadd.f32 %v1246_v14, %v1245_v10  ;;  %v1248_v16 = vpop.f32.mrb[14].mxu1 }
 0x122   :  { %v859_v12 = vadd.f32 %v1219_v8, %v810_v50  ;;  %v1222_v13 = vadd.f32 %v1221_v11, %v1220_v9  ;;  %v1249_v18 = vpop.f32.mrb[15].mxu1 }
 0x123   :  { %v1250_v19 = vadd.f32 %v1249_v18, %v1248_v16 }
 0x124   :  { %v862_v17 = vadd.f32 %v1222_v13, %v813_v53  ;;  %v908_v20 = vadd.f32 %v1247_v15, %v859_v12 }
 0x126   :  { %v911_v21 = vadd.f32 %v1250_v19, %v862_v17 }
 0x136   :  { %v1279_v22 = vpop.f32.mrb[16].mxu0 }
 0x137   :  { %v957_v24 = vadd.f32 %v1279_v22, %v908_v20  ;;  %v948_v25 = vpop.f32.mrb[17].mxu0 }
 0x138   :  { %v949_v27 = vadd.f32 %v948_v25, %v900_v4  ;;  %v1280_v28 = vpop.f32.mrb[18].mxu0 }
 0x139   :  { %v987_v29 = vmul.f32 %v1118_v23, %v957_v24  ;;  %v960_v30 = vadd.f32 %v1280_v28, %v911_v21  ;;  %v951_v31 = vpop.f32.mrb[19].mxu0 }
 0x13a   :  { %v985_v32 = vmul.f32 %v1118_v23, %v949_v27  ;;  %v952_v33 = vadd.f32 %v951_v31, %v903_v7 }
 0x13b   :  { %v998_v34 = vadd.f32 %v1119_v26, %v987_v29  ;;  %v988_v35 = vmul.f32 %v1118_v23, %v960_v30 }
 0x13c   :  { %v996_v36 = vadd.f32 %v1119_v26, %v985_v32  ;;  %v986_v37 = vmul.f32 %v1118_v23, %v952_v33 }
 0x13d   :  { %v999_v38 = vadd.f32 %v1119_v26, %v988_v35  ;;  %v1002_v40 = vmax.f32 %v998_v34, 0.0 }
 0x13e   :  { %v997_v39 = vadd.f32 %v1119_v26, %v986_v37  ;;  %v1000_v42 = vmax.f32 %v996_v36, 0.0 }
 0x13f   :  { %v1003_v41 = vmax.f32 %v999_v38, 0.0 }
 0x140   :  { %v1001_v43 = vmax.f32 %v997_v39, 0.0 }
 0x141   :  { %v1136_v44 = vpack.c.bf16 %v1003_v41, %v1002_v40 }
 0x142   :  { %v1131_v45 = vpack.c.bf16 %v1001_v43, %v1000_v42 }
 0x143   :  { %1138 = vst [vmem:[%s1690_s4 + $0x8] sm:$0xff] %v1136_v44  }
 0x144   :  { %1132 = vst [vmem:[%s1690_s4] sm:$0xff] %v1131_v45  }

// kernel: resnet18_baseline_forward.36
= control target key start
LH: loop header
LB: loop body
LE: loop exit
PB: predicated region body
PF: predicated region fallthrough
CT: control target
= control target key end

     0   :  { %s2134_s1 = inlined_call_operand.vmem [shape: bf16[1152,256], index: 1, kind: input, shape index: {}]   ;;  %s2135_s0 = inlined_call_operand.vmem [shape: bf16[16,1152], index: 0, kind: input, shape index: {}]   ;;  %s2136_s2 = inlined_call_operand.vmem [shape: f32[1,256], index: 2, kind: input, shape index: {}]   ;;  %s2137_s3 = inlined_call_operand.vmem [shape: f32[1,256], index: 3, kind: input, shape index: {}]   ;;  %s2138_s4 = inlined_call_operand.vmem [shape: bf16[16,256], index: 4, kind: output, shape index: {}]  }
   0x1   :  { %v1408_v0 = vld [vmem:[%s2134_s1 + $0x4] ss:$8 sps:$4 sm:$0xff]   ;;  %v1412_v2 = vld [vmem:[%s2134_s1] ss:$8 sps:$4 sm:$0xff]   ;;  %v1414_v4 = vld [vmem:[%s2134_s1 + $0x14] ss:$8 sps:$4 sm:$0xff]  }
   0x2   :  { %v1410_v1 = vld [vmem:[%s2134_s1 + $0x204] ss:$8 sps:$4 sm:$0xff]   ;;  %950 = vmatprep.subr.bf16.mxu1 %v1408_v0  ;;  %v1413_v3 = vld [vmem:[%s2134_s1 + $0x200] ss:$8 sps:$4 sm:$0xff]   ;;  %v1416_v5 = vld [vmem:[%s2134_s1 + $0x214] ss:$8 sps:$4 sm:$0xff]  }
   0x3   :  { %1036 = vmatprep.subr.bf16.mxu0 %v1410_v1  ;;  %951 = vmatpush1.bf16.msra.mxu1 %v1412_v2  ;;  %v1418_v6 = vld [vmem:[%s2134_s1 + $0x10] ss:$8 sps:$4 sm:$0xff]   ;;  %v1420_v8 = vld [vmem:[%s2134_s1 + $0x24] ss:$8 sps:$4 sm:$0xff]   ;;  %v1424_v10 = vld [vmem:[%s2134_s1 + $0x20] ss:$8 sps:$4 sm:$0xff]  }
   0x4   :  { %1037 = vmatpush1.bf16.msra.mxu0 %v1413_v3  ;;  %952 = vmatprep.subr.bf16.mxu1 %v1414_v4  ;;  %v1419_v7 = vld [vmem:[%s2134_s1 + $0x210] ss:$8 sps:$4 sm:$0xff]   ;;  %v1422_v9 = vld [vmem:[%s2134_s1 + $0x224] ss:$8 sps:$4 sm:$0xff]   ;;  %v1425_v11 = vld [vmem:[%s2134_s1 + $0x220] ss:$8 sps:$4 sm:$0xff]  }
   0x5   :  { %1038 = vmatprep.subr.bf16.mxu0 %v1416_v5  ;;  %v1426_v12 = vld [vmem:[%s2134_s1 + $0x34] ss:$8 sps:$4 sm:$0xff]   ;;  %v1430_v14 = vld [vmem:[%s2134_s1 + $0x30] ss:$8 sps:$4 sm:$0xff]   ;;  %v1432_v16 = vld [vmem:[%s2134_s1 + $0x44] ss:$8 sps:$4 sm:$0xff]  }
   0x6   :  { %v1428_v13 = vld [vmem:[%s2134_s1 + $0x234] ss:$8 sps:$4 sm:$0xff]   ;;  %v1431_v15 = vld [vmem:[%s2134_s1 + $0x230] ss:$8 sps:$4 sm:$0xff]   ;;  %v1434_v17 = vld [vmem:[%s2134_s1 + $0x244] ss:$8 sps:$4 sm:$0xff]  }
   0x7   :  { %953 = vmatpush1.bf16.msra.mxu1 %v1418_v6  ;;  %v1436_v18 = vld [vmem:[%s2134_s1 + $0x40] ss:$8 sps:$4 sm:$0xff]   ;;  %v1438_v20 = vld [vmem:[%s2134_s1 + $0x54] ss:$8 sps:$4 sm:$0xff]   ;;  %v1442_v22 = vld [vmem:[%s2134_s1 + $0x50] ss:$8 sps:$4 sm:$0xff]  }
   0x8   :  { %1039 = vmatpush1.bf16.msra.mxu0 %v1419_v7  ;;  %954 = vmatprep.subr.bf16.mxu1 %v1420_v8  ;;  %v1437_v19 = vld [vmem:[%s2134_s1 + $0x240] ss:$8 sps:$4 sm:$0xff]   ;;  %v1440_v21 = vld [vmem:[%s2134_s1 + $0x254] ss:$8 sps:$4 sm:$0xff]   ;;  %v1443_v23 = vld [vmem:[%s2134_s1 + $0x250] ss:$8 sps:$4 sm:$0xff]  }
   0x9   :  { %1040 = vmatprep.subr.bf16.mxu0 %v1422_v9  ;;  %v1444_v24 = vld [vmem:[%s2134_s1 + $0x64] ss:$8 sps:$4 sm:$0xff]   ;;  %v1448_v26 = vld [vmem:[%s2134_s1 + $0x60] ss:$8 sps:$4 sm:$0xff]   ;;  %v1450_v28 = vld [vmem:[%s2134_s1 + $0x74] ss:$8 sps:$4 sm:$0xff]  }
   0xa   :  { %v1446_v25 = vld [vmem:[%s2134_s1 + $0x264] ss:$8 sps:$4 sm:$0xff]   ;;  %v1449_v27 = vld [vmem:[%s2134_s1 + $0x260] ss:$8 sps:$4 sm:$0xff]   ;;  %v1452_v29 = vld [vmem:[%s2134_s1 + $0x274] ss:$8 sps:$4 sm:$0xff]  }
   0xb   :  { %955 = vmatpush1.bf16.msra.mxu1 %v1424_v10  ;;  %v1454_v30 = vld [vmem:[%s2134_s1 + $0x70] ss:$8 sps:$4 sm:$0xff]   ;;  %v1456_v32 = vld [vmem:[%s2134_s1 + $0x84] ss:$8 sps:$4 sm:$0xff]   ;;  %v1460_v34 = vld [vmem:[%s2134_s1 + $0x80] ss:$8 sps:$4 sm:$0xff]  }
   0xc   :  { %1041 = vmatpush1.bf16.msra.mxu0 %v1425_v11  ;;  %956 = vmatprep.subr.bf16.mxu1 %v1426_v12  ;;  %v1455_v31 = vld [vmem:[%s2134_s1 + $0x270] ss:$8 sps:$4 sm:$0xff]   ;;  %v1458_v33 = vld [vmem:[%s2134_s1 + $0x284] ss:$8 sps:$4 sm:$0xff]   ;;  %v1461_v35 = vld [vmem:[%s2134_s1 + $0x280] ss:$8 sps:$4 sm:$0xff]  }
   0xd   :  { %1042 = vmatprep.subr.bf16.mxu0 %v1428_v13  ;;  %v1462_v36 = vld [vmem:[%s2134_s1 + $0x94] ss:$8 sps:$4 sm:$0xff]   ;;  %v1466_v38 = vld [vmem:[%s2134_s1 + $0x90] ss:$8 sps:$4 sm:$0xff]   ;;  %v1468_v40 = vld [vmem:[%s2134_s1 + $0xa4] ss:$8 sps:$4 sm:$0xff]  }
   0xe   :  { %v1464_v37 = vld [vmem:[%s2134_s1 + $0x294] ss:$8 sps:$4 sm:$0xff]   ;;  %v1467_v39 = vld [vmem:[%s2134_s1 + $0x290] ss:$8 sps:$4 sm:$0xff]   ;;  %v1470_v41 = vld [vmem:[%s2134_s1 + $0x2a4] ss:$8 sps:$4 sm:$0xff]  }
   0xf   :  { %957 = vmatpush1.bf16.msra.mxu1 %v1430_v14  ;;  %v1472_v42 = vld [vmem:[%s2134_s1 + $0xa0] ss:$8 sps:$4 sm:$0xff]   ;;  %v1474_v44 = vld [vmem:[%s2134_s1 + $0xb4] ss:$8 sps:$4 sm:$0xff]   ;;  %v1478_v46 = vld [vmem:[%s2134_s1 + $0xb0] ss:$8 sps:$4 sm:$0xff]  }
  0x10   :  { %1043 = vmatpush1.bf16.msra.mxu0 %v1431_v15  ;;  %958 = vmatprep.subr.bf16.mxu1 %v1432_v16  ;;  %v1473_v43 = vld [vmem:[%s2134_s1 + $0x2a0] ss:$8 sps:$4 sm:$0xff]   ;;  %v1476_v45 = vld [vmem:[%s2134_s1 + $0x2b4] ss:$8 sps:$4 sm:$0xff]   ;;  %v1479_v47 = vld [vmem:[%s2134_s1 + $0x2b0] ss:$8 sps:$4 sm:$0xff]  }
  0x11   :  { %1044 = vmatprep.subr.bf16.mxu0 %v1434_v17  ;;  %v1506_v48 = vld [vmem:[%s2135_s0 + $0x4] ss:$36 sps:$4 sm:$0xff]   ;;  %v1512_v51 = vld [vmem:[%s2135_s0 + $0x14] ss:$36 sps:$4 sm:$0xff]  }
  0x12   :  { %v1480_v49 = vld [vmem:[%s2134_s1 + $0xc4] ss:$8 sps:$4 sm:$0xff]   ;;  %982 = vmatprep.mubr.bf16.mxu1 %v1506_v48  ;;  %v1484_v52 = vld [vmem:[%s2134_s1 + $0xc0] ss:$8 sps:$4 sm:$0xff]   ;;  %v1486_v54 = vld [vmem:[%s2134_s1 + $0xd4] ss:$8 sps:$4 sm:$0xff]   ;;  %1068 = vmatprep.mubr.bf16.mxu0 %v1512_v51 }
  0x13   :  { %959 = vmatpush1.bf16.msra.mxu1 %v1436_v18  ;;  %v1482_v50 = vld [vmem:[%s2134_s1 + $0x2c4] ss:$8 sps:$4 sm:$0xff]   ;;  %v1485_v53 = vld [vmem:[%s2134_s1 + $0x2c0] ss:$8 sps:$4 sm:$0xff]   ;;  %v1488_v55 = vld [vmem:[%s2134_s1 + $0x2d4] ss:$8 sps:$4 sm:$0xff]  }
  0x14   :  { %1045 = vmatpush1.bf16.msra.mxu0 %v1437_v19  ;;  %960 = vmatprep.subr.bf16.mxu1 %v1438_v20  ;;  %v1490_v56 = vld [vmem:[%s2134_s1 + $0xd0] ss:$8 sps:$4 sm:$0xff]   ;;  %v1492_v58 = vld [vmem:[%s2134_s1 + $0xe4] ss:$8 sps:$4 sm:$0xff]   ;;  %v1496_v60 = vld [vmem:[%s2134_s1 + $0xe0] ss:$8 sps:$4 sm:$0xff]  }
  0x15   :  { %1046 = vmatprep.subr.bf16.mxu0 %v1440_v21  ;;  %v1491_v57 = vld [vmem:[%s2134_s1 + $0x2d0] ss:$8 sps:$4 sm:$0xff]   ;;  %v1494_v59 = vld [vmem:[%s2134_s1 + $0x2e4] ss:$8 sps:$4 sm:$0xff]   ;;  %v1497_v61 = vld [vmem:[%s2134_s1 + $0x2e0] ss:$8 sps:$4 sm:$0xff]  }
  0x16   :  { %v1498_v62 = vld [vmem:[%s2134_s1 + $0xf4] ss:$8 sps:$4 sm:$0xff]   ;;  %v1502_v0 = vld [vmem:[%s2134_s1 + $0xf0] ss:$8 sps:$4 sm:$0xff]   ;;  %v1509_v2 = vld [vmem:[%s2134_s1 + $0x104] ss:$8 sps:$4 sm:$0xff]  }
  0x17   :  { %961 = vmatpush1.bf16.msra.mxu1 %v1442_v22  ;;  %v1500_v63 = vld [vmem:[%s2134_s1 + $0x2f4] ss:$8 sps:$4 sm:$0xff]   ;;  %v1503_v1 = vld [vmem:[%s2134_s1 + $0x2f0] ss:$8 sps:$4 sm:$0xff]   ;;  %v1515_v3 = vld [vmem:[%s2134_s1 + $0x304] ss:$8 sps:$4 sm:$0xff]  }
  0x18   :  { %1047 = vmatpush1.bf16.msra.mxu0 %v1443_v23  ;;  %962 = vmatprep.subr.bf16.mxu1 %v1444_v24  ;;  %v1504_v4 = vld [vmem:[%s2135_s0] ss:$36 sps:$4 sm:$0xff]   ;;  %v1510_v6 = vld [vmem:[%s2135_s0 + $0x10] ss:$36 sps:$4 sm:$0xff]  }
  0x19   :  { %1048 = vmatprep.subr.bf16.mxu0 %v1446_v25  ;;  %v1507_v5 = vld [vmem:[%s2134_s1 + $0x100] ss:$8 sps:$4 sm:$0xff]   ;;  %v1518_v8 = vld [vmem:[%s2134_s1 + $0x114] ss:$8 sps:$4 sm:$0xff]   ;;  %v1516_v10 = vld [vmem:[%s2134_s1 + $0x110] ss:$8 sps:$4 sm:$0xff]  }
  0x1a   :  { %v1513_v7 = vld [vmem:[%s2134_s1 + $0x300] ss:$8 sps:$4 sm:$0xff]   ;;  %v1521_v9 = vld [vmem:[%s2134_s1 + $0x314] ss:$8 sps:$4 sm:$0xff]   ;;  %v1519_v11 = vld [vmem:[%s2134_s1 + $0x310] ss:$8 sps:$4 sm:$0xff]  }
  0x1b   :  { %963 = vmatpush1.bf16.msra.mxu1 %v1448_v26  ;;  %v1524_v12 = vld [vmem:[%s2134_s1 + $0x124] ss:$8 sps:$4 sm:$0xff]   ;;  %v1522_v14 = vld [vmem:[%s2134_s1 + $0x120] ss:$8 sps:$4 sm:$0xff]   ;;  %v1530_v16 = vld [vmem:[%s2134_s1 + $0x134] ss:$8 sps:$4 sm:$0xff]  }
  0x1c   :  { %1049 = vmatpush1.bf16.msra.mxu0 %v1449_v27  ;;  %964 = vmatprep.subr.bf16.mxu1 %v1450_v28  ;;  %v1527_v13 = vld [vmem:[%s2134_s1 + $0x324] ss:$8 sps:$4 sm:$0xff]   ;;  %v1525_v15 = vld [vmem:[%s2134_s1 + $0x320] ss:$8 sps:$4 sm:$0xff]   ;;  %v1533_v17 = vld [vmem:[%s2134_s1 + $0x334] ss:$8 sps:$4 sm:$0xff]  }
  0x1d   :  { %1050 = vmatprep.subr.bf16.mxu0 %v1452_v29  ;;  %v1528_v18 = vld [vmem:[%s2134_s1 + $0x130] ss:$8 sps:$4 sm:$0xff]   ;;  %v1536_v20 = vld [vmem:[%s2134_s1 + $0x144] ss:$8 sps:$4 sm:$0xff]   ;;  %v1534_v22 = vld [vmem:[%s2134_s1 + $0x140] ss:$8 sps:$4 sm:$0xff]  }
  0x1e   :  { %v1531_v19 = vld [vmem:[%s2134_s1 + $0x330] ss:$8 sps:$4 sm:$0xff]   ;;  %v1539_v21 = vld [vmem:[%s2134_s1 + $0x344] ss:$8 sps:$4 sm:$0xff]   ;;  %v1537_v23 = vld [vmem:[%s2134_s1 + $0x340] ss:$8 sps:$4 sm:$0xff]  }
  0x1f   :  { %965 = vmatpush1.bf16.msra.mxu1 %v1454_v30  ;;  %v1542_v24 = vld [vmem:[%s2134_s1 + $0x154] ss:$8 sps:$4 sm:$0xff]   ;;  %v1540_v26 = vld [vmem:[%s2134_s1 + $0x150] ss:$8 sps:$4 sm:$0xff]   ;;  %v1548_v28 = vld [vmem:[%s2134_s1 + $0x164] ss:$8 sps:$4 sm:$0xff]  }
  0x20   :  { %1051 = vmatpush1.bf16.msra.mxu0 %v1455_v31  ;;  %966 = vmatprep.subr.bf16.mxu1 %v1456_v32  ;;  %v1545_v25 = vld [vmem:[%s2134_s1 + $0x354] ss:$8 sps:$4 sm:$0xff]   ;;  %v1543_v27 = vld [vmem:[%s2134_s1 + $0x350] ss:$8 sps:$4 sm:$0xff]   ;;  %v1551_v29 = vld [vmem:[%s2134_s1 + $0x364] ss:$8 sps:$4 sm:$0xff]  }
  0x21   :  { %1052 = vmatprep.subr.bf16.mxu0 %v1458_v33  ;;  %v1546_v30 = vld [vmem:[%s2134_s1 + $0x160] ss:$8 sps:$4 sm:$0xff]   ;;  %v1554_v32 = vld [vmem:[%s2134_s1 + $0x174] ss:$8 sps:$4 sm:$0xff]  }
  0x22   :  { %v1549_v31 = vld [vmem:[%s2134_s1 + $0x360] ss:$8 sps:$4 sm:$0xff]   ;;  %v1557_v33 = vld [vmem:[%s2134_s1 + $0x374] ss:$8 sps:$4 sm:$0xff]  }
  0x23   :  { %967 = vmatpush1.bf16.msra.mxu1 %v1460_v34  ;;  %v1608_v34 = vld [vmem:[%s2135_s0 + $0xc] ss:$36 sps:$4 sm:$0xff]   ;;  %v1570_v48 = vld [vmem:[%s2134_s1 + $0x1a0] ss:$8 sps:$4 sm:$0xff]   ;;  %v1581_v51 = vld [vmem:[%s2134_s1 + $0x3b4] ss:$8 sps:$4 sm:$0xff]  }
  0x24   :  { %1053 = vmatpush1.bf16.msra.mxu0 %v1461_v35  ;;  %968 = vmatprep.subr.bf16.mxu1 %v1462_v36  ;;  %v1611_v35 = vld [vmem:[%s2135_s0 + $0x1c] ss:$36 sps:$4 sm:$0xff]   ;;  %v1552_v36 = vld [vmem:[%s2134_s1 + $0x170] ss:$8 sps:$4 sm:$0xff]  }
  0x25   :  { %1054 = vmatprep.subr.bf16.mxu0 %v1464_v37  ;;  %v1555_v37 = vld [vmem:[%s2134_s1 + $0x370] ss:$8 sps:$4 sm:$0xff]  }
  0x27   :  { %969 = vmatpush1.bf16.msra.mxu1 %v1466_v38  ;;  %v1560_v38 = vld [vmem:[%s2134_s1 + $0x184] ss:$8 sps:$4 sm:$0xff]  }
  0x28   :  { %1055 = vmatpush1.bf16.msra.mxu0 %v1467_v39  ;;  %970 = vmatprep.subr.bf16.mxu1 %v1468_v40  ;;  %v1563_v39 = vld [vmem:[%s2134_s1 + $0x384] ss:$8 sps:$4 sm:$0xff]   ;;  %v1558_v40 = vld [vmem:[%s2134_s1 + $0x180] ss:$8 sps:$4 sm:$0xff]  }
  0x29   :  { %1056 = vmatprep.subr.bf16.mxu0 %v1470_v41  ;;  %v1561_v41 = vld [vmem:[%s2134_s1 + $0x380] ss:$8 sps:$4 sm:$0xff]  }
  0x2b   :  { %971 = vmatpush1.bf16.msra.mxu1 %v1472_v42  ;;  %v1566_v42 = vld [vmem:[%s2134_s1 + $0x194] ss:$8 sps:$4 sm:$0xff]  }
  0x2c   :  { %1057 = vmatpush1.bf16.msra.mxu0 %v1473_v43  ;;  %972 = vmatprep.subr.bf16.mxu1 %v1474_v44  ;;  %v1569_v43 = vld [vmem:[%s2134_s1 + $0x394] ss:$8 sps:$4 sm:$0xff]   ;;  %v1564_v44 = vld [vmem:[%s2134_s1 + $0x190] ss:$8 sps:$4 sm:$0xff]  }
  0x2d   :  { %1058 = vmatprep.subr.bf16.mxu0 %v1476_v45  ;;  %v1567_v45 = vld [vmem:[%s2134_s1 + $0x390] ss:$8 sps:$4 sm:$0xff]  }
  0x2f   :  { %973 = vmatpush1.bf16.msra.mxu1 %v1478_v46  ;;  %v1572_v46 = vld [vmem:[%s2134_s1 + $0x1a4] ss:$8 sps:$4 sm:$0xff]  }
  0x30   :  { %1059 = vmatpush1.bf16.msra.mxu0 %v1479_v47  ;;  %974 = vmatprep.subr.bf16.mxu1 %v1480_v49  ;;  %v1575_v47 = vld [vmem:[%s2134_s1 + $0x3a4] ss:$8 sps:$4 sm:$0xff]   ;;  %v1573_v49 = vld [vmem:[%s2134_s1 + $0x3a0] ss:$8 sps:$4 sm:$0xff]  }
  0x31   :  { %1060 = vmatprep.subr.bf16.mxu0 %v1482_v50  ;;  %v1578_v50 = vld [vmem:[%s2134_s1 + $0x1b4] ss:$8 sps:$4 sm:$0xff]  }
  0x33   :  { %975 = vmatpush1.bf16.msra.mxu1 %v1484_v52  ;;  %v1576_v52 = vld [vmem:[%s2134_s1 + $0x1b0] ss:$8 sps:$4 sm:$0xff]  }
  0x34   :  { %1061 = vmatpush1.bf16.msra.mxu0 %v1485_v53  ;;  %976 = vmatprep.subr.bf16.mxu1 %v1486_v54  ;;  %v1579_v53 = vld [vmem:[%s2134_s1 + $0x3b0] ss:$8 sps:$4 sm:$0xff]   ;;  %v1584_v54 = vld [vmem:[%s2134_s1 + $0x1c4] ss:$8 sps:$4 sm:$0xff]  }
  0x35   :  { %1062 = vmatprep.subr.bf16.mxu0 %v1488_v55  ;;  %v1587_v55 = vld [vmem:[%s2134_s1 + $0x3c4] ss:$8 sps:$4 sm:$0xff]  }
  0x37   :  { %977 = vmatpush1.bf16.msra.mxu1 %v1490_v56  ;;  %v1582_v56 = vld [vmem:[%s2134_s1 + $0x1c0] ss:$8 sps:$4 sm:$0xff]  }
  0x38   :  { %1063 = vmatpush1.bf16.msra.mxu0 %v1491_v57  ;;  %978 = vmatprep.subr.bf16.mxu1 %v1492_v58  ;;  %v1585_v57 = vld [vmem:[%s2134_s1 + $0x3c0] ss:$8 sps:$4 sm:$0xff]   ;;  %v1590_v58 = vld [vmem:[%s2134_s1 + $0x1d4] ss:$8 sps:$4 sm:$0xff]  }
  0x39   :  { %1064 = vmatprep.subr.bf16.mxu0 %v1494_v59  ;;  %v1593_v59 = vld [vmem:[%s2134_s1 + $0x3d4] ss:$8 sps:$4 sm:$0xff]  }
  0x3b   :  { %979 = vmatpush1.bf16.msra.mxu1 %v1496_v60  ;;  %v1588_v60 = vld [vmem:[%s2134_s1 + $0x1d0] ss:$8 sps:$4 sm:$0xff]  }
  0x3c   :  { %1065 = vmatpush1.bf16.msra.mxu0 %v1497_v61  ;;  %980 = vmatprep.subr.bf16.mxu1 %v1498_v62  ;;  %v1591_v61 = vld [vmem:[%s2134_s1 + $0x3d0] ss:$8 sps:$4 sm:$0xff]   ;;  %v1596_v62 = vld [vmem:[%s2134_s1 + $0x1e4] ss:$8 sps:$4 sm:$0xff]  }
  0x3d   :  { %1066 = vmatprep.subr.bf16.mxu0 %v1500_v63  ;;  %v1599_v63 = vld [vmem:[%s2134_s1 + $0x3e4] ss:$8 sps:$4 sm:$0xff]  }
  0x3f   :  { %981 = vmatpush1.bf16.msra.mxu1 %v1502_v0  ;;  %v1594_v0 = vld [vmem:[%s2134_s1 + $0x1e0] ss:$8 sps:$4 sm:$0xff]  }
  0x40   :  { %1067 = vmatpush1.bf16.msra.mxu0 %v1503_v1  ;;  %993 = vmatprep.subr.bf16.mxu1 %v1509_v2  ;;  %v1597_v1 = vld [vmem:[%s2134_s1 + $0x3e0] ss:$8 sps:$4 sm:$0xff]   ;;  %v1602_v2 = vld [vmem:[%s2134_s1 + $0x1f4] ss:$8 sps:$4 sm:$0xff]  }
  0x41   :  { %1079 = vmatprep.subr.bf16.mxu0 %v1515_v3  ;;  %v1605_v3 = vld [vmem:[%s2134_s1 + $0x3f4] ss:$8 sps:$4 sm:$0xff]  }
  0x42   :  { %983 = vmatmul.mubr.bf16.vlgmr.msra.gmra.mrb[0].mxu1 %v1504_v4  ;;  %v1600_v4 = vld [vmem:[%s2134_s1 + $0x1f0] ss:$8 sps:$4 sm:$0xff]  }
  0x43   :  { %1069 = vmatmul.mubr.bf16.vlgmr.msra.gmra.mrb[0].mxu0 %v1510_v6  ;;  %994 = vmatpush1.bf16.msra.mxu1 %v1507_v5  ;;  %v1603_v5 = vld [vmem:[%s2134_s1 + $0x3f0] ss:$8 sps:$4 sm:$0xff]   ;;  %v1614_v6 = vld [vmem:[%s2134_s1 + $0x404] ss:$8 sps:$4 sm:$0xff]  }
  0x44   :  { %1080 = vmatpush1.bf16.msra.mxu0 %v1513_v7  ;;  %995 = vmatprep.subr.bf16.mxu1 %v1518_v8  ;;  %v1606_v7 = vld [vmem:[%s2135_s0 + $0x8] ss:$36 sps:$4 sm:$0xff]   ;;  %v1609_v8 = vld [vmem:[%s2135_s0 + $0x18] ss:$36 sps:$4 sm:$0xff]  }
  0x45   :  { %1081 = vmatprep.subr.bf16.mxu0 %v1521_v9  ;;  %1025 = vmatprep.mubr.bf16.mxu1 %v1608_v34  ;;  %v1612_v9 = vld [vmem:[%s2134_s1 + $0x400] ss:$8 sps:$4 sm:$0xff]  }
  0x46   :  { %1111 = vmatprep.mubr.bf16.mxu0 %v1611_v35  ;;  %v1196_v35 = vld [vmem:[%s2137_s3] sm:$0x3] }
  0x47   :  { %996 = vmatpush1.bf16.msra.mxu1 %v1516_v10  ;;  %v1617_v10 = vld [vmem:[%s2134_s1 + $0x414] ss:$8 sps:$4 sm:$0xff]  }
  0x48   :  { %1082 = vmatpush1.bf16.msra.mxu0 %v1519_v11  ;;  %997 = vmatprep.subr.bf16.mxu1 %v1524_v12  ;;  %v1615_v11 = vld [vmem:[%s2134_s1 + $0x410] ss:$8 sps:$4 sm:$0xff]   ;;  %v1637_v12 = vmov 0  }
  0x49   :  { %1083 = vmatprep.subr.bf16.mxu0 %v1527_v13  ;;  %v1620_v13 = vld [vmem:[%s2134_s1 + $0x424] ss:$8 sps:$4 sm:$0xff]  }
  0x4b   :  { %998 = vmatpush1.bf16.msra.mxu1 %v1522_v14  ;;  %v1618_v14 = vld [vmem:[%s2134_s1 + $0x420] ss:$8 sps:$4 sm:$0xff]  }
  0x4c   :  { %1084 = vmatpush1.bf16.msra.mxu0 %v1525_v15  ;;  %999 = vmatprep.subr.bf16.mxu1 %v1530_v16  ;;  %v1623_v15 = vld [vmem:[%s2134_s1 + $0x434] ss:$8 sps:$4 sm:$0xff]   ;;  %v1621_v16 = vld [vmem:[%s2134_s1 + $0x430] ss:$8 sps:$4 sm:$0xff]  }
  0x4d   :  { %1085 = vmatprep.subr.bf16.mxu0 %v1533_v17  ;;  %v1626_v17 = vld [vmem:[%s2134_s1 + $0x444] ss:$8 sps:$4 sm:$0xff]  }
  0x4f   :  { %1000 = vmatpush1.bf16.msra.mxu1 %v1528_v18  ;;  %v1624_v18 = vld [vmem:[%s2134_s1 + $0x440] ss:$8 sps:$4 sm:$0xff]  }
  0x50   :  { %1086 = vmatpush1.bf16.msra.mxu0 %v1531_v19  ;;  %1001 = vmatprep.subr.bf16.mxu1 %v1536_v20  ;;  %v1629_v19 = vld [vmem:[%s2134_s1 + $0x454] ss:$8 sps:$4 sm:$0xff]   ;;  %v1627_v20 = vld [vmem:[%s2134_s1 + $0x450] ss:$8 sps:$4 sm:$0xff]  }
  0x51   :  { %1087 = vmatprep.subr.bf16.mxu0 %v1539_v21  ;;  %v1632_v21 = vld [vmem:[%s2134_s1 + $0x464] ss:$8 sps:$4 sm:$0xff]  }
  0x53   :  { %1002 = vmatpush1.bf16.msra.mxu1 %v1534_v22  ;;  %v1630_v22 = vld [vmem:[%s2134_s1 + $0x460] ss:$8 sps:$4 sm:$0xff]  }
  0x54   :  { %1088 = vmatpush1.bf16.msra.mxu0 %v1537_v23  ;;  %1003 = vmatprep.subr.bf16.mxu1 %v1542_v24  ;;  %v1635_v23 = vld [vmem:[%s2134_s1 + $0x474] ss:$8 sps:$4 sm:$0xff]   ;;  %v1633_v24 = vld [vmem:[%s2134_s1 + $0x470] ss:$8 sps:$4 sm:$0xff]  }
  0x55   :  { %1089 = vmatprep.subr.bf16.mxu0 %v1545_v25  ;;  %v1636_v25 = vld [vmem:[%s2135_s0 + $0x20] ss:$36 sps:$4 sm:$0xff]  }
  0x57   :  { %1004 = vmatpush1.bf16.msra.mxu1 %v1540_v26 }
  0x58   :  { %1090 = vmatpush1.bf16.msra.mxu0 %v1543_v27  ;;  %1005 = vmatprep.subr.bf16.mxu1 %v1548_v28 }
  0x59   :  { %1091 = vmatprep.subr.bf16.mxu0 %v1551_v29 }
  0x5b   :  { %1006 = vmatpush1.bf16.msra.mxu1 %v1546_v30  ;;  %v1182_v30 = vlaneseq }
  0x5c   :  { %1092 = vmatpush1.bf16.msra.mxu0 %v1549_v31  ;;  %1007 = vmatprep.subr.bf16.mxu1 %v1554_v32 }
  0x5d   :  { %1093 = vmatprep.subr.bf16.mxu0 %v1557_v33  ;;  %v1183_v31 = vshrl.u32 %v1182_v30, 7  ;;  %v1180_v33 = vld [vmem:[%s2136_s2] sm:$0x3] }
  0x5f   :  { %1008 = vmatpush1.bf16.msra.mxu1 %v1552_v36  ;;  %v1184_v32 = vsub.s32 0, %v1183_v31  ;;  %v1188_v34 = vsub.s32 1, %v1183_v31 }
  0x60   :  { %1094 = vmatpush1.bf16.msra.mxu0 %v1555_v37  ;;  %1009 = vmatprep.subr.bf16.mxu1 %v1560_v38 }
  0x61   :  { %1095 = vmatprep.subr.bf16.mxu0 %v1563_v39  ;;  %v1185_v36 = vrot.slane %v1180_v33, %v1184_v32  ;;  %v1189_v38 = vrot.slane %v1180_v33, %v1188_v34 }
  0x63   :  { %1010 = vmatpush1.bf16.msra.mxu1 %v1558_v40  ;;  %v1201_v40 = vrot.slane %v1196_v35, %v1184_v32 }
  0x64   :  { %1096 = vmatpush1.bf16.msra.mxu0 %v1561_v41  ;;  %1011 = vmatprep.subr.bf16.mxu1 %v1566_v42 }
  0x65   :  { %1097 = vmatprep.subr.bf16.mxu0 %v1569_v43  ;;  %v1205_v43 = vrot.slane %v1196_v35, %v1188_v34 }
  0x67   :  { %1012 = vmatpush1.bf16.msra.mxu1 %v1564_v44 }
  0x68   :  { %1098 = vmatpush1.bf16.msra.mxu0 %v1567_v45  ;;  %1013 = vmatprep.subr.bf16.mxu1 %v1572_v46 }
  0x69   :  { %1099 = vmatprep.subr.bf16.mxu0 %v1575_v47 }
  0x6b   :  { %1014 = vmatpush1.bf16.msra.mxu1 %v1570_v48 }
  0x6c   :  { %1100 = vmatpush1.bf16.msra.mxu0 %v1573_v49  ;;  %1015 = vmatprep.subr.bf16.mxu1 %v1578_v50 }
  0x6d   :  { %1101 = vmatprep.subr.bf16.mxu0 %v1581_v51 }
  0x6f   :  { %1016 = vmatpush1.bf16.msra.mxu1 %v1576_v52 }
  0x70   :  { %1102 = vmatpush1.bf16.msra.mxu0 %v1579_v53  ;;  %1017 = vmatprep.subr.bf16.mxu1 %v1584_v54 }
  0x71   :  { %1103 = vmatprep.subr.bf16.mxu0 %v1587_v55 }
  0x73   :  { %1018 = vmatpush1.bf16.msra.mxu1 %v1582_v56 }
  0x74   :  { %1104 = vmatpush1.bf16.msra.mxu0 %v1585_v57  ;;  %1019 = vmatprep.subr.bf16.mxu1 %v1590_v58 }
  0x75   :  { %1105 = vmatprep.subr.bf16.mxu0 %v1593_v59 }
  0x77   :  { %1020 = vmatpush1.bf16.msra.mxu1 %v1588_v60 }
  0x78   :  { %1106 = vmatpush1.bf16.msra.mxu0 %v1591_v61  ;;  %1021 = vmatprep.subr.bf16.mxu1 %v1596_v62 }
  0x79   :  { %1107 = vmatprep.subr.bf16.mxu0 %v1599_v63 }
  0x7b   :  { %1022 = vmatpush1.bf16.msra.mxu1 %v1594_v0 }
  0x7c   :  { %1108 = vmatpush1.bf16.msra.mxu0 %v1597_v1  ;;  %1023 = vmatprep.subr.bf16.mxu1 %v1602_v2 }
  0x7d   :  { %1109 = vmatprep.subr.bf16.mxu0 %v1605_v3 }
  0x7f   :  { %1024 = vmatpush1.bf16.msra.mxu1 %v1600_v4 }
  0x80   :  { %1110 = vmatpush1.bf16.msra.mxu0 %v1603_v5 }
  0x81   :  { %1122 = vmatprep.subr.bf16.mxu0 %v1614_v6 }
  0x82   :  { %1026 = vmatmul.mubr.bf16.vlgmr.msra.gmra.mrb[0].mxu1 %v1606_v7 }
  0x83   :  { %1112 = vmatmul.mubr.bf16.vlgmr.msra.gmra.mrb[0].mxu0 %v1609_v8 }
  0x84   :  { %1123 = vmatpush1.bf16.msra.mxu0 %v1612_v9  ;;  %1154 = vmatprep.mubr.bf16.mxu0 %v1637_v12 }
  0x85   :  { %1124 = vmatprep.subr.bf16.mxu0 %v1617_v10 }
  0x88   :  { %1125 = vmatpush1.bf16.msra.mxu0 %v1615_v11 }
  0x89   :  { %1126 = vmatprep.subr.bf16.mxu0 %v1620_v13 }
  0x8c   :  { %1127 = vmatpush1.bf16.msra.mxu0 %v1618_v14 }
  0x8d   :  { %1128 = vmatprep.subr.bf16.mxu0 %v1623_v15 }
  0x90   :  { %1129 = vmatpush1.bf16.msra.mxu0 %v1621_v16 }
  0x91   :  { %1130 = vmatprep.subr.bf16.mxu0 %v1626_v17 }
  0x94   :  { %1131 = vmatpush1.bf16.msra.mxu0 %v1624_v18 }
  0x95   :  { %1132 = vmatprep.subr.bf16.mxu0 %v1629_v19 }
  0x98   :  { %1133 = vmatpush1.bf16.msra.mxu0 %v1627_v20 }
  0x99   :  { %1134 = vmatprep.subr.bf16.mxu0 %v1632_v21 }
  0x9c   :  { %1135 = vmatpush1.bf16.msra.mxu0 %v1630_v22 }
  0x9d   :  { %1136 = vmatprep.subr.bf16.mxu0 %v1635_v23 }
  0xa0   :  { %1137 = vmatpush1.bf16.msra.mxu0 %v1633_v24 }
  0xa3   :  { %1155 = vmatmul.mubr.bf16.vlgmr.msra.gmra.mrb[0].mxu0 %v1636_v25 }
 0x155   :  { %v1027_v26 = vpop.f32.mrb[0].mxu1 }
 0x156   :  { %v1029_v27 = vpop.f32.mrb[1].mxu1 }
 0x157   :  { %v1031_v28 = vpop.f32.mrb[2].mxu1 }
 0x158   :  { %v1033_v29 = vpop.f32.mrb[3].mxu1 }
 0x176   :  { %v1156_v37 = vpop.f32.mrb[0].mxu0 }
 0x177   :  { %v1391_v39 = vadd.f32 %v1156_v37, %v1027_v26  ;;  %v1158_v41 = vpop.f32.mrb[1].mxu0 }
 0x178   :  { %v1392_v42 = vadd.f32 %v1158_v41, %v1029_v27  ;;  %v1160_v44 = vpop.f32.mrb[2].mxu0 }
 0x179   :  { %v1192_v45 = vmul.f32 %v1391_v39, %v1185_v36  ;;  %v1393_v46 = vadd.f32 %v1160_v44, %v1031_v28  ;;  %v1162_v47 = vpop.f32.mrb[3].mxu0 }
 0x17a   :  { %v1193_v48 = vmul.f32 %v1392_v42, %v1189_v38  ;;  %v1394_v49 = vadd.f32 %v1162_v47, %v1033_v29 }
 0x17b   :  { %v1208_v50 = vadd.f32 %v1201_v40, %v1192_v45  ;;  %v1194_v51 = vmul.f32 %v1393_v46, %v1185_v36 }
 0x17c   :  { %v1209_v52 = vadd.f32 %v1205_v43, %v1193_v48  ;;  %v1195_v53 = vmul.f32 %v1394_v49, %v1189_v38 }
 0x17d   :  { %v1212_v54 = vmax.f32 %v1208_v50, 0.0  ;;  %v1210_v55 = vadd.f32 %v1201_v40, %v1194_v51 }
 0x17e   :  { %v1213_v56 = vmax.f32 %v1209_v52, 0.0  ;;  %v1211_v57 = vadd.f32 %v1205_v43, %v1195_v53 }
 0x17f   :  { %v1214_v58 = vmax.f32 %v1210_v55, 0.0 }
 0x180   :  { %v1389_v59 = vpack.c.bf16 %v1213_v56, %v1212_v54  ;;  %v1215_v60 = vmax.f32 %v1211_v57, 0.0 }
 0x182   :  { %1228 = vst [vmem:[%s2138_s4] sm:$0xff] %v1389_v59  ;;  %v1390_v61 = vpack.c.bf16 %v1215_v60, %v1214_v58 }
 0x184   :  { %1229 = vst [vmem:[%s2138_s4 + $0x8] sm:$0xff] %v1390_v61 }

// kernel: resnet18_baseline_forward.38
= control target key start
LH: loop header
LB: loop body
LE: loop exit
PB: predicated region body
PF: predicated region fallthrough
CT: control target
= control target key end

     0   :  { %s1336_s18 = smov 0   ;;  %s1338_s19 = smov 0   ;;  %s1476_s0 = inlined_call_operand.vmem [shape: bf16[16,2304], index: 0, kind: input, shape index: {}]   ;;  %s1477_s1 = inlined_call_operand.vmem [shape: bf16[2304,256], index: 1, kind: input, shape index: {}]   ;;  %s1478_s2 = inlined_call_operand.vmem [shape: f32[1,256], index: 2, kind: input, shape index: {}]   ;;  %s1479_s3 = inlined_call_operand.vmem [shape: f32[1,256], index: 3, kind: input, shape index: {}]   ;;  %s1480_s4 = inlined_call_operand.vmem [shape: bf16[16,256], index: 4, kind: input, shape index: {}]   ;;  %s1481_s5 = inlined_call_operand.vmem [shape: bf16[16,256], index: 5, kind: output, shape index: {}]  }
   0x1   :  { %s1340_s20 = smov 0   ;;  %s1342_s21 = smov 0  }
   0x2   :  { %s1344_s22 = smov 0  }
   0x3 LB: > { %s27_s23 = sadd.s32 1, %s1298_s21  ;;  %p50_p1 = scmp.ne.s32.totalorder %s1290_s19, %s1286_s18  ;;  %s1302_s22 = sphi %s1344_s22, %s15_s22   ;;  %s1298_s21 = sphi %s1342_s21, %s1485_s21   ;;  %s1294_s20 = sphi %s1340_s20, %s1484_s20   ;;  %s1290_s19 = sphi %s1338_s19, %s1483_s19   ;;  %s1286_s18 = sphi %s1336_s18, %s1482_s18  }
   0x4   : > { %p28_p0 = scmp.ge.s32.totalorder %s27_s23, 6  ;;  %p51_p2 = scmp.eq.s32.totalorder %s1302_s22, 0 }
   0x5   : > { %s43_s25 = sadd.s32 1, %s1290_s19  ;;  %p1068_p5 = scmp.ge.s32.totalorder %s1302_s22, 6 }
   0x6   : > { %s1487_s23 = smov (%p28_p0, %s27_s23), 0  ;;  %p52_p3 = por %p51_p2, %p50_p1 }
   0x7   : > { %s39_s24 = ssub.s32 %s1298_s21, %s1487_s23  ;;  %243 = sbr.rel (%p1068_p5) target bundleno = 21 (0x15), region = 28 }
   0x8   : > { %p41_p4 = scmp.eq.s32.totalorder %s39_s24, 0 }
   0xa   : > { %s1371_s26 = scalar_select %p41_p4, %s1290_s19, %s43_s25  }
   0xe   : > { %246 = sbr.rel (!%p52_p3) target bundleno = 21 (0x15), region = 32  ;;  %s248_s27 = sand.u32 (%p52_p3), 1, %s1290_s19  }
   0xf   : > { %s1136_s28 = smul.u32 (%p52_p3), 12, %s1298_s21 }
  0x10   : > { %s1144_s29 = smul.u32 (%p52_p3), 24, %s248_s27 }
  0x11   : > { %s256_s7 = scalar_lea.vmem (%p52_p3), %s1476_s0, %s1136_s28 }
  0x12   : > { %v271_v0 = vld [vmem:[%s256_s7] sm:$0xff] (%p52_p3)  ;;  %v273_v1 = vld [vmem:[%s256_s7 + $0x48] sm:$0xff] (%p52_p3)  ;;  %s250_s8 = scalar_lea.vmem (%p52_p3), [#allocation3], %s1144_s29  ;;  %v1072_v3 = vld [vmem:[%s256_s7 + $0x50] sm:$0xf] (%p52_p3) }
  0x13   : > { %v1070_v2 = vld [vmem:[%s256_s7 + $0x8] sm:$0xf] (%p52_p3)  ;;  %272 = vst [vmem:[%s250_s8] sm:$0xff] (%p52_p3), %v271_v0  ;;  %274 = vst [vmem:[%s250_s8 + $0xc] sm:$0xff] (%p52_p3), %v273_v1 }
  0x14   : > { %1071 = vst [vmem:[%s250_s8 + $0x8] sm:$0xf] (%p52_p3), %v1070_v2  ;;  %1073 = vst [vmem:[%s250_s8 + $0x14] sm:$0xf] (%p52_p3), %v1072_v3 }
  0x15 PF: > { %p1074_p6 = scmp.ge.s32.totalorder %s1302_s22, 1  ;;  %p305_p7 = scmp.lt.s32.totalorder %s1302_s22, 7 }
  0x17   : > { %p306_p8 = pnand %p1074_p6, %p305_p7 }
  0x18   : > { %s312_s9 = sand.u32 (!%p306_p8), 1, %s1286_s18   ;;  %s374_s10 = smul.u32 (!%p306_p8), 48, %s1294_s20 }
  0x19   : > { %309 = sbr.rel (%p306_p8) target bundleno = 342 (0x156), region = 62  ;;  %p1077_p10 = scmp.ne.s32.totalorder (!%p306_p8), %s1294_s20, 0 }
  0x1a   : > { %s1145_s11 = smul.u32 (!%p306_p8), 24, %s312_s9  ;;  %p376_p9 = scmp.lt.s32.totalorder (!%p306_p8), %s374_s10, 287 }
  0x1c   : > { %s1388_s16 = scalar_lea.vmem (!%p306_p8), [#allocation3], %s1145_s11 }
  0x20   : > { %s1489_s10 = smov (!%p376_p9, %s374_s10), 287  ;;  %424 = sbr.rel (%p1077_p10) target bundleno = 39 (0x27), region = 70 }
  0x21   : > { %s1137_s12 = sshll.u32 %s1489_s10, 3  ;;  %v1304_v4 = vmov (!%p1077_p10), 0.0  }
  0x22   : > { %s1386_s15 = scalar_lea.vmem %s1477_s1, %s1137_s12  ;;  %425 = vst [vmem:[#allocation2] sm:$0xff] (!%p1077_p10), %v1304_v4  ;;  %426 = vst [vmem:[#allocation2 + $0x8] sm:$0xff] (!%p1077_p10), %v1304_v4 }
  0x23   : > { %427 = vst [vmem:[#allocation2 + $0x10] sm:$0xff] (!%p1077_p10), %v1304_v4  ;;  %428 = vst [vmem:[#allocation2 + $0x18] sm:$0xff] (!%p1077_p10), %v1304_v4 }
  0x27 PF: > { %v1188_v5 = vld [vmem:[%s1386_s15 + $0x4] ss:$8 sps:$4 sm:$0xff]   ;;  %v1190_v6 = vld [vmem:[%s1386_s15] ss:$8 sps:$4 sm:$0xff]   ;;  %v1305_v7 = vmov 0   ;;  %p1129_p11 = scmp.ne.s32.totalorder %s1294_s20, 5 }
  0x28   : > { %816 = vmatprep.mubr.bf16.mxu0 %v1305_v7  ;;  %741 = vmatprep.subr.bf16.mxu1 %v1188_v5  ;;  %v1191_v8 = vld [vmem:[%s1386_s15 + $0x14] ss:$8 sps:$4 sm:$0xff]   ;;  %v1193_v9 = vld [vmem:[%s1386_s15 + $0x10] ss:$8 sps:$4 sm:$0xff]   ;;  %v1194_v10 = vld [vmem:[%s1386_s15 + $0x24] ss:$8 sps:$4 sm:$0xff]  }
  0x29   : > { %742 = vmatpush1.bf16.msra.mxu1 %v1190_v6  ;;  %v1196_v11 = vld [vmem:[%s1386_s15 + $0x20] ss:$8 sps:$4 sm:$0xff]   ;;  %v1197_v12 = vld [vmem:[%s1386_s15 + $0x34] ss:$8 sps:$4 sm:$0xff]   ;;  %v1199_v13 = vld [vmem:[%s1386_s15 + $0x30] ss:$8 sps:$4 sm:$0xff]  }
  0x2a   : > { %743 = vmatprep.subr.bf16.mxu1 %v1191_v8  ;;  %v1212_v14 = vld [vmem:[%s1386_s15 + $0x104] ss:$8 sps:$4 sm:$0xff]   ;;  %v1214_v15 = vld [vmem:[%s1386_s15 + $0x100] ss:$8 sps:$4 sm:$0xff]   ;;  %v1218_v17 = vld [vmem:[%s1386_s15 + $0x114] ss:$8 sps:$4 sm:$0xff]  }
  0x2b   : > { %v1200_v16 = vld [vmem:[%s1386_s15 + $0x44] ss:$8 sps:$4 sm:$0xff]   ;;  %784 = vmatprep.subr.bf16.mxu0 %v1212_v14  ;;  %v1220_v18 = vld [vmem:[%s1386_s15 + $0x110] ss:$8 sps:$4 sm:$0xff]   ;;  %v1202_v19 = vld [vmem:[%s1386_s15 + $0x40] ss:$8 sps:$4 sm:$0xff]  }
  0x2c   : > { %785 = vmatpush1.bf16.msra.mxu0 %v1214_v15  ;;  %v1203_v20 = vld [vmem:[%s1386_s15 + $0x54] ss:$8 sps:$4 sm:$0xff]   ;;  %v1224_v21 = vld [vmem:[%s1386_s15 + $0x124] ss:$8 sps:$4 sm:$0xff]   ;;  %v1226_v22 = vld [vmem:[%s1386_s15 + $0x120] ss:$8 sps:$4 sm:$0xff]  }
  0x2d   : > { %744 = vmatpush1.bf16.msra.mxu1 %v1193_v9  ;;  %786 = vmatprep.subr.bf16.mxu0 %v1218_v17  ;;  %v1205_v23 = vld [vmem:[%s1386_s15 + $0x50] ss:$8 sps:$4 sm:$0xff]   ;;  %v1230_v24 = vld [vmem:[%s1386_s15 + $0x134] ss:$8 sps:$4 sm:$0xff]   ;;  %v1206_v25 = vld [vmem:[%s1386_s15 + $0x64] ss:$8 sps:$4 sm:$0xff]  }
  0x2e   : > { %745 = vmatprep.subr.bf16.mxu1 %v1194_v10  ;;  %v1232_v26 = vld [vmem:[%s1386_s15 + $0x130] ss:$8 sps:$4 sm:$0xff]   ;;  %v1208_v27 = vld [vmem:[%s1386_s15 + $0x60] ss:$8 sps:$4 sm:$0xff]   ;;  %v1236_v28 = vld [vmem:[%s1386_s15 + $0x144] ss:$8 sps:$4 sm:$0xff]  }
  0x2f   : > { %v1209_v29 = vld [vmem:[%s1386_s15 + $0x74] ss:$8 sps:$4 sm:$0xff]   ;;  %v1238_v30 = vld [vmem:[%s1386_s15 + $0x140] ss:$8 sps:$4 sm:$0xff]   ;;  %v1211_v31 = vld [vmem:[%s1386_s15 + $0x70] ss:$8 sps:$4 sm:$0xff]  }
  0x30   : > { %787 = vmatpush1.bf16.msra.mxu0 %v1220_v18  ;;  %v1242_v32 = vld [vmem:[%s1386_s15 + $0x154] ss:$8 sps:$4 sm:$0xff]   ;;  %v1215_v33 = vld [vmem:[%s1386_s15 + $0x84] ss:$8 sps:$4 sm:$0xff]   ;;  %v1244_v34 = vld [vmem:[%s1386_s15 + $0x150] ss:$8 sps:$4 sm:$0xff]  }
  0x31   : > { %746 = vmatpush1.bf16.msra.mxu1 %v1196_v11  ;;  %788 = vmatprep.subr.bf16.mxu0 %v1224_v21  ;;  %v1217_v35 = vld [vmem:[%s1386_s15 + $0x80] ss:$8 sps:$4 sm:$0xff]   ;;  %v1248_v36 = vld [vmem:[%s1386_s15 + $0x164] ss:$8 sps:$4 sm:$0xff]   ;;  %v1221_v37 = vld [vmem:[%s1386_s15 + $0x94] ss:$8 sps:$4 sm:$0xff]  }
  0x32   : > { %747 = vmatprep.subr.bf16.mxu1 %v1197_v12  ;;  %v1250_v38 = vld [vmem:[%s1386_s15 + $0x160] ss:$8 sps:$4 sm:$0xff]   ;;  %v1223_v40 = vld [vmem:[%s1386_s15 + $0x90] ss:$8 sps:$4 sm:$0xff]   ;;  %v1254_v41 = vld [vmem:[%s1386_s15 + $0x174] ss:$8 sps:$4 sm:$0xff]  }
  0x33   : > { %v1263_v39 = vld [vmem:[%s1388_s16 + $0x4] ss:$12 sps:$4 sm:$0xff]   ;;  %v1260_v46 = vld [vmem:[%s1388_s16 + $0x8] ss:$12 sps:$4 sm:$0xff]   ;;  %v1261_v56 = vld [vmem:[%s1388_s16] ss:$12 sps:$4 sm:$0xff]  }
  0x34   : > { %789 = vmatpush1.bf16.msra.mxu0 %v1226_v22  ;;  %v1227_v42 = vld [vmem:[%s1386_s15 + $0xa4] ss:$8 sps:$4 sm:$0xff]   ;;  %773 = vmatprep.mubr.bf16.mxu1 %v1263_v39  ;;  %v1256_v43 = vld [vmem:[%s1386_s15 + $0x170] ss:$8 sps:$4 sm:$0xff]   ;;  %v1229_v44 = vld [vmem:[%s1386_s15 + $0xa0] ss:$8 sps:$4 sm:$0xff]  }
  0x35   : > { %748 = vmatpush1.bf16.msra.mxu1 %v1199_v13  ;;  %790 = vmatprep.subr.bf16.mxu0 %v1230_v24  ;;  %v1233_v45 = vld [vmem:[%s1386_s15 + $0xb4] ss:$8 sps:$4 sm:$0xff]   ;;  %v1235_v47 = vld [vmem:[%s1386_s15 + $0xb0] ss:$8 sps:$4 sm:$0xff]   ;;  %v1239_v48 = vld [vmem:[%s1386_s15 + $0xc4] ss:$8 sps:$4 sm:$0xff]   ;;  %v845_v13 = vlaneseq (!%p1129_p11) }
  0x36   : > { %749 = vmatprep.subr.bf16.mxu1 %v1200_v16  ;;  %v1241_v49 = vld [vmem:[%s1386_s15 + $0xc0] ss:$8 sps:$4 sm:$0xff]   ;;  %v1245_v50 = vld [vmem:[%s1386_s15 + $0xd4] ss:$8 sps:$4 sm:$0xff]   ;;  %v1247_v51 = vld [vmem:[%s1386_s15 + $0xd0] ss:$8 sps:$4 sm:$0xff]  }
  0x37   : > { %v1251_v52 = vld [vmem:[%s1386_s15 + $0xe4] ss:$8 sps:$4 sm:$0xff]   ;;  %v1253_v53 = vld [vmem:[%s1386_s15 + $0xe0] ss:$8 sps:$4 sm:$0xff]   ;;  %v1257_v54 = vld [vmem:[%s1386_s15 + $0xf4] ss:$8 sps:$4 sm:$0xff]  }
  0x38   : > { %791 = vmatpush1.bf16.msra.mxu0 %v1232_v26  ;;  %v1259_v55 = vld [vmem:[%s1386_s15 + $0xf0] ss:$8 sps:$4 sm:$0xff]   ;;  %v429_v61 = vld [vmem:[#allocation2] sm:$0xff]  ;;  %v430_v0 = vld [vmem:[#allocation2 + $0x8] sm:$0xff]  ;;  %v846_v14 = vshrl.u32 (!%p1129_p11), %v845_v13, 7 }
  0x39   : > { %750 = vmatpush1.bf16.msra.mxu1 %v1202_v19  ;;  %792 = vmatprep.subr.bf16.mxu0 %v1236_v28  ;;  %v431_v3 = vld [vmem:[#allocation2 + $0x10] sm:$0xff]  ;;  %v432_v7 = vld [vmem:[#allocation2 + $0x18] sm:$0xff]  ;;  %v843_v15 = vld [vmem:[%s1478_s2] sm:$0x3] (!%p1129_p11) }
  0x3a   : > { %751 = vmatprep.subr.bf16.mxu1 %v1203_v20  ;;  %v859_v16 = vld [vmem:[%s1479_s3] sm:$0x3] (!%p1129_p11)  ;;  %v847_v18 = vsub.s32 (!%p1129_p11), 0, %v846_v14  ;;  %v851_v19 = vsub.s32 (!%p1129_p11), 1, %v846_v14  ;;  %v876_v21 = vld [vmem:[%s1480_s4 + $0x8] sm:$0xff] (!%p1129_p11) }
  0x3b   : > { %v875_v20 = vld [vmem:[%s1480_s4] sm:$0xff] (!%p1129_p11) }
  0x3c   : > { %793 = vmatpush1.bf16.msra.mxu0 %v1238_v30  ;;  %v852_v26 = vrot.slane (!%p1129_p11), %v843_v15, %v851_v19  ;;  %v868_v28 = vrot.slane (!%p1129_p11), %v859_v16, %v851_v19  ;;  %v878_v30 = vunpack.c.h.bf16 (!%p1129_p11), %v875_v20 }
  0x3d   : > { %752 = vmatpush1.bf16.msra.mxu1 %v1205_v23  ;;  %794 = vmatprep.subr.bf16.mxu0 %v1242_v32  ;;  %v880_v32 = vunpack.c.h.bf16 (!%p1129_p11), %v876_v21 }
  0x3e   : > { %753 = vmatprep.subr.bf16.mxu1 %v1206_v25  ;;  %v848_v25 = vrot.slane (!%p1129_p11), %v843_v15, %v847_v18 }
  0x40   : > { %795 = vmatpush1.bf16.msra.mxu0 %v1244_v34 }
  0x41   : > { %754 = vmatpush1.bf16.msra.mxu1 %v1208_v27  ;;  %796 = vmatprep.subr.bf16.mxu0 %v1248_v36  ;;  %v864_v27 = vrot.slane (!%p1129_p11), %v859_v16, %v847_v18 }
  0x42   : > { %755 = vmatprep.subr.bf16.mxu1 %v1209_v29  ;;  %v877_v29 = vunpack.c.l.bf16 (!%p1129_p11), %v875_v20 }
  0x44   : > { %797 = vmatpush1.bf16.msra.mxu0 %v1250_v38 }
  0x45   : > { %756 = vmatpush1.bf16.msra.mxu1 %v1211_v31  ;;  %798 = vmatprep.subr.bf16.mxu0 %v1254_v41  ;;  %v879_v31 = vunpack.c.l.bf16 (!%p1129_p11), %v876_v21 }
  0x46   : > { %757 = vmatprep.subr.bf16.mxu1 %v1215_v33 }
  0x48   : > { %799 = vmatpush1.bf16.msra.mxu0 %v1256_v43 }
  0x49   : > { %758 = vmatpush1.bf16.msra.mxu1 %v1217_v35 }
  0x4a   : > { %759 = vmatprep.subr.bf16.mxu1 %v1221_v37 }
  0x4b   : > { %817 = vmatmul.mubr.bf16.vlgmr.msra.gmra.mrb[0].mxu0 %v1260_v46 }
  0x4d   : > { %760 = vmatpush1.bf16.msra.mxu1 %v1223_v40 }
  0x4e   : > { %761 = vmatprep.subr.bf16.mxu1 %v1227_v42 }
  0x51   : > { %762 = vmatpush1.bf16.msra.mxu1 %v1229_v44 }
  0x52   : > { %763 = vmatprep.subr.bf16.mxu1 %v1233_v45 }
  0x55   : > { %764 = vmatpush1.bf16.msra.mxu1 %v1235_v47 }
  0x56   : > { %765 = vmatprep.subr.bf16.mxu1 %v1239_v48 }
  0x59   : > { %766 = vmatpush1.bf16.msra.mxu1 %v1241_v49 }
  0x5a   : > { %767 = vmatprep.subr.bf16.mxu1 %v1245_v50 }
  0x5d   : > { %768 = vmatpush1.bf16.msra.mxu1 %v1247_v51 }
  0x5e   : > { %769 = vmatprep.subr.bf16.mxu1 %v1251_v52 }
  0x61   : > { %770 = vmatpush1.bf16.msra.mxu1 %v1253_v53 }
  0x62   : > { %771 = vmatprep.subr.bf16.mxu1 %v1257_v54 }
  0x65   : > { %772 = vmatpush1.bf16.msra.mxu1 %v1259_v55 }
  0x68   : > { %774 = vmatmul.mubr.bf16.vlgmr.msra.gmra.mrb[0].mxu1 %v1261_v56 }
 0x11e   : > { %v818_v57 = vpop.f32.mrb[0].mxu0 }
 0x11f   : > { %v820_v58 = vpop.f32.mrb[1].mxu0 }
 0x120   : > { %v822_v59 = vpop.f32.mrb[2].mxu0 }
 0x121   : > { %v824_v60 = vpop.f32.mrb[3].mxu0 }
 0x13b   : > { %v775_v62 = vpop.f32.mrb[0].mxu1 }
 0x13c   : > { %v819_v63 = vadd.f32 %v818_v57, %v775_v62  ;;  %v777_v1 = vpop.f32.mrb[1].mxu1 }
 0x13d   : > { %v821_v2 = vadd.f32 %v820_v58, %v777_v1  ;;  %v779_v4 = vpop.f32.mrb[2].mxu1  ;;  %838 = sbr.rel (%p1129_p11) target bundleno = 342 (0x156), region = 74 }
 0x13e   : > { %v827_v5 = vadd.f32 %v819_v63, %v429_v61  ;;  %v823_v6 = vadd.f32 %v822_v59, %v779_v4  ;;  %v781_v8 = vpop.f32.mrb[3].mxu1 }
 0x13f   : > { %v828_v9 = vadd.f32 %v821_v2, %v430_v0  ;;  %v825_v10 = vadd.f32 %v824_v60, %v781_v8 }
 0x140   : > { %831 = vst [vmem:[#allocation2] sm:$0xff] %v827_v5  ;;  %v829_v11 = vadd.f32 %v823_v6, %v431_v3 }
 0x141   : > { %832 = vst [vmem:[#allocation2 + $0x8] sm:$0xff] %v828_v9  ;;  %v830_v12 = vadd.f32 %v825_v10, %v432_v7 }
 0x142   : > { %833 = vst [vmem:[#allocation2 + $0x10] sm:$0xff] %v829_v11 }
 0x143   : > { %834 = vst [vmem:[#allocation2 + $0x18] sm:$0xff] %v830_v12 }
 0x147   : > { %v839_v17 = vld [vmem:[#allocation2] sm:$0xff] }
 0x148   : > { %v840_v22 = vld [vmem:[#allocation2 + $0x8] sm:$0xff]  ;;  %v855_v33 = vmul.f32 %v848_v25, %v839_v17 }
 0x149   : > { %v841_v23 = vld [vmem:[#allocation2 + $0x10] sm:$0xff]  ;;  %v856_v34 = vmul.f32 %v852_v26, %v840_v22 }
 0x14a   : > { %v842_v24 = vld [vmem:[#allocation2 + $0x18] sm:$0xff]  ;;  %v857_v35 = vmul.f32 %v848_v25, %v841_v23  ;;  %v871_v37 = vadd.f32 %v864_v27, %v855_v33 }
 0x14b   : > { %v858_v36 = vmul.f32 %v852_v26, %v842_v24  ;;  %v872_v38 = vadd.f32 %v868_v28, %v856_v34 }
 0x14c   : > { %v873_v39 = vadd.f32 %v864_v27, %v857_v35  ;;  %v881_v41 = vadd.f32 %v877_v29, %v871_v37 }
 0x14d   : > { %v874_v40 = vadd.f32 %v868_v28, %v858_v36  ;;  %v882_v42 = vadd.f32 %v878_v30, %v872_v38 }
 0x14e   : > { %v883_v43 = vadd.f32 %v879_v31, %v873_v39  ;;  %v885_v45 = vmax.f32 %v881_v41, 0.0 }
 0x14f   : > { %v884_v44 = vadd.f32 %v880_v32, %v874_v40  ;;  %v886_v46 = vmax.f32 %v882_v42, 0.0 }
 0x150   : > { %v887_v47 = vmax.f32 %v883_v43, 0.0 }
 0x151   : > { %v888_v48 = vmax.f32 %v884_v44, 0.0  ;;  %v1138_v49 = vpack.c.bf16 %v886_v46, %v885_v45 }
 0x153   : > { %v1139_v50 = vpack.c.bf16 %v888_v48, %v887_v47  ;;  %901 = vst [vmem:[%s1481_s5] sm:$0xff] %v1138_v49 }
 0x155   : > { %902 = vst [vmem:[%s1481_s5 + $0x8] sm:$0xff] %v1139_v50 }
 0x156 PF: > { %s15_s22 = sadd.s32 1, %s1302_s22   ;;  %s1482_s18 = smov %s1290_s19 }
 0x157   : > { %p12_p12 = scmp.ge.s32.totalorder %s15_s22, 8   ;;  %s1483_s19 = smov %s1371_s26 }
 0x158   : > { %s1484_s20 = smov %s1298_s21  ;;  %s1485_s21 = smov %s1487_s23 }
 0x159   :  { %14 = sbr.rel (!%p12_p12) target bundleno = 3 (0x3), region = 127 }

// kernel: resnet18_baseline_forward.37
= control target key start
LH: loop header
LB: loop body
LE: loop exit
PB: predicated region body
PF: predicated region fallthrough
CT: control target
= control target key end

     0   :  { %v289_v1 = vmov 0   ;;  %v194_v18 = vlaneseq  ;;  %s378_s1 = inlined_call_operand.vmem [shape: bf16[128,256], index: 1, kind: input, shape index: {}]   ;;  %s379_s0 = inlined_call_operand.vmem [shape: bf16[16,128], index: 0, kind: input, shape index: {}]   ;;  %s380_s2 = inlined_call_operand.vmem [shape: f32[1,256], index: 2, kind: input, shape index: {}]   ;;  %s381_s3 = inlined_call_operand.vmem [shape: f32[1,256], index: 3, kind: input, shape index: {}]   ;;  %s382_s4 = inlined_call_operand.vmem [shape: bf16[16,256], index: 4, kind: output, shape index: {}]  }
   0x1   :  { %v264_v0 = vld [vmem:[%s378_s1 + $0x4] ss:$8 sps:$4 sm:$0xff]   ;;  %166 = vmatprep.mubr.bf16.mxu0 %v289_v1  ;;  %v266_v2 = vld [vmem:[%s378_s1] ss:$8 sps:$4 sm:$0xff]   ;;  %v267_v3 = vld [vmem:[%s378_s1 + $0x14] ss:$8 sps:$4 sm:$0xff]  }
   0x2   :  { %134 = vmatprep.subr.bf16.mxu0 %v264_v0  ;;  %v269_v4 = vld [vmem:[%s378_s1 + $0x10] ss:$8 sps:$4 sm:$0xff]   ;;  %v270_v5 = vld [vmem:[%s378_s1 + $0x24] ss:$8 sps:$4 sm:$0xff]   ;;  %v272_v6 = vld [vmem:[%s378_s1 + $0x20] ss:$8 sps:$4 sm:$0xff]  }
   0x3   :  { %135 = vmatpush1.bf16.msra.mxu0 %v266_v2  ;;  %v273_v7 = vld [vmem:[%s378_s1 + $0x34] ss:$8 sps:$4 sm:$0xff]   ;;  %v275_v8 = vld [vmem:[%s378_s1 + $0x30] ss:$8 sps:$4 sm:$0xff]   ;;  %v276_v9 = vld [vmem:[%s378_s1 + $0x44] ss:$8 sps:$4 sm:$0xff]  }
   0x4   :  { %136 = vmatprep.subr.bf16.mxu0 %v267_v3  ;;  %v278_v10 = vld [vmem:[%s378_s1 + $0x40] ss:$8 sps:$4 sm:$0xff]   ;;  %v279_v11 = vld [vmem:[%s378_s1 + $0x54] ss:$8 sps:$4 sm:$0xff]   ;;  %v281_v12 = vld [vmem:[%s378_s1 + $0x50] ss:$8 sps:$4 sm:$0xff]  }
   0x5   :  { %v282_v13 = vld [vmem:[%s378_s1 + $0x64] ss:$8 sps:$4 sm:$0xff]   ;;  %v284_v14 = vld [vmem:[%s378_s1 + $0x60] ss:$8 sps:$4 sm:$0xff]   ;;  %v285_v15 = vld [vmem:[%s378_s1 + $0x74] ss:$8 sps:$4 sm:$0xff]  }
   0x6   :  { %v287_v16 = vld [vmem:[%s378_s1 + $0x70] ss:$8 sps:$4 sm:$0xff]   ;;  %v288_v17 = vld [vmem:[%s379_s0] sm:$0xff]   ;;  %v195_v19 = vshrl.u32 %v194_v18, 7 }
   0x7   :  { %137 = vmatpush1.bf16.msra.mxu0 %v269_v4  ;;  %v192_v21 = vld [vmem:[%s380_s2] sm:$0x3] }
   0x8   :  { %138 = vmatprep.subr.bf16.mxu0 %v270_v5  ;;  %v196_v20 = vsub.s32 0, %v195_v19  ;;  %v200_v22 = vsub.s32 1, %v195_v19  ;;  %v208_v23 = vld [vmem:[%s381_s3] sm:$0x3] }
   0xa   :  { %v197_v24 = vrot.slane %v192_v21, %v196_v20  ;;  %v201_v25 = vrot.slane %v192_v21, %v200_v22  ;;  %v213_v26 = vrot.slane %v208_v23, %v196_v20  ;;  %v217_v28 = vrot.slane %v208_v23, %v200_v22 }
   0xb   :  { %139 = vmatpush1.bf16.msra.mxu0 %v272_v6 }
   0xc   :  { %140 = vmatprep.subr.bf16.mxu0 %v273_v7 }
   0xf   :  { %141 = vmatpush1.bf16.msra.mxu0 %v275_v8 }
  0x10   :  { %142 = vmatprep.subr.bf16.mxu0 %v276_v9 }
  0x13   :  { %143 = vmatpush1.bf16.msra.mxu0 %v278_v10 }
  0x14   :  { %144 = vmatprep.subr.bf16.mxu0 %v279_v11 }
  0x17   :  { %145 = vmatpush1.bf16.msra.mxu0 %v281_v12 }
  0x18   :  { %146 = vmatprep.subr.bf16.mxu0 %v282_v13 }
  0x1b   :  { %147 = vmatpush1.bf16.msra.mxu0 %v284_v14 }
  0x1c   :  { %148 = vmatprep.subr.bf16.mxu0 %v285_v15 }
  0x1f   :  { %149 = vmatpush1.bf16.msra.mxu0 %v287_v16 }
  0x22   :  { %167 = vmatmul.mubr.bf16.vlgmr.msra.gmra.mrb[0].mxu0 %v288_v17 }
  0xf5   :  { %v168_v27 = vpop.f32.mrb[0].mxu0 }
  0xf6   :  { %v204_v29 = vmul.f32 %v197_v24, %v168_v27  ;;  %v170_v30 = vpop.f32.mrb[1].mxu0 }
  0xf7   :  { %v205_v31 = vmul.f32 %v201_v25, %v170_v30  ;;  %v172_v32 = vpop.f32.mrb[2].mxu0 }
  0xf8   :  { %v220_v33 = vadd.f32 %v213_v26, %v204_v29  ;;  %v206_v34 = vmul.f32 %v197_v24, %v172_v32  ;;  %v174_v35 = vpop.f32.mrb[3].mxu0 }
  0xf9   :  { %v221_v36 = vadd.f32 %v217_v28, %v205_v31  ;;  %v207_v37 = vmul.f32 %v201_v25, %v174_v35 }
  0xfa   :  { %v222_v38 = vadd.f32 %v213_v26, %v206_v34 }
  0xfb   :  { %v261_v39 = vpack.c.bf16 %v221_v36, %v220_v33  ;;  %v223_v40 = vadd.f32 %v217_v28, %v207_v37 }
  0xfd   :  { %236 = vst [vmem:[%s382_s4] sm:$0xff] %v261_v39  ;;  %v262_v41 = vpack.c.bf16 %v223_v40, %v222_v38 }
  0xff   :  { %237 = vst [vmem:[%s382_s4 + $0x8] sm:$0xff] %v262_v41 }

// kernel: resnet18_baseline_forward.39
= control target key start
LH: loop header
LB: loop body
LE: loop exit
PB: predicated region body
PF: predicated region fallthrough
CT: control target
= control target key end

     0   :  { %s1231_s15 = smov 0   ;;  %s1233_s16 = smov 0   ;;  %s1365_s0 = inlined_call_operand.vmem [shape: bf16[16,2304], index: 0, kind: input, shape index: {}]   ;;  %s1366_s1 = inlined_call_operand.vmem [shape: bf16[2304,256], index: 1, kind: input, shape index: {}]   ;;  %s1367_s2 = inlined_call_operand.vmem [shape: f32[1,256], index: 2, kind: input, shape index: {}]   ;;  %s1368_s3 = inlined_call_operand.vmem [shape: f32[1,256], index: 3, kind: input, shape index: {}]   ;;  %s1369_s4 = inlined_call_operand.vmem [shape: bf16[16,256], index: 4, kind: output, shape index: {}]  }
   0x1   :  { %s1235_s17 = smov 0   ;;  %s1237_s18 = smov 0  }
   0x2   :  { %s1239_s19 = smov 0  }
   0x3 LB: > { %s26_s20 = sadd.s32 1, %s1198_s18  ;;  %p49_p1 = scmp.ne.s32.totalorder %s1190_s16, %s1186_s15  ;;  %s1202_s19 = sphi %s1239_s19, %s14_s19   ;;  %s1198_s18 = sphi %s1237_s18, %s1373_s18   ;;  %s1194_s17 = sphi %s1235_s17, %s1372_s17   ;;  %s1190_s16 = sphi %s1233_s16, %s1371_s16   ;;  %s1186_s15 = sphi %s1231_s15, %s1370_s15  }
   0x4   : > { %p27_p0 = scmp.ge.s32.totalorder %s26_s20, 6  ;;  %p50_p2 = scmp.eq.s32.totalorder %s1202_s19, 0 }
   0x5   : > { %s42_s22 = sadd.s32 1, %s1190_s16  ;;  %p968_p5 = scmp.ge.s32.totalorder %s1202_s19, 6 }
   0x6   : > { %s1375_s20 = smov (%p27_p0, %s26_s20), 0  ;;  %p51_p3 = por %p50_p2, %p49_p1 }
   0x7   : > { %s38_s21 = ssub.s32 %s1198_s18, %s1375_s20  ;;  %199 = sbr.rel (%p968_p5) target bundleno = 21 (0x15), region = 24 }
   0x8   : > { %p40_p4 = scmp.eq.s32.totalorder %s38_s21, 0 }
   0xa   : > { %s1266_s23 = scalar_select %p40_p4, %s1190_s16, %s42_s22  }
   0xe   : > { %202 = sbr.rel (!%p51_p3) target bundleno = 21 (0x15), region = 28  ;;  %s204_s24 = sand.u32 (%p51_p3), 1, %s1190_s16  }
   0xf   : > { %s1036_s25 = smul.u32 (%p51_p3), 12, %s1198_s18 }
  0x10   : > { %s1044_s26 = smul.u32 (%p51_p3), 24, %s204_s24 }
  0x11   : > { %s212_s29 = scalar_lea.vmem (%p51_p3), %s1365_s0, %s1036_s25 }
  0x12   : > { %v227_v0 = vld [vmem:[%s212_s29] sm:$0xff] (%p51_p3)  ;;  %v229_v1 = vld [vmem:[%s212_s29 + $0x48] sm:$0xff] (%p51_p3)  ;;  %s206_s30 = scalar_lea.vmem (%p51_p3), [#allocation3], %s1044_s26  ;;  %v972_v3 = vld [vmem:[%s212_s29 + $0x50] sm:$0xf] (%p51_p3) }
  0x13   : > { %v970_v2 = vld [vmem:[%s212_s29 + $0x8] sm:$0xf] (%p51_p3)  ;;  %228 = vst [vmem:[%s206_s30] sm:$0xff] (%p51_p3), %v227_v0  ;;  %230 = vst [vmem:[%s206_s30 + $0xc] sm:$0xff] (%p51_p3), %v229_v1 }
  0x14   : > { %971 = vst [vmem:[%s206_s30 + $0x8] sm:$0xf] (%p51_p3), %v970_v2  ;;  %973 = vst [vmem:[%s206_s30 + $0x14] sm:$0xf] (%p51_p3), %v972_v3 }
  0x15 PF: > { %p974_p6 = scmp.ge.s32.totalorder %s1202_s19, 1  ;;  %p261_p7 = scmp.lt.s32.totalorder %s1202_s19, 7 }
  0x17   : > { %p262_p8 = pnand %p974_p6, %p261_p7 }
  0x18   : > { %s268_s5 = sand.u32 (!%p262_p8), 1, %s1186_s15   ;;  %s318_s6 = smul.u32 (!%p262_p8), 48, %s1194_s17 }
  0x19   : > { %265 = sbr.rel (%p262_p8) target bundleno = 340 (0x154), region = 58  ;;  %p977_p10 = scmp.ne.s32.totalorder (!%p262_p8), %s1194_s17, 0 }
  0x1a   : > { %s1045_s7 = smul.u32 (!%p262_p8), 24, %s268_s5  ;;  %p320_p9 = scmp.lt.s32.totalorder (!%p262_p8), %s318_s6, 287 }
  0x1c   : > { %s1283_s12 = scalar_lea.vmem (!%p262_p8), [#allocation3], %s1045_s7 }
  0x20   : > { %s1377_s6 = smov (!%p320_p9, %s318_s6), 287  ;;  %356 = sbr.rel (%p977_p10) target bundleno = 39 (0x27), region = 66 }
  0x21   : > { %s1037_s8 = sshll.u32 %s1377_s6, 3  ;;  %v1204_v4 = vmov (!%p977_p10), 0.0  }
  0x22   : > { %s1281_s11 = scalar_lea.vmem %s1366_s1, %s1037_s8  ;;  %357 = vst [vmem:[#allocation2] sm:$0xff] (!%p977_p10), %v1204_v4  ;;  %358 = vst [vmem:[#allocation2 + $0x8] sm:$0xff] (!%p977_p10), %v1204_v4 }
  0x23   : > { %359 = vst [vmem:[#allocation2 + $0x10] sm:$0xff] (!%p977_p10), %v1204_v4  ;;  %360 = vst [vmem:[#allocation2 + $0x18] sm:$0xff] (!%p977_p10), %v1204_v4 }
  0x27 PF: > { %v1088_v5 = vld [vmem:[%s1281_s11 + $0x4] ss:$8 sps:$4 sm:$0xff]   ;;  %v1090_v6 = vld [vmem:[%s1281_s11] ss:$8 sps:$4 sm:$0xff]   ;;  %v1205_v7 = vmov 0   ;;  %p1029_p11 = scmp.ne.s32.totalorder %s1194_s17, 5 }
  0x28   : > { %748 = vmatprep.mubr.bf16.mxu0 %v1205_v7  ;;  %673 = vmatprep.subr.bf16.mxu1 %v1088_v5  ;;  %v1091_v8 = vld [vmem:[%s1281_s11 + $0x14] ss:$8 sps:$4 sm:$0xff]   ;;  %v1093_v9 = vld [vmem:[%s1281_s11 + $0x10] ss:$8 sps:$4 sm:$0xff]   ;;  %v1094_v10 = vld [vmem:[%s1281_s11 + $0x24] ss:$8 sps:$4 sm:$0xff]  }
  0x29   : > { %674 = vmatpush1.bf16.msra.mxu1 %v1090_v6  ;;  %v1096_v11 = vld [vmem:[%s1281_s11 + $0x20] ss:$8 sps:$4 sm:$0xff]   ;;  %v1097_v12 = vld [vmem:[%s1281_s11 + $0x34] ss:$8 sps:$4 sm:$0xff]   ;;  %v1099_v13 = vld [vmem:[%s1281_s11 + $0x30] ss:$8 sps:$4 sm:$0xff]  }
  0x2a   : > { %675 = vmatprep.subr.bf16.mxu1 %v1091_v8  ;;  %v1112_v14 = vld [vmem:[%s1281_s11 + $0x104] ss:$8 sps:$4 sm:$0xff]   ;;  %v1114_v15 = vld [vmem:[%s1281_s11 + $0x100] ss:$8 sps:$4 sm:$0xff]   ;;  %v1118_v17 = vld [vmem:[%s1281_s11 + $0x114] ss:$8 sps:$4 sm:$0xff]  }
  0x2b   : > { %v1100_v16 = vld [vmem:[%s1281_s11 + $0x44] ss:$8 sps:$4 sm:$0xff]   ;;  %716 = vmatprep.subr.bf16.mxu0 %v1112_v14  ;;  %v1120_v18 = vld [vmem:[%s1281_s11 + $0x110] ss:$8 sps:$4 sm:$0xff]   ;;  %v1102_v19 = vld [vmem:[%s1281_s11 + $0x40] ss:$8 sps:$4 sm:$0xff]  }
  0x2c   : > { %717 = vmatpush1.bf16.msra.mxu0 %v1114_v15  ;;  %v1103_v20 = vld [vmem:[%s1281_s11 + $0x54] ss:$8 sps:$4 sm:$0xff]   ;;  %v1124_v21 = vld [vmem:[%s1281_s11 + $0x124] ss:$8 sps:$4 sm:$0xff]   ;;  %v1126_v22 = vld [vmem:[%s1281_s11 + $0x120] ss:$8 sps:$4 sm:$0xff]  }
  0x2d   : > { %676 = vmatpush1.bf16.msra.mxu1 %v1093_v9  ;;  %718 = vmatprep.subr.bf16.mxu0 %v1118_v17  ;;  %v1105_v23 = vld [vmem:[%s1281_s11 + $0x50] ss:$8 sps:$4 sm:$0xff]   ;;  %v1130_v24 = vld [vmem:[%s1281_s11 + $0x134] ss:$8 sps:$4 sm:$0xff]   ;;  %v1106_v25 = vld [vmem:[%s1281_s11 + $0x64] ss:$8 sps:$4 sm:$0xff]  }
  0x2e   : > { %677 = vmatprep.subr.bf16.mxu1 %v1094_v10  ;;  %v1132_v26 = vld [vmem:[%s1281_s11 + $0x130] ss:$8 sps:$4 sm:$0xff]   ;;  %v1108_v27 = vld [vmem:[%s1281_s11 + $0x60] ss:$8 sps:$4 sm:$0xff]   ;;  %v1136_v28 = vld [vmem:[%s1281_s11 + $0x144] ss:$8 sps:$4 sm:$0xff]  }
  0x2f   : > { %v1109_v29 = vld [vmem:[%s1281_s11 + $0x74] ss:$8 sps:$4 sm:$0xff]   ;;  %v1138_v30 = vld [vmem:[%s1281_s11 + $0x140] ss:$8 sps:$4 sm:$0xff]   ;;  %v1111_v31 = vld [vmem:[%s1281_s11 + $0x70] ss:$8 sps:$4 sm:$0xff]  }
  0x30   : > { %719 = vmatpush1.bf16.msra.mxu0 %v1120_v18  ;;  %v1142_v32 = vld [vmem:[%s1281_s11 + $0x154] ss:$8 sps:$4 sm:$0xff]   ;;  %v1115_v33 = vld [vmem:[%s1281_s11 + $0x84] ss:$8 sps:$4 sm:$0xff]   ;;  %v1144_v34 = vld [vmem:[%s1281_s11 + $0x150] ss:$8 sps:$4 sm:$0xff]  }
  0x31   : > { %678 = vmatpush1.bf16.msra.mxu1 %v1096_v11  ;;  %720 = vmatprep.subr.bf16.mxu0 %v1124_v21  ;;  %v1117_v35 = vld [vmem:[%s1281_s11 + $0x80] ss:$8 sps:$4 sm:$0xff]   ;;  %v1148_v36 = vld [vmem:[%s1281_s11 + $0x164] ss:$8 sps:$4 sm:$0xff]   ;;  %v1121_v37 = vld [vmem:[%s1281_s11 + $0x94] ss:$8 sps:$4 sm:$0xff]  }
  0x32   : > { %679 = vmatprep.subr.bf16.mxu1 %v1097_v12  ;;  %v1150_v38 = vld [vmem:[%s1281_s11 + $0x160] ss:$8 sps:$4 sm:$0xff]   ;;  %v1123_v40 = vld [vmem:[%s1281_s11 + $0x90] ss:$8 sps:$4 sm:$0xff]   ;;  %v1154_v41 = vld [vmem:[%s1281_s11 + $0x174] ss:$8 sps:$4 sm:$0xff]  }
  0x33   : > { %v1163_v39 = vld [vmem:[%s1283_s12 + $0x4] ss:$12 sps:$4 sm:$0xff]   ;;  %v1160_v46 = vld [vmem:[%s1283_s12 + $0x8] ss:$12 sps:$4 sm:$0xff]   ;;  %v1161_v56 = vld [vmem:[%s1283_s12] ss:$12 sps:$4 sm:$0xff]  }
  0x34   : > { %721 = vmatpush1.bf16.msra.mxu0 %v1126_v22  ;;  %v1127_v42 = vld [vmem:[%s1281_s11 + $0xa4] ss:$8 sps:$4 sm:$0xff]   ;;  %705 = vmatprep.mubr.bf16.mxu1 %v1163_v39  ;;  %v1156_v43 = vld [vmem:[%s1281_s11 + $0x170] ss:$8 sps:$4 sm:$0xff]   ;;  %v1129_v44 = vld [vmem:[%s1281_s11 + $0xa0] ss:$8 sps:$4 sm:$0xff]  }
  0x35   : > { %680 = vmatpush1.bf16.msra.mxu1 %v1099_v13  ;;  %722 = vmatprep.subr.bf16.mxu0 %v1130_v24  ;;  %v1133_v45 = vld [vmem:[%s1281_s11 + $0xb4] ss:$8 sps:$4 sm:$0xff]   ;;  %v1135_v47 = vld [vmem:[%s1281_s11 + $0xb0] ss:$8 sps:$4 sm:$0xff]   ;;  %v1139_v48 = vld [vmem:[%s1281_s11 + $0xc4] ss:$8 sps:$4 sm:$0xff]   ;;  %v777_v13 = vlaneseq (!%p1029_p11) }
  0x36   : > { %681 = vmatprep.subr.bf16.mxu1 %v1100_v16  ;;  %v1141_v49 = vld [vmem:[%s1281_s11 + $0xc0] ss:$8 sps:$4 sm:$0xff]   ;;  %v1145_v50 = vld [vmem:[%s1281_s11 + $0xd4] ss:$8 sps:$4 sm:$0xff]   ;;  %v1147_v51 = vld [vmem:[%s1281_s11 + $0xd0] ss:$8 sps:$4 sm:$0xff]  }
  0x37   : > { %v1151_v52 = vld [vmem:[%s1281_s11 + $0xe4] ss:$8 sps:$4 sm:$0xff]   ;;  %v1153_v53 = vld [vmem:[%s1281_s11 + $0xe0] ss:$8 sps:$4 sm:$0xff]   ;;  %v1157_v54 = vld [vmem:[%s1281_s11 + $0xf4] ss:$8 sps:$4 sm:$0xff]  }
  0x38   : > { %723 = vmatpush1.bf16.msra.mxu0 %v1132_v26  ;;  %v1159_v55 = vld [vmem:[%s1281_s11 + $0xf0] ss:$8 sps:$4 sm:$0xff]   ;;  %v361_v61 = vld [vmem:[#allocation2] sm:$0xff]  ;;  %v362_v0 = vld [vmem:[#allocation2 + $0x8] sm:$0xff]  ;;  %v778_v14 = vshrl.u32 (!%p1029_p11), %v777_v13, 7 }
  0x39   : > { %682 = vmatpush1.bf16.msra.mxu1 %v1102_v19  ;;  %724 = vmatprep.subr.bf16.mxu0 %v1136_v28  ;;  %v363_v3 = vld [vmem:[#allocation2 + $0x10] sm:$0xff]  ;;  %v364_v7 = vld [vmem:[#allocation2 + $0x18] sm:$0xff]  ;;  %v775_v15 = vld [vmem:[%s1367_s2] sm:$0x3] (!%p1029_p11) }
  0x3a   : > { %683 = vmatprep.subr.bf16.mxu1 %v1103_v20  ;;  %v791_v16 = vld [vmem:[%s1368_s3] sm:$0x3] (!%p1029_p11)  ;;  %v779_v18 = vsub.s32 (!%p1029_p11), 0, %v778_v14  ;;  %v783_v19 = vsub.s32 (!%p1029_p11), 1, %v778_v14 }
  0x3c   : > { %725 = vmatpush1.bf16.msra.mxu0 %v1138_v30  ;;  %v784_v24 = vrot.slane (!%p1029_p11), %v775_v15, %v783_v19  ;;  %v800_v26 = vrot.slane (!%p1029_p11), %v791_v16, %v783_v19 }
  0x3d   : > { %684 = vmatpush1.bf16.msra.mxu1 %v1105_v23  ;;  %726 = vmatprep.subr.bf16.mxu0 %v1142_v32  ;;  %v780_v23 = vrot.slane (!%p1029_p11), %v775_v15, %v779_v18 }
  0x3e   : > { %685 = vmatprep.subr.bf16.mxu1 %v1106_v25  ;;  %v796_v25 = vrot.slane (!%p1029_p11), %v791_v16, %v779_v18 }
  0x40   : > { %727 = vmatpush1.bf16.msra.mxu0 %v1144_v34 }
  0x41   : > { %686 = vmatpush1.bf16.msra.mxu1 %v1108_v27  ;;  %728 = vmatprep.subr.bf16.mxu0 %v1148_v36 }
  0x42   : > { %687 = vmatprep.subr.bf16.mxu1 %v1109_v29 }
  0x44   : > { %729 = vmatpush1.bf16.msra.mxu0 %v1150_v38 }
  0x45   : > { %688 = vmatpush1.bf16.msra.mxu1 %v1111_v31  ;;  %730 = vmatprep.subr.bf16.mxu0 %v1154_v41 }
  0x46   : > { %689 = vmatprep.subr.bf16.mxu1 %v1115_v33 }
  0x48   : > { %731 = vmatpush1.bf16.msra.mxu0 %v1156_v43 }
  0x49   : > { %690 = vmatpush1.bf16.msra.mxu1 %v1117_v35 }
  0x4a   : > { %691 = vmatprep.subr.bf16.mxu1 %v1121_v37 }
  0x4b   : > { %749 = vmatmul.mubr.bf16.vlgmr.msra.gmra.mrb[0].mxu0 %v1160_v46 }
  0x4d   : > { %692 = vmatpush1.bf16.msra.mxu1 %v1123_v40 }
  0x4e   : > { %693 = vmatprep.subr.bf16.mxu1 %v1127_v42 }
  0x51   : > { %694 = vmatpush1.bf16.msra.mxu1 %v1129_v44 }
  0x52   : > { %695 = vmatprep.subr.bf16.mxu1 %v1133_v45 }
  0x55   : > { %696 = vmatpush1.bf16.msra.mxu1 %v1135_v47 }
  0x56   : > { %697 = vmatprep.subr.bf16.mxu1 %v1139_v48 }
  0x59   : > { %698 = vmatpush1.bf16.msra.mxu1 %v1141_v49 }
  0x5a   : > { %699 = vmatprep.subr.bf16.mxu1 %v1145_v50 }
  0x5d   : > { %700 = vmatpush1.bf16.msra.mxu1 %v1147_v51 }
  0x5e   : > { %701 = vmatprep.subr.bf16.mxu1 %v1151_v52 }
  0x61   : > { %702 = vmatpush1.bf16.msra.mxu1 %v1153_v53 }
  0x62   : > { %703 = vmatprep.subr.bf16.mxu1 %v1157_v54 }
  0x65   : > { %704 = vmatpush1.bf16.msra.mxu1 %v1159_v55 }
  0x68   : > { %706 = vmatmul.mubr.bf16.vlgmr.msra.gmra.mrb[0].mxu1 %v1161_v56 }
 0x11e   : > { %v750_v57 = vpop.f32.mrb[0].mxu0 }
 0x11f   : > { %v752_v58 = vpop.f32.mrb[1].mxu0 }
 0x120   : > { %v754_v59 = vpop.f32.mrb[2].mxu0 }
 0x121   : > { %v756_v60 = vpop.f32.mrb[3].mxu0 }
 0x13b   : > { %v707_v62 = vpop.f32.mrb[0].mxu1 }
 0x13c   : > { %v751_v63 = vadd.f32 %v750_v57, %v707_v62  ;;  %v709_v1 = vpop.f32.mrb[1].mxu1 }
 0x13d   : > { %v753_v2 = vadd.f32 %v752_v58, %v709_v1  ;;  %v711_v4 = vpop.f32.mrb[2].mxu1  ;;  %770 = sbr.rel (%p1029_p11) target bundleno = 340 (0x154), region = 70 }
 0x13e   : > { %v759_v5 = vadd.f32 %v751_v63, %v361_v61  ;;  %v755_v6 = vadd.f32 %v754_v59, %v711_v4  ;;  %v713_v8 = vpop.f32.mrb[3].mxu1 }
 0x13f   : > { %v760_v9 = vadd.f32 %v753_v2, %v362_v0  ;;  %v757_v10 = vadd.f32 %v756_v60, %v713_v8 }
 0x140   : > { %763 = vst [vmem:[#allocation2] sm:$0xff] %v759_v5  ;;  %v761_v11 = vadd.f32 %v755_v6, %v363_v3 }
 0x141   : > { %764 = vst [vmem:[#allocation2 + $0x8] sm:$0xff] %v760_v9  ;;  %v762_v12 = vadd.f32 %v757_v10, %v364_v7 }
 0x142   : > { %765 = vst [vmem:[#allocation2 + $0x10] sm:$0xff] %v761_v11 }
 0x143   : > { %766 = vst [vmem:[#allocation2 + $0x18] sm:$0xff] %v762_v12 }
 0x147   : > { %v771_v17 = vld [vmem:[#allocation2] sm:$0xff] }
 0x148   : > { %v772_v20 = vld [vmem:[#allocation2 + $0x8] sm:$0xff]  ;;  %v787_v27 = vmul.f32 %v780_v23, %v771_v17 }
 0x149   : > { %v773_v21 = vld [vmem:[#allocation2 + $0x10] sm:$0xff]  ;;  %v788_v28 = vmul.f32 %v784_v24, %v772_v20 }
 0x14a   : > { %v774_v22 = vld [vmem:[#allocation2 + $0x18] sm:$0xff]  ;;  %v789_v29 = vmul.f32 %v780_v23, %v773_v21  ;;  %v803_v31 = vadd.f32 %v796_v25, %v787_v27 }
 0x14b   : > { %v790_v30 = vmul.f32 %v784_v24, %v774_v22  ;;  %v804_v32 = vadd.f32 %v800_v26, %v788_v28 }
 0x14c   : > { %v805_v33 = vadd.f32 %v796_v25, %v789_v29  ;;  %v807_v35 = vmax.f32 %v803_v31, 0.0 }
 0x14d   : > { %v806_v34 = vadd.f32 %v800_v26, %v790_v30  ;;  %v808_v36 = vmax.f32 %v804_v32, 0.0 }
 0x14e   : > { %v809_v37 = vmax.f32 %v805_v33, 0.0 }
 0x14f   : > { %v810_v38 = vmax.f32 %v806_v34, 0.0  ;;  %v1038_v39 = vpack.c.bf16 %v808_v36, %v807_v35 }
 0x151   : > { %v1039_v40 = vpack.c.bf16 %v810_v38, %v809_v37  ;;  %823 = vst [vmem:[%s1369_s4] sm:$0xff] %v1038_v39 }
 0x153   : > { %824 = vst [vmem:[%s1369_s4 + $0x8] sm:$0xff] %v1039_v40 }
 0x154 PF: > { %s14_s19 = sadd.s32 1, %s1202_s19   ;;  %s1370_s15 = smov %s1190_s16 }
 0x155   : > { %p11_p12 = scmp.ge.s32.totalorder %s14_s19, 8   ;;  %s1371_s16 = smov %s1266_s23 }
 0x156   : > { %s1372_s17 = smov %s1198_s18  ;;  %s1373_s18 = smov %s1375_s20 }
 0x157   :  { %13 = sbr.rel (!%p11_p12) target bundleno = 3 (0x3), region = 120 }

// kernel: resnet18_baseline_forward.41
= control target key start
LH: loop header
LB: loop body
LE: loop exit
PB: predicated region body
PF: predicated region fallthrough
CT: control target
= control target key end

     0   :  { %s1899_s0 = inlined_call_operand.vmem [shape: bf16[16,2304], index: 0, kind: input, shape index: {}]   ;;  %s1900_s1 = inlined_call_operand.vmem [shape: bf16[2304,512], index: 1, kind: input, shape index: {}]   ;;  %s1901_s2 = inlined_call_operand.vmem [shape: f32[1,512], index: 2, kind: input, shape index: {}]   ;;  %s1902_s3 = inlined_call_operand.vmem [shape: f32[1,512], index: 3, kind: input, shape index: {}]   ;;  %s1903_s4 = inlined_call_operand.vmem [shape: bf16[16,512], index: 4, kind: output, shape index: {}]  }
   0x1   :  { %1906 = sst [smem:[#allocation8_spill]] %s1899_s0 }
   0x2   :  { %1907 = sst [smem:[#allocation9_spill]] %s1900_s1 }
   0x3   :  { %s1557_s15 = smov 0   ;;  %s1559_s16 = smov 0  }
   0x4   :  { %s1561_s17 = smov 0   ;;  %s1563_s18 = smov 0  }
   0x5   :  { %s1565_s19 = smov 0   ;;  %s1567_s20 = smov 0  }
   0x6   :  { %s1569_s21 = smov 0   ;;  %s1571_s22 = smov 0  }
   0x7   :  { %s1573_s23 = smov 0   ;;  %s1575_s24 = smov 0  }
   0x8   :  { %s1577_s25 = smov 0  }
   0x9 LB: > { %s1187_s26 = sadd.s32 4294967295, %s1528_s25   ;;  %s26_s27 = sadd.s32 1, %s1520_s23  ;;  %s1528_s25 = sphi %s1577_s25, %s14_s25   ;;  %s1524_s24 = sphi %s1575_s24, %s1926_s24   ;;  %s1520_s23 = sphi %s1573_s23, %s1925_s23   ;;  %s1516_s22 = sphi %s1571_s22, %s1924_s22   ;;  %s1512_s21 = sphi %s1569_s21, %s1923_s21   ;;  %s1508_s20 = sphi %s1567_s20, %s1922_s20   ;;  %s1504_s19 = sphi %s1565_s19, %s1921_s19   ;;  %s1500_s18 = sphi %s1563_s18, %s1920_s18   ;;  %s1496_s17 = sphi %s1561_s17, %s1919_s17   ;;  %s1492_s16 = sphi %s1559_s16, %s1918_s16   ;;  %s1488_s15 = sphi %s1557_s15, %s1917_s15  }
   0xa   : > { %p27_p0 = scmp.ge.s32.totalorder %s26_s27, 6  ;;  %s29_s28 = sadd.s32 1, %s1524_s24 }
   0xb   : > { %s42_s29 = sadd.s32 1, %s1508_s20  ;;  %p49_p1 = scmp.ne.s32.totalorder %s1508_s20, %s1504_s19 }
   0xc   : > { %s1928_s27 = smov (%p27_p0, %s26_s27), 0  ;;  %s1930_s28 = smov (!%p27_p0, %s29_s28), %s1524_s24 }
   0xd   : > { %1908 = sst [smem:[#allocation6_spill]] %s1928_s27  ;;  %s38_s30 = ssub.s32 %s1520_s23, %s1928_s27 }
   0xe   : > { %p50_p2 = scmp.eq.s32.totalorder %s1528_s25, 0  ;;  %p31_p3 = scmp.ge.s32.totalorder %s1930_s28, 2 }
   0xf   : > { %p40_p4 = scmp.eq.s32.totalorder %s38_s30, 0  ;;  %s70_s6 = sadd.s32 1, %s1500_s18 }
  0x10   : > { %p1624_p5 = por %p50_p2, %p49_p1  ;;  %s1932_s28 = smov (%p31_p3, %s1930_s28), 0 }
  0x11   : > { %1910 = sst [smem:[#allocation7_spill]] %s1932_s28  ;;  %s66_s8 = ssub.s32 %s1524_s24, %s1932_s28 }
  0x12   : > { %s1632_s7 = scalar_select %p40_p4, %s1508_s20, %s42_s29  }
  0x13   : > { %p77_p6 = scmp.ne.s32.totalorder %s1500_s18, %s1496_s17  ;;  %s67_s9 = sor.u32 %s66_s8, %s38_s30 }
  0x14   : > { %p148_p7 = scmp.eq.s32.totalorder %s66_s8, 0  ;;  %p68_p8 = scmp.eq.s32.totalorder %s67_s9, 0 }
  0x15   : > { %p1638_p9 = por %p77_p6, %p50_p2  ;;  %s150_s11 = sadd.s32 1, %s1492_s16 }
  0x16   : > { %p160_p10 = scmp.ne.s32.totalorder %s1492_s16, %s1488_s15  ;;  %p161_p11 = scmp.eq.s32.totalorder %s1187_s26, 11 }
  0x17   : > { %s1646_s12 = scalar_select %p68_p8, %s1500_s18, %s70_s6  }
  0x18   : > { %s1649_s13 = scalar_select %p148_p7, %s1492_s16, %s150_s11  }
  0x19   : > { %p1651_p12 = por %p161_p11, %p160_p10  ;;  %p1190_p13 = scmp.ge.s32.totalorder %s1528_s25, 12 }
  0x1b   : > { %183 = sbr.rel (%p1190_p13) target bundleno = 79 (0x4f), region = 16 }
  0x22   : > { %186 = sbr.rel (!%p1624_p5) target bundleno = 45 (0x2d), region = 20  ;;  %s188_s29 = sand.u32 (%p1624_p5), 1, %s1508_s20  }
  0x23   : > { %s1263_s30 = smul.u32 (%p1624_p5), 12, %s1520_s23  ;;  %s1913_s0 = sld [smem:[#allocation8_spill]] (%p1624_p5) }
  0x24   : > { %s1272_s8 = smul.u32 (%p1624_p5), 24, %s188_s29 }
  0x26   : > { %s190_s26 = scalar_lea.vmem (%p1624_p5), [#allocation3], %s1272_s8 }
  0x29   : > { %s196_s11 = scalar_lea.vmem %s1913_s0, %s1263_s30 }
  0x2a   : > { %v211_v0 = vld [vmem:[%s196_s11] sm:$0xff]  ;;  %v213_v1 = vld [vmem:[%s196_s11 + $0x48] sm:$0xff]  ;;  %v1194_v3 = vld [vmem:[%s196_s11 + $0x50] sm:$0xf] }
  0x2b   : > { %v1192_v2 = vld [vmem:[%s196_s11 + $0x8] sm:$0xf]  ;;  %212 = vst [vmem:[%s190_s26] sm:$0xff] %v211_v0  ;;  %214 = vst [vmem:[%s190_s26 + $0xc] sm:$0xff] %v213_v1 }
  0x2c   : > { %1193 = vst [vmem:[%s190_s26 + $0x8] sm:$0xf] %v1192_v2  ;;  %1195 = vst [vmem:[%s190_s26 + $0x14] sm:$0xf] %v1194_v3 }
  0x2d PF: > { %231 = sbr.rel (!%p1638_p9) target bundleno = 79 (0x4f), region = 46  ;;  %s233_s5 = sand.u32 (%p1638_p9), 1, %s1500_s18  }
  0x2e   : > { %s1273_s29 = smul.u32 (%p1638_p9), 384, %s233_s5  ;;  %s1196_s6 = sshll.u32 (%p1638_p9), %s1524_s24, 1 }
  0x2f   : > { %s1264_s30 = smul.u32 (%p1638_p9), 192, %s1520_s23  ;;  %s1914_s1 = sld [smem:[#allocation9_spill]] (%p1638_p9) }
  0x30   : > { %s1676_s10 = scalar_lea.vmem (%p1638_p9), [#allocation4], %s1273_s29 }
  0x31   : > { %s239_s9 = sadd.s32 (%p1638_p9), %s1264_s30, %s1196_s6 }
  0x32   : > { %s1198_s0 = sshll.u32 (%p1638_p9), %s239_s9, 2 }
  0x35   : > { %s1671_s27 = scalar_lea.vmem %s1914_s1, %s1198_s0 }
  0x36   : > { %v363_v4 = vld [vmem:[%s1671_s27] sm:$0xff]  ;;  %v365_v5 = vld [vmem:[%s1671_s27 + $0x10] sm:$0xff] }
  0x37   : > { %v367_v6 = vld [vmem:[%s1671_s27 + $0x20] sm:$0xff]  ;;  %364 = vst [vmem:[%s1676_s10] sm:$0xff] %v363_v4  ;;  %366 = vst [vmem:[%s1676_s10 + $0x8] sm:$0xff] %v365_v5  ;;  %v369_v7 = vld [vmem:[%s1671_s27 + $0x30] sm:$0xff] }
  0x38   : > { %368 = vst [vmem:[%s1676_s10 + $0x10] sm:$0xff] %v367_v6  ;;  %v371_v8 = vld [vmem:[%s1671_s27 + $0x40] sm:$0xff]  ;;  %v373_v9 = vld [vmem:[%s1671_s27 + $0x50] sm:$0xff]  ;;  %370 = vst [vmem:[%s1676_s10 + $0x18] sm:$0xff] %v369_v7 }
  0x39   : > { %372 = vst [vmem:[%s1676_s10 + $0x20] sm:$0xff] %v371_v8  ;;  %374 = vst [vmem:[%s1676_s10 + $0x28] sm:$0xff] %v373_v9  ;;  %v375_v10 = vld [vmem:[%s1671_s27 + $0x60] sm:$0xff]  ;;  %v377_v11 = vld [vmem:[%s1671_s27 + $0x70] sm:$0xff] }
  0x3a   : > { %v379_v12 = vld [vmem:[%s1671_s27 + $0x80] sm:$0xff]  ;;  %376 = vst [vmem:[%s1676_s10 + $0x30] sm:$0xff] %v375_v10  ;;  %378 = vst [vmem:[%s1676_s10 + $0x38] sm:$0xff] %v377_v11  ;;  %v381_v13 = vld [vmem:[%s1671_s27 + $0x90] sm:$0xff] }
  0x3b   : > { %380 = vst [vmem:[%s1676_s10 + $0x40] sm:$0xff] %v379_v12  ;;  %v383_v14 = vld [vmem:[%s1671_s27 + $0xa0] sm:$0xff]  ;;  %v385_v15 = vld [vmem:[%s1671_s27 + $0xb0] sm:$0xff]  ;;  %382 = vst [vmem:[%s1676_s10 + $0x48] sm:$0xff] %v381_v13 }
  0x3c   : > { %384 = vst [vmem:[%s1676_s10 + $0x50] sm:$0xff] %v383_v14  ;;  %386 = vst [vmem:[%s1676_s10 + $0x58] sm:$0xff] %v385_v15  ;;  %v387_v16 = vld [vmem:[%s1671_s27 + $0xc0] sm:$0xff]  ;;  %v389_v17 = vld [vmem:[%s1671_s27 + $0xd0] sm:$0xff] }
  0x3d   : > { %v391_v18 = vld [vmem:[%s1671_s27 + $0xe0] sm:$0xff]  ;;  %388 = vst [vmem:[%s1676_s10 + $0x60] sm:$0xff] %v387_v16  ;;  %390 = vst [vmem:[%s1676_s10 + $0x68] sm:$0xff] %v389_v17  ;;  %v393_v19 = vld [vmem:[%s1671_s27 + $0xf0] sm:$0xff] }
  0x3e   : > { %392 = vst [vmem:[%s1676_s10 + $0x70] sm:$0xff] %v391_v18  ;;  %v395_v20 = vld [vmem:[%s1671_s27 + $0x100] sm:$0xff]  ;;  %v397_v21 = vld [vmem:[%s1671_s27 + $0x110] sm:$0xff]  ;;  %394 = vst [vmem:[%s1676_s10 + $0x78] sm:$0xff] %v393_v19 }
  0x3f   : > { %396 = vst [vmem:[%s1676_s10 + $0x80] sm:$0xff] %v395_v20  ;;  %398 = vst [vmem:[%s1676_s10 + $0x88] sm:$0xff] %v397_v21  ;;  %v399_v22 = vld [vmem:[%s1671_s27 + $0x120] sm:$0xff]  ;;  %v401_v23 = vld [vmem:[%s1671_s27 + $0x130] sm:$0xff] }
  0x40   : > { %v403_v24 = vld [vmem:[%s1671_s27 + $0x140] sm:$0xff]  ;;  %400 = vst [vmem:[%s1676_s10 + $0x90] sm:$0xff] %v399_v22  ;;  %402 = vst [vmem:[%s1676_s10 + $0x98] sm:$0xff] %v401_v23  ;;  %v405_v25 = vld [vmem:[%s1671_s27 + $0x150] sm:$0xff] }
  0x41   : > { %404 = vst [vmem:[%s1676_s10 + $0xa0] sm:$0xff] %v403_v24  ;;  %v407_v26 = vld [vmem:[%s1671_s27 + $0x160] sm:$0xff]  ;;  %v409_v27 = vld [vmem:[%s1671_s27 + $0x170] sm:$0xff]  ;;  %406 = vst [vmem:[%s1676_s10 + $0xa8] sm:$0xff] %v405_v25 }
  0x42   : > { %408 = vst [vmem:[%s1676_s10 + $0xb0] sm:$0xff] %v407_v26  ;;  %410 = vst [vmem:[%s1676_s10 + $0xb8] sm:$0xff] %v409_v27  ;;  %v411_v28 = vld [vmem:[%s1671_s27 + $0x180] sm:$0xff]  ;;  %v413_v29 = vld [vmem:[%s1671_s27 + $0x190] sm:$0xff] }
  0x43   : > { %v415_v30 = vld [vmem:[%s1671_s27 + $0x1a0] sm:$0xff]  ;;  %412 = vst [vmem:[%s1676_s10 + $0xc0] sm:$0xff] %v411_v28  ;;  %414 = vst [vmem:[%s1676_s10 + $0xc8] sm:$0xff] %v413_v29  ;;  %v417_v31 = vld [vmem:[%s1671_s27 + $0x1b0] sm:$0xff] }
  0x44   : > { %416 = vst [vmem:[%s1676_s10 + $0xd0] sm:$0xff] %v415_v30  ;;  %v419_v32 = vld [vmem:[%s1671_s27 + $0x1c0] sm:$0xff]  ;;  %v421_v33 = vld [vmem:[%s1671_s27 + $0x1d0] sm:$0xff]  ;;  %418 = vst [vmem:[%s1676_s10 + $0xd8] sm:$0xff] %v417_v31 }
  0x45   : > { %420 = vst [vmem:[%s1676_s10 + $0xe0] sm:$0xff] %v419_v32  ;;  %422 = vst [vmem:[%s1676_s10 + $0xe8] sm:$0xff] %v421_v33  ;;  %v423_v34 = vld [vmem:[%s1671_s27 + $0x1e0] sm:$0xff]  ;;  %v425_v35 = vld [vmem:[%s1671_s27 + $0x1f0] sm:$0xff] }
  0x46   : > { %v427_v36 = vld [vmem:[%s1671_s27 + $0x200] sm:$0xff]  ;;  %424 = vst [vmem:[%s1676_s10 + $0xf0] sm:$0xff] %v423_v34  ;;  %426 = vst [vmem:[%s1676_s10 + $0xf8] sm:$0xff] %v425_v35  ;;  %v429_v37 = vld [vmem:[%s1671_s27 + $0x210] sm:$0xff] }
  0x47   : > { %428 = vst [vmem:[%s1676_s10 + $0x100] sm:$0xff] %v427_v36  ;;  %v431_v38 = vld [vmem:[%s1671_s27 + $0x220] sm:$0xff]  ;;  %v433_v39 = vld [vmem:[%s1671_s27 + $0x230] sm:$0xff]  ;;  %430 = vst [vmem:[%s1676_s10 + $0x108] sm:$0xff] %v429_v37 }
  0x48   : > { %432 = vst [vmem:[%s1676_s10 + $0x110] sm:$0xff] %v431_v38  ;;  %434 = vst [vmem:[%s1676_s10 + $0x118] sm:$0xff] %v433_v39  ;;  %v435_v40 = vld [vmem:[%s1671_s27 + $0x240] sm:$0xff]  ;;  %v437_v41 = vld [vmem:[%s1671_s27 + $0x250] sm:$0xff] }
  0x49   : > { %v439_v42 = vld [vmem:[%s1671_s27 + $0x260] sm:$0xff]  ;;  %436 = vst [vmem:[%s1676_s10 + $0x120] sm:$0xff] %v435_v40  ;;  %438 = vst [vmem:[%s1676_s10 + $0x128] sm:$0xff] %v437_v41  ;;  %v441_v43 = vld [vmem:[%s1671_s27 + $0x270] sm:$0xff] }
  0x4a   : > { %440 = vst [vmem:[%s1676_s10 + $0x130] sm:$0xff] %v439_v42  ;;  %v443_v44 = vld [vmem:[%s1671_s27 + $0x280] sm:$0xff]  ;;  %v445_v45 = vld [vmem:[%s1671_s27 + $0x290] sm:$0xff]  ;;  %442 = vst [vmem:[%s1676_s10 + $0x138] sm:$0xff] %v441_v43 }
  0x4b   : > { %444 = vst [vmem:[%s1676_s10 + $0x140] sm:$0xff] %v443_v44  ;;  %446 = vst [vmem:[%s1676_s10 + $0x148] sm:$0xff] %v445_v45  ;;  %v447_v46 = vld [vmem:[%s1671_s27 + $0x2a0] sm:$0xff]  ;;  %v449_v47 = vld [vmem:[%s1671_s27 + $0x2b0] sm:$0xff] }
  0x4c   : > { %v451_v48 = vld [vmem:[%s1671_s27 + $0x2c0] sm:$0xff]  ;;  %448 = vst [vmem:[%s1676_s10 + $0x150] sm:$0xff] %v447_v46  ;;  %450 = vst [vmem:[%s1676_s10 + $0x158] sm:$0xff] %v449_v47  ;;  %v453_v49 = vld [vmem:[%s1671_s27 + $0x2d0] sm:$0xff] }
  0x4d   : > { %452 = vst [vmem:[%s1676_s10 + $0x160] sm:$0xff] %v451_v48  ;;  %v455_v50 = vld [vmem:[%s1671_s27 + $0x2e0] sm:$0xff]  ;;  %v457_v51 = vld [vmem:[%s1671_s27 + $0x2f0] sm:$0xff]  ;;  %454 = vst [vmem:[%s1676_s10 + $0x168] sm:$0xff] %v453_v49 }
  0x4e   : > { %456 = vst [vmem:[%s1676_s10 + $0x170] sm:$0xff] %v455_v50  ;;  %458 = vst [vmem:[%s1676_s10 + $0x178] sm:$0xff] %v457_v51 }
  0x4f PF: > { %p1199_p0 = scmp.ge.s32.totalorder %s1528_s25, 1  ;;  %p479_p1 = scmp.lt.s32.totalorder %s1528_s25, 13 }
  0x51   : > { %p480_p2 = pnand %p1199_p0, %p479_p1 }
  0x52   : > { %s486_s0 = sand.u32 (!%p480_p2), 1, %s1504_s19   ;;  %s493_s28 = sand.u32 (!%p480_p2), 1, %s1496_s17  }
  0x53   : > { %483 = sbr.rel (%p480_p2) target bundleno = 406 (0x196), region = 92  ;;  %s526_s26 = sand.u32 (!%p480_p2), 1, %s1488_s15  }
  0x54   : > { %s1274_s11 = smul.u32 (!%p480_p2), 24, %s486_s0  ;;  %s1200_s5 = sshll.u32 (!%p480_p2), %s526_s26, 4 }
  0x55   : > { %s1275_s27 = smul.u32 (!%p480_p2), 384, %s493_s28  ;;  %s1201_s29 = sshll.u32 (!%p480_p2), %s1516_s22, 1 }
  0x56   : > { %p534_p3 = scmp.lt.s32.totalorder (!%p480_p2), %s1201_s29, 3  ;;  %s1787_s19 = scalar_lea.vmem (!%p480_p2), [#allocation3], %s1274_s11 }
  0x57   : > { %s1789_s17 = scalar_lea.vmem (!%p480_p2), [#allocation4], %s1275_s27  ;;  %s1791_s15 = scalar_lea.vmem (!%p480_p2), [#allocation5], %s1200_s5 }
  0x58   : > { %p1203_p4 = scmp.ne.s32.totalorder (!%p480_p2), %s1512_s21, 0 }
  0x5a   : > { %s1934_s29 = smov (!%p534_p3, %s1201_s29), 3  ;;  %549 = sbr.rel (%p1203_p4) target bundleno = 97 (0x61), region = 104 }
  0x5b   : > { %s536_s9 = scalar_lea.vmem %s1901_s2, %s1934_s29  ;;  %s541_s1 = scalar_lea.vmem %s1902_s3, %s1934_s29  ;;  %v1530_v52 = vmov (!%p1203_p4), 0.0  }
  0x5c   : > { %550 = vst [vmem:[#allocation2] sm:$0xff] (!%p1203_p4), %v1530_v52  ;;  %551 = vst [vmem:[#allocation2 + $0x8] sm:$0xff] (!%p1203_p4), %v1530_v52 }
  0x5d   : > { %552 = vst [vmem:[#allocation2 + $0x10] sm:$0xff] (!%p1203_p4), %v1530_v52  ;;  %553 = vst [vmem:[#allocation2 + $0x18] sm:$0xff] (!%p1203_p4), %v1530_v52 }
  0x61 PF: > { %v1366_v53 = vld [vmem:[%s1789_s17 + $0x4] ss:$8 sps:$4 sm:$0xff]   ;;  %v1368_v54 = vld [vmem:[%s1789_s17] ss:$8 sps:$4 sm:$0xff]   ;;  %v1531_v55 = vmov 0   ;;  %p1255_p5 = scmp.ne.s32.totalorder %s1512_s21, 5 }
  0x62   : > { %941 = vmatprep.mubr.bf16.mxu0 %v1531_v55  ;;  %866 = vmatprep.subr.bf16.mxu1 %v1366_v53  ;;  %v1369_v56 = vld [vmem:[%s1789_s17 + $0x14] ss:$8 sps:$4 sm:$0xff]   ;;  %v1371_v57 = vld [vmem:[%s1789_s17 + $0x10] ss:$8 sps:$4 sm:$0xff]   ;;  %v1372_v58 = vld [vmem:[%s1789_s17 + $0x24] ss:$8 sps:$4 sm:$0xff]  }
  0x63   : > { %867 = vmatpush1.bf16.msra.mxu1 %v1368_v54  ;;  %v1374_v59 = vld [vmem:[%s1789_s17 + $0x20] ss:$8 sps:$4 sm:$0xff]   ;;  %v1375_v60 = vld [vmem:[%s1789_s17 + $0x34] ss:$8 sps:$4 sm:$0xff]   ;;  %v1377_v61 = vld [vmem:[%s1789_s17 + $0x30] ss:$8 sps:$4 sm:$0xff]  }
  0x64   : > { %868 = vmatprep.subr.bf16.mxu1 %v1369_v56  ;;  %v1390_v62 = vld [vmem:[%s1789_s17 + $0x104] ss:$8 sps:$4 sm:$0xff]   ;;  %v1392_v63 = vld [vmem:[%s1789_s17 + $0x100] ss:$8 sps:$4 sm:$0xff]   ;;  %v1396_v1 = vld [vmem:[%s1789_s17 + $0x114] ss:$8 sps:$4 sm:$0xff]  }
  0x65   : > { %v1378_v0 = vld [vmem:[%s1789_s17 + $0x44] ss:$8 sps:$4 sm:$0xff]   ;;  %909 = vmatprep.subr.bf16.mxu0 %v1390_v62  ;;  %v1398_v2 = vld [vmem:[%s1789_s17 + $0x110] ss:$8 sps:$4 sm:$0xff]   ;;  %v1380_v3 = vld [vmem:[%s1789_s17 + $0x40] ss:$8 sps:$4 sm:$0xff]  }
  0x66   : > { %910 = vmatpush1.bf16.msra.mxu0 %v1392_v63  ;;  %v1381_v4 = vld [vmem:[%s1789_s17 + $0x54] ss:$8 sps:$4 sm:$0xff]   ;;  %v1402_v5 = vld [vmem:[%s1789_s17 + $0x124] ss:$8 sps:$4 sm:$0xff]   ;;  %v1404_v6 = vld [vmem:[%s1789_s17 + $0x120] ss:$8 sps:$4 sm:$0xff]  }
  0x67   : > { %869 = vmatpush1.bf16.msra.mxu1 %v1371_v57  ;;  %911 = vmatprep.subr.bf16.mxu0 %v1396_v1  ;;  %v1383_v7 = vld [vmem:[%s1789_s17 + $0x50] ss:$8 sps:$4 sm:$0xff]   ;;  %v1408_v8 = vld [vmem:[%s1789_s17 + $0x134] ss:$8 sps:$4 sm:$0xff]   ;;  %v1384_v9 = vld [vmem:[%s1789_s17 + $0x64] ss:$8 sps:$4 sm:$0xff]  }
  0x68   : > { %870 = vmatprep.subr.bf16.mxu1 %v1372_v58  ;;  %v1410_v10 = vld [vmem:[%s1789_s17 + $0x130] ss:$8 sps:$4 sm:$0xff]   ;;  %v1386_v11 = vld [vmem:[%s1789_s17 + $0x60] ss:$8 sps:$4 sm:$0xff]   ;;  %v1414_v12 = vld [vmem:[%s1789_s17 + $0x144] ss:$8 sps:$4 sm:$0xff]  }
  0x69   : > { %v1387_v13 = vld [vmem:[%s1789_s17 + $0x74] ss:$8 sps:$4 sm:$0xff]   ;;  %v1416_v14 = vld [vmem:[%s1789_s17 + $0x140] ss:$8 sps:$4 sm:$0xff]   ;;  %v1389_v15 = vld [vmem:[%s1789_s17 + $0x70] ss:$8 sps:$4 sm:$0xff]  }
  0x6a   : > { %912 = vmatpush1.bf16.msra.mxu0 %v1398_v2  ;;  %v1420_v16 = vld [vmem:[%s1789_s17 + $0x154] ss:$8 sps:$4 sm:$0xff]   ;;  %v1393_v17 = vld [vmem:[%s1789_s17 + $0x84] ss:$8 sps:$4 sm:$0xff]   ;;  %v1422_v18 = vld [vmem:[%s1789_s17 + $0x150] ss:$8 sps:$4 sm:$0xff]  }
  0x6b   : > { %871 = vmatpush1.bf16.msra.mxu1 %v1374_v59  ;;  %913 = vmatprep.subr.bf16.mxu0 %v1402_v5  ;;  %v1395_v19 = vld [vmem:[%s1789_s17 + $0x80] ss:$8 sps:$4 sm:$0xff]   ;;  %v1426_v20 = vld [vmem:[%s1789_s17 + $0x164] ss:$8 sps:$4 sm:$0xff]   ;;  %v1399_v21 = vld [vmem:[%s1789_s17 + $0x94] ss:$8 sps:$4 sm:$0xff]  }
  0x6c   : > { %872 = vmatprep.subr.bf16.mxu1 %v1375_v60  ;;  %v1428_v22 = vld [vmem:[%s1789_s17 + $0x160] ss:$8 sps:$4 sm:$0xff]   ;;  %v1401_v24 = vld [vmem:[%s1789_s17 + $0x90] ss:$8 sps:$4 sm:$0xff]   ;;  %v1432_v25 = vld [vmem:[%s1789_s17 + $0x174] ss:$8 sps:$4 sm:$0xff]  }
  0x6d   : > { %v1441_v23 = vld [vmem:[%s1787_s19 + $0x4] ss:$12 sps:$4 sm:$0xff]   ;;  %v1438_v30 = vld [vmem:[%s1787_s19 + $0x8] ss:$12 sps:$4 sm:$0xff]   ;;  %v1439_v40 = vld [vmem:[%s1787_s19] ss:$12 sps:$4 sm:$0xff]  }
  0x6e   : > { %914 = vmatpush1.bf16.msra.mxu0 %v1404_v6  ;;  %v1405_v26 = vld [vmem:[%s1789_s17 + $0xa4] ss:$8 sps:$4 sm:$0xff]   ;;  %898 = vmatprep.mubr.bf16.mxu1 %v1441_v23  ;;  %v1434_v27 = vld [vmem:[%s1789_s17 + $0x170] ss:$8 sps:$4 sm:$0xff]   ;;  %v1407_v28 = vld [vmem:[%s1789_s17 + $0xa0] ss:$8 sps:$4 sm:$0xff]  }
  0x6f   : > { %873 = vmatpush1.bf16.msra.mxu1 %v1377_v61  ;;  %915 = vmatprep.subr.bf16.mxu0 %v1408_v8  ;;  %v1411_v29 = vld [vmem:[%s1789_s17 + $0xb4] ss:$8 sps:$4 sm:$0xff]   ;;  %v1413_v31 = vld [vmem:[%s1789_s17 + $0xb0] ss:$8 sps:$4 sm:$0xff]   ;;  %v1417_v32 = vld [vmem:[%s1789_s17 + $0xc4] ss:$8 sps:$4 sm:$0xff]   ;;  %v970_v61 = vlaneseq (!%p1255_p5) }
  0x70   : > { %874 = vmatprep.subr.bf16.mxu1 %v1378_v0  ;;  %v1419_v33 = vld [vmem:[%s1789_s17 + $0xc0] ss:$8 sps:$4 sm:$0xff]   ;;  %v1423_v34 = vld [vmem:[%s1789_s17 + $0xd4] ss:$8 sps:$4 sm:$0xff]   ;;  %v1425_v35 = vld [vmem:[%s1789_s17 + $0xd0] ss:$8 sps:$4 sm:$0xff]  }
  0x71   : > { %v1429_v36 = vld [vmem:[%s1789_s17 + $0xe4] ss:$8 sps:$4 sm:$0xff]   ;;  %v1431_v37 = vld [vmem:[%s1789_s17 + $0xe0] ss:$8 sps:$4 sm:$0xff]   ;;  %v1435_v38 = vld [vmem:[%s1789_s17 + $0xf4] ss:$8 sps:$4 sm:$0xff]  }
  0x72   : > { %916 = vmatpush1.bf16.msra.mxu0 %v1410_v10  ;;  %v1437_v39 = vld [vmem:[%s1789_s17 + $0xf0] ss:$8 sps:$4 sm:$0xff]   ;;  %v556_v51 = vld [vmem:[#allocation2 + $0x10] sm:$0xff]  ;;  %v557_v55 = vld [vmem:[#allocation2 + $0x18] sm:$0xff]  ;;  %v971_v62 = vshrl.u32 (!%p1255_p5), %v970_v61, 7 }
  0x73   : > { %875 = vmatpush1.bf16.msra.mxu1 %v1380_v3  ;;  %917 = vmatprep.subr.bf16.mxu0 %v1414_v12  ;;  %v554_v45 = vld [vmem:[#allocation2] sm:$0xff]  ;;  %v555_v48 = vld [vmem:[#allocation2 + $0x8] sm:$0xff] }
  0x74   : > { %876 = vmatprep.subr.bf16.mxu1 %v1381_v4  ;;  %v968_v63 = vld [vmem:[%s536_s9] sm:$0x3] (!%p1255_p5)  ;;  %v972_v2 = vsub.s32 (!%p1255_p5), 0, %v971_v62  ;;  %v976_v3 = vsub.s32 (!%p1255_p5), 1, %v971_v62 }
  0x75   : > { %v984_v0 = vld [vmem:[%s541_s1] sm:$0x3] (!%p1255_p5) }
  0x76   : > { %918 = vmatpush1.bf16.msra.mxu0 %v1416_v14  ;;  %v977_v8 = vrot.slane (!%p1255_p5), %v968_v63, %v976_v3  ;;  %v993_v10 = vrot.slane (!%p1255_p5), %v984_v0, %v976_v3 }
  0x77   : > { %877 = vmatpush1.bf16.msra.mxu1 %v1383_v7  ;;  %919 = vmatprep.subr.bf16.mxu0 %v1420_v16  ;;  %v973_v7 = vrot.slane (!%p1255_p5), %v968_v63, %v972_v2 }
  0x78   : > { %878 = vmatprep.subr.bf16.mxu1 %v1384_v9  ;;  %v989_v9 = vrot.slane (!%p1255_p5), %v984_v0, %v972_v2 }
  0x7a   : > { %920 = vmatpush1.bf16.msra.mxu0 %v1422_v18 }
  0x7b   : > { %879 = vmatpush1.bf16.msra.mxu1 %v1386_v11  ;;  %921 = vmatprep.subr.bf16.mxu0 %v1426_v20 }
  0x7c   : > { %880 = vmatprep.subr.bf16.mxu1 %v1387_v13 }
  0x7e   : > { %922 = vmatpush1.bf16.msra.mxu0 %v1428_v22 }
  0x7f   : > { %881 = vmatpush1.bf16.msra.mxu1 %v1389_v15  ;;  %923 = vmatprep.subr.bf16.mxu0 %v1432_v25 }
  0x80   : > { %882 = vmatprep.subr.bf16.mxu1 %v1393_v17 }
  0x82   : > { %924 = vmatpush1.bf16.msra.mxu0 %v1434_v27 }
  0x83   : > { %883 = vmatpush1.bf16.msra.mxu1 %v1395_v19 }
  0x84   : > { %884 = vmatprep.subr.bf16.mxu1 %v1399_v21 }
  0x85   : > { %942 = vmatmul.mubr.bf16.vlgmr.msra.gmra.mrb[0].mxu0 %v1438_v30 }
  0x87   : > { %885 = vmatpush1.bf16.msra.mxu1 %v1401_v24 }
  0x88   : > { %886 = vmatprep.subr.bf16.mxu1 %v1405_v26 }
  0x8b   : > { %887 = vmatpush1.bf16.msra.mxu1 %v1407_v28 }
  0x8c   : > { %888 = vmatprep.subr.bf16.mxu1 %v1411_v29 }
  0x8f   : > { %889 = vmatpush1.bf16.msra.mxu1 %v1413_v31 }
  0x90   : > { %890 = vmatprep.subr.bf16.mxu1 %v1417_v32 }
  0x93   : > { %891 = vmatpush1.bf16.msra.mxu1 %v1419_v33 }
  0x94   : > { %892 = vmatprep.subr.bf16.mxu1 %v1423_v34 }
  0x97   : > { %893 = vmatpush1.bf16.msra.mxu1 %v1425_v35 }
  0x98   : > { %894 = vmatprep.subr.bf16.mxu1 %v1429_v36 }
  0x9b   : > { %895 = vmatpush1.bf16.msra.mxu1 %v1431_v37 }
  0x9c   : > { %896 = vmatprep.subr.bf16.mxu1 %v1435_v38 }
  0x9f   : > { %897 = vmatpush1.bf16.msra.mxu1 %v1437_v39 }
  0xa2   : > { %899 = vmatmul.mubr.bf16.vlgmr.msra.gmra.mrb[0].mxu1 %v1439_v40 }
 0x158   : > { %v943_v41 = vpop.f32.mrb[0].mxu0 }
 0x159   : > { %v945_v42 = vpop.f32.mrb[1].mxu0 }
 0x15a   : > { %v947_v43 = vpop.f32.mrb[2].mxu0 }
 0x15b   : > { %v949_v44 = vpop.f32.mrb[3].mxu0 }
 0x175   : > { %v900_v46 = vpop.f32.mrb[0].mxu1 }
 0x176   : > { %v944_v47 = vadd.f32 %v943_v41, %v900_v46  ;;  %v902_v49 = vpop.f32.mrb[1].mxu1 }
 0x177   : > { %v946_v50 = vadd.f32 %v945_v42, %v902_v49  ;;  %v904_v52 = vpop.f32.mrb[2].mxu1  ;;  %963 = sbr.rel (%p1255_p5) target bundleno = 398 (0x18e), region = 108 }
 0x178   : > { %v952_v53 = vadd.f32 %v944_v47, %v554_v45  ;;  %v948_v54 = vadd.f32 %v947_v43, %v904_v52  ;;  %v906_v56 = vpop.f32.mrb[3].mxu1 }
 0x179   : > { %v953_v57 = vadd.f32 %v946_v50, %v555_v48  ;;  %v950_v58 = vadd.f32 %v949_v44, %v906_v56 }
 0x17a   : > { %956 = vst [vmem:[#allocation2] sm:$0xff] %v952_v53  ;;  %v954_v59 = vadd.f32 %v948_v54, %v556_v51 }
 0x17b   : > { %957 = vst [vmem:[#allocation2 + $0x8] sm:$0xff] %v953_v57  ;;  %v955_v60 = vadd.f32 %v950_v58, %v557_v55 }
 0x17c   : > { %958 = vst [vmem:[#allocation2 + $0x10] sm:$0xff] %v954_v59 }
 0x17d   : > { %959 = vst [vmem:[#allocation2 + $0x18] sm:$0xff] %v955_v60 }
 0x181   : > { %v964_v1 = vld [vmem:[#allocation2] sm:$0xff] }
 0x182   : > { %v965_v4 = vld [vmem:[#allocation2 + $0x8] sm:$0xff]  ;;  %v980_v11 = vmul.f32 %v973_v7, %v964_v1 }
 0x183   : > { %v966_v5 = vld [vmem:[#allocation2 + $0x10] sm:$0xff]  ;;  %v981_v12 = vmul.f32 %v977_v8, %v965_v4 }
 0x184   : > { %v967_v6 = vld [vmem:[#allocation2 + $0x18] sm:$0xff]  ;;  %v982_v13 = vmul.f32 %v973_v7, %v966_v5  ;;  %v996_v15 = vadd.f32 %v989_v9, %v980_v11 }
 0x185   : > { %v983_v14 = vmul.f32 %v977_v8, %v967_v6  ;;  %v997_v16 = vadd.f32 %v993_v10, %v981_v12 }
 0x186   : > { %v998_v17 = vadd.f32 %v989_v9, %v982_v13  ;;  %v1000_v19 = vmax.f32 %v996_v15, 0.0 }
 0x187   : > { %v999_v18 = vadd.f32 %v993_v10, %v983_v14  ;;  %v1001_v20 = vmax.f32 %v997_v16, 0.0 }
 0x188   : > { %v1002_v21 = vmax.f32 %v998_v17, 0.0 }
 0x189   : > { %v1003_v22 = vmax.f32 %v999_v18, 0.0  ;;  %v1265_v23 = vpack.c.bf16 %v1001_v20, %v1000_v19 }
 0x18b   : > { %v1266_v24 = vpack.c.bf16 %v1003_v22, %v1002_v21  ;;  %1016 = vst [vmem:[%s1791_s15] sm:$0xff] %v1265_v23 }
 0x18d   : > { %1017 = vst [vmem:[%s1791_s15 + $0x8] sm:$0xff] %v1266_v24 }
 0x18e PF: > { %1024 = sbr.rel (!%p1651_p12) target bundleno = 406 (0x196), region = 112  ;;  %s1267_s1 = sshll.u32 (%p1651_p12), %s1516_s22, 3 }
 0x18f   : > { %s1030_s5 = scalar_lea.vmem (%p1651_p12), %s1903_s4, %s1267_s1 }
 0x192   : > { %v1060_v25 = vld [vmem:[%s1791_s15] sm:$0xff] (%p1651_p12) }
 0x193   : > { %1061 = vst [vmem:[%s1030_s5] sm:$0xff] (%p1651_p12), %v1060_v25 }
 0x194   : > { %v1062_v26 = vld [vmem:[%s1791_s15 + $0x8] sm:$0xff] (%p1651_p12) }
 0x195   : > { %1063 = vst [vmem:[%s1030_s5 + $0x10] sm:$0xff] %v1062_v26 }
 0x196 PF: > { %s14_s25 = sadd.s32 1, %s1528_s25   ;;  %s1915_s14 = sld [smem:[#allocation6_spill]] }
 0x197   : > { %p11_p6 = scmp.ge.s32.totalorder %s14_s25, 14   ;;  %s1916_s29 = sld [smem:[#allocation7_spill]] }
 0x198   : > { %s1917_s15 = smov %s1492_s16  ;;  %s1918_s16 = smov %s1649_s13 }
 0x199   : > { %s1919_s17 = smov %s1500_s18  ;;  %s1920_s18 = smov %s1646_s12 }
 0x19a   : > { %s1921_s19 = smov %s1508_s20  ;;  %s1922_s20 = smov %s1632_s7 }
 0x19b   : > { %s1923_s21 = smov %s1520_s23  ;;  %s1924_s22 = smov %s1524_s24 }
 0x19c   : > { %s1925_s23 = smov %s1915_s14  ;;  %13 = sbr.rel (!%p11_p6) target bundleno = 9 (0x9), region = 201 }
 0x19d   : > { %s1926_s24 = smov %s1916_s29 }

// kernel: resnet18_baseline_forward.42
= control target key start
LH: loop header
LB: loop body
LE: loop exit
PB: predicated region body
PF: predicated region fallthrough
CT: control target
= control target key end

     0   :  { %s1156_s15 = smov 0   ;;  %s1158_s16 = smov 0   ;;  %s1347_s0 = inlined_call_operand.vmem [shape: bf16[16,256], index: 0, kind: input, shape index: {}]   ;;  %s1348_s1 = inlined_call_operand.vmem [shape: bf16[256,512], index: 1, kind: input, shape index: {}]   ;;  %s1349_s2 = inlined_call_operand.vmem [shape: f32[1,512], index: 2, kind: input, shape index: {}]   ;;  %s1350_s3 = inlined_call_operand.vmem [shape: f32[1,512], index: 3, kind: input, shape index: {}]   ;;  %s1351_s4 = inlined_call_operand.vmem [shape: bf16[16,512], index: 4, kind: output, shape index: {}]  }
   0x1   :  { %s1160_s17 = smov 0   ;;  %s1162_s18 = smov 0  }
   0x2   :  { %s1164_s19 = smov 0  }
   0x3 LB: > { %s29_s20 = sadd.s32 1, %s1125_s18  ;;  %s942_s21 = sadd.s32 4294967295, %s1129_s19   ;;  %s1129_s19 = sphi %s1164_s19, %s14_s19   ;;  %s1125_s18 = sphi %s1162_s18, %s1356_s18   ;;  %s1121_s17 = sphi %s1160_s17, %s1355_s17   ;;  %s1117_s16 = sphi %s1158_s16, %s1354_s16   ;;  %s1113_s15 = sphi %s1156_s15, %s1353_s15  }
   0x4   : > { %p31_p0 = scmp.ge.s32.totalorder %s29_s20, 2  ;;  %p77_p1 = scmp.ne.s32.totalorder %s1117_s16, %s1113_s15 }
   0x5   : > { %p78_p2 = scmp.eq.s32.totalorder %s1129_s19, 0  ;;  %p161_p4 = scmp.eq.s32.totalorder %s942_s21, 1 }
   0x6   : > { %s1358_s20 = smov (%p31_p0, %s29_s20), 0  ;;  %s70_s23 = sadd.s32 1, %s1117_s16 }
   0x7   : > { %p79_p3 = por %p78_p2, %p77_p1  ;;  %s66_s22 = ssub.s32 %s1125_s18, %s1358_s20 }
   0x8   : > { %p68_p5 = scmp.eq.s32.totalorder %s66_s22, 0  ;;  %p1191_p6 = por %p161_p4, %p77_p1 }
   0x9   : > { %p946_p7 = scmp.ge.s32.totalorder %s1129_s19, 2 }
   0xa   : > { %s1196_s25 = scalar_select %p68_p5, %s1117_s16, %s70_s23  }
   0xb   : > { %198 = sbr.rel (%p946_p7) target bundleno = 38 (0x26), region = 20 }
  0x12   : > { %201 = sbr.rel (!%p79_p3) target bundleno = 38 (0x26), region = 24  ;;  %s203_s26 = sand.u32 (%p79_p3), 1, %s1117_s16  }
  0x13   : > { %s996_s27 = sshll.u32 (%p79_p3), %s1125_s18, 3  ;;  %s947_s28 = sshll.u32 (%p79_p3), %s203_s26, 8 }
  0x14   : > { %s1204_s5 = scalar_lea.vmem (%p79_p3), %s1348_s1, %s996_s27  ;;  %s1209_s6 = scalar_lea.vmem (%p79_p3), [#allocation3], %s947_s28 }
  0x15   : > { %v301_v0 = vld [vmem:[%s1204_s5] sm:$0xff] (%p79_p3)  ;;  %v303_v1 = vld [vmem:[%s1204_s5 + $0x10] sm:$0xff] (%p79_p3) }
  0x16   : > { %v305_v2 = vld [vmem:[%s1204_s5 + $0x20] sm:$0xff] (%p79_p3)  ;;  %302 = vst [vmem:[%s1209_s6] sm:$0xff] (%p79_p3), %v301_v0  ;;  %304 = vst [vmem:[%s1209_s6 + $0x8] sm:$0xff] (%p79_p3), %v303_v1  ;;  %v307_v3 = vld [vmem:[%s1204_s5 + $0x30] sm:$0xff] (%p79_p3) }
  0x17   : > { %306 = vst [vmem:[%s1209_s6 + $0x10] sm:$0xff] (%p79_p3), %v305_v2  ;;  %v309_v4 = vld [vmem:[%s1204_s5 + $0x40] sm:$0xff] (%p79_p3)  ;;  %v311_v5 = vld [vmem:[%s1204_s5 + $0x50] sm:$0xff] (%p79_p3)  ;;  %308 = vst [vmem:[%s1209_s6 + $0x18] sm:$0xff] (%p79_p3), %v307_v3 }
  0x18   : > { %310 = vst [vmem:[%s1209_s6 + $0x20] sm:$0xff] (%p79_p3), %v309_v4  ;;  %312 = vst [vmem:[%s1209_s6 + $0x28] sm:$0xff] (%p79_p3), %v311_v5  ;;  %v313_v6 = vld [vmem:[%s1204_s5 + $0x60] sm:$0xff] (%p79_p3)  ;;  %v315_v7 = vld [vmem:[%s1204_s5 + $0x70] sm:$0xff] (%p79_p3) }
  0x19   : > { %v317_v8 = vld [vmem:[%s1204_s5 + $0x80] sm:$0xff]  ;;  %314 = vst [vmem:[%s1209_s6 + $0x30] sm:$0xff] %v313_v6  ;;  %316 = vst [vmem:[%s1209_s6 + $0x38] sm:$0xff] %v315_v7  ;;  %v319_v9 = vld [vmem:[%s1204_s5 + $0x90] sm:$0xff] }
  0x1a   : > { %318 = vst [vmem:[%s1209_s6 + $0x40] sm:$0xff] %v317_v8  ;;  %v321_v10 = vld [vmem:[%s1204_s5 + $0xa0] sm:$0xff]  ;;  %v323_v11 = vld [vmem:[%s1204_s5 + $0xb0] sm:$0xff]  ;;  %320 = vst [vmem:[%s1209_s6 + $0x48] sm:$0xff] %v319_v9 }
  0x1b   : > { %322 = vst [vmem:[%s1209_s6 + $0x50] sm:$0xff] %v321_v10  ;;  %324 = vst [vmem:[%s1209_s6 + $0x58] sm:$0xff] %v323_v11  ;;  %v325_v12 = vld [vmem:[%s1204_s5 + $0xc0] sm:$0xff]  ;;  %v327_v13 = vld [vmem:[%s1204_s5 + $0xd0] sm:$0xff] }
  0x1c   : > { %v329_v14 = vld [vmem:[%s1204_s5 + $0xe0] sm:$0xff]  ;;  %326 = vst [vmem:[%s1209_s6 + $0x60] sm:$0xff] %v325_v12  ;;  %328 = vst [vmem:[%s1209_s6 + $0x68] sm:$0xff] %v327_v13  ;;  %v331_v15 = vld [vmem:[%s1204_s5 + $0xf0] sm:$0xff] }
  0x1d   : > { %330 = vst [vmem:[%s1209_s6 + $0x70] sm:$0xff] %v329_v14  ;;  %v333_v16 = vld [vmem:[%s1204_s5 + $0x100] sm:$0xff]  ;;  %v335_v17 = vld [vmem:[%s1204_s5 + $0x110] sm:$0xff]  ;;  %332 = vst [vmem:[%s1209_s6 + $0x78] sm:$0xff] %v331_v15 }
  0x1e   : > { %334 = vst [vmem:[%s1209_s6 + $0x80] sm:$0xff] %v333_v16  ;;  %336 = vst [vmem:[%s1209_s6 + $0x88] sm:$0xff] %v335_v17  ;;  %v337_v18 = vld [vmem:[%s1204_s5 + $0x120] sm:$0xff]  ;;  %v339_v19 = vld [vmem:[%s1204_s5 + $0x130] sm:$0xff] }
  0x1f   : > { %v341_v20 = vld [vmem:[%s1204_s5 + $0x140] sm:$0xff]  ;;  %338 = vst [vmem:[%s1209_s6 + $0x90] sm:$0xff] %v337_v18  ;;  %340 = vst [vmem:[%s1209_s6 + $0x98] sm:$0xff] %v339_v19  ;;  %v343_v21 = vld [vmem:[%s1204_s5 + $0x150] sm:$0xff] }
  0x20   : > { %342 = vst [vmem:[%s1209_s6 + $0xa0] sm:$0xff] %v341_v20  ;;  %v345_v22 = vld [vmem:[%s1204_s5 + $0x160] sm:$0xff]  ;;  %v347_v23 = vld [vmem:[%s1204_s5 + $0x170] sm:$0xff]  ;;  %344 = vst [vmem:[%s1209_s6 + $0xa8] sm:$0xff] %v343_v21 }
  0x21   : > { %346 = vst [vmem:[%s1209_s6 + $0xb0] sm:$0xff] %v345_v22  ;;  %348 = vst [vmem:[%s1209_s6 + $0xb8] sm:$0xff] %v347_v23  ;;  %v349_v24 = vld [vmem:[%s1204_s5 + $0x180] sm:$0xff]  ;;  %v351_v25 = vld [vmem:[%s1204_s5 + $0x190] sm:$0xff] }
  0x22   : > { %v353_v26 = vld [vmem:[%s1204_s5 + $0x1a0] sm:$0xff]  ;;  %350 = vst [vmem:[%s1209_s6 + $0xc0] sm:$0xff] %v349_v24  ;;  %352 = vst [vmem:[%s1209_s6 + $0xc8] sm:$0xff] %v351_v25  ;;  %v355_v27 = vld [vmem:[%s1204_s5 + $0x1b0] sm:$0xff] }
  0x23   : > { %354 = vst [vmem:[%s1209_s6 + $0xd0] sm:$0xff] %v353_v26  ;;  %v357_v28 = vld [vmem:[%s1204_s5 + $0x1c0] sm:$0xff]  ;;  %v359_v29 = vld [vmem:[%s1204_s5 + $0x1d0] sm:$0xff]  ;;  %356 = vst [vmem:[%s1209_s6 + $0xd8] sm:$0xff] %v355_v27 }
  0x24   : > { %358 = vst [vmem:[%s1209_s6 + $0xe0] sm:$0xff] %v357_v28  ;;  %360 = vst [vmem:[%s1209_s6 + $0xe8] sm:$0xff] %v359_v29  ;;  %v361_v30 = vld [vmem:[%s1204_s5 + $0x1e0] sm:$0xff]  ;;  %v363_v31 = vld [vmem:[%s1204_s5 + $0x1f0] sm:$0xff] }
  0x25   : > { %362 = vst [vmem:[%s1209_s6 + $0xf0] sm:$0xff] %v361_v30  ;;  %364 = vst [vmem:[%s1209_s6 + $0xf8] sm:$0xff] %v363_v31 }
  0x26 PF: > { %p950_p8 = scmp.ge.s32.totalorder %s1129_s19, 1  ;;  %p385_p9 = scmp.lt.s32.totalorder %s1129_s19, 3 }
  0x28   : > { %p386_p10 = pnand %p950_p8, %p385_p9 }
  0x29   : > { %s392_s7 = sand.u32 (!%p386_p10), 1, %s1113_s15   ;;  %v1090_v32 = vld [vmem:[%s1347_s0 + $0x4] ss:$8 sps:$4 sm:$0xff] (!%p386_p10)   ;;  %v1088_v1 = vld [vmem:[%s1347_s0] ss:$8 sps:$4 sm:$0xff] (!%p386_p10)   ;;  %s953_s14 = sshll.u32 (!%p386_p10), %s1121_s17, 1  ;;  %v736_v2 = vlaneseq (!%p386_p10) }
  0x2a   : > { %389 = sbr.rel (%p386_p10) target bundleno = 339 (0x153), region = 70  ;;  %s951_s8 = sshll.u32 (!%p386_p10), %s392_s7, 8  ;;  %708 = vmatprep.mubr.bf16.mxu0 (!%p386_p10), %v1090_v32 }
  0x2b   : > { %s1280_s11 = scalar_lea.vmem (!%p386_p10), [#allocation3], %s951_s8  ;;  %p449_p11 = scmp.lt.s32.totalorder (!%p386_p10), %s953_s14, 3  ;;  %v737_v3 = vshrl.u32 (!%p386_p10), %v736_v2, 7 }
  0x2c   : > { %v1040_v33 = vld [vmem:[%s1280_s11 + $0x4] ss:$8 sps:$4 sm:$0xff] (!%p386_p10)   ;;  %v1042_v34 = vld [vmem:[%s1280_s11] ss:$8 sps:$4 sm:$0xff] (!%p386_p10)   ;;  %v1043_v35 = vld [vmem:[%s1280_s11 + $0x14] ss:$8 sps:$4 sm:$0xff] (!%p386_p10)  }
  0x2d   : > { %676 = vmatprep.subr.bf16.mxu0 (!%p386_p10), %v1040_v33  ;;  %v1045_v36 = vld [vmem:[%s1280_s11 + $0x10] ss:$8 sps:$4 sm:$0xff] (!%p386_p10)   ;;  %v1046_v37 = vld [vmem:[%s1280_s11 + $0x24] ss:$8 sps:$4 sm:$0xff] (!%p386_p10)   ;;  %v1048_v38 = vld [vmem:[%s1280_s11 + $0x20] ss:$8 sps:$4 sm:$0xff] (!%p386_p10)  }
  0x2e   : > { %677 = vmatpush1.bf16.msra.mxu0 (!%p386_p10), %v1042_v34  ;;  %v1049_v39 = vld [vmem:[%s1280_s11 + $0x34] ss:$8 sps:$4 sm:$0xff] (!%p386_p10)   ;;  %v1051_v40 = vld [vmem:[%s1280_s11 + $0x30] ss:$8 sps:$4 sm:$0xff] (!%p386_p10)   ;;  %v1052_v41 = vld [vmem:[%s1280_s11 + $0x44] ss:$8 sps:$4 sm:$0xff] (!%p386_p10)  }
  0x2f   : > { %678 = vmatprep.subr.bf16.mxu0 (!%p386_p10), %v1043_v35  ;;  %v1054_v42 = vld [vmem:[%s1280_s11 + $0x40] ss:$8 sps:$4 sm:$0xff] (!%p386_p10)   ;;  %v1055_v43 = vld [vmem:[%s1280_s11 + $0x54] ss:$8 sps:$4 sm:$0xff] (!%p386_p10)   ;;  %v1057_v44 = vld [vmem:[%s1280_s11 + $0x50] ss:$8 sps:$4 sm:$0xff] (!%p386_p10)  }
  0x30   : > { %v1058_v45 = vld [vmem:[%s1280_s11 + $0x64] ss:$8 sps:$4 sm:$0xff] (!%p386_p10)   ;;  %v1060_v46 = vld [vmem:[%s1280_s11 + $0x60] ss:$8 sps:$4 sm:$0xff] (!%p386_p10)   ;;  %v1061_v47 = vld [vmem:[%s1280_s11 + $0x74] ss:$8 sps:$4 sm:$0xff] (!%p386_p10)  }
  0x31   : > { %v1063_v48 = vld [vmem:[%s1280_s11 + $0x70] ss:$8 sps:$4 sm:$0xff]   ;;  %v1064_v49 = vld [vmem:[%s1280_s11 + $0x84] ss:$8 sps:$4 sm:$0xff]   ;;  %v1066_v50 = vld [vmem:[%s1280_s11 + $0x80] ss:$8 sps:$4 sm:$0xff]  }
  0x32   : > { %679 = vmatpush1.bf16.msra.mxu0 %v1045_v36  ;;  %v1067_v51 = vld [vmem:[%s1280_s11 + $0x94] ss:$8 sps:$4 sm:$0xff]   ;;  %v1069_v52 = vld [vmem:[%s1280_s11 + $0x90] ss:$8 sps:$4 sm:$0xff]   ;;  %v1070_v53 = vld [vmem:[%s1280_s11 + $0xa4] ss:$8 sps:$4 sm:$0xff]  }
  0x33   : > { %680 = vmatprep.subr.bf16.mxu0 %v1046_v37  ;;  %v1072_v54 = vld [vmem:[%s1280_s11 + $0xa0] ss:$8 sps:$4 sm:$0xff]   ;;  %v1073_v55 = vld [vmem:[%s1280_s11 + $0xb4] ss:$8 sps:$4 sm:$0xff]   ;;  %v1075_v56 = vld [vmem:[%s1280_s11 + $0xb0] ss:$8 sps:$4 sm:$0xff]  }
  0x34   : > { %v1076_v57 = vld [vmem:[%s1280_s11 + $0xc4] ss:$8 sps:$4 sm:$0xff]   ;;  %v1078_v58 = vld [vmem:[%s1280_s11 + $0xc0] ss:$8 sps:$4 sm:$0xff]   ;;  %v1079_v59 = vld [vmem:[%s1280_s11 + $0xd4] ss:$8 sps:$4 sm:$0xff]  }
  0x35   : > { %v1081_v60 = vld [vmem:[%s1280_s11 + $0xd0] ss:$8 sps:$4 sm:$0xff]   ;;  %v1082_v61 = vld [vmem:[%s1280_s11 + $0xe4] ss:$8 sps:$4 sm:$0xff]   ;;  %v1084_v62 = vld [vmem:[%s1280_s11 + $0xe0] ss:$8 sps:$4 sm:$0xff]  }
  0x36   : > { %681 = vmatpush1.bf16.msra.mxu0 %v1048_v38  ;;  %v1085_v63 = vld [vmem:[%s1280_s11 + $0xf4] ss:$8 sps:$4 sm:$0xff]   ;;  %v1087_v0 = vld [vmem:[%s1280_s11 + $0xf0] ss:$8 sps:$4 sm:$0xff]   ;;  %s1360_s14 = smov (!%p449_p11, %s953_s14), 3  ;;  %v738_v4 = vsub.s32 0, %v737_v3 }
  0x37   : > { %682 = vmatprep.subr.bf16.mxu0 %v1049_v39  ;;  %s451_s23 = scalar_lea.vmem %s1349_s2, %s1360_s14  ;;  %s456_s28 = scalar_lea.vmem %s1350_s3, %s1360_s14  ;;  %v742_v6 = vsub.s32 1, %v737_v3 }
  0x38   : > { %v734_v5 = vld [vmem:[%s451_s23] sm:$0x3]  ;;  %s952_s29 = sshll.u32 %s392_s7, 4  ;;  %s999_s15 = sshll.u32 (%p1191_p6), %s1121_s17, 3 }
  0x39   : > { %v750_v7 = vld [vmem:[%s456_s28] sm:$0x3]  ;;  %v739_v8 = vrot.slane %v734_v5, %v738_v4  ;;  %v743_v9 = vrot.slane %v734_v5, %v742_v6  ;;  %s433_s30 = scalar_lea.vmem [#allocation4], %s952_s29  ;;  %s792_s7 = scalar_lea.vmem (%p1191_p6), %s1351_s4, %s999_s15 }
  0x3a   : > { %683 = vmatpush1.bf16.msra.mxu0 %v1051_v40  ;;  %v755_v10 = vrot.slane %v750_v7, %v738_v4  ;;  %v759_v12 = vrot.slane %v750_v7, %v742_v6 }
  0x3b   : > { %684 = vmatprep.subr.bf16.mxu0 %v1052_v41 }
  0x3e   : > { %685 = vmatpush1.bf16.msra.mxu0 %v1054_v42 }
  0x3f   : > { %686 = vmatprep.subr.bf16.mxu0 %v1055_v43 }
  0x42   : > { %687 = vmatpush1.bf16.msra.mxu0 %v1057_v44 }
  0x43   : > { %688 = vmatprep.subr.bf16.mxu0 %v1058_v45 }
  0x46   : > { %689 = vmatpush1.bf16.msra.mxu0 %v1060_v46 }
  0x47   : > { %690 = vmatprep.subr.bf16.mxu0 %v1061_v47 }
  0x4a   : > { %691 = vmatpush1.bf16.msra.mxu0 %v1063_v48 }
  0x4b   : > { %692 = vmatprep.subr.bf16.mxu0 %v1064_v49 }
  0x4e   : > { %693 = vmatpush1.bf16.msra.mxu0 %v1066_v50 }
  0x4f   : > { %694 = vmatprep.subr.bf16.mxu0 %v1067_v51 }
  0x52   : > { %695 = vmatpush1.bf16.msra.mxu0 %v1069_v52 }
  0x53   : > { %696 = vmatprep.subr.bf16.mxu0 %v1070_v53 }
  0x56   : > { %697 = vmatpush1.bf16.msra.mxu0 %v1072_v54 }
  0x57   : > { %698 = vmatprep.subr.bf16.mxu0 %v1073_v55 }
  0x5a   : > { %699 = vmatpush1.bf16.msra.mxu0 %v1075_v56 }
  0x5b   : > { %700 = vmatprep.subr.bf16.mxu0 %v1076_v57 }
  0x5e   : > { %701 = vmatpush1.bf16.msra.mxu0 %v1078_v58 }
  0x5f   : > { %702 = vmatprep.subr.bf16.mxu0 %v1079_v59 }
  0x62   : > { %703 = vmatpush1.bf16.msra.mxu0 %v1081_v60 }
  0x63   : > { %704 = vmatprep.subr.bf16.mxu0 %v1082_v61 }
  0x66   : > { %705 = vmatpush1.bf16.msra.mxu0 %v1084_v62 }
  0x67   : > { %706 = vmatprep.subr.bf16.mxu0 %v1085_v63 }
  0x6a   : > { %707 = vmatpush1.bf16.msra.mxu0 %v1087_v0 }
  0x6d   : > { %709 = vmatmul.mubr.bf16.vlgmr.msra.gmra.mrb[0].mxu0 %v1088_v1 }
 0x140   : > { %v710_v11 = vpop.f32.mrb[0].mxu0 }
 0x141   : > { %v746_v13 = vmul.f32 %v739_v8, %v710_v11  ;;  %v712_v14 = vpop.f32.mrb[1].mxu0 }
 0x142   : > { %v747_v15 = vmul.f32 %v743_v9, %v712_v14  ;;  %v714_v16 = vpop.f32.mrb[2].mxu0 }
 0x143   : > { %v762_v17 = vadd.f32 %v755_v10, %v746_v13  ;;  %v748_v18 = vmul.f32 %v739_v8, %v714_v16  ;;  %v716_v19 = vpop.f32.mrb[3].mxu0 }
 0x144   : > { %v763_v20 = vadd.f32 %v759_v12, %v747_v15  ;;  %v749_v21 = vmul.f32 %v743_v9, %v716_v19  ;;  %786 = sbr.rel (!%p1191_p6) target bundleno = 339 (0x153), region = 86 }
 0x145   : > { %v764_v22 = vadd.f32 %v755_v10, %v748_v18 }
 0x146   : > { %v997_v23 = vpack.c.bf16 %v763_v20, %v762_v17  ;;  %v765_v24 = vadd.f32 %v759_v12, %v749_v21 }
 0x148   : > { %778 = vst [vmem:[%s433_s30] sm:$0xff] %v997_v23  ;;  %v998_v25 = vpack.c.bf16 %v765_v24, %v764_v22 }
 0x14a   : > { %779 = vst [vmem:[%s433_s30 + $0x8] sm:$0xff] %v998_v25 }
 0x14f   : > { %v822_v26 = vld [vmem:[%s433_s30] sm:$0xff] }
 0x150   : > { %823 = vst [vmem:[%s792_s7] sm:$0xff] %v822_v26 }
 0x151   : > { %v824_v27 = vld [vmem:[%s433_s30 + $0x8] sm:$0xff] }
 0x152   : > { %825 = vst [vmem:[%s792_s7 + $0x10] sm:$0xff] %v824_v27 }
 0x153 PF: > { %s14_s19 = sadd.s32 1, %s1129_s19   ;;  %s1353_s15 = smov %s1117_s16 }
 0x154   : > { %p11_p12 = scmp.ge.s32.totalorder %s14_s19, 4   ;;  %s1354_s16 = smov %s1196_s25 }
 0x155   : > { %s1355_s17 = smov %s1125_s18  ;;  %s1356_s18 = smov %s1358_s20 }
 0x156   :  { %13 = sbr.rel (!%p11_p12) target bundleno = 3 (0x3), region = 164 }

// kernel: resnet18_baseline_forward.43
= control target key start
LH: loop header
LB: loop body
LE: loop exit
PB: predicated region body
PF: predicated region fallthrough
CT: control target
= control target key end

     0   :  { %s2296_s0 = inlined_call_operand.vmem [shape: bf16[16,4608], index: 0, kind: input, shape index: {}]   ;;  %s2297_s1 = inlined_call_operand.vmem [shape: bf16[4608,512], index: 1, kind: input, shape index: {}]   ;;  %s2298_s2 = inlined_call_operand.vmem [shape: f32[1,512], index: 2, kind: input, shape index: {}]   ;;  %s2299_s3 = inlined_call_operand.vmem [shape: f32[1,512], index: 3, kind: input, shape index: {}]   ;;  %s2300_s4 = inlined_call_operand.vmem [shape: bf16[16,512], index: 4, kind: input, shape index: {}]   ;;  %s2301_s5 = inlined_call_operand.vmem [shape: bf16[16,512], index: 5, kind: output, shape index: {}]  }
   0x1   :  { %2305 = sst [smem:[#allocation11_spill]] %s2296_s0 }
   0x2   :  { %s1880_s18 = smov 0   ;;  %s1882_s19 = smov 0  }
   0x3   :  { %s1884_s20 = smov 0   ;;  %s1886_s21 = smov 0  }
   0x4   :  { %s1888_s22 = smov 0   ;;  %s1890_s23 = smov 0  }
   0x5   :  { %s1892_s24 = smov 0   ;;  %s1894_s25 = smov 0  }
   0x6   :  { %s1896_s26 = smov 0   ;;  %s1898_s27 = smov 0  }
   0x7   :  { %s1900_s28 = smov 0  }
   0x8 LB: > { %2306 = sst [smem:[#allocation7_spill]] %s1827_s23  ;;  %s1461_s29 = sadd.s32 4294967295, %s1847_s28   ;;  %s1847_s28 = sphi %s1900_s28, %s15_s28   ;;  %s1843_s27 = sphi %s1898_s27, %s2326_s27   ;;  %s1839_s26 = sphi %s1896_s26, %s2325_s26   ;;  %s1835_s25 = sphi %s1894_s25, %s2324_s25   ;;  %s1831_s24 = sphi %s1892_s24, %s2323_s24   ;;  %s1827_s23 = sphi %s1890_s23, %s2316_s23   ;;  %s1823_s22 = sphi %s1888_s22, %s2315_s22   ;;  %s1819_s21 = sphi %s1886_s21, %s2322_s21   ;;  %s1815_s20 = sphi %s1884_s20, %s2321_s20   ;;  %s1811_s19 = sphi %s1882_s19, %s2320_s19   ;;  %s1807_s18 = sphi %s1880_s18, %s2319_s18  }
   0x9   : > { %s27_s30 = sadd.s32 1, %s1839_s26  ;;  %s30_s6 = sadd.s32 1, %s1843_s27 }
   0xa   : > { %p28_p0 = scmp.ge.s32.totalorder %s27_s30, 9  ;;  %s43_s7 = sadd.s32 1, %s1827_s23 }
   0xb   : > { %p50_p1 = scmp.ne.s32.totalorder %s1827_s23, %s1823_s22  ;;  %p51_p2 = scmp.eq.s32.totalorder %s1847_s28, 0 }
   0xc   : > { %s2328_s30 = smov (%p28_p0, %s27_s30), 0  ;;  %s2330_s6 = smov (!%p28_p0, %s30_s6), %s1843_s27 }
   0xd   : > { %2307 = sst [smem:[#allocation8_spill]] %s2328_s30  ;;  %s39_s8 = ssub.s32 %s1839_s26, %s2328_s30 }
   0xe   : > { %p32_p3 = scmp.ge.s32.totalorder %s2330_s6, 2  ;;  %p41_p4 = scmp.eq.s32.totalorder %s39_s8, 0 }
   0xf   : > { %p1949_p5 = por %p51_p2, %p50_p1  ;;  %s71_s10 = sadd.s32 1, %s1819_s21 }
  0x10   : > { %s2332_s6 = smov (%p32_p3, %s2330_s6), 0  ;;  %p78_p6 = scmp.ne.s32.totalorder %s1819_s21, %s1815_s20 }
  0x11   : > { %2309 = sst [smem:[#allocation9_spill]] %s2332_s6  ;;  %s67_s12 = ssub.s32 %s1843_s27, %s2332_s6 }
  0x12   : > { %s1957_s11 = scalar_select %p41_p4, %s1827_s23, %s43_s7  }
  0x13   : > { %s68_s13 = sor.u32 %s67_s12, %s39_s8  ;;  %p149_p7 = scmp.eq.s32.totalorder %s67_s12, 0 }
  0x14   : > { %2310 = sst [smem:[#allocation10_spill]] %s1957_s11  ;;  %p69_p8 = scmp.eq.s32.totalorder %s68_s13, 0 }
  0x15   : > { %p1965_p9 = por %p78_p6, %p51_p2  ;;  %s151_s15 = sadd.s32 1, %s1811_s19 }
  0x16   : > { %p158_p10 = scmp.ne.s32.totalorder %s1811_s19, %s1807_s18  ;;  %p190_p12 = scmp.eq.s32.totalorder %s1461_s29, 17 }
  0x17   : > { %s1973_s16 = scalar_select %p69_p8, %s1819_s21, %s71_s10  }
  0x18   : > { %s1976_s17 = scalar_select %p149_p7, %s1811_s19, %s151_s15  }
  0x19   : > { %p1980_p11 = por %p158_p10, %p51_p2  ;;  %p1984_p13 = por %p190_p12, %p158_p10 }
  0x1a   : > { %p1464_p0 = scmp.ge.s32.totalorder %s1847_s28, 18 }
  0x1c   : > { %212 = sbr.rel (%p1464_p0) target bundleno = 93 (0x5d), region = 16 }
  0x23   : > { %215 = sbr.rel (!%p1949_p5) target bundleno = 47 (0x2f), region = 20  ;;  %s217_s10 = sand.u32 (%p1949_p5), 1, %s1827_s23  }
  0x24   : > { %s1560_s12 = sshll.u32 (%p1949_p5), %s1839_s26, 4  ;;  %s1465_s13 = sshll.u32 (%p1949_p5), %s217_s10, 5 }
  0x25   : > { %s2314_s0 = sld [smem:[#allocation11_spill]] (%p1949_p5)  ;;  %s219_s29 = scalar_lea.vmem (%p1949_p5), [#allocation3], %s1465_s13 }
  0x2b   : > { %s225_s30 = scalar_lea.vmem %s2314_s0, %s1560_s12 }
  0x2c   : > { %v238_v0 = vld [vmem:[%s225_s30] sm:$0xff]  ;;  %v240_v1 = vld [vmem:[%s225_s30 + $0x8] sm:$0xff]  ;;  %v242_v2 = vld [vmem:[%s225_s30 + $0x90] sm:$0xff] }
  0x2d   : > { %239 = vst [vmem:[%s219_s29] sm:$0xff] %v238_v0  ;;  %241 = vst [vmem:[%s219_s29 + $0x8] sm:$0xff] %v240_v1  ;;  %v244_v3 = vld [vmem:[%s225_s30 + $0x98] sm:$0xff] }
  0x2e   : > { %243 = vst [vmem:[%s219_s29 + $0x10] sm:$0xff] %v242_v2  ;;  %245 = vst [vmem:[%s219_s29 + $0x18] sm:$0xff] %v244_v3 }
  0x2f PF: > { %251 = sbr.rel (!%p1965_p9) target bundleno = 86 (0x56), region = 43  ;;  %s253_s9 = sand.u32 (%p1965_p9), 1, %s1819_s21  }
  0x30   : > { %s1470_s10 = sshll.u32 (%p1965_p9), %s1843_s27, 1  ;;  %s1468_s6 = sshll.u32 (%p1965_p9), %s253_s9, 9 }
  0x31   : > { %s1561_s12 = sshll.u32 (%p1965_p9), %s1839_s26, 8  ;;  %s2009_s30 = scalar_lea.vmem (%p1965_p9), [#allocation4], %s1468_s6 }
  0x32   : > { %s259_s15 = sadd.s32 (%p1965_p9), %s1561_s12, %s1470_s10 }
  0x33   : > { %s1472_s0 = sshll.u32 (%p1965_p9), %s259_s15, 2 }
  0x34   : > { %s2004_s23 = scalar_lea.vmem (%p1965_p9), %s2297_s1, %s1472_s0 }
  0x35   : > { %v415_v4 = vld [vmem:[%s2004_s23] sm:$0xff] (%p1965_p9)  ;;  %v417_v5 = vld [vmem:[%s2004_s23 + $0x10] sm:$0xff] (%p1965_p9) }
  0x36   : > { %v419_v6 = vld [vmem:[%s2004_s23 + $0x20] sm:$0xff]  ;;  %416 = vst [vmem:[%s2009_s30] sm:$0xff] %v415_v4  ;;  %418 = vst [vmem:[%s2009_s30 + $0x8] sm:$0xff] %v417_v5  ;;  %v421_v7 = vld [vmem:[%s2004_s23 + $0x30] sm:$0xff] }
  0x37   : > { %420 = vst [vmem:[%s2009_s30 + $0x10] sm:$0xff] %v419_v6  ;;  %v423_v8 = vld [vmem:[%s2004_s23 + $0x40] sm:$0xff]  ;;  %v425_v9 = vld [vmem:[%s2004_s23 + $0x50] sm:$0xff]  ;;  %422 = vst [vmem:[%s2009_s30 + $0x18] sm:$0xff] %v421_v7 }
  0x38   : > { %424 = vst [vmem:[%s2009_s30 + $0x20] sm:$0xff] %v423_v8  ;;  %426 = vst [vmem:[%s2009_s30 + $0x28] sm:$0xff] %v425_v9  ;;  %v427_v10 = vld [vmem:[%s2004_s23 + $0x60] sm:$0xff]  ;;  %v429_v11 = vld [vmem:[%s2004_s23 + $0x70] sm:$0xff] }
  0x39   : > { %v431_v12 = vld [vmem:[%s2004_s23 + $0x80] sm:$0xff]  ;;  %428 = vst [vmem:[%s2009_s30 + $0x30] sm:$0xff] %v427_v10  ;;  %430 = vst [vmem:[%s2009_s30 + $0x38] sm:$0xff] %v429_v11  ;;  %v433_v13 = vld [vmem:[%s2004_s23 + $0x90] sm:$0xff] }
  0x3a   : > { %432 = vst [vmem:[%s2009_s30 + $0x40] sm:$0xff] %v431_v12  ;;  %v435_v14 = vld [vmem:[%s2004_s23 + $0xa0] sm:$0xff]  ;;  %v437_v15 = vld [vmem:[%s2004_s23 + $0xb0] sm:$0xff]  ;;  %434 = vst [vmem:[%s2009_s30 + $0x48] sm:$0xff] %v433_v13 }
  0x3b   : > { %436 = vst [vmem:[%s2009_s30 + $0x50] sm:$0xff] %v435_v14  ;;  %438 = vst [vmem:[%s2009_s30 + $0x58] sm:$0xff] %v437_v15  ;;  %v439_v16 = vld [vmem:[%s2004_s23 + $0xc0] sm:$0xff]  ;;  %v441_v17 = vld [vmem:[%s2004_s23 + $0xd0] sm:$0xff] }
  0x3c   : > { %v443_v18 = vld [vmem:[%s2004_s23 + $0xe0] sm:$0xff]  ;;  %440 = vst [vmem:[%s2009_s30 + $0x60] sm:$0xff] %v439_v16  ;;  %442 = vst [vmem:[%s2009_s30 + $0x68] sm:$0xff] %v441_v17  ;;  %v445_v19 = vld [vmem:[%s2004_s23 + $0xf0] sm:$0xff] }
  0x3d   : > { %444 = vst [vmem:[%s2009_s30 + $0x70] sm:$0xff] %v443_v18  ;;  %v447_v20 = vld [vmem:[%s2004_s23 + $0x100] sm:$0xff]  ;;  %v449_v21 = vld [vmem:[%s2004_s23 + $0x110] sm:$0xff]  ;;  %446 = vst [vmem:[%s2009_s30 + $0x78] sm:$0xff] %v445_v19 }
  0x3e   : > { %448 = vst [vmem:[%s2009_s30 + $0x80] sm:$0xff] %v447_v20  ;;  %450 = vst [vmem:[%s2009_s30 + $0x88] sm:$0xff] %v449_v21  ;;  %v451_v22 = vld [vmem:[%s2004_s23 + $0x120] sm:$0xff]  ;;  %v453_v23 = vld [vmem:[%s2004_s23 + $0x130] sm:$0xff] }
  0x3f   : > { %v455_v24 = vld [vmem:[%s2004_s23 + $0x140] sm:$0xff]  ;;  %452 = vst [vmem:[%s2009_s30 + $0x90] sm:$0xff] %v451_v22  ;;  %454 = vst [vmem:[%s2009_s30 + $0x98] sm:$0xff] %v453_v23  ;;  %v457_v25 = vld [vmem:[%s2004_s23 + $0x150] sm:$0xff] }
  0x40   : > { %456 = vst [vmem:[%s2009_s30 + $0xa0] sm:$0xff] %v455_v24  ;;  %v459_v26 = vld [vmem:[%s2004_s23 + $0x160] sm:$0xff]  ;;  %v461_v27 = vld [vmem:[%s2004_s23 + $0x170] sm:$0xff]  ;;  %458 = vst [vmem:[%s2009_s30 + $0xa8] sm:$0xff] %v457_v25 }
  0x41   : > { %460 = vst [vmem:[%s2009_s30 + $0xb0] sm:$0xff] %v459_v26  ;;  %462 = vst [vmem:[%s2009_s30 + $0xb8] sm:$0xff] %v461_v27  ;;  %v463_v28 = vld [vmem:[%s2004_s23 + $0x180] sm:$0xff]  ;;  %v465_v29 = vld [vmem:[%s2004_s23 + $0x190] sm:$0xff] }
  0x42   : > { %v467_v30 = vld [vmem:[%s2004_s23 + $0x1a0] sm:$0xff]  ;;  %464 = vst [vmem:[%s2009_s30 + $0xc0] sm:$0xff] %v463_v28  ;;  %466 = vst [vmem:[%s2009_s30 + $0xc8] sm:$0xff] %v465_v29  ;;  %v469_v31 = vld [vmem:[%s2004_s23 + $0x1b0] sm:$0xff] }
  0x43   : > { %468 = vst [vmem:[%s2009_s30 + $0xd0] sm:$0xff] %v467_v30  ;;  %v471_v32 = vld [vmem:[%s2004_s23 + $0x1c0] sm:$0xff]  ;;  %v473_v33 = vld [vmem:[%s2004_s23 + $0x1d0] sm:$0xff]  ;;  %470 = vst [vmem:[%s2009_s30 + $0xd8] sm:$0xff] %v469_v31 }
  0x44   : > { %472 = vst [vmem:[%s2009_s30 + $0xe0] sm:$0xff] %v471_v32  ;;  %474 = vst [vmem:[%s2009_s30 + $0xe8] sm:$0xff] %v473_v33  ;;  %v475_v34 = vld [vmem:[%s2004_s23 + $0x1e0] sm:$0xff]  ;;  %v477_v35 = vld [vmem:[%s2004_s23 + $0x1f0] sm:$0xff] }
  0x45   : > { %v479_v36 = vld [vmem:[%s2004_s23 + $0x200] sm:$0xff]  ;;  %476 = vst [vmem:[%s2009_s30 + $0xf0] sm:$0xff] %v475_v34  ;;  %478 = vst [vmem:[%s2009_s30 + $0xf8] sm:$0xff] %v477_v35  ;;  %v481_v37 = vld [vmem:[%s2004_s23 + $0x210] sm:$0xff] }
  0x46   : > { %480 = vst [vmem:[%s2009_s30 + $0x100] sm:$0xff] %v479_v36  ;;  %v483_v38 = vld [vmem:[%s2004_s23 + $0x220] sm:$0xff]  ;;  %v485_v39 = vld [vmem:[%s2004_s23 + $0x230] sm:$0xff]  ;;  %482 = vst [vmem:[%s2009_s30 + $0x108] sm:$0xff] %v481_v37 }
  0x47   : > { %484 = vst [vmem:[%s2009_s30 + $0x110] sm:$0xff] %v483_v38  ;;  %486 = vst [vmem:[%s2009_s30 + $0x118] sm:$0xff] %v485_v39  ;;  %v487_v40 = vld [vmem:[%s2004_s23 + $0x240] sm:$0xff]  ;;  %v489_v41 = vld [vmem:[%s2004_s23 + $0x250] sm:$0xff] }
  0x48   : > { %v491_v42 = vld [vmem:[%s2004_s23 + $0x260] sm:$0xff]  ;;  %488 = vst [vmem:[%s2009_s30 + $0x120] sm:$0xff] %v487_v40  ;;  %490 = vst [vmem:[%s2009_s30 + $0x128] sm:$0xff] %v489_v41  ;;  %v493_v43 = vld [vmem:[%s2004_s23 + $0x270] sm:$0xff] }
  0x49   : > { %492 = vst [vmem:[%s2009_s30 + $0x130] sm:$0xff] %v491_v42  ;;  %v495_v44 = vld [vmem:[%s2004_s23 + $0x280] sm:$0xff]  ;;  %v497_v45 = vld [vmem:[%s2004_s23 + $0x290] sm:$0xff]  ;;  %494 = vst [vmem:[%s2009_s30 + $0x138] sm:$0xff] %v493_v43 }
  0x4a   : > { %496 = vst [vmem:[%s2009_s30 + $0x140] sm:$0xff] %v495_v44  ;;  %498 = vst [vmem:[%s2009_s30 + $0x148] sm:$0xff] %v497_v45  ;;  %v499_v46 = vld [vmem:[%s2004_s23 + $0x2a0] sm:$0xff]  ;;  %v501_v47 = vld [vmem:[%s2004_s23 + $0x2b0] sm:$0xff] }
  0x4b   : > { %v503_v48 = vld [vmem:[%s2004_s23 + $0x2c0] sm:$0xff]  ;;  %500 = vst [vmem:[%s2009_s30 + $0x150] sm:$0xff] %v499_v46  ;;  %502 = vst [vmem:[%s2009_s30 + $0x158] sm:$0xff] %v501_v47  ;;  %v505_v49 = vld [vmem:[%s2004_s23 + $0x2d0] sm:$0xff] }
  0x4c   : > { %504 = vst [vmem:[%s2009_s30 + $0x160] sm:$0xff] %v503_v48  ;;  %v507_v50 = vld [vmem:[%s2004_s23 + $0x2e0] sm:$0xff]  ;;  %v509_v51 = vld [vmem:[%s2004_s23 + $0x2f0] sm:$0xff]  ;;  %506 = vst [vmem:[%s2009_s30 + $0x168] sm:$0xff] %v505_v49 }
  0x4d   : > { %508 = vst [vmem:[%s2009_s30 + $0x170] sm:$0xff] %v507_v50  ;;  %510 = vst [vmem:[%s2009_s30 + $0x178] sm:$0xff] %v509_v51  ;;  %v511_v52 = vld [vmem:[%s2004_s23 + $0x300] sm:$0xff]  ;;  %v513_v53 = vld [vmem:[%s2004_s23 + $0x310] sm:$0xff] }
  0x4e   : > { %v515_v54 = vld [vmem:[%s2004_s23 + $0x320] sm:$0xff]  ;;  %512 = vst [vmem:[%s2009_s30 + $0x180] sm:$0xff] %v511_v52  ;;  %514 = vst [vmem:[%s2009_s30 + $0x188] sm:$0xff] %v513_v53  ;;  %v517_v55 = vld [vmem:[%s2004_s23 + $0x330] sm:$0xff] }
  0x4f   : > { %516 = vst [vmem:[%s2009_s30 + $0x190] sm:$0xff] %v515_v54  ;;  %v519_v56 = vld [vmem:[%s2004_s23 + $0x340] sm:$0xff]  ;;  %v521_v57 = vld [vmem:[%s2004_s23 + $0x350] sm:$0xff]  ;;  %518 = vst [vmem:[%s2009_s30 + $0x198] sm:$0xff] %v517_v55 }
  0x50   : > { %520 = vst [vmem:[%s2009_s30 + $0x1a0] sm:$0xff] %v519_v56  ;;  %522 = vst [vmem:[%s2009_s30 + $0x1a8] sm:$0xff] %v521_v57  ;;  %v523_v58 = vld [vmem:[%s2004_s23 + $0x360] sm:$0xff]  ;;  %v525_v59 = vld [vmem:[%s2004_s23 + $0x370] sm:$0xff] }
  0x51   : > { %v527_v60 = vld [vmem:[%s2004_s23 + $0x380] sm:$0xff]  ;;  %524 = vst [vmem:[%s2009_s30 + $0x1b0] sm:$0xff] %v523_v58  ;;  %526 = vst [vmem:[%s2009_s30 + $0x1b8] sm:$0xff] %v525_v59  ;;  %v529_v61 = vld [vmem:[%s2004_s23 + $0x390] sm:$0xff] }
  0x52   : > { %528 = vst [vmem:[%s2009_s30 + $0x1c0] sm:$0xff] %v527_v60  ;;  %v531_v62 = vld [vmem:[%s2004_s23 + $0x3a0] sm:$0xff]  ;;  %v533_v63 = vld [vmem:[%s2004_s23 + $0x3b0] sm:$0xff]  ;;  %530 = vst [vmem:[%s2009_s30 + $0x1c8] sm:$0xff] %v529_v61 }
  0x53   : > { %532 = vst [vmem:[%s2009_s30 + $0x1d0] sm:$0xff] %v531_v62  ;;  %534 = vst [vmem:[%s2009_s30 + $0x1d8] sm:$0xff] %v533_v63  ;;  %v535_v0 = vld [vmem:[%s2004_s23 + $0x3c0] sm:$0xff]  ;;  %v537_v1 = vld [vmem:[%s2004_s23 + $0x3d0] sm:$0xff] }
  0x54   : > { %v539_v2 = vld [vmem:[%s2004_s23 + $0x3e0] sm:$0xff]  ;;  %536 = vst [vmem:[%s2009_s30 + $0x1e0] sm:$0xff] %v535_v0  ;;  %538 = vst [vmem:[%s2009_s30 + $0x1e8] sm:$0xff] %v537_v1  ;;  %v541_v3 = vld [vmem:[%s2004_s23 + $0x3f0] sm:$0xff] }
  0x55   : > { %540 = vst [vmem:[%s2009_s30 + $0x1f0] sm:$0xff] %v539_v2  ;;  %542 = vst [vmem:[%s2009_s30 + $0x1f8] sm:$0xff] %v541_v3 }
  0x56 PF: > { %564 = sbr.rel (!%p1980_p11) target bundleno = 93 (0x5d), region = 89  ;;  %s566_s0 = sand.u32 (%p1980_p11), 1, %s1811_s19  }
  0x57   : > { %s1562_s11 = sshll.u32 (%p1980_p11), %s1843_s27, 3  ;;  %s1473_s14 = sshll.u32 (%p1980_p11), %s566_s0, 4 }
  0x58   : > { %s574_s10 = scalar_lea.vmem (%p1980_p11), %s2300_s4, %s1562_s11  ;;  %s568_s6 = scalar_lea.vmem (%p1980_p11), [#allocation5], %s1473_s14 }
  0x59   : > { %v604_v4 = vld [vmem:[%s574_s10] sm:$0xff] (%p1980_p11)  ;;  %v606_v5 = vld [vmem:[%s574_s10 + $0x10] sm:$0xff] (%p1980_p11) }
  0x5a   : > { %605 = vst [vmem:[%s568_s6] sm:$0xff] (%p1980_p11), %v604_v4  ;;  %607 = vst [vmem:[%s568_s6 + $0x8] sm:$0xff] (%p1980_p11), %v606_v5 }
  0x5d PF: > { %p1476_p1 = scmp.ge.s32.totalorder %s1847_s28, 1  ;;  %p612_p2 = scmp.lt.s32.totalorder %s1847_s28, 19 }
  0x5f   : > { %p613_p3 = pnand %p1476_p1, %p612_p2 }
  0x60   : > { %s619_s23 = sand.u32 (!%p613_p3), 1, %s1823_s22   ;;  %s626_s7 = sand.u32 (!%p613_p3), 1, %s1815_s20  }
  0x61   : > { %616 = sbr.rel (%p613_p3) target bundleno = 423 (0x1a7), region = 127  ;;  %s1477_s12 = sshll.u32 (!%p613_p3), %s619_s23, 5 }
  0x62   : > { %s1478_s15 = sshll.u32 (!%p613_p3), %s626_s7, 9  ;;  %s633_s13 = sand.u32 (!%p613_p3), 1, %s1807_s18  }
  0x63   : > { %s1481_s30 = sshll.u32 (!%p613_p3), %s1835_s25, 1  ;;  %s2149_s0 = sshll.u32 (!%p613_p3), %s633_s13, 4 }
  0x64   : > { %p680_p4 = scmp.lt.s32.totalorder (!%p613_p3), %s1481_s30, 3  ;;  %s2161_s10 = scalar_lea.vmem (!%p613_p3), [#allocation3], %s1477_s12 }
  0x65   : > { %s2163_s18 = scalar_lea.vmem (!%p613_p3), [#allocation4], %s1478_s15  ;;  %s635_s6 = scalar_lea.vmem (!%p613_p3), [#allocation5], %s2149_s0 }
  0x66   : > { %s2167_s23 = scalar_lea.vmem (!%p613_p3), [#allocation6], %s2149_s0  ;;  %p1483_p5 = scmp.ne.s32.totalorder (!%p613_p3), %s1831_s24, 0 }
  0x68   : > { %s2334_s30 = smov (!%p680_p4, %s1481_s30), 3  ;;  %696 = sbr.rel (%p1483_p5) target bundleno = 111 (0x6f), region = 143 }
  0x69   : > { %s682_s29 = scalar_lea.vmem %s2298_s2, %s2334_s30  ;;  %s687_s20 = scalar_lea.vmem %s2299_s3, %s2334_s30  ;;  %v1849_v6 = vmov (!%p1483_p5), 0.0  }
  0x6a   : > { %697 = vst [vmem:[#allocation2] sm:$0xff] (!%p1483_p5), %v1849_v6  ;;  %698 = vst [vmem:[#allocation2 + $0x8] sm:$0xff] (!%p1483_p5), %v1849_v6 }
  0x6b   : > { %699 = vst [vmem:[#allocation2 + $0x10] sm:$0xff] (!%p1483_p5), %v1849_v6  ;;  %700 = vst [vmem:[#allocation2 + $0x18] sm:$0xff] (!%p1483_p5), %v1849_v6 }
  0x6f PF: > { %v1659_v7 = vld [vmem:[%s2163_s18 + $0x4] ss:$8 sps:$4 sm:$0xff]   ;;  %v1663_v9 = vld [vmem:[%s2163_s18] ss:$8 sps:$4 sm:$0xff]   ;;  %v1665_v11 = vld [vmem:[%s2163_s18 + $0x14] ss:$8 sps:$4 sm:$0xff]  }
  0x70   : > { %v1661_v8 = vld [vmem:[%s2163_s18 + $0x104] ss:$8 sps:$4 sm:$0xff]   ;;  %1113 = vmatprep.subr.bf16.mxu1 %v1659_v7  ;;  %v1664_v10 = vld [vmem:[%s2163_s18 + $0x100] ss:$8 sps:$4 sm:$0xff]   ;;  %v1667_v12 = vld [vmem:[%s2163_s18 + $0x114] ss:$8 sps:$4 sm:$0xff]  }
  0x71   : > { %1156 = vmatprep.subr.bf16.mxu0 %v1661_v8  ;;  %1114 = vmatpush1.bf16.msra.mxu1 %v1663_v9  ;;  %v1669_v13 = vld [vmem:[%s2163_s18 + $0x10] ss:$8 sps:$4 sm:$0xff]   ;;  %v1671_v15 = vld [vmem:[%s2163_s18 + $0x24] ss:$8 sps:$4 sm:$0xff]   ;;  %v1675_v17 = vld [vmem:[%s2163_s18 + $0x20] ss:$8 sps:$4 sm:$0xff]  }
  0x72   : > { %1157 = vmatpush1.bf16.msra.mxu0 %v1664_v10  ;;  %1115 = vmatprep.subr.bf16.mxu1 %v1665_v11  ;;  %v1670_v14 = vld [vmem:[%s2163_s18 + $0x110] ss:$8 sps:$4 sm:$0xff]   ;;  %v1673_v16 = vld [vmem:[%s2163_s18 + $0x124] ss:$8 sps:$4 sm:$0xff]   ;;  %v1676_v18 = vld [vmem:[%s2163_s18 + $0x120] ss:$8 sps:$4 sm:$0xff]  }
  0x73   : > { %1158 = vmatprep.subr.bf16.mxu0 %v1667_v12  ;;  %v1677_v19 = vld [vmem:[%s2163_s18 + $0x34] ss:$8 sps:$4 sm:$0xff]   ;;  %v1681_v21 = vld [vmem:[%s2163_s18 + $0x30] ss:$8 sps:$4 sm:$0xff]   ;;  %v1683_v23 = vld [vmem:[%s2163_s18 + $0x44] ss:$8 sps:$4 sm:$0xff]  }
  0x74   : > { %v1679_v20 = vld [vmem:[%s2163_s18 + $0x134] ss:$8 sps:$4 sm:$0xff]   ;;  %v1682_v22 = vld [vmem:[%s2163_s18 + $0x130] ss:$8 sps:$4 sm:$0xff]   ;;  %v1685_v24 = vld [vmem:[%s2163_s18 + $0x144] ss:$8 sps:$4 sm:$0xff]  }
  0x75   : > { %1116 = vmatpush1.bf16.msra.mxu1 %v1669_v13  ;;  %v1687_v25 = vld [vmem:[%s2163_s18 + $0x40] ss:$8 sps:$4 sm:$0xff]   ;;  %v1689_v27 = vld [vmem:[%s2163_s18 + $0x54] ss:$8 sps:$4 sm:$0xff]   ;;  %v1693_v29 = vld [vmem:[%s2163_s18 + $0x50] ss:$8 sps:$4 sm:$0xff]  }
  0x76   : > { %1159 = vmatpush1.bf16.msra.mxu0 %v1670_v14  ;;  %1117 = vmatprep.subr.bf16.mxu1 %v1671_v15  ;;  %v1688_v26 = vld [vmem:[%s2163_s18 + $0x140] ss:$8 sps:$4 sm:$0xff]   ;;  %v1691_v28 = vld [vmem:[%s2163_s18 + $0x154] ss:$8 sps:$4 sm:$0xff]   ;;  %v1694_v30 = vld [vmem:[%s2163_s18 + $0x150] ss:$8 sps:$4 sm:$0xff]  }
  0x77   : > { %1160 = vmatprep.subr.bf16.mxu0 %v1673_v16  ;;  %v1695_v31 = vld [vmem:[%s2163_s18 + $0x64] ss:$8 sps:$4 sm:$0xff]   ;;  %v1699_v33 = vld [vmem:[%s2163_s18 + $0x60] ss:$8 sps:$4 sm:$0xff]   ;;  %v1701_v35 = vld [vmem:[%s2163_s18 + $0x74] ss:$8 sps:$4 sm:$0xff]  }
  0x78   : > { %v1697_v32 = vld [vmem:[%s2163_s18 + $0x164] ss:$8 sps:$4 sm:$0xff]   ;;  %v1700_v34 = vld [vmem:[%s2163_s18 + $0x160] ss:$8 sps:$4 sm:$0xff]   ;;  %v1703_v36 = vld [vmem:[%s2163_s18 + $0x174] ss:$8 sps:$4 sm:$0xff]  }
  0x79   : > { %1118 = vmatpush1.bf16.msra.mxu1 %v1675_v17  ;;  %v1705_v37 = vld [vmem:[%s2163_s18 + $0x70] ss:$8 sps:$4 sm:$0xff]   ;;  %v1707_v39 = vld [vmem:[%s2163_s18 + $0x84] ss:$8 sps:$4 sm:$0xff]   ;;  %v1711_v41 = vld [vmem:[%s2163_s18 + $0x80] ss:$8 sps:$4 sm:$0xff]  }
  0x7a   : > { %1161 = vmatpush1.bf16.msra.mxu0 %v1676_v18  ;;  %1119 = vmatprep.subr.bf16.mxu1 %v1677_v19  ;;  %v1706_v38 = vld [vmem:[%s2163_s18 + $0x170] ss:$8 sps:$4 sm:$0xff]   ;;  %v1709_v40 = vld [vmem:[%s2163_s18 + $0x184] ss:$8 sps:$4 sm:$0xff]   ;;  %v1712_v42 = vld [vmem:[%s2163_s18 + $0x180] ss:$8 sps:$4 sm:$0xff]  }
  0x7b   : > { %1162 = vmatprep.subr.bf16.mxu0 %v1679_v20  ;;  %v1713_v43 = vld [vmem:[%s2163_s18 + $0x94] ss:$8 sps:$4 sm:$0xff]   ;;  %v1717_v45 = vld [vmem:[%s2163_s18 + $0x90] ss:$8 sps:$4 sm:$0xff]   ;;  %v1719_v47 = vld [vmem:[%s2163_s18 + $0xa4] ss:$8 sps:$4 sm:$0xff]  }
  0x7c   : > { %v1715_v44 = vld [vmem:[%s2163_s18 + $0x194] ss:$8 sps:$4 sm:$0xff]   ;;  %v1718_v46 = vld [vmem:[%s2163_s18 + $0x190] ss:$8 sps:$4 sm:$0xff]   ;;  %v1721_v48 = vld [vmem:[%s2163_s18 + $0x1a4] ss:$8 sps:$4 sm:$0xff]  }
  0x7d   : > { %1120 = vmatpush1.bf16.msra.mxu1 %v1681_v21  ;;  %v1723_v49 = vld [vmem:[%s2163_s18 + $0xa0] ss:$8 sps:$4 sm:$0xff]   ;;  %v1725_v51 = vld [vmem:[%s2163_s18 + $0xb4] ss:$8 sps:$4 sm:$0xff]   ;;  %v1729_v53 = vld [vmem:[%s2163_s18 + $0xb0] ss:$8 sps:$4 sm:$0xff]  }
  0x7e   : > { %1163 = vmatpush1.bf16.msra.mxu0 %v1682_v22  ;;  %1121 = vmatprep.subr.bf16.mxu1 %v1683_v23  ;;  %v1724_v50 = vld [vmem:[%s2163_s18 + $0x1a0] ss:$8 sps:$4 sm:$0xff]   ;;  %v1727_v52 = vld [vmem:[%s2163_s18 + $0x1b4] ss:$8 sps:$4 sm:$0xff]   ;;  %v1730_v55 = vld [vmem:[%s2163_s18 + $0x1b0] ss:$8 sps:$4 sm:$0xff]  }
  0x7f   : > { %1164 = vmatprep.subr.bf16.mxu0 %v1685_v24  ;;  %v1757_v54 = vld [vmem:[%s2161_s10 + $0x4] ss:$16 sps:$4 sm:$0xff]   ;;  %v1760_v58 = vld [vmem:[%s2161_s10 + $0xc] ss:$16 sps:$4 sm:$0xff]   ;;  %v1735_v59 = vld [vmem:[%s2163_s18 + $0xc0] ss:$8 sps:$4 sm:$0xff]  }
  0x80   : > { %v1731_v56 = vld [vmem:[%s2163_s18 + $0xc4] ss:$8 sps:$4 sm:$0xff]   ;;  %1145 = vmatprep.mubr.bf16.mxu1 %v1757_v54  ;;  %1188 = vmatprep.mubr.bf16.mxu0 %v1760_v58  ;;  %v1736_v60 = vld [vmem:[%s2163_s18 + $0x1c0] ss:$8 sps:$4 sm:$0xff]   ;;  %v1737_v61 = vld [vmem:[%s2163_s18 + $0xd4] ss:$8 sps:$4 sm:$0xff]  }
  0x81   : > { %1122 = vmatpush1.bf16.msra.mxu1 %v1687_v25  ;;  %v1733_v57 = vld [vmem:[%s2163_s18 + $0x1c4] ss:$8 sps:$4 sm:$0xff]   ;;  %v1739_v62 = vld [vmem:[%s2163_s18 + $0x1d4] ss:$8 sps:$4 sm:$0xff]   ;;  %v1741_v63 = vld [vmem:[%s2163_s18 + $0xd0] ss:$8 sps:$4 sm:$0xff]  }
  0x82   : > { %1165 = vmatpush1.bf16.msra.mxu0 %v1688_v26  ;;  %1123 = vmatprep.subr.bf16.mxu1 %v1689_v27  ;;  %v1742_v0 = vld [vmem:[%s2163_s18 + $0x1d0] ss:$8 sps:$4 sm:$0xff]   ;;  %v1743_v1 = vld [vmem:[%s2163_s18 + $0xe4] ss:$8 sps:$4 sm:$0xff]   ;;  %v1747_v3 = vld [vmem:[%s2163_s18 + $0xe0] ss:$8 sps:$4 sm:$0xff]  }
  0x83   : > { %1166 = vmatprep.subr.bf16.mxu0 %v1691_v28  ;;  %v1745_v2 = vld [vmem:[%s2163_s18 + $0x1e4] ss:$8 sps:$4 sm:$0xff]   ;;  %v1748_v4 = vld [vmem:[%s2163_s18 + $0x1e0] ss:$8 sps:$4 sm:$0xff]   ;;  %v1749_v5 = vld [vmem:[%s2163_s18 + $0xf4] ss:$8 sps:$4 sm:$0xff]  }
  0x84   : > { %v1751_v6 = vld [vmem:[%s2163_s18 + $0x1f4] ss:$8 sps:$4 sm:$0xff]   ;;  %v1753_v7 = vld [vmem:[%s2163_s18 + $0xf0] ss:$8 sps:$4 sm:$0xff]   ;;  %v701_v12 = vld [vmem:[#allocation2] sm:$0xff]  ;;  %p1552_p6 = scmp.ne.s32.totalorder %s1831_s24, 8 }
  0x85   : > { %1124 = vmatpush1.bf16.msra.mxu1 %v1693_v29  ;;  %v1754_v8 = vld [vmem:[%s2163_s18 + $0x1f0] ss:$8 sps:$4 sm:$0xff]   ;;  %v702_v16 = vld [vmem:[#allocation2 + $0x8] sm:$0xff] }
  0x86   : > { %1167 = vmatpush1.bf16.msra.mxu0 %v1694_v30  ;;  %1125 = vmatprep.subr.bf16.mxu1 %v1695_v31  ;;  %v1755_v9 = vld [vmem:[%s2161_s10] ss:$16 sps:$4 sm:$0xff]   ;;  %v1758_v10 = vld [vmem:[%s2161_s10 + $0x8] ss:$16 sps:$4 sm:$0xff]   ;;  %v1217_v31 = vlaneseq (!%p1552_p6) }
  0x87   : > { %1168 = vmatprep.subr.bf16.mxu0 %v1697_v32  ;;  %v703_v20 = vld [vmem:[#allocation2 + $0x10] sm:$0xff]  ;;  %v704_v25 = vld [vmem:[#allocation2 + $0x18] sm:$0xff] }
  0x88   : > { %v1218_v32 = vshrl.u32 (!%p1552_p6), %v1217_v31, 7 }
  0x89   : > { %1126 = vmatpush1.bf16.msra.mxu1 %v1699_v33  ;;  %v1215_v33 = vld [vmem:[%s682_s29] sm:$0x3] (!%p1552_p6) }
  0x8a   : > { %1169 = vmatpush1.bf16.msra.mxu0 %v1700_v34  ;;  %1127 = vmatprep.subr.bf16.mxu1 %v1701_v35  ;;  %v1231_v34 = vld [vmem:[%s687_s20] sm:$0x3] (!%p1552_p6) }
  0x8b   : > { %1170 = vmatprep.subr.bf16.mxu0 %v1703_v36  ;;  %v1219_v36 = vsub.s32 (!%p1552_p6), 0, %v1218_v32 }
  0x8d   : > { %1128 = vmatpush1.bf16.msra.mxu1 %v1705_v37  ;;  %v1223_v37 = vsub.s32 (!%p1552_p6), 1, %v1218_v32 }
  0x8e   : > { %1171 = vmatpush1.bf16.msra.mxu0 %v1706_v38  ;;  %1129 = vmatprep.subr.bf16.mxu1 %v1707_v39  ;;  %v1247_v38 = vld [vmem:[%s635_s6] sm:$0xff] (!%p1552_p6)  ;;  %v1248_v39 = vld [vmem:[%s635_s6 + $0x8] sm:$0xff] (!%p1552_p6) }
  0x8f   : > { %1172 = vmatprep.subr.bf16.mxu0 %v1709_v40 }
  0x91   : > { %1130 = vmatpush1.bf16.msra.mxu1 %v1711_v41 }
  0x92   : > { %1173 = vmatpush1.bf16.msra.mxu0 %v1712_v42  ;;  %1131 = vmatprep.subr.bf16.mxu1 %v1713_v43  ;;  %v1220_v43 = vrot.slane (!%p1552_p6), %v1215_v33, %v1219_v36 }
  0x93   : > { %1174 = vmatprep.subr.bf16.mxu0 %v1715_v44  ;;  %v1224_v44 = vrot.slane (!%p1552_p6), %v1215_v33, %v1223_v37 }
  0x95   : > { %1132 = vmatpush1.bf16.msra.mxu1 %v1717_v45  ;;  %v1236_v45 = vrot.slane (!%p1552_p6), %v1231_v34, %v1219_v36 }
  0x96   : > { %1175 = vmatpush1.bf16.msra.mxu0 %v1718_v46  ;;  %1133 = vmatprep.subr.bf16.mxu1 %v1719_v47  ;;  %v1240_v46 = vrot.slane (!%p1552_p6), %v1231_v34, %v1223_v37  ;;  %v1249_v47 = vunpack.c.l.bf16 (!%p1552_p6), %v1247_v38 }
  0x97   : > { %1176 = vmatprep.subr.bf16.mxu0 %v1721_v48  ;;  %v1250_v48 = vunpack.c.h.bf16 (!%p1552_p6), %v1247_v38 }
  0x99   : > { %1134 = vmatpush1.bf16.msra.mxu1 %v1723_v49  ;;  %v1251_v49 = vunpack.c.l.bf16 (!%p1552_p6), %v1248_v39 }
  0x9a   : > { %1177 = vmatpush1.bf16.msra.mxu0 %v1724_v50  ;;  %1135 = vmatprep.subr.bf16.mxu1 %v1725_v51  ;;  %v1252_v50 = vunpack.c.h.bf16 (!%p1552_p6), %v1248_v39 }
  0x9b   : > { %1178 = vmatprep.subr.bf16.mxu0 %v1727_v52 }
  0x9d   : > { %1136 = vmatpush1.bf16.msra.mxu1 %v1729_v53 }
  0x9e   : > { %1179 = vmatpush1.bf16.msra.mxu0 %v1730_v55  ;;  %1137 = vmatprep.subr.bf16.mxu1 %v1731_v56 }
  0x9f   : > { %1180 = vmatprep.subr.bf16.mxu0 %v1733_v57 }
  0xa1   : > { %1138 = vmatpush1.bf16.msra.mxu1 %v1735_v59 }
  0xa2   : > { %1181 = vmatpush1.bf16.msra.mxu0 %v1736_v60  ;;  %1139 = vmatprep.subr.bf16.mxu1 %v1737_v61 }
  0xa3   : > { %1182 = vmatprep.subr.bf16.mxu0 %v1739_v62 }
  0xa5   : > { %1140 = vmatpush1.bf16.msra.mxu1 %v1741_v63 }
  0xa6   : > { %1183 = vmatpush1.bf16.msra.mxu0 %v1742_v0  ;;  %1141 = vmatprep.subr.bf16.mxu1 %v1743_v1 }
  0xa7   : > { %1184 = vmatprep.subr.bf16.mxu0 %v1745_v2 }
  0xa9   : > { %1142 = vmatpush1.bf16.msra.mxu1 %v1747_v3 }
  0xaa   : > { %1185 = vmatpush1.bf16.msra.mxu0 %v1748_v4  ;;  %1143 = vmatprep.subr.bf16.mxu1 %v1749_v5 }
  0xab   : > { %1186 = vmatprep.subr.bf16.mxu0 %v1751_v6 }
  0xad   : > { %1144 = vmatpush1.bf16.msra.mxu1 %v1753_v7 }
  0xae   : > { %1187 = vmatpush1.bf16.msra.mxu0 %v1754_v8 }
  0xb0   : > { %1146 = vmatmul.mubr.bf16.vlgmr.msra.gmra.mrb[0].mxu1 %v1755_v9 }
  0xb1   : > { %1189 = vmatmul.mubr.bf16.vlgmr.msra.gmra.mrb[0].mxu0 %v1758_v10 }
 0x183   : > { %v1147_v11 = vpop.f32.mrb[0].mxu1 }
 0x184   : > { %v1190_v13 = vpop.f32.mrb[0].mxu0  ;;  %v1149_v15 = vpop.f32.mrb[1].mxu1 }
 0x185   : > { %v1191_v14 = vadd.f32 %v1190_v13, %v1147_v11  ;;  %v1192_v17 = vpop.f32.mrb[1].mxu0  ;;  %v1151_v19 = vpop.f32.mrb[2].mxu1 }
 0x186   : > { %v1193_v18 = vadd.f32 %v1192_v17, %v1149_v15  ;;  %v1194_v21 = vpop.f32.mrb[2].mxu0  ;;  %v1153_v24 = vpop.f32.mrb[3].mxu1  ;;  %1210 = sbr.rel (%p1552_p6) target bundleno = 415 (0x19f), region = 147 }
 0x187   : > { %v1199_v22 = vadd.f32 %v1191_v14, %v701_v12  ;;  %v1195_v23 = vadd.f32 %v1194_v21, %v1151_v19  ;;  %v1196_v26 = vpop.f32.mrb[3].mxu0 }
 0x188   : > { %v1200_v27 = vadd.f32 %v1193_v18, %v702_v16  ;;  %v1197_v28 = vadd.f32 %v1196_v26, %v1153_v24 }
 0x189   : > { %1203 = vst [vmem:[#allocation2] sm:$0xff] %v1199_v22  ;;  %v1201_v29 = vadd.f32 %v1195_v23, %v703_v20 }
 0x18a   : > { %1204 = vst [vmem:[#allocation2 + $0x8] sm:$0xff] %v1200_v27  ;;  %v1202_v30 = vadd.f32 %v1197_v28, %v704_v25 }
 0x18b   : > { %1205 = vst [vmem:[#allocation2 + $0x10] sm:$0xff] %v1201_v29 }
 0x18c   : > { %1206 = vst [vmem:[#allocation2 + $0x18] sm:$0xff] %v1202_v30 }
 0x190   : > { %v1211_v35 = vld [vmem:[#allocation2] sm:$0xff] }
 0x191   : > { %v1212_v40 = vld [vmem:[#allocation2 + $0x8] sm:$0xff]  ;;  %v1227_v51 = vmul.f32 %v1220_v43, %v1211_v35 }
 0x192   : > { %v1213_v41 = vld [vmem:[#allocation2 + $0x10] sm:$0xff]  ;;  %v1228_v52 = vmul.f32 %v1224_v44, %v1212_v40 }
 0x193   : > { %v1214_v42 = vld [vmem:[#allocation2 + $0x18] sm:$0xff]  ;;  %v1229_v53 = vmul.f32 %v1220_v43, %v1213_v41  ;;  %v1243_v55 = vadd.f32 %v1236_v45, %v1227_v51 }
 0x194   : > { %v1230_v54 = vmul.f32 %v1224_v44, %v1214_v42  ;;  %v1244_v56 = vadd.f32 %v1240_v46, %v1228_v52 }
 0x195   : > { %v1245_v57 = vadd.f32 %v1236_v45, %v1229_v53  ;;  %v1253_v59 = vadd.f32 %v1249_v47, %v1243_v55 }
 0x196   : > { %v1246_v58 = vadd.f32 %v1240_v46, %v1230_v54  ;;  %v1254_v60 = vadd.f32 %v1250_v48, %v1244_v56 }
 0x197   : > { %v1255_v61 = vadd.f32 %v1251_v49, %v1245_v57  ;;  %v1257_v63 = vmax.f32 %v1253_v59, 0.0 }
 0x198   : > { %v1256_v62 = vadd.f32 %v1252_v50, %v1246_v58  ;;  %v1258_v0 = vmax.f32 %v1254_v60, 0.0 }
 0x199   : > { %v1259_v1 = vmax.f32 %v1255_v61, 0.0 }
 0x19a   : > { %v1260_v2 = vmax.f32 %v1256_v62, 0.0  ;;  %v1563_v3 = vpack.c.bf16 %v1258_v0, %v1257_v63 }
 0x19c   : > { %v1564_v4 = vpack.c.bf16 %v1260_v2, %v1259_v1  ;;  %1273 = vst [vmem:[%s2167_s23] sm:$0xff] %v1563_v3 }
 0x19e   : > { %1274 = vst [vmem:[%s2167_s23 + $0x8] sm:$0xff] %v1564_v4 }
 0x19f PF: > { %1281 = sbr.rel (!%p1984_p13) target bundleno = 423 (0x1a7), region = 151  ;;  %s1565_s24 = sshll.u32 (%p1984_p13), %s1835_s25, 3 }
 0x1a0   : > { %s1287_s11 = scalar_lea.vmem (%p1984_p13), %s2301_s5, %s1565_s24 }
 0x1a3   : > { %v1317_v5 = vld [vmem:[%s2167_s23] sm:$0xff] (%p1984_p13) }
 0x1a4   : > { %1318 = vst [vmem:[%s1287_s11] sm:$0xff] (%p1984_p13), %v1317_v5 }
 0x1a5   : > { %v1319_v6 = vld [vmem:[%s2167_s23 + $0x8] sm:$0xff] (%p1984_p13) }
 0x1a6   : > { %1320 = vst [vmem:[%s1287_s11 + $0x10] sm:$0xff] %v1319_v6 }
 0x1a7 PF: > { %s15_s28 = sadd.s32 1, %s1847_s28   ;;  %s2315_s22 = sld [smem:[#allocation7_spill]] }
 0x1a8   : > { %p12_p7 = scmp.ge.s32.totalorder %s15_s28, 20   ;;  %s2316_s23 = sld [smem:[#allocation10_spill]] }
 0x1a9   : > { %s2317_s8 = sld [smem:[#allocation8_spill]]  ;;  %s2318_s14 = sld [smem:[#allocation9_spill]] }
 0x1aa   : > { %s2319_s18 = smov %s1811_s19  ;;  %s2320_s19 = smov %s1976_s17 }
 0x1ab   : > { %s2321_s20 = smov %s1819_s21  ;;  %s2322_s21 = smov %s1973_s16 }
 0x1ac   : > { %s2323_s24 = smov %s1839_s26  ;;  %s2324_s25 = smov %s1843_s27 }
 0x1ad   :  { %14 = sbr.rel (!%p12_p7) target bundleno = 8 (0x8), region = 242 }
 0x1af   : > { %s2325_s26 = smov %s2317_s8  ;;  %s2326_s27 = smov %s2318_s14 }

// kernel: resnet18_baseline_forward.44
= control target key start
LH: loop header
LB: loop body
LE: loop exit
PB: predicated region body
PF: predicated region fallthrough
CT: control target
= control target key end

     0   :  { %s2137_s0 = inlined_call_operand.vmem [shape: bf16[16,4608], index: 0, kind: input, shape index: {}]   ;;  %s2138_s1 = inlined_call_operand.vmem [shape: bf16[4608,512], index: 1, kind: input, shape index: {}]   ;;  %s2139_s2 = inlined_call_operand.vmem [shape: f32[1,512], index: 2, kind: input, shape index: {}]   ;;  %s2140_s3 = inlined_call_operand.vmem [shape: f32[1,512], index: 3, kind: input, shape index: {}]   ;;  %s2141_s4 = inlined_call_operand.vmem [shape: bf16[16,512], index: 4, kind: output, shape index: {}]  }
   0x1   :  { %2144 = sst [smem:[#allocation8_spill]] %s2137_s0 }
   0x2   :  { %2145 = sst [smem:[#allocation9_spill]] %s2138_s1 }
   0x3   :  { %s1746_s15 = smov 0   ;;  %s1748_s16 = smov 0  }
   0x4   :  { %s1750_s17 = smov 0   ;;  %s1752_s18 = smov 0  }
   0x5   :  { %s1754_s19 = smov 0   ;;  %s1756_s20 = smov 0  }
   0x6   :  { %s1758_s21 = smov 0   ;;  %s1760_s22 = smov 0  }
   0x7   :  { %s1762_s23 = smov 0   ;;  %s1764_s24 = smov 0  }
   0x8   :  { %s1766_s25 = smov 0  }
   0x9 LB: > { %s1337_s26 = sadd.s32 4294967295, %s1718_s25   ;;  %s26_s27 = sadd.s32 1, %s1710_s23  ;;  %s1718_s25 = sphi %s1766_s25, %s14_s25   ;;  %s1714_s24 = sphi %s1764_s24, %s2164_s24   ;;  %s1710_s23 = sphi %s1762_s23, %s2163_s23   ;;  %s1706_s22 = sphi %s1760_s22, %s2162_s22   ;;  %s1702_s21 = sphi %s1758_s21, %s2161_s21   ;;  %s1698_s20 = sphi %s1756_s20, %s2160_s20   ;;  %s1694_s19 = sphi %s1754_s19, %s2159_s19   ;;  %s1690_s18 = sphi %s1752_s18, %s2158_s18   ;;  %s1686_s17 = sphi %s1750_s17, %s2157_s17   ;;  %s1682_s16 = sphi %s1748_s16, %s2156_s16   ;;  %s1678_s15 = sphi %s1746_s15, %s2155_s15  }
   0xa   : > { %p27_p0 = scmp.ge.s32.totalorder %s26_s27, 9  ;;  %s29_s28 = sadd.s32 1, %s1714_s24 }
   0xb   : > { %s42_s29 = sadd.s32 1, %s1698_s20  ;;  %p49_p1 = scmp.ne.s32.totalorder %s1698_s20, %s1694_s19 }
   0xc   : > { %s2166_s27 = smov (%p27_p0, %s26_s27), 0  ;;  %s2168_s28 = smov (!%p27_p0, %s29_s28), %s1714_s24 }
   0xd   : > { %2146 = sst [smem:[#allocation6_spill]] %s2166_s27  ;;  %s38_s30 = ssub.s32 %s1710_s23, %s2166_s27 }
   0xe   : > { %p50_p2 = scmp.eq.s32.totalorder %s1718_s25, 0  ;;  %p31_p3 = scmp.ge.s32.totalorder %s2168_s28, 2 }
   0xf   : > { %p40_p4 = scmp.eq.s32.totalorder %s38_s30, 0  ;;  %s70_s6 = sadd.s32 1, %s1690_s18 }
  0x10   : > { %p1813_p5 = por %p50_p2, %p49_p1  ;;  %s2170_s28 = smov (%p31_p3, %s2168_s28), 0 }
  0x11   : > { %2148 = sst [smem:[#allocation7_spill]] %s2170_s28  ;;  %s66_s8 = ssub.s32 %s1714_s24, %s2170_s28 }
  0x12   : > { %s1821_s7 = scalar_select %p40_p4, %s1698_s20, %s42_s29  }
  0x13   : > { %p77_p6 = scmp.ne.s32.totalorder %s1690_s18, %s1686_s17  ;;  %s67_s9 = sor.u32 %s66_s8, %s38_s30 }
  0x14   : > { %p148_p7 = scmp.eq.s32.totalorder %s66_s8, 0  ;;  %p68_p8 = scmp.eq.s32.totalorder %s67_s9, 0 }
  0x15   : > { %p1827_p9 = por %p77_p6, %p50_p2  ;;  %s150_s11 = sadd.s32 1, %s1682_s16 }
  0x16   : > { %p160_p10 = scmp.ne.s32.totalorder %s1682_s16, %s1678_s15  ;;  %p161_p11 = scmp.eq.s32.totalorder %s1337_s26, 17 }
  0x17   : > { %s1835_s12 = scalar_select %p68_p8, %s1690_s18, %s70_s6  }
  0x18   : > { %s1838_s13 = scalar_select %p148_p7, %s1682_s16, %s150_s11  }
  0x19   : > { %p1840_p12 = por %p161_p11, %p160_p10  ;;  %p1340_p13 = scmp.ge.s32.totalorder %s1718_s25, 18 }
  0x1b   : > { %183 = sbr.rel (%p1340_p13) target bundleno = 88 (0x58), region = 16 }
  0x22   : > { %186 = sbr.rel (!%p1813_p5) target bundleno = 46 (0x2e), region = 20  ;;  %s188_s29 = sand.u32 (%p1813_p5), 1, %s1698_s20  }
  0x23   : > { %s1432_s30 = sshll.u32 (%p1813_p5), %s1710_s23, 4  ;;  %s1341_s8 = sshll.u32 (%p1813_p5), %s188_s29, 5 }
  0x24   : > { %s2151_s0 = sld [smem:[#allocation8_spill]] (%p1813_p5)  ;;  %s190_s26 = scalar_lea.vmem (%p1813_p5), [#allocation3], %s1341_s8 }
  0x2a   : > { %s196_s11 = scalar_lea.vmem %s2151_s0, %s1432_s30 }
  0x2b   : > { %v209_v0 = vld [vmem:[%s196_s11] sm:$0xff]  ;;  %v211_v1 = vld [vmem:[%s196_s11 + $0x8] sm:$0xff]  ;;  %v213_v2 = vld [vmem:[%s196_s11 + $0x90] sm:$0xff] }
  0x2c   : > { %210 = vst [vmem:[%s190_s26] sm:$0xff] %v209_v0  ;;  %212 = vst [vmem:[%s190_s26 + $0x8] sm:$0xff] %v211_v1  ;;  %v215_v3 = vld [vmem:[%s196_s11 + $0x98] sm:$0xff] }
  0x2d   : > { %214 = vst [vmem:[%s190_s26 + $0x10] sm:$0xff] %v213_v2  ;;  %216 = vst [vmem:[%s190_s26 + $0x18] sm:$0xff] %v215_v3 }
  0x2e PF: > { %222 = sbr.rel (!%p1827_p9) target bundleno = 88 (0x58), region = 43  ;;  %s224_s5 = sand.u32 (%p1827_p9), 1, %s1690_s18  }
  0x2f   : > { %s1346_s29 = sshll.u32 (%p1827_p9), %s1714_s24, 1  ;;  %s1344_s6 = sshll.u32 (%p1827_p9), %s224_s5, 9 }
  0x30   : > { %s1433_s30 = sshll.u32 (%p1827_p9), %s1710_s23, 8  ;;  %s2152_s1 = sld [smem:[#allocation9_spill]] (%p1827_p9) }
  0x31   : > { %s230_s9 = sadd.s32 (%p1827_p9), %s1433_s30, %s1346_s29  ;;  %s1865_s10 = scalar_lea.vmem (%p1827_p9), [#allocation4], %s1344_s6 }
  0x32   : > { %s1348_s0 = sshll.u32 (%p1827_p9), %s230_s9, 2 }
  0x36   : > { %s1860_s27 = scalar_lea.vmem %s2152_s1, %s1348_s0 }
  0x37   : > { %v386_v4 = vld [vmem:[%s1860_s27] sm:$0xff]  ;;  %v388_v5 = vld [vmem:[%s1860_s27 + $0x10] sm:$0xff] }
  0x38   : > { %v390_v6 = vld [vmem:[%s1860_s27 + $0x20] sm:$0xff]  ;;  %387 = vst [vmem:[%s1865_s10] sm:$0xff] %v386_v4  ;;  %389 = vst [vmem:[%s1865_s10 + $0x8] sm:$0xff] %v388_v5  ;;  %v392_v7 = vld [vmem:[%s1860_s27 + $0x30] sm:$0xff] }
  0x39   : > { %391 = vst [vmem:[%s1865_s10 + $0x10] sm:$0xff] %v390_v6  ;;  %v394_v8 = vld [vmem:[%s1860_s27 + $0x40] sm:$0xff]  ;;  %v396_v9 = vld [vmem:[%s1860_s27 + $0x50] sm:$0xff]  ;;  %393 = vst [vmem:[%s1865_s10 + $0x18] sm:$0xff] %v392_v7 }
  0x3a   : > { %395 = vst [vmem:[%s1865_s10 + $0x20] sm:$0xff] %v394_v8  ;;  %397 = vst [vmem:[%s1865_s10 + $0x28] sm:$0xff] %v396_v9  ;;  %v398_v10 = vld [vmem:[%s1860_s27 + $0x60] sm:$0xff]  ;;  %v400_v11 = vld [vmem:[%s1860_s27 + $0x70] sm:$0xff] }
  0x3b   : > { %v402_v12 = vld [vmem:[%s1860_s27 + $0x80] sm:$0xff]  ;;  %399 = vst [vmem:[%s1865_s10 + $0x30] sm:$0xff] %v398_v10  ;;  %401 = vst [vmem:[%s1865_s10 + $0x38] sm:$0xff] %v400_v11  ;;  %v404_v13 = vld [vmem:[%s1860_s27 + $0x90] sm:$0xff] }
  0x3c   : > { %403 = vst [vmem:[%s1865_s10 + $0x40] sm:$0xff] %v402_v12  ;;  %v406_v14 = vld [vmem:[%s1860_s27 + $0xa0] sm:$0xff]  ;;  %v408_v15 = vld [vmem:[%s1860_s27 + $0xb0] sm:$0xff]  ;;  %405 = vst [vmem:[%s1865_s10 + $0x48] sm:$0xff] %v404_v13 }
  0x3d   : > { %407 = vst [vmem:[%s1865_s10 + $0x50] sm:$0xff] %v406_v14  ;;  %409 = vst [vmem:[%s1865_s10 + $0x58] sm:$0xff] %v408_v15  ;;  %v410_v16 = vld [vmem:[%s1860_s27 + $0xc0] sm:$0xff]  ;;  %v412_v17 = vld [vmem:[%s1860_s27 + $0xd0] sm:$0xff] }
  0x3e   : > { %v414_v18 = vld [vmem:[%s1860_s27 + $0xe0] sm:$0xff]  ;;  %411 = vst [vmem:[%s1865_s10 + $0x60] sm:$0xff] %v410_v16  ;;  %413 = vst [vmem:[%s1865_s10 + $0x68] sm:$0xff] %v412_v17  ;;  %v416_v19 = vld [vmem:[%s1860_s27 + $0xf0] sm:$0xff] }
  0x3f   : > { %415 = vst [vmem:[%s1865_s10 + $0x70] sm:$0xff] %v414_v18  ;;  %v418_v20 = vld [vmem:[%s1860_s27 + $0x100] sm:$0xff]  ;;  %v420_v21 = vld [vmem:[%s1860_s27 + $0x110] sm:$0xff]  ;;  %417 = vst [vmem:[%s1865_s10 + $0x78] sm:$0xff] %v416_v19 }
  0x40   : > { %419 = vst [vmem:[%s1865_s10 + $0x80] sm:$0xff] %v418_v20  ;;  %421 = vst [vmem:[%s1865_s10 + $0x88] sm:$0xff] %v420_v21  ;;  %v422_v22 = vld [vmem:[%s1860_s27 + $0x120] sm:$0xff]  ;;  %v424_v23 = vld [vmem:[%s1860_s27 + $0x130] sm:$0xff] }
  0x41   : > { %v426_v24 = vld [vmem:[%s1860_s27 + $0x140] sm:$0xff]  ;;  %423 = vst [vmem:[%s1865_s10 + $0x90] sm:$0xff] %v422_v22  ;;  %425 = vst [vmem:[%s1865_s10 + $0x98] sm:$0xff] %v424_v23  ;;  %v428_v25 = vld [vmem:[%s1860_s27 + $0x150] sm:$0xff] }
  0x42   : > { %427 = vst [vmem:[%s1865_s10 + $0xa0] sm:$0xff] %v426_v24  ;;  %v430_v26 = vld [vmem:[%s1860_s27 + $0x160] sm:$0xff]  ;;  %v432_v27 = vld [vmem:[%s1860_s27 + $0x170] sm:$0xff]  ;;  %429 = vst [vmem:[%s1865_s10 + $0xa8] sm:$0xff] %v428_v25 }
  0x43   : > { %431 = vst [vmem:[%s1865_s10 + $0xb0] sm:$0xff] %v430_v26  ;;  %433 = vst [vmem:[%s1865_s10 + $0xb8] sm:$0xff] %v432_v27  ;;  %v434_v28 = vld [vmem:[%s1860_s27 + $0x180] sm:$0xff]  ;;  %v436_v29 = vld [vmem:[%s1860_s27 + $0x190] sm:$0xff] }
  0x44   : > { %v438_v30 = vld [vmem:[%s1860_s27 + $0x1a0] sm:$0xff]  ;;  %435 = vst [vmem:[%s1865_s10 + $0xc0] sm:$0xff] %v434_v28  ;;  %437 = vst [vmem:[%s1865_s10 + $0xc8] sm:$0xff] %v436_v29  ;;  %v440_v31 = vld [vmem:[%s1860_s27 + $0x1b0] sm:$0xff] }
  0x45   : > { %439 = vst [vmem:[%s1865_s10 + $0xd0] sm:$0xff] %v438_v30  ;;  %v442_v32 = vld [vmem:[%s1860_s27 + $0x1c0] sm:$0xff]  ;;  %v444_v33 = vld [vmem:[%s1860_s27 + $0x1d0] sm:$0xff]  ;;  %441 = vst [vmem:[%s1865_s10 + $0xd8] sm:$0xff] %v440_v31 }
  0x46   : > { %443 = vst [vmem:[%s1865_s10 + $0xe0] sm:$0xff] %v442_v32  ;;  %445 = vst [vmem:[%s1865_s10 + $0xe8] sm:$0xff] %v444_v33  ;;  %v446_v34 = vld [vmem:[%s1860_s27 + $0x1e0] sm:$0xff]  ;;  %v448_v35 = vld [vmem:[%s1860_s27 + $0x1f0] sm:$0xff] }
  0x47   : > { %v450_v36 = vld [vmem:[%s1860_s27 + $0x200] sm:$0xff]  ;;  %447 = vst [vmem:[%s1865_s10 + $0xf0] sm:$0xff] %v446_v34  ;;  %449 = vst [vmem:[%s1865_s10 + $0xf8] sm:$0xff] %v448_v35  ;;  %v452_v37 = vld [vmem:[%s1860_s27 + $0x210] sm:$0xff] }
  0x48   : > { %451 = vst [vmem:[%s1865_s10 + $0x100] sm:$0xff] %v450_v36  ;;  %v454_v38 = vld [vmem:[%s1860_s27 + $0x220] sm:$0xff]  ;;  %v456_v39 = vld [vmem:[%s1860_s27 + $0x230] sm:$0xff]  ;;  %453 = vst [vmem:[%s1865_s10 + $0x108] sm:$0xff] %v452_v37 }
  0x49   : > { %455 = vst [vmem:[%s1865_s10 + $0x110] sm:$0xff] %v454_v38  ;;  %457 = vst [vmem:[%s1865_s10 + $0x118] sm:$0xff] %v456_v39  ;;  %v458_v40 = vld [vmem:[%s1860_s27 + $0x240] sm:$0xff]  ;;  %v460_v41 = vld [vmem:[%s1860_s27 + $0x250] sm:$0xff] }
  0x4a   : > { %v462_v42 = vld [vmem:[%s1860_s27 + $0x260] sm:$0xff]  ;;  %459 = vst [vmem:[%s1865_s10 + $0x120] sm:$0xff] %v458_v40  ;;  %461 = vst [vmem:[%s1865_s10 + $0x128] sm:$0xff] %v460_v41  ;;  %v464_v43 = vld [vmem:[%s1860_s27 + $0x270] sm:$0xff] }
  0x4b   : > { %463 = vst [vmem:[%s1865_s10 + $0x130] sm:$0xff] %v462_v42  ;;  %v466_v44 = vld [vmem:[%s1860_s27 + $0x280] sm:$0xff]  ;;  %v468_v45 = vld [vmem:[%s1860_s27 + $0x290] sm:$0xff]  ;;  %465 = vst [vmem:[%s1865_s10 + $0x138] sm:$0xff] %v464_v43 }
  0x4c   : > { %467 = vst [vmem:[%s1865_s10 + $0x140] sm:$0xff] %v466_v44  ;;  %469 = vst [vmem:[%s1865_s10 + $0x148] sm:$0xff] %v468_v45  ;;  %v470_v46 = vld [vmem:[%s1860_s27 + $0x2a0] sm:$0xff]  ;;  %v472_v47 = vld [vmem:[%s1860_s27 + $0x2b0] sm:$0xff] }
  0x4d   : > { %v474_v48 = vld [vmem:[%s1860_s27 + $0x2c0] sm:$0xff]  ;;  %471 = vst [vmem:[%s1865_s10 + $0x150] sm:$0xff] %v470_v46  ;;  %473 = vst [vmem:[%s1865_s10 + $0x158] sm:$0xff] %v472_v47  ;;  %v476_v49 = vld [vmem:[%s1860_s27 + $0x2d0] sm:$0xff] }
  0x4e   : > { %475 = vst [vmem:[%s1865_s10 + $0x160] sm:$0xff] %v474_v48  ;;  %v478_v50 = vld [vmem:[%s1860_s27 + $0x2e0] sm:$0xff]  ;;  %v480_v51 = vld [vmem:[%s1860_s27 + $0x2f0] sm:$0xff]  ;;  %477 = vst [vmem:[%s1865_s10 + $0x168] sm:$0xff] %v476_v49 }
  0x4f   : > { %479 = vst [vmem:[%s1865_s10 + $0x170] sm:$0xff] %v478_v50  ;;  %481 = vst [vmem:[%s1865_s10 + $0x178] sm:$0xff] %v480_v51  ;;  %v482_v52 = vld [vmem:[%s1860_s27 + $0x300] sm:$0xff]  ;;  %v484_v53 = vld [vmem:[%s1860_s27 + $0x310] sm:$0xff] }
  0x50   : > { %v486_v54 = vld [vmem:[%s1860_s27 + $0x320] sm:$0xff]  ;;  %483 = vst [vmem:[%s1865_s10 + $0x180] sm:$0xff] %v482_v52  ;;  %485 = vst [vmem:[%s1865_s10 + $0x188] sm:$0xff] %v484_v53  ;;  %v488_v55 = vld [vmem:[%s1860_s27 + $0x330] sm:$0xff] }
  0x51   : > { %487 = vst [vmem:[%s1865_s10 + $0x190] sm:$0xff] %v486_v54  ;;  %v490_v56 = vld [vmem:[%s1860_s27 + $0x340] sm:$0xff]  ;;  %v492_v57 = vld [vmem:[%s1860_s27 + $0x350] sm:$0xff]  ;;  %489 = vst [vmem:[%s1865_s10 + $0x198] sm:$0xff] %v488_v55 }
  0x52   : > { %491 = vst [vmem:[%s1865_s10 + $0x1a0] sm:$0xff] %v490_v56  ;;  %493 = vst [vmem:[%s1865_s10 + $0x1a8] sm:$0xff] %v492_v57  ;;  %v494_v58 = vld [vmem:[%s1860_s27 + $0x360] sm:$0xff]  ;;  %v496_v59 = vld [vmem:[%s1860_s27 + $0x370] sm:$0xff] }
  0x53   : > { %v498_v60 = vld [vmem:[%s1860_s27 + $0x380] sm:$0xff]  ;;  %495 = vst [vmem:[%s1865_s10 + $0x1b0] sm:$0xff] %v494_v58  ;;  %497 = vst [vmem:[%s1865_s10 + $0x1b8] sm:$0xff] %v496_v59  ;;  %v500_v61 = vld [vmem:[%s1860_s27 + $0x390] sm:$0xff] }
  0x54   : > { %499 = vst [vmem:[%s1865_s10 + $0x1c0] sm:$0xff] %v498_v60  ;;  %v502_v62 = vld [vmem:[%s1860_s27 + $0x3a0] sm:$0xff]  ;;  %v504_v63 = vld [vmem:[%s1860_s27 + $0x3b0] sm:$0xff]  ;;  %501 = vst [vmem:[%s1865_s10 + $0x1c8] sm:$0xff] %v500_v61 }
  0x55   : > { %503 = vst [vmem:[%s1865_s10 + $0x1d0] sm:$0xff] %v502_v62  ;;  %505 = vst [vmem:[%s1865_s10 + $0x1d8] sm:$0xff] %v504_v63  ;;  %v506_v0 = vld [vmem:[%s1860_s27 + $0x3c0] sm:$0xff]  ;;  %v508_v1 = vld [vmem:[%s1860_s27 + $0x3d0] sm:$0xff] }
  0x56   : > { %v510_v2 = vld [vmem:[%s1860_s27 + $0x3e0] sm:$0xff]  ;;  %507 = vst [vmem:[%s1865_s10 + $0x1e0] sm:$0xff] %v506_v0  ;;  %509 = vst [vmem:[%s1865_s10 + $0x1e8] sm:$0xff] %v508_v1  ;;  %v512_v3 = vld [vmem:[%s1860_s27 + $0x3f0] sm:$0xff] }
  0x57   : > { %511 = vst [vmem:[%s1865_s10 + $0x1f0] sm:$0xff] %v510_v2  ;;  %513 = vst [vmem:[%s1865_s10 + $0x1f8] sm:$0xff] %v512_v3 }
  0x58 PF: > { %p1349_p0 = scmp.ge.s32.totalorder %s1718_s25, 1  ;;  %p534_p1 = scmp.lt.s32.totalorder %s1718_s25, 19 }
  0x5a   : > { %p535_p2 = pnand %p1349_p0, %p534_p1 }
  0x5b   : > { %s541_s0 = sand.u32 (!%p535_p2), 1, %s1694_s19   ;;  %s548_s28 = sand.u32 (!%p535_p2), 1, %s1686_s17  }
  0x5c   : > { %538 = sbr.rel (%p535_p2) target bundleno = 416 (0x1a0), region = 89  ;;  %s1350_s11 = sshll.u32 (!%p535_p2), %s541_s0, 5 }
  0x5d   : > { %s1351_s26 = sshll.u32 (!%p535_p2), %s548_s28, 9  ;;  %s581_s5 = sand.u32 (!%p535_p2), 1, %s1678_s15  }
  0x5e   : > { %s1353_s29 = sshll.u32 (!%p535_p2), %s1706_s22, 1  ;;  %s1352_s27 = sshll.u32 (!%p535_p2), %s581_s5, 4 }
  0x5f   : > { %p589_p3 = scmp.lt.s32.totalorder (!%p535_p2), %s1353_s29, 3  ;;  %s2008_s19 = scalar_lea.vmem (!%p535_p2), [#allocation3], %s1350_s11 }
  0x60   : > { %s2010_s17 = scalar_lea.vmem (!%p535_p2), [#allocation4], %s1351_s26  ;;  %s2012_s15 = scalar_lea.vmem (!%p535_p2), [#allocation5], %s1352_s27 }
  0x61   : > { %p1355_p4 = scmp.ne.s32.totalorder (!%p535_p2), %s1702_s21, 0 }
  0x63   : > { %s2172_s29 = smov (!%p589_p3, %s1353_s29), 3  ;;  %603 = sbr.rel (%p1355_p4) target bundleno = 106 (0x6a), region = 101 }
  0x64   : > { %s591_s9 = scalar_lea.vmem %s2139_s2, %s2172_s29  ;;  %s596_s1 = scalar_lea.vmem %s2140_s3, %s2172_s29  ;;  %v1720_v4 = vmov (!%p1355_p4), 0.0  }
  0x65   : > { %604 = vst [vmem:[#allocation2] sm:$0xff] (!%p1355_p4), %v1720_v4  ;;  %605 = vst [vmem:[#allocation2 + $0x8] sm:$0xff] (!%p1355_p4), %v1720_v4 }
  0x66   : > { %606 = vst [vmem:[#allocation2 + $0x10] sm:$0xff] (!%p1355_p4), %v1720_v4  ;;  %607 = vst [vmem:[#allocation2 + $0x18] sm:$0xff] (!%p1355_p4), %v1720_v4 }
  0x6a PF: > { %v1530_v5 = vld [vmem:[%s2010_s17 + $0x4] ss:$8 sps:$4 sm:$0xff]   ;;  %v1534_v7 = vld [vmem:[%s2010_s17] ss:$8 sps:$4 sm:$0xff]   ;;  %v1536_v9 = vld [vmem:[%s2010_s17 + $0x14] ss:$8 sps:$4 sm:$0xff]  }
  0x6b   : > { %v1532_v6 = vld [vmem:[%s2010_s17 + $0x104] ss:$8 sps:$4 sm:$0xff]   ;;  %1020 = vmatprep.subr.bf16.mxu1 %v1530_v5  ;;  %v1535_v8 = vld [vmem:[%s2010_s17 + $0x100] ss:$8 sps:$4 sm:$0xff]   ;;  %v1538_v10 = vld [vmem:[%s2010_s17 + $0x114] ss:$8 sps:$4 sm:$0xff]  }
  0x6c   : > { %1063 = vmatprep.subr.bf16.mxu0 %v1532_v6  ;;  %1021 = vmatpush1.bf16.msra.mxu1 %v1534_v7  ;;  %v1540_v11 = vld [vmem:[%s2010_s17 + $0x10] ss:$8 sps:$4 sm:$0xff]   ;;  %v1542_v13 = vld [vmem:[%s2010_s17 + $0x24] ss:$8 sps:$4 sm:$0xff]   ;;  %v1546_v15 = vld [vmem:[%s2010_s17 + $0x20] ss:$8 sps:$4 sm:$0xff]  }
  0x6d   : > { %1064 = vmatpush1.bf16.msra.mxu0 %v1535_v8  ;;  %1022 = vmatprep.subr.bf16.mxu1 %v1536_v9  ;;  %v1541_v12 = vld [vmem:[%s2010_s17 + $0x110] ss:$8 sps:$4 sm:$0xff]   ;;  %v1544_v14 = vld [vmem:[%s2010_s17 + $0x124] ss:$8 sps:$4 sm:$0xff]   ;;  %v1547_v16 = vld [vmem:[%s2010_s17 + $0x120] ss:$8 sps:$4 sm:$0xff]  }
  0x6e   : > { %1065 = vmatprep.subr.bf16.mxu0 %v1538_v10  ;;  %v1548_v17 = vld [vmem:[%s2010_s17 + $0x34] ss:$8 sps:$4 sm:$0xff]   ;;  %v1552_v19 = vld [vmem:[%s2010_s17 + $0x30] ss:$8 sps:$4 sm:$0xff]   ;;  %v1554_v21 = vld [vmem:[%s2010_s17 + $0x44] ss:$8 sps:$4 sm:$0xff]  }
  0x6f   : > { %v1550_v18 = vld [vmem:[%s2010_s17 + $0x134] ss:$8 sps:$4 sm:$0xff]   ;;  %v1553_v20 = vld [vmem:[%s2010_s17 + $0x130] ss:$8 sps:$4 sm:$0xff]   ;;  %v1556_v22 = vld [vmem:[%s2010_s17 + $0x144] ss:$8 sps:$4 sm:$0xff]  }
  0x70   : > { %1023 = vmatpush1.bf16.msra.mxu1 %v1540_v11  ;;  %v1558_v23 = vld [vmem:[%s2010_s17 + $0x40] ss:$8 sps:$4 sm:$0xff]   ;;  %v1560_v25 = vld [vmem:[%s2010_s17 + $0x54] ss:$8 sps:$4 sm:$0xff]   ;;  %v1564_v27 = vld [vmem:[%s2010_s17 + $0x50] ss:$8 sps:$4 sm:$0xff]  }
  0x71   : > { %1066 = vmatpush1.bf16.msra.mxu0 %v1541_v12  ;;  %1024 = vmatprep.subr.bf16.mxu1 %v1542_v13  ;;  %v1559_v24 = vld [vmem:[%s2010_s17 + $0x140] ss:$8 sps:$4 sm:$0xff]   ;;  %v1562_v26 = vld [vmem:[%s2010_s17 + $0x154] ss:$8 sps:$4 sm:$0xff]   ;;  %v1565_v28 = vld [vmem:[%s2010_s17 + $0x150] ss:$8 sps:$4 sm:$0xff]  }
  0x72   : > { %1067 = vmatprep.subr.bf16.mxu0 %v1544_v14  ;;  %v1566_v29 = vld [vmem:[%s2010_s17 + $0x64] ss:$8 sps:$4 sm:$0xff]   ;;  %v1570_v31 = vld [vmem:[%s2010_s17 + $0x60] ss:$8 sps:$4 sm:$0xff]   ;;  %v1572_v33 = vld [vmem:[%s2010_s17 + $0x74] ss:$8 sps:$4 sm:$0xff]  }
  0x73   : > { %v1568_v30 = vld [vmem:[%s2010_s17 + $0x164] ss:$8 sps:$4 sm:$0xff]   ;;  %v1571_v32 = vld [vmem:[%s2010_s17 + $0x160] ss:$8 sps:$4 sm:$0xff]   ;;  %v1574_v34 = vld [vmem:[%s2010_s17 + $0x174] ss:$8 sps:$4 sm:$0xff]  }
  0x74   : > { %1025 = vmatpush1.bf16.msra.mxu1 %v1546_v15  ;;  %v1576_v35 = vld [vmem:[%s2010_s17 + $0x70] ss:$8 sps:$4 sm:$0xff]   ;;  %v1578_v37 = vld [vmem:[%s2010_s17 + $0x84] ss:$8 sps:$4 sm:$0xff]   ;;  %v1582_v39 = vld [vmem:[%s2010_s17 + $0x80] ss:$8 sps:$4 sm:$0xff]  }
  0x75   : > { %1068 = vmatpush1.bf16.msra.mxu0 %v1547_v16  ;;  %1026 = vmatprep.subr.bf16.mxu1 %v1548_v17  ;;  %v1577_v36 = vld [vmem:[%s2010_s17 + $0x170] ss:$8 sps:$4 sm:$0xff]   ;;  %v1580_v38 = vld [vmem:[%s2010_s17 + $0x184] ss:$8 sps:$4 sm:$0xff]   ;;  %v1583_v40 = vld [vmem:[%s2010_s17 + $0x180] ss:$8 sps:$4 sm:$0xff]  }
  0x76   : > { %1069 = vmatprep.subr.bf16.mxu0 %v1550_v18  ;;  %v1584_v41 = vld [vmem:[%s2010_s17 + $0x94] ss:$8 sps:$4 sm:$0xff]   ;;  %v1588_v43 = vld [vmem:[%s2010_s17 + $0x90] ss:$8 sps:$4 sm:$0xff]   ;;  %v1590_v45 = vld [vmem:[%s2010_s17 + $0xa4] ss:$8 sps:$4 sm:$0xff]  }
  0x77   : > { %v1586_v42 = vld [vmem:[%s2010_s17 + $0x194] ss:$8 sps:$4 sm:$0xff]   ;;  %v1589_v44 = vld [vmem:[%s2010_s17 + $0x190] ss:$8 sps:$4 sm:$0xff]   ;;  %v1592_v46 = vld [vmem:[%s2010_s17 + $0x1a4] ss:$8 sps:$4 sm:$0xff]  }
  0x78   : > { %1027 = vmatpush1.bf16.msra.mxu1 %v1552_v19  ;;  %v1594_v47 = vld [vmem:[%s2010_s17 + $0xa0] ss:$8 sps:$4 sm:$0xff]   ;;  %v1596_v49 = vld [vmem:[%s2010_s17 + $0xb4] ss:$8 sps:$4 sm:$0xff]   ;;  %v1600_v51 = vld [vmem:[%s2010_s17 + $0xb0] ss:$8 sps:$4 sm:$0xff]  }
  0x79   : > { %1070 = vmatpush1.bf16.msra.mxu0 %v1553_v20  ;;  %1028 = vmatprep.subr.bf16.mxu1 %v1554_v21  ;;  %v1595_v48 = vld [vmem:[%s2010_s17 + $0x1a0] ss:$8 sps:$4 sm:$0xff]   ;;  %v1598_v50 = vld [vmem:[%s2010_s17 + $0x1b4] ss:$8 sps:$4 sm:$0xff]   ;;  %v1601_v53 = vld [vmem:[%s2010_s17 + $0x1b0] ss:$8 sps:$4 sm:$0xff]  }
  0x7a   : > { %1071 = vmatprep.subr.bf16.mxu0 %v1556_v22  ;;  %v1628_v52 = vld [vmem:[%s2008_s19 + $0x4] ss:$16 sps:$4 sm:$0xff]   ;;  %v1631_v56 = vld [vmem:[%s2008_s19 + $0xc] ss:$16 sps:$4 sm:$0xff]   ;;  %v1606_v57 = vld [vmem:[%s2010_s17 + $0xc0] ss:$8 sps:$4 sm:$0xff]  }
  0x7b   : > { %v1602_v54 = vld [vmem:[%s2010_s17 + $0xc4] ss:$8 sps:$4 sm:$0xff]   ;;  %1052 = vmatprep.mubr.bf16.mxu1 %v1628_v52  ;;  %1095 = vmatprep.mubr.bf16.mxu0 %v1631_v56  ;;  %v1607_v58 = vld [vmem:[%s2010_s17 + $0x1c0] ss:$8 sps:$4 sm:$0xff]   ;;  %v1608_v59 = vld [vmem:[%s2010_s17 + $0xd4] ss:$8 sps:$4 sm:$0xff]  }
  0x7c   : > { %1029 = vmatpush1.bf16.msra.mxu1 %v1558_v23  ;;  %v1604_v55 = vld [vmem:[%s2010_s17 + $0x1c4] ss:$8 sps:$4 sm:$0xff]   ;;  %v1610_v60 = vld [vmem:[%s2010_s17 + $0x1d4] ss:$8 sps:$4 sm:$0xff]   ;;  %v1612_v61 = vld [vmem:[%s2010_s17 + $0xd0] ss:$8 sps:$4 sm:$0xff]  }
  0x7d   : > { %1072 = vmatpush1.bf16.msra.mxu0 %v1559_v24  ;;  %1030 = vmatprep.subr.bf16.mxu1 %v1560_v25  ;;  %v1613_v62 = vld [vmem:[%s2010_s17 + $0x1d0] ss:$8 sps:$4 sm:$0xff]   ;;  %v1614_v63 = vld [vmem:[%s2010_s17 + $0xe4] ss:$8 sps:$4 sm:$0xff]   ;;  %v1618_v1 = vld [vmem:[%s2010_s17 + $0xe0] ss:$8 sps:$4 sm:$0xff]  }
  0x7e   : > { %1073 = vmatprep.subr.bf16.mxu0 %v1562_v26  ;;  %v1616_v0 = vld [vmem:[%s2010_s17 + $0x1e4] ss:$8 sps:$4 sm:$0xff]   ;;  %v1619_v2 = vld [vmem:[%s2010_s17 + $0x1e0] ss:$8 sps:$4 sm:$0xff]   ;;  %v1620_v3 = vld [vmem:[%s2010_s17 + $0xf4] ss:$8 sps:$4 sm:$0xff]  }
  0x7f   : > { %v1622_v4 = vld [vmem:[%s2010_s17 + $0x1f4] ss:$8 sps:$4 sm:$0xff]   ;;  %v1624_v5 = vld [vmem:[%s2010_s17 + $0xf0] ss:$8 sps:$4 sm:$0xff]   ;;  %v608_v10 = vld [vmem:[#allocation2] sm:$0xff]  ;;  %p1424_p5 = scmp.ne.s32.totalorder %s1702_s21, 8 }
  0x80   : > { %1031 = vmatpush1.bf16.msra.mxu1 %v1564_v27  ;;  %v1625_v6 = vld [vmem:[%s2010_s17 + $0x1f0] ss:$8 sps:$4 sm:$0xff]   ;;  %v609_v14 = vld [vmem:[#allocation2 + $0x8] sm:$0xff] }
  0x81   : > { %1074 = vmatpush1.bf16.msra.mxu0 %v1565_v28  ;;  %1032 = vmatprep.subr.bf16.mxu1 %v1566_v29  ;;  %v1626_v7 = vld [vmem:[%s2008_s19] ss:$16 sps:$4 sm:$0xff]   ;;  %v1629_v8 = vld [vmem:[%s2008_s19 + $0x8] ss:$16 sps:$4 sm:$0xff]   ;;  %v1124_v29 = vlaneseq (!%p1424_p5) }
  0x82   : > { %1075 = vmatprep.subr.bf16.mxu0 %v1568_v30  ;;  %v610_v18 = vld [vmem:[#allocation2 + $0x10] sm:$0xff]  ;;  %v611_v23 = vld [vmem:[#allocation2 + $0x18] sm:$0xff] }
  0x83   : > { %v1125_v30 = vshrl.u32 (!%p1424_p5), %v1124_v29, 7 }
  0x84   : > { %1033 = vmatpush1.bf16.msra.mxu1 %v1570_v31  ;;  %v1122_v31 = vld [vmem:[%s591_s9] sm:$0x3] (!%p1424_p5) }
  0x85   : > { %1076 = vmatpush1.bf16.msra.mxu0 %v1571_v32  ;;  %1034 = vmatprep.subr.bf16.mxu1 %v1572_v33  ;;  %v1138_v32 = vld [vmem:[%s596_s1] sm:$0x3] (!%p1424_p5) }
  0x86   : > { %1077 = vmatprep.subr.bf16.mxu0 %v1574_v34  ;;  %v1126_v34 = vsub.s32 (!%p1424_p5), 0, %v1125_v30 }
  0x88   : > { %1035 = vmatpush1.bf16.msra.mxu1 %v1576_v35  ;;  %v1130_v35 = vsub.s32 (!%p1424_p5), 1, %v1125_v30 }
  0x89   : > { %1078 = vmatpush1.bf16.msra.mxu0 %v1577_v36  ;;  %1036 = vmatprep.subr.bf16.mxu1 %v1578_v37 }
  0x8a   : > { %1079 = vmatprep.subr.bf16.mxu0 %v1580_v38 }
  0x8c   : > { %1037 = vmatpush1.bf16.msra.mxu1 %v1582_v39  ;;  %v1127_v39 = vrot.slane (!%p1424_p5), %v1122_v31, %v1126_v34 }
  0x8d   : > { %1080 = vmatpush1.bf16.msra.mxu0 %v1583_v40  ;;  %1038 = vmatprep.subr.bf16.mxu1 %v1584_v41  ;;  %v1131_v40 = vrot.slane (!%p1424_p5), %v1122_v31, %v1130_v35  ;;  %v1143_v41 = vrot.slane (!%p1424_p5), %v1138_v32, %v1126_v34 }
  0x8e   : > { %1081 = vmatprep.subr.bf16.mxu0 %v1586_v42  ;;  %v1147_v42 = vrot.slane (!%p1424_p5), %v1138_v32, %v1130_v35 }
  0x90   : > { %1039 = vmatpush1.bf16.msra.mxu1 %v1588_v43 }
  0x91   : > { %1082 = vmatpush1.bf16.msra.mxu0 %v1589_v44  ;;  %1040 = vmatprep.subr.bf16.mxu1 %v1590_v45 }
  0x92   : > { %1083 = vmatprep.subr.bf16.mxu0 %v1592_v46 }
  0x94   : > { %1041 = vmatpush1.bf16.msra.mxu1 %v1594_v47 }
  0x95   : > { %1084 = vmatpush1.bf16.msra.mxu0 %v1595_v48  ;;  %1042 = vmatprep.subr.bf16.mxu1 %v1596_v49 }
  0x96   : > { %1085 = vmatprep.subr.bf16.mxu0 %v1598_v50 }
  0x98   : > { %1043 = vmatpush1.bf16.msra.mxu1 %v1600_v51 }
  0x99   : > { %1086 = vmatpush1.bf16.msra.mxu0 %v1601_v53  ;;  %1044 = vmatprep.subr.bf16.mxu1 %v1602_v54 }
  0x9a   : > { %1087 = vmatprep.subr.bf16.mxu0 %v1604_v55 }
  0x9c   : > { %1045 = vmatpush1.bf16.msra.mxu1 %v1606_v57 }
  0x9d   : > { %1088 = vmatpush1.bf16.msra.mxu0 %v1607_v58  ;;  %1046 = vmatprep.subr.bf16.mxu1 %v1608_v59 }
  0x9e   : > { %1089 = vmatprep.subr.bf16.mxu0 %v1610_v60 }
  0xa0   : > { %1047 = vmatpush1.bf16.msra.mxu1 %v1612_v61 }
  0xa1   : > { %1090 = vmatpush1.bf16.msra.mxu0 %v1613_v62  ;;  %1048 = vmatprep.subr.bf16.mxu1 %v1614_v63 }
  0xa2   : > { %1091 = vmatprep.subr.bf16.mxu0 %v1616_v0 }
  0xa4   : > { %1049 = vmatpush1.bf16.msra.mxu1 %v1618_v1 }
  0xa5   : > { %1092 = vmatpush1.bf16.msra.mxu0 %v1619_v2  ;;  %1050 = vmatprep.subr.bf16.mxu1 %v1620_v3 }
  0xa6   : > { %1093 = vmatprep.subr.bf16.mxu0 %v1622_v4 }
  0xa8   : > { %1051 = vmatpush1.bf16.msra.mxu1 %v1624_v5 }
  0xa9   : > { %1094 = vmatpush1.bf16.msra.mxu0 %v1625_v6 }
  0xab   : > { %1053 = vmatmul.mubr.bf16.vlgmr.msra.gmra.mrb[0].mxu1 %v1626_v7 }
  0xac   : > { %1096 = vmatmul.mubr.bf16.vlgmr.msra.gmra.mrb[0].mxu0 %v1629_v8 }
 0x17e   : > { %v1054_v9 = vpop.f32.mrb[0].mxu1 }
 0x17f   : > { %v1097_v11 = vpop.f32.mrb[0].mxu0  ;;  %v1056_v13 = vpop.f32.mrb[1].mxu1 }
 0x180   : > { %v1098_v12 = vadd.f32 %v1097_v11, %v1054_v9  ;;  %v1099_v15 = vpop.f32.mrb[1].mxu0  ;;  %v1058_v17 = vpop.f32.mrb[2].mxu1 }
 0x181   : > { %v1100_v16 = vadd.f32 %v1099_v15, %v1056_v13  ;;  %v1101_v19 = vpop.f32.mrb[2].mxu0  ;;  %v1060_v22 = vpop.f32.mrb[3].mxu1  ;;  %1117 = sbr.rel (%p1424_p5) target bundleno = 408 (0x198), region = 105 }
 0x182   : > { %v1106_v20 = vadd.f32 %v1098_v12, %v608_v10  ;;  %v1102_v21 = vadd.f32 %v1101_v19, %v1058_v17  ;;  %v1103_v24 = vpop.f32.mrb[3].mxu0 }
 0x183   : > { %v1107_v25 = vadd.f32 %v1100_v16, %v609_v14  ;;  %v1104_v26 = vadd.f32 %v1103_v24, %v1060_v22 }
 0x184   : > { %1110 = vst [vmem:[#allocation2] sm:$0xff] %v1106_v20  ;;  %v1108_v27 = vadd.f32 %v1102_v21, %v610_v18 }
 0x185   : > { %1111 = vst [vmem:[#allocation2 + $0x8] sm:$0xff] %v1107_v25  ;;  %v1109_v28 = vadd.f32 %v1104_v26, %v611_v23 }
 0x186   : > { %1112 = vst [vmem:[#allocation2 + $0x10] sm:$0xff] %v1108_v27 }
 0x187   : > { %1113 = vst [vmem:[#allocation2 + $0x18] sm:$0xff] %v1109_v28 }
 0x18b   : > { %v1118_v33 = vld [vmem:[#allocation2] sm:$0xff] }
 0x18c   : > { %v1119_v36 = vld [vmem:[#allocation2 + $0x8] sm:$0xff]  ;;  %v1134_v43 = vmul.f32 %v1127_v39, %v1118_v33 }
 0x18d   : > { %v1120_v37 = vld [vmem:[#allocation2 + $0x10] sm:$0xff]  ;;  %v1135_v44 = vmul.f32 %v1131_v40, %v1119_v36 }
 0x18e   : > { %v1121_v38 = vld [vmem:[#allocation2 + $0x18] sm:$0xff]  ;;  %v1136_v45 = vmul.f32 %v1127_v39, %v1120_v37  ;;  %v1150_v47 = vadd.f32 %v1143_v41, %v1134_v43 }
 0x18f   : > { %v1137_v46 = vmul.f32 %v1131_v40, %v1121_v38  ;;  %v1151_v48 = vadd.f32 %v1147_v42, %v1135_v44 }
 0x190   : > { %v1152_v49 = vadd.f32 %v1143_v41, %v1136_v45  ;;  %v1154_v51 = vmax.f32 %v1150_v47, 0.0 }
 0x191   : > { %v1153_v50 = vadd.f32 %v1147_v42, %v1137_v46  ;;  %v1155_v52 = vmax.f32 %v1151_v48, 0.0 }
 0x192   : > { %v1156_v53 = vmax.f32 %v1152_v49, 0.0 }
 0x193   : > { %v1157_v54 = vmax.f32 %v1153_v50, 0.0  ;;  %v1434_v55 = vpack.c.bf16 %v1155_v52, %v1154_v51 }
 0x195   : > { %v1435_v56 = vpack.c.bf16 %v1157_v54, %v1156_v53  ;;  %1170 = vst [vmem:[%s2012_s15] sm:$0xff] %v1434_v55 }
 0x197   : > { %1171 = vst [vmem:[%s2012_s15 + $0x8] sm:$0xff] %v1435_v56 }
 0x198 PF: > { %1178 = sbr.rel (!%p1840_p12) target bundleno = 416 (0x1a0), region = 109  ;;  %s1436_s1 = sshll.u32 (%p1840_p12), %s1706_s22, 3 }
 0x199   : > { %s1184_s29 = scalar_lea.vmem (%p1840_p12), %s2141_s4, %s1436_s1 }
 0x19c   : > { %v1214_v57 = vld [vmem:[%s2012_s15] sm:$0xff] (%p1840_p12) }
 0x19d   : > { %1215 = vst [vmem:[%s1184_s29] sm:$0xff] (%p1840_p12), %v1214_v57 }
 0x19e   : > { %v1216_v58 = vld [vmem:[%s2012_s15 + $0x8] sm:$0xff] (%p1840_p12) }
 0x19f   : > { %1217 = vst [vmem:[%s1184_s29 + $0x10] sm:$0xff] %v1216_v58 }
 0x1a0 PF: > { %s14_s25 = sadd.s32 1, %s1718_s25   ;;  %s2153_s14 = sld [smem:[#allocation6_spill]] }
 0x1a1   : > { %p11_p6 = scmp.ge.s32.totalorder %s14_s25, 20   ;;  %s2154_s27 = sld [smem:[#allocation7_spill]] }
 0x1a2   : > { %s2155_s15 = smov %s1682_s16  ;;  %s2156_s16 = smov %s1838_s13 }
 0x1a3   : > { %s2157_s17 = smov %s1690_s18  ;;  %s2158_s18 = smov %s1835_s12 }
 0x1a4   : > { %s2159_s19 = smov %s1698_s20  ;;  %s2160_s20 = smov %s1821_s7 }
 0x1a5   : > { %s2161_s21 = smov %s1710_s23  ;;  %s2162_s22 = smov %s1714_s24 }
 0x1a6   : > { %s2163_s23 = smov %s2153_s14  ;;  %13 = sbr.rel (!%p11_p6) target bundleno = 9 (0x9), region = 192 }
 0x1a7   : > { %s2164_s24 = smov %s2154_s27 }

// kernel: resnet18_baseline_forward.46
= control target key start
LH: loop header
LB: loop body
LE: loop exit
PB: predicated region body
PF: predicated region fallthrough
CT: control target
= control target key end

     0   :  { %vm21_vm0 = vcmask 1041409   ;;  %vm23_vm1 = vcmask 1043459   ;;  %vm25_vm2 = vcmask 1045509   ;;  %vm27_vm3 = vcmask 1047559   ;;  %s55_s0 = inlined_call_operand.vmem [shape: bf16[2,1,512], index: 0, kind: input, shape index: {}]   ;;  %s56_s1 = inlined_call_operand.vmem [shape: f32[2,512], index: 1, kind: output, shape index: {}]  }
   0x1   :  { %v36_v0 = vld [vmem:[%s55_s0] sm:$0xff]  }
   0x2   :  { %v37_v1 = vunpack.c.l.bf16 %v36_v0  ;;  %v38_v2 = vunpack.c.h.bf16 %v36_v0 }
   0x4   :  { %v20_v3 = vrot.slane %v38_v2, 7 }
   0x6   :  { %v22_v4 = vsel %vm21_vm0, %v20_v3, %v37_v1 }
   0x7   :  { %v24_v5 = vsel %vm23_vm1, %v20_v3, %v22_v4 }
   0x8   :  { %v26_v6 = vsel %vm25_vm2, %v20_v3, %v24_v5 }
   0x9   :  { %v28_v7 = vsel %vm27_vm3, %v20_v3, %v26_v6 }
   0xa   :  { %30 = vst [vmem:[%s56_s1] sm:$0xff] %v28_v7 }

// kernel: resnet18_baseline_forward.47
= control target key start
LH: loop header
LB: loop body
LE: loop exit
PB: predicated region body
PF: predicated region fallthrough
CT: control target
= control target key end

     0   :  { %s1624_s15 = smov 0   ;;  %s1626_s16 = smov 0   ;;  %s1917_s0 = inlined_call_operand.vmem [shape: bf16[16,512], index: 0, kind: input, shape index: {}]   ;;  %s1918_s1 = inlined_call_operand.vmem [shape: bf16[512,512], index: 1, kind: input, shape index: {}]   ;;  %s1919_s2 = inlined_call_operand.vmem [shape: f32[1,512], index: 2, kind: input, shape index: {}]   ;;  %s1920_s3 = inlined_call_operand.vmem [shape: f32[1,512], index: 3, kind: input, shape index: {}]   ;;  %s1921_s4 = inlined_call_operand.vmem [shape: bf16[16,512], index: 4, kind: output, shape index: {}]  }
   0x1   :  { %s1628_s17 = smov 0   ;;  %s1630_s18 = smov 0  }
   0x2   :  { %s1632_s19 = smov 0  }
   0x3 LB: > { %s29_s20 = sadd.s32 1, %s1593_s18  ;;  %s1321_s21 = sadd.s32 4294967295, %s1597_s19   ;;  %s1597_s19 = sphi %s1632_s19, %s14_s19   ;;  %s1593_s18 = sphi %s1630_s18, %s1926_s18   ;;  %s1589_s17 = sphi %s1628_s17, %s1925_s17   ;;  %s1585_s16 = sphi %s1626_s16, %s1924_s16   ;;  %s1581_s15 = sphi %s1624_s15, %s1923_s15  }
   0x4   : > { %p31_p0 = scmp.ge.s32.totalorder %s29_s20, 2  ;;  %p77_p1 = scmp.ne.s32.totalorder %s1585_s16, %s1581_s15 }
   0x5   : > { %p78_p2 = scmp.eq.s32.totalorder %s1597_s19, 0  ;;  %p161_p4 = scmp.eq.s32.totalorder %s1321_s21, 1 }
   0x6   : > { %s1928_s20 = smov (%p31_p0, %s29_s20), 0  ;;  %s70_s23 = sadd.s32 1, %s1585_s16 }
   0x7   : > { %p79_p3 = por %p78_p2, %p77_p1  ;;  %s66_s22 = ssub.s32 %s1593_s18, %s1928_s20 }
   0x8   : > { %p68_p5 = scmp.eq.s32.totalorder %s66_s22, 0  ;;  %p1659_p6 = por %p161_p4, %p77_p1 }
   0x9   : > { %p1325_p7 = scmp.ge.s32.totalorder %s1597_s19, 2 }
   0xa   : > { %s1664_s25 = scalar_select %p68_p5, %s1585_s16, %s70_s23  }
   0xb   : > { %198 = sbr.rel (%p1325_p7) target bundleno = 54 (0x36), region = 20 }
  0x12   : > { %201 = sbr.rel (!%p79_p3) target bundleno = 54 (0x36), region = 24  ;;  %s203_s26 = sand.u32 (%p79_p3), 1, %s1585_s16  }
  0x13   : > { %s1409_s27 = sshll.u32 (%p79_p3), %s1593_s18, 3  ;;  %s1326_s28 = sshll.u32 (%p79_p3), %s203_s26, 9 }
  0x14   : > { %s1672_s5 = scalar_lea.vmem (%p79_p3), %s1918_s1, %s1409_s27  ;;  %s1677_s6 = scalar_lea.vmem (%p79_p3), [#allocation3], %s1326_s28 }
  0x15   : > { %v365_v0 = vld [vmem:[%s1672_s5] sm:$0xff] (%p79_p3)  ;;  %v367_v1 = vld [vmem:[%s1672_s5 + $0x10] sm:$0xff] (%p79_p3) }
  0x16   : > { %v369_v2 = vld [vmem:[%s1672_s5 + $0x20] sm:$0xff] (%p79_p3)  ;;  %366 = vst [vmem:[%s1677_s6] sm:$0xff] (%p79_p3), %v365_v0  ;;  %368 = vst [vmem:[%s1677_s6 + $0x8] sm:$0xff] (%p79_p3), %v367_v1  ;;  %v371_v3 = vld [vmem:[%s1672_s5 + $0x30] sm:$0xff] (%p79_p3) }
  0x17   : > { %370 = vst [vmem:[%s1677_s6 + $0x10] sm:$0xff] (%p79_p3), %v369_v2  ;;  %v373_v4 = vld [vmem:[%s1672_s5 + $0x40] sm:$0xff] (%p79_p3)  ;;  %v375_v5 = vld [vmem:[%s1672_s5 + $0x50] sm:$0xff] (%p79_p3)  ;;  %372 = vst [vmem:[%s1677_s6 + $0x18] sm:$0xff] (%p79_p3), %v371_v3 }
  0x18   : > { %374 = vst [vmem:[%s1677_s6 + $0x20] sm:$0xff] (%p79_p3), %v373_v4  ;;  %376 = vst [vmem:[%s1677_s6 + $0x28] sm:$0xff] (%p79_p3), %v375_v5  ;;  %v377_v6 = vld [vmem:[%s1672_s5 + $0x60] sm:$0xff] (%p79_p3)  ;;  %v379_v7 = vld [vmem:[%s1672_s5 + $0x70] sm:$0xff] (%p79_p3) }
  0x19   : > { %v381_v8 = vld [vmem:[%s1672_s5 + $0x80] sm:$0xff]  ;;  %378 = vst [vmem:[%s1677_s6 + $0x30] sm:$0xff] %v377_v6  ;;  %380 = vst [vmem:[%s1677_s6 + $0x38] sm:$0xff] %v379_v7  ;;  %v383_v9 = vld [vmem:[%s1672_s5 + $0x90] sm:$0xff] }
  0x1a   : > { %382 = vst [vmem:[%s1677_s6 + $0x40] sm:$0xff] %v381_v8  ;;  %v385_v10 = vld [vmem:[%s1672_s5 + $0xa0] sm:$0xff]  ;;  %v387_v11 = vld [vmem:[%s1672_s5 + $0xb0] sm:$0xff]  ;;  %384 = vst [vmem:[%s1677_s6 + $0x48] sm:$0xff] %v383_v9 }
  0x1b   : > { %386 = vst [vmem:[%s1677_s6 + $0x50] sm:$0xff] %v385_v10  ;;  %388 = vst [vmem:[%s1677_s6 + $0x58] sm:$0xff] %v387_v11  ;;  %v389_v12 = vld [vmem:[%s1672_s5 + $0xc0] sm:$0xff]  ;;  %v391_v13 = vld [vmem:[%s1672_s5 + $0xd0] sm:$0xff] }
  0x1c   : > { %v393_v14 = vld [vmem:[%s1672_s5 + $0xe0] sm:$0xff]  ;;  %390 = vst [vmem:[%s1677_s6 + $0x60] sm:$0xff] %v389_v12  ;;  %392 = vst [vmem:[%s1677_s6 + $0x68] sm:$0xff] %v391_v13  ;;  %v395_v15 = vld [vmem:[%s1672_s5 + $0xf0] sm:$0xff] }
  0x1d   : > { %394 = vst [vmem:[%s1677_s6 + $0x70] sm:$0xff] %v393_v14  ;;  %v397_v16 = vld [vmem:[%s1672_s5 + $0x100] sm:$0xff]  ;;  %v399_v17 = vld [vmem:[%s1672_s5 + $0x110] sm:$0xff]  ;;  %396 = vst [vmem:[%s1677_s6 + $0x78] sm:$0xff] %v395_v15 }
  0x1e   : > { %398 = vst [vmem:[%s1677_s6 + $0x80] sm:$0xff] %v397_v16  ;;  %400 = vst [vmem:[%s1677_s6 + $0x88] sm:$0xff] %v399_v17  ;;  %v401_v18 = vld [vmem:[%s1672_s5 + $0x120] sm:$0xff]  ;;  %v403_v19 = vld [vmem:[%s1672_s5 + $0x130] sm:$0xff] }
  0x1f   : > { %v405_v20 = vld [vmem:[%s1672_s5 + $0x140] sm:$0xff]  ;;  %402 = vst [vmem:[%s1677_s6 + $0x90] sm:$0xff] %v401_v18  ;;  %404 = vst [vmem:[%s1677_s6 + $0x98] sm:$0xff] %v403_v19  ;;  %v407_v21 = vld [vmem:[%s1672_s5 + $0x150] sm:$0xff] }
  0x20   : > { %406 = vst [vmem:[%s1677_s6 + $0xa0] sm:$0xff] %v405_v20  ;;  %v409_v22 = vld [vmem:[%s1672_s5 + $0x160] sm:$0xff]  ;;  %v411_v23 = vld [vmem:[%s1672_s5 + $0x170] sm:$0xff]  ;;  %408 = vst [vmem:[%s1677_s6 + $0xa8] sm:$0xff] %v407_v21 }
  0x21   : > { %410 = vst [vmem:[%s1677_s6 + $0xb0] sm:$0xff] %v409_v22  ;;  %412 = vst [vmem:[%s1677_s6 + $0xb8] sm:$0xff] %v411_v23  ;;  %v413_v24 = vld [vmem:[%s1672_s5 + $0x180] sm:$0xff]  ;;  %v415_v25 = vld [vmem:[%s1672_s5 + $0x190] sm:$0xff] }
  0x22   : > { %v417_v26 = vld [vmem:[%s1672_s5 + $0x1a0] sm:$0xff]  ;;  %414 = vst [vmem:[%s1677_s6 + $0xc0] sm:$0xff] %v413_v24  ;;  %416 = vst [vmem:[%s1677_s6 + $0xc8] sm:$0xff] %v415_v25  ;;  %v419_v27 = vld [vmem:[%s1672_s5 + $0x1b0] sm:$0xff] }
  0x23   : > { %418 = vst [vmem:[%s1677_s6 + $0xd0] sm:$0xff] %v417_v26  ;;  %v421_v28 = vld [vmem:[%s1672_s5 + $0x1c0] sm:$0xff]  ;;  %v423_v29 = vld [vmem:[%s1672_s5 + $0x1d0] sm:$0xff]  ;;  %420 = vst [vmem:[%s1677_s6 + $0xd8] sm:$0xff] %v419_v27 }
  0x24   : > { %422 = vst [vmem:[%s1677_s6 + $0xe0] sm:$0xff] %v421_v28  ;;  %424 = vst [vmem:[%s1677_s6 + $0xe8] sm:$0xff] %v423_v29  ;;  %v425_v30 = vld [vmem:[%s1672_s5 + $0x1e0] sm:$0xff]  ;;  %v427_v31 = vld [vmem:[%s1672_s5 + $0x1f0] sm:$0xff] }
  0x25   : > { %v429_v32 = vld [vmem:[%s1672_s5 + $0x200] sm:$0xff]  ;;  %426 = vst [vmem:[%s1677_s6 + $0xf0] sm:$0xff] %v425_v30  ;;  %428 = vst [vmem:[%s1677_s6 + $0xf8] sm:$0xff] %v427_v31  ;;  %v431_v33 = vld [vmem:[%s1672_s5 + $0x210] sm:$0xff] }
  0x26   : > { %430 = vst [vmem:[%s1677_s6 + $0x100] sm:$0xff] %v429_v32  ;;  %v433_v34 = vld [vmem:[%s1672_s5 + $0x220] sm:$0xff]  ;;  %v435_v35 = vld [vmem:[%s1672_s5 + $0x230] sm:$0xff]  ;;  %432 = vst [vmem:[%s1677_s6 + $0x108] sm:$0xff] %v431_v33 }
  0x27   : > { %434 = vst [vmem:[%s1677_s6 + $0x110] sm:$0xff] %v433_v34  ;;  %436 = vst [vmem:[%s1677_s6 + $0x118] sm:$0xff] %v435_v35  ;;  %v437_v36 = vld [vmem:[%s1672_s5 + $0x240] sm:$0xff]  ;;  %v439_v37 = vld [vmem:[%s1672_s5 + $0x250] sm:$0xff] }
  0x28   : > { %v441_v38 = vld [vmem:[%s1672_s5 + $0x260] sm:$0xff]  ;;  %438 = vst [vmem:[%s1677_s6 + $0x120] sm:$0xff] %v437_v36  ;;  %440 = vst [vmem:[%s1677_s6 + $0x128] sm:$0xff] %v439_v37  ;;  %v443_v39 = vld [vmem:[%s1672_s5 + $0x270] sm:$0xff] }
  0x29   : > { %442 = vst [vmem:[%s1677_s6 + $0x130] sm:$0xff] %v441_v38  ;;  %v445_v40 = vld [vmem:[%s1672_s5 + $0x280] sm:$0xff]  ;;  %v447_v41 = vld [vmem:[%s1672_s5 + $0x290] sm:$0xff]  ;;  %444 = vst [vmem:[%s1677_s6 + $0x138] sm:$0xff] %v443_v39 }
  0x2a   : > { %446 = vst [vmem:[%s1677_s6 + $0x140] sm:$0xff] %v445_v40  ;;  %448 = vst [vmem:[%s1677_s6 + $0x148] sm:$0xff] %v447_v41  ;;  %v449_v42 = vld [vmem:[%s1672_s5 + $0x2a0] sm:$0xff]  ;;  %v451_v43 = vld [vmem:[%s1672_s5 + $0x2b0] sm:$0xff] }
  0x2b   : > { %v453_v44 = vld [vmem:[%s1672_s5 + $0x2c0] sm:$0xff]  ;;  %450 = vst [vmem:[%s1677_s6 + $0x150] sm:$0xff] %v449_v42  ;;  %452 = vst [vmem:[%s1677_s6 + $0x158] sm:$0xff] %v451_v43  ;;  %v455_v45 = vld [vmem:[%s1672_s5 + $0x2d0] sm:$0xff] }
  0x2c   : > { %454 = vst [vmem:[%s1677_s6 + $0x160] sm:$0xff] %v453_v44  ;;  %v457_v46 = vld [vmem:[%s1672_s5 + $0x2e0] sm:$0xff]  ;;  %v459_v47 = vld [vmem:[%s1672_s5 + $0x2f0] sm:$0xff]  ;;  %456 = vst [vmem:[%s1677_s6 + $0x168] sm:$0xff] %v455_v45 }
  0x2d   : > { %458 = vst [vmem:[%s1677_s6 + $0x170] sm:$0xff] %v457_v46  ;;  %460 = vst [vmem:[%s1677_s6 + $0x178] sm:$0xff] %v459_v47  ;;  %v461_v48 = vld [vmem:[%s1672_s5 + $0x300] sm:$0xff]  ;;  %v463_v49 = vld [vmem:[%s1672_s5 + $0x310] sm:$0xff] }
  0x2e   : > { %v465_v50 = vld [vmem:[%s1672_s5 + $0x320] sm:$0xff]  ;;  %462 = vst [vmem:[%s1677_s6 + $0x180] sm:$0xff] %v461_v48  ;;  %464 = vst [vmem:[%s1677_s6 + $0x188] sm:$0xff] %v463_v49  ;;  %v467_v51 = vld [vmem:[%s1672_s5 + $0x330] sm:$0xff] }
  0x2f   : > { %466 = vst [vmem:[%s1677_s6 + $0x190] sm:$0xff] %v465_v50  ;;  %v469_v52 = vld [vmem:[%s1672_s5 + $0x340] sm:$0xff]  ;;  %v471_v53 = vld [vmem:[%s1672_s5 + $0x350] sm:$0xff]  ;;  %468 = vst [vmem:[%s1677_s6 + $0x198] sm:$0xff] %v467_v51 }
  0x30   : > { %470 = vst [vmem:[%s1677_s6 + $0x1a0] sm:$0xff] %v469_v52  ;;  %472 = vst [vmem:[%s1677_s6 + $0x1a8] sm:$0xff] %v471_v53  ;;  %v473_v54 = vld [vmem:[%s1672_s5 + $0x360] sm:$0xff]  ;;  %v475_v55 = vld [vmem:[%s1672_s5 + $0x370] sm:$0xff] }
  0x31   : > { %v477_v56 = vld [vmem:[%s1672_s5 + $0x380] sm:$0xff]  ;;  %474 = vst [vmem:[%s1677_s6 + $0x1b0] sm:$0xff] %v473_v54  ;;  %476 = vst [vmem:[%s1677_s6 + $0x1b8] sm:$0xff] %v475_v55  ;;  %v479_v57 = vld [vmem:[%s1672_s5 + $0x390] sm:$0xff] }
  0x32   : > { %478 = vst [vmem:[%s1677_s6 + $0x1c0] sm:$0xff] %v477_v56  ;;  %v481_v58 = vld [vmem:[%s1672_s5 + $0x3a0] sm:$0xff]  ;;  %v483_v59 = vld [vmem:[%s1672_s5 + $0x3b0] sm:$0xff]  ;;  %480 = vst [vmem:[%s1677_s6 + $0x1c8] sm:$0xff] %v479_v57 }
  0x33   : > { %482 = vst [vmem:[%s1677_s6 + $0x1d0] sm:$0xff] %v481_v58  ;;  %484 = vst [vmem:[%s1677_s6 + $0x1d8] sm:$0xff] %v483_v59  ;;  %v485_v60 = vld [vmem:[%s1672_s5 + $0x3c0] sm:$0xff]  ;;  %v487_v61 = vld [vmem:[%s1672_s5 + $0x3d0] sm:$0xff] }
  0x34   : > { %v489_v62 = vld [vmem:[%s1672_s5 + $0x3e0] sm:$0xff]  ;;  %486 = vst [vmem:[%s1677_s6 + $0x1e0] sm:$0xff] %v485_v60  ;;  %488 = vst [vmem:[%s1677_s6 + $0x1e8] sm:$0xff] %v487_v61  ;;  %v491_v63 = vld [vmem:[%s1672_s5 + $0x3f0] sm:$0xff] }
  0x35   : > { %490 = vst [vmem:[%s1677_s6 + $0x1f0] sm:$0xff] %v489_v62  ;;  %492 = vst [vmem:[%s1677_s6 + $0x1f8] sm:$0xff] %v491_v63 }
  0x36 PF: > { %p1329_p8 = scmp.ge.s32.totalorder %s1597_s19, 1  ;;  %p513_p9 = scmp.lt.s32.totalorder %s1597_s19, 3 }
  0x38   : > { %p514_p10 = pnand %p1329_p8, %p513_p9 }
  0x39   : > { %s520_s7 = sand.u32 (!%p514_p10), 1, %s1581_s15   ;;  %v1555_v0 = vld [vmem:[%s1917_s0 + $0x4] ss:$16 sps:$4 sm:$0xff] (!%p514_p10)   ;;  %v1558_v1 = vld [vmem:[%s1917_s0 + $0xc] ss:$16 sps:$4 sm:$0xff] (!%p514_p10)   ;;  %s1332_s26 = sshll.u32 (!%p514_p10), %s1589_s17, 1 }
  0x3a   : > { %517 = sbr.rel (%p514_p10) target bundleno = 360 (0x168), region = 70  ;;  %s1330_s8 = sshll.u32 (!%p514_p10), %s520_s7, 9  ;;  %1040 = vmatprep.mubr.bf16.mxu1 (!%p514_p10), %v1555_v0  ;;  %1083 = vmatprep.mubr.bf16.mxu0 (!%p514_p10), %v1558_v1 }
  0x3b   : > { %s1815_s13 = scalar_lea.vmem (!%p514_p10), [#allocation3], %s1330_s8  ;;  %p577_p11 = scmp.lt.s32.totalorder (!%p514_p10), %s1332_s26, 3 }
  0x3c   : > { %v1457_v2 = vld [vmem:[%s1815_s13 + $0x4] ss:$8 sps:$4 sm:$0xff] (!%p514_p10)   ;;  %v1461_v4 = vld [vmem:[%s1815_s13] ss:$8 sps:$4 sm:$0xff] (!%p514_p10)   ;;  %v1463_v6 = vld [vmem:[%s1815_s13 + $0x14] ss:$8 sps:$4 sm:$0xff] (!%p514_p10)  }
  0x3d   : > { %v1459_v3 = vld [vmem:[%s1815_s13 + $0x104] ss:$8 sps:$4 sm:$0xff] (!%p514_p10)   ;;  %1008 = vmatprep.subr.bf16.mxu1 (!%p514_p10), %v1457_v2  ;;  %v1462_v5 = vld [vmem:[%s1815_s13 + $0x100] ss:$8 sps:$4 sm:$0xff] (!%p514_p10)   ;;  %v1465_v7 = vld [vmem:[%s1815_s13 + $0x114] ss:$8 sps:$4 sm:$0xff] (!%p514_p10)  }
  0x3e   : > { %1051 = vmatprep.subr.bf16.mxu0 (!%p514_p10), %v1459_v3  ;;  %1009 = vmatpush1.bf16.msra.mxu1 (!%p514_p10), %v1461_v4  ;;  %v1467_v8 = vld [vmem:[%s1815_s13 + $0x10] ss:$8 sps:$4 sm:$0xff] (!%p514_p10)   ;;  %v1469_v10 = vld [vmem:[%s1815_s13 + $0x24] ss:$8 sps:$4 sm:$0xff] (!%p514_p10)   ;;  %v1473_v12 = vld [vmem:[%s1815_s13 + $0x20] ss:$8 sps:$4 sm:$0xff] (!%p514_p10)   ;;  %v1111_v4 = vlaneseq (!%p514_p10) }
  0x3f   : > { %1052 = vmatpush1.bf16.msra.mxu0 (!%p514_p10), %v1462_v5  ;;  %1010 = vmatprep.subr.bf16.mxu1 (!%p514_p10), %v1463_v6  ;;  %v1468_v9 = vld [vmem:[%s1815_s13 + $0x110] ss:$8 sps:$4 sm:$0xff] (!%p514_p10)   ;;  %v1471_v11 = vld [vmem:[%s1815_s13 + $0x124] ss:$8 sps:$4 sm:$0xff] (!%p514_p10)   ;;  %v1474_v13 = vld [vmem:[%s1815_s13 + $0x120] ss:$8 sps:$4 sm:$0xff] (!%p514_p10)  }
  0x40   : > { %1053 = vmatprep.subr.bf16.mxu0 (!%p514_p10), %v1465_v7  ;;  %v1475_v14 = vld [vmem:[%s1815_s13 + $0x34] ss:$8 sps:$4 sm:$0xff] (!%p514_p10)   ;;  %v1479_v16 = vld [vmem:[%s1815_s13 + $0x30] ss:$8 sps:$4 sm:$0xff] (!%p514_p10)   ;;  %v1481_v18 = vld [vmem:[%s1815_s13 + $0x44] ss:$8 sps:$4 sm:$0xff] (!%p514_p10)  }
  0x41   : > { %v1477_v15 = vld [vmem:[%s1815_s13 + $0x134] ss:$8 sps:$4 sm:$0xff]   ;;  %v1480_v17 = vld [vmem:[%s1815_s13 + $0x130] ss:$8 sps:$4 sm:$0xff]   ;;  %v1483_v19 = vld [vmem:[%s1815_s13 + $0x144] ss:$8 sps:$4 sm:$0xff]  }
  0x42   : > { %1011 = vmatpush1.bf16.msra.mxu1 %v1467_v8  ;;  %v1485_v20 = vld [vmem:[%s1815_s13 + $0x40] ss:$8 sps:$4 sm:$0xff]   ;;  %v1487_v22 = vld [vmem:[%s1815_s13 + $0x54] ss:$8 sps:$4 sm:$0xff]   ;;  %v1491_v24 = vld [vmem:[%s1815_s13 + $0x50] ss:$8 sps:$4 sm:$0xff]  }
  0x43   : > { %1054 = vmatpush1.bf16.msra.mxu0 %v1468_v9  ;;  %1012 = vmatprep.subr.bf16.mxu1 %v1469_v10  ;;  %v1486_v21 = vld [vmem:[%s1815_s13 + $0x140] ss:$8 sps:$4 sm:$0xff]   ;;  %v1489_v23 = vld [vmem:[%s1815_s13 + $0x154] ss:$8 sps:$4 sm:$0xff]   ;;  %v1492_v25 = vld [vmem:[%s1815_s13 + $0x150] ss:$8 sps:$4 sm:$0xff]  }
  0x44   : > { %1055 = vmatprep.subr.bf16.mxu0 %v1471_v11  ;;  %v1493_v26 = vld [vmem:[%s1815_s13 + $0x64] ss:$8 sps:$4 sm:$0xff]   ;;  %v1497_v28 = vld [vmem:[%s1815_s13 + $0x60] ss:$8 sps:$4 sm:$0xff]   ;;  %v1499_v30 = vld [vmem:[%s1815_s13 + $0x74] ss:$8 sps:$4 sm:$0xff]  }
  0x45   : > { %v1495_v27 = vld [vmem:[%s1815_s13 + $0x164] ss:$8 sps:$4 sm:$0xff]   ;;  %v1498_v29 = vld [vmem:[%s1815_s13 + $0x160] ss:$8 sps:$4 sm:$0xff]   ;;  %v1501_v31 = vld [vmem:[%s1815_s13 + $0x174] ss:$8 sps:$4 sm:$0xff]  }
  0x46   : > { %1013 = vmatpush1.bf16.msra.mxu1 %v1473_v12  ;;  %v1503_v32 = vld [vmem:[%s1815_s13 + $0x70] ss:$8 sps:$4 sm:$0xff]   ;;  %v1505_v34 = vld [vmem:[%s1815_s13 + $0x84] ss:$8 sps:$4 sm:$0xff]   ;;  %v1509_v36 = vld [vmem:[%s1815_s13 + $0x80] ss:$8 sps:$4 sm:$0xff]  }
  0x47   : > { %1056 = vmatpush1.bf16.msra.mxu0 %v1474_v13  ;;  %1014 = vmatprep.subr.bf16.mxu1 %v1475_v14  ;;  %v1504_v33 = vld [vmem:[%s1815_s13 + $0x170] ss:$8 sps:$4 sm:$0xff]   ;;  %v1507_v35 = vld [vmem:[%s1815_s13 + $0x184] ss:$8 sps:$4 sm:$0xff]   ;;  %v1510_v37 = vld [vmem:[%s1815_s13 + $0x180] ss:$8 sps:$4 sm:$0xff]  }
  0x48   : > { %1057 = vmatprep.subr.bf16.mxu0 %v1477_v15  ;;  %v1511_v38 = vld [vmem:[%s1815_s13 + $0x94] ss:$8 sps:$4 sm:$0xff]   ;;  %v1515_v40 = vld [vmem:[%s1815_s13 + $0x90] ss:$8 sps:$4 sm:$0xff]   ;;  %v1517_v42 = vld [vmem:[%s1815_s13 + $0xa4] ss:$8 sps:$4 sm:$0xff]  }
  0x49   : > { %v1513_v39 = vld [vmem:[%s1815_s13 + $0x194] ss:$8 sps:$4 sm:$0xff]   ;;  %v1516_v41 = vld [vmem:[%s1815_s13 + $0x190] ss:$8 sps:$4 sm:$0xff]   ;;  %v1519_v43 = vld [vmem:[%s1815_s13 + $0x1a4] ss:$8 sps:$4 sm:$0xff]  }
  0x4a   : > { %1015 = vmatpush1.bf16.msra.mxu1 %v1479_v16  ;;  %v1521_v44 = vld [vmem:[%s1815_s13 + $0xa0] ss:$8 sps:$4 sm:$0xff]   ;;  %v1523_v46 = vld [vmem:[%s1815_s13 + $0xb4] ss:$8 sps:$4 sm:$0xff]   ;;  %v1527_v48 = vld [vmem:[%s1815_s13 + $0xb0] ss:$8 sps:$4 sm:$0xff]  }
  0x4b   : > { %1058 = vmatpush1.bf16.msra.mxu0 %v1480_v17  ;;  %1016 = vmatprep.subr.bf16.mxu1 %v1481_v18  ;;  %v1522_v45 = vld [vmem:[%s1815_s13 + $0x1a0] ss:$8 sps:$4 sm:$0xff]   ;;  %v1525_v47 = vld [vmem:[%s1815_s13 + $0x1b4] ss:$8 sps:$4 sm:$0xff]   ;;  %v1528_v49 = vld [vmem:[%s1815_s13 + $0x1b0] ss:$8 sps:$4 sm:$0xff]  }
  0x4c   : > { %1059 = vmatprep.subr.bf16.mxu0 %v1483_v19  ;;  %v1529_v50 = vld [vmem:[%s1815_s13 + $0xc4] ss:$8 sps:$4 sm:$0xff]   ;;  %v1533_v52 = vld [vmem:[%s1815_s13 + $0xc0] ss:$8 sps:$4 sm:$0xff]   ;;  %v1535_v54 = vld [vmem:[%s1815_s13 + $0xd4] ss:$8 sps:$4 sm:$0xff]  }
  0x4d   : > { %v1531_v51 = vld [vmem:[%s1815_s13 + $0x1c4] ss:$8 sps:$4 sm:$0xff]   ;;  %v1534_v53 = vld [vmem:[%s1815_s13 + $0x1c0] ss:$8 sps:$4 sm:$0xff]   ;;  %v1537_v55 = vld [vmem:[%s1815_s13 + $0x1d4] ss:$8 sps:$4 sm:$0xff]  }
  0x4e   : > { %1017 = vmatpush1.bf16.msra.mxu1 %v1485_v20  ;;  %v1539_v56 = vld [vmem:[%s1815_s13 + $0xd0] ss:$8 sps:$4 sm:$0xff]   ;;  %v1541_v58 = vld [vmem:[%s1815_s13 + $0xe4] ss:$8 sps:$4 sm:$0xff]   ;;  %v1545_v60 = vld [vmem:[%s1815_s13 + $0xe0] ss:$8 sps:$4 sm:$0xff]  }
  0x4f   : > { %1060 = vmatpush1.bf16.msra.mxu0 %v1486_v21  ;;  %1018 = vmatprep.subr.bf16.mxu1 %v1487_v22  ;;  %v1540_v57 = vld [vmem:[%s1815_s13 + $0x1d0] ss:$8 sps:$4 sm:$0xff]   ;;  %v1543_v59 = vld [vmem:[%s1815_s13 + $0x1e4] ss:$8 sps:$4 sm:$0xff]   ;;  %v1546_v61 = vld [vmem:[%s1815_s13 + $0x1e0] ss:$8 sps:$4 sm:$0xff]  }
  0x50   : > { %1061 = vmatprep.subr.bf16.mxu0 %v1489_v23  ;;  %v1547_v62 = vld [vmem:[%s1815_s13 + $0xf4] ss:$8 sps:$4 sm:$0xff]   ;;  %v1551_v0 = vld [vmem:[%s1815_s13 + $0xf0] ss:$8 sps:$4 sm:$0xff]   ;;  %s1930_s26 = smov (!%p577_p11, %s1332_s26), 3  ;;  %v1112_v5 = vshrl.u32 %v1111_v4, 7 }
  0x51   : > { %v1549_v63 = vld [vmem:[%s1815_s13 + $0x1f4] ss:$8 sps:$4 sm:$0xff]   ;;  %v1552_v1 = vld [vmem:[%s1815_s13 + $0x1f0] ss:$8 sps:$4 sm:$0xff]   ;;  %s579_s29 = scalar_lea.vmem %s1919_s2, %s1930_s26  ;;  %s584_s6 = scalar_lea.vmem %s1920_s3, %s1930_s26 }
  0x52   : > { %1019 = vmatpush1.bf16.msra.mxu1 %v1491_v24  ;;  %v1553_v2 = vld [vmem:[%s1917_s0] ss:$16 sps:$4 sm:$0xff]   ;;  %v1556_v3 = vld [vmem:[%s1917_s0 + $0x8] ss:$16 sps:$4 sm:$0xff]   ;;  %v1113_v6 = vsub.s32 0, %v1112_v5  ;;  %v1117_v8 = vsub.s32 1, %v1112_v5 }
  0x53   : > { %1062 = vmatpush1.bf16.msra.mxu0 %v1492_v25  ;;  %1020 = vmatprep.subr.bf16.mxu1 %v1493_v26  ;;  %v1109_v7 = vld [vmem:[%s579_s29] sm:$0x3]  ;;  %s1331_s8 = sshll.u32 %s520_s7, 4  ;;  %s1412_s10 = sshll.u32 (%p1659_p6), %s1589_s17, 3 }
  0x54   : > { %1063 = vmatprep.subr.bf16.mxu0 %v1495_v27  ;;  %v1125_v9 = vld [vmem:[%s584_s6] sm:$0x3]  ;;  %v1114_v10 = vrot.slane %v1109_v7, %v1113_v6  ;;  %v1118_v13 = vrot.slane %v1109_v7, %v1117_v8  ;;  %s561_s9 = scalar_lea.vmem [#allocation4], %s1331_s8  ;;  %s1171_s11 = scalar_lea.vmem (%p1659_p6), %s1921_s4, %s1412_s10 }
  0x55   : > { %v1130_v15 = vrot.slane %v1125_v9, %v1113_v6  ;;  %v1134_v19 = vrot.slane %v1125_v9, %v1117_v8 }
  0x56   : > { %1021 = vmatpush1.bf16.msra.mxu1 %v1497_v28 }
  0x57   : > { %1064 = vmatpush1.bf16.msra.mxu0 %v1498_v29  ;;  %1022 = vmatprep.subr.bf16.mxu1 %v1499_v30 }
  0x58   : > { %1065 = vmatprep.subr.bf16.mxu0 %v1501_v31 }
  0x5a   : > { %1023 = vmatpush1.bf16.msra.mxu1 %v1503_v32 }
  0x5b   : > { %1066 = vmatpush1.bf16.msra.mxu0 %v1504_v33  ;;  %1024 = vmatprep.subr.bf16.mxu1 %v1505_v34 }
  0x5c   : > { %1067 = vmatprep.subr.bf16.mxu0 %v1507_v35 }
  0x5e   : > { %1025 = vmatpush1.bf16.msra.mxu1 %v1509_v36 }
  0x5f   : > { %1068 = vmatpush1.bf16.msra.mxu0 %v1510_v37  ;;  %1026 = vmatprep.subr.bf16.mxu1 %v1511_v38 }
  0x60   : > { %1069 = vmatprep.subr.bf16.mxu0 %v1513_v39 }
  0x62   : > { %1027 = vmatpush1.bf16.msra.mxu1 %v1515_v40 }
  0x63   : > { %1070 = vmatpush1.bf16.msra.mxu0 %v1516_v41  ;;  %1028 = vmatprep.subr.bf16.mxu1 %v1517_v42 }
  0x64   : > { %1071 = vmatprep.subr.bf16.mxu0 %v1519_v43 }
  0x66   : > { %1029 = vmatpush1.bf16.msra.mxu1 %v1521_v44 }
  0x67   : > { %1072 = vmatpush1.bf16.msra.mxu0 %v1522_v45  ;;  %1030 = vmatprep.subr.bf16.mxu1 %v1523_v46 }
  0x68   : > { %1073 = vmatprep.subr.bf16.mxu0 %v1525_v47 }
  0x6a   : > { %1031 = vmatpush1.bf16.msra.mxu1 %v1527_v48 }
  0x6b   : > { %1074 = vmatpush1.bf16.msra.mxu0 %v1528_v49  ;;  %1032 = vmatprep.subr.bf16.mxu1 %v1529_v50 }
  0x6c   : > { %1075 = vmatprep.subr.bf16.mxu0 %v1531_v51 }
  0x6e   : > { %1033 = vmatpush1.bf16.msra.mxu1 %v1533_v52 }
  0x6f   : > { %1076 = vmatpush1.bf16.msra.mxu0 %v1534_v53  ;;  %1034 = vmatprep.subr.bf16.mxu1 %v1535_v54 }
  0x70   : > { %1077 = vmatprep.subr.bf16.mxu0 %v1537_v55 }
  0x72   : > { %1035 = vmatpush1.bf16.msra.mxu1 %v1539_v56 }
  0x73   : > { %1078 = vmatpush1.bf16.msra.mxu0 %v1540_v57  ;;  %1036 = vmatprep.subr.bf16.mxu1 %v1541_v58 }
  0x74   : > { %1079 = vmatprep.subr.bf16.mxu0 %v1543_v59 }
  0x76   : > { %1037 = vmatpush1.bf16.msra.mxu1 %v1545_v60 }
  0x77   : > { %1080 = vmatpush1.bf16.msra.mxu0 %v1546_v61  ;;  %1038 = vmatprep.subr.bf16.mxu1 %v1547_v62 }
  0x78   : > { %1081 = vmatprep.subr.bf16.mxu0 %v1549_v63 }
  0x7a   : > { %1039 = vmatpush1.bf16.msra.mxu1 %v1551_v0 }
  0x7b   : > { %1082 = vmatpush1.bf16.msra.mxu0 %v1552_v1 }
  0x7d   : > { %1041 = vmatmul.mubr.bf16.vlgmr.msra.gmra.mrb[0].mxu1 %v1553_v2 }
  0x7e   : > { %1084 = vmatmul.mubr.bf16.vlgmr.msra.gmra.mrb[0].mxu0 %v1556_v3 }
 0x150   : > { %v1042_v11 = vpop.f32.mrb[0].mxu1 }
 0x151   : > { %v1085_v12 = vpop.f32.mrb[0].mxu0  ;;  %v1044_v16 = vpop.f32.mrb[1].mxu1 }
 0x152   : > { %v1086_v14 = vadd.f32 %v1085_v12, %v1042_v11  ;;  %v1087_v17 = vpop.f32.mrb[1].mxu0  ;;  %v1046_v20 = vpop.f32.mrb[2].mxu1 }
 0x153   : > { %v1088_v18 = vadd.f32 %v1087_v17, %v1044_v16  ;;  %v1089_v21 = vpop.f32.mrb[2].mxu0  ;;  %v1048_v24 = vpop.f32.mrb[3].mxu1 }
 0x154   : > { %v1121_v22 = vmul.f32 %v1114_v10, %v1086_v14  ;;  %v1090_v23 = vadd.f32 %v1089_v21, %v1046_v20  ;;  %v1091_v25 = vpop.f32.mrb[3].mxu0 }
 0x155   : > { %v1122_v26 = vmul.f32 %v1118_v13, %v1088_v18  ;;  %v1092_v27 = vadd.f32 %v1091_v25, %v1048_v24 }
 0x156   : > { %v1137_v28 = vadd.f32 %v1130_v15, %v1121_v22  ;;  %v1123_v29 = vmul.f32 %v1114_v10, %v1090_v23 }
 0x157   : > { %v1138_v30 = vadd.f32 %v1134_v19, %v1122_v26  ;;  %v1124_v31 = vmul.f32 %v1118_v13, %v1092_v27 }
 0x158   : > { %v1141_v32 = vmax.f32 %v1137_v28, 0.0  ;;  %v1139_v33 = vadd.f32 %v1130_v15, %v1123_v29 }
 0x159   : > { %v1142_v34 = vmax.f32 %v1138_v30, 0.0  ;;  %v1140_v35 = vadd.f32 %v1134_v19, %v1124_v31  ;;  %1165 = sbr.rel (!%p1659_p6) target bundleno = 360 (0x168), region = 86 }
 0x15a   : > { %v1143_v36 = vmax.f32 %v1139_v33, 0.0 }
 0x15b   : > { %v1410_v37 = vpack.c.bf16 %v1142_v34, %v1141_v32  ;;  %v1144_v38 = vmax.f32 %v1140_v35, 0.0 }
 0x15d   : > { %1157 = vst [vmem:[%s561_s9] sm:$0xff] %v1410_v37  ;;  %v1411_v39 = vpack.c.bf16 %v1144_v38, %v1143_v36 }
 0x15f   : > { %1158 = vst [vmem:[%s561_s9 + $0x8] sm:$0xff] %v1411_v39 }
 0x164   : > { %v1201_v40 = vld [vmem:[%s561_s9] sm:$0xff] }
 0x165   : > { %1202 = vst [vmem:[%s1171_s11] sm:$0xff] %v1201_v40 }
 0x166   : > { %v1203_v41 = vld [vmem:[%s561_s9 + $0x8] sm:$0xff] }
 0x167   : > { %1204 = vst [vmem:[%s1171_s11 + $0x10] sm:$0xff] %v1203_v41 }
 0x168 PF: > { %s14_s19 = sadd.s32 1, %s1597_s19   ;;  %s1923_s15 = smov %s1585_s16 }
 0x169   : > { %p11_p12 = scmp.ge.s32.totalorder %s14_s19, 4   ;;  %s1924_s16 = smov %s1664_s25 }
 0x16a   : > { %s1925_s17 = smov %s1593_s18  ;;  %s1926_s18 = smov %s1928_s20 }
 0x16b   :  { %13 = sbr.rel (!%p11_p12) target bundleno = 3 (0x3), region = 164 }

// kernel: resnet18_baseline_forward.48
= control target key start
LH: loop header
LB: loop body
LE: loop exit
PB: predicated region body
PF: predicated region fallthrough
CT: control target
= control target key end

     0   :  { %s700_s1 = inlined_call_operand.vmem [shape: bf16[512,128], index: 1, kind: input, shape index: {}]   ;;  %s701_s0 = inlined_call_operand.vmem [shape: bf16[16,512], index: 0, kind: input, shape index: {}]   ;;  %s702_s2 = inlined_call_operand.vmem [shape: f32[1,128], index: 2, kind: input, shape index: {}]   ;;  %s703_s3 = inlined_call_operand.vmem [shape: f32[1,128], index: 3, kind: input, shape index: {}]   ;;  %s704_s4 = inlined_call_operand.vmem [shape: bf16[16,128], index: 4, kind: output, shape index: {}]  }
   0x1   :  { %v520_v0 = vld [vmem:[%s700_s1 + $0x40] sm:$0xff]   ;;  %v524_v4 = vld [vmem:[%s700_s1 + $0x48] sm:$0xff]   ;;  %v528_v8 = vld [vmem:[%s700_s1 + $0x50] sm:$0xff]  }
   0x2   :  { %v521_v1 = vld [vmem:[%s700_s1 + $0xc0] sm:$0xff]   ;;  %476 = vmatprep.subr.bf16.mxu0 %v520_v0  ;;  %v525_v5 = vld [vmem:[%s700_s1 + $0xc8] sm:$0xff]   ;;  %v529_v9 = vld [vmem:[%s700_s1 + $0xd0] sm:$0xff]  }
   0x3   :  { %v522_v2 = vld [vmem:[%s700_s1] sm:$0xff]   ;;  %498 = vmatprep.subr.bf16.mxu1 %v521_v1  ;;  %v526_v6 = vld [vmem:[%s700_s1 + $0x8] sm:$0xff]   ;;  %v530_v10 = vld [vmem:[%s700_s1 + $0x10] sm:$0xff]  }
   0x4   :  { %v523_v3 = vld [vmem:[%s700_s1 + $0x80] sm:$0xff]   ;;  %477 = vmatpush3.bf16.msra.mxu0 %v522_v2  ;;  %v527_v7 = vld [vmem:[%s700_s1 + $0x88] sm:$0xff]   ;;  %v531_v11 = vld [vmem:[%s700_s1 + $0x90] sm:$0xff]  }
   0x5   :  { %499 = vmatpush3.bf16.msra.mxu1 %v523_v3  ;;  %478 = vmatprep.subr.bf16.mxu0 %v524_v4  ;;  %v532_v12 = vld [vmem:[%s700_s1 + $0x58] sm:$0xff]   ;;  %v536_v16 = vld [vmem:[%s700_s1 + $0x60] sm:$0xff]   ;;  %v540_v20 = vld [vmem:[%s700_s1 + $0x68] sm:$0xff]  }
   0x6   :  { %500 = vmatprep.subr.bf16.mxu1 %v525_v5  ;;  %v533_v13 = vld [vmem:[%s700_s1 + $0xd8] sm:$0xff]   ;;  %v537_v17 = vld [vmem:[%s700_s1 + $0xe0] sm:$0xff]   ;;  %v541_v21 = vld [vmem:[%s700_s1 + $0xe8] sm:$0xff]  }
   0x7   :  { %v534_v14 = vld [vmem:[%s700_s1 + $0x18] sm:$0xff]   ;;  %v538_v18 = vld [vmem:[%s700_s1 + $0x20] sm:$0xff]   ;;  %v542_v22 = vld [vmem:[%s700_s1 + $0x28] sm:$0xff]  }
   0x8   :  { %479 = vmatpush3.bf16.msra.mxu0 %v526_v6  ;;  %v535_v15 = vld [vmem:[%s700_s1 + $0x98] sm:$0xff]   ;;  %v539_v19 = vld [vmem:[%s700_s1 + $0xa0] sm:$0xff]   ;;  %v543_v23 = vld [vmem:[%s700_s1 + $0xa8] sm:$0xff]  }
   0x9   :  { %501 = vmatpush3.bf16.msra.mxu1 %v527_v7  ;;  %480 = vmatprep.subr.bf16.mxu0 %v528_v8  ;;  %v544_v24 = vld [vmem:[%s700_s1 + $0x70] sm:$0xff]   ;;  %v548_v28 = vld [vmem:[%s700_s1 + $0x78] sm:$0xff]   ;;  %v465_v45 = vld [vmem:[%s702_s2] ss:$0 sm:$0xff] }
   0xa   :  { %502 = vmatprep.subr.bf16.mxu1 %v529_v9  ;;  %v545_v25 = vld [vmem:[%s700_s1 + $0xf0] sm:$0xff]   ;;  %v549_v29 = vld [vmem:[%s700_s1 + $0xf8] sm:$0xff]   ;;  %v466_v52 = vld [vmem:[%s703_s3] ss:$0 sm:$0xff] }
   0xb   :  { %v546_v26 = vld [vmem:[%s700_s1 + $0x30] sm:$0xff]   ;;  %v550_v30 = vld [vmem:[%s700_s1 + $0x38] sm:$0xff]  }
   0xc   :  { %481 = vmatpush3.bf16.msra.mxu0 %v530_v10  ;;  %v547_v27 = vld [vmem:[%s700_s1 + $0xb0] sm:$0xff]   ;;  %v551_v31 = vld [vmem:[%s700_s1 + $0xb8] sm:$0xff]  }
   0xd   :  { %503 = vmatpush3.bf16.msra.mxu1 %v531_v11  ;;  %482 = vmatprep.subr.bf16.mxu0 %v532_v12  ;;  %v552_v32 = vld [vmem:[%s701_s0] ss:$16 sps:$4 sm:$0xff]   ;;  %v554_v33 = vld [vmem:[%s701_s0 + $0x4] ss:$16 sps:$4 sm:$0xff]   ;;  %v555_v34 = vld [vmem:[%s701_s0 + $0x8] ss:$16 sps:$4 sm:$0xff]  }
   0xe   :  { %504 = vmatprep.subr.bf16.mxu1 %v533_v13  ;;  %v557_v35 = vld [vmem:[%s701_s0 + $0xc] ss:$16 sps:$4 sm:$0xff]   ;;  %338 = vmatprep.mubr.bf16.mxu0 %v554_v33 }
   0xf   :  { %379 = vmatprep.mubr.bf16.mxu1 %v557_v35 }
  0x10   :  { %483 = vmatpush3.bf16.msra.mxu0 %v534_v14 }
  0x11   :  { %505 = vmatpush3.bf16.msra.mxu1 %v535_v15  ;;  %484 = vmatprep.subr.bf16.mxu0 %v536_v16 }
  0x12   :  { %506 = vmatprep.subr.bf16.mxu1 %v537_v17 }
  0x14   :  { %485 = vmatpush3.bf16.msra.mxu0 %v538_v18 }
  0x15   :  { %507 = vmatpush3.bf16.msra.mxu1 %v539_v19  ;;  %486 = vmatprep.subr.bf16.mxu0 %v540_v20 }
  0x16   :  { %508 = vmatprep.subr.bf16.mxu1 %v541_v21 }
  0x18   :  { %487 = vmatpush3.bf16.msra.mxu0 %v542_v22 }
  0x19   :  { %509 = vmatpush3.bf16.msra.mxu1 %v543_v23  ;;  %488 = vmatprep.subr.bf16.mxu0 %v544_v24 }
  0x1a   :  { %510 = vmatprep.subr.bf16.mxu1 %v545_v25 }
  0x1c   :  { %489 = vmatpush3.bf16.msra.mxu0 %v546_v26 }
  0x1d   :  { %511 = vmatpush3.bf16.msra.mxu1 %v547_v27  ;;  %490 = vmatprep.subr.bf16.mxu0 %v548_v28 }
  0x1e   :  { %512 = vmatprep.subr.bf16.mxu1 %v549_v29 }
  0x20   :  { %491 = vmatpush3.bf16.msra.mxu0 %v550_v30 }
  0x21   :  { %513 = vmatpush3.bf16.msra.mxu1 %v551_v31 }
  0x23   :  { %339 = vmatmul.mubr.bf16.vlgmr.msra.gmra.mrb[0].mxu0 %v552_v32 }
  0x24   :  { %380 = vmatmul.mubr.bf16.vlgmr.msra.gmra.mrb[0].mxu1 %v555_v34 }
  0xf6   :  { %v492_v36 = vpop.f32.mrb[0].mxu0 }
  0xf7   :  { %v514_v37 = vpop.f32.mrb[0].mxu1  ;;  %v493_v38 = vpop.f32.mrb[1].mxu0 }
  0xf8   :  { %v494_v39 = vadd.f32 %v493_v38, %v492_v36  ;;  %v515_v40 = vpop.f32.mrb[1].mxu1  ;;  %v495_v41 = vpop.f32.mrb[2].mxu0 }
  0xf9   :  { %v516_v42 = vadd.f32 %v515_v40, %v514_v37  ;;  %v517_v43 = vpop.f32.mrb[2].mxu1  ;;  %v496_v44 = vpop.f32.mrb[3].mxu0 }
  0xfa   :  { %v497_v46 = vadd.f32 %v496_v44, %v495_v41  ;;  %v518_v47 = vpop.f32.mrb[3].mxu1 }
  0xfb   :  { %v382_v48 = vadd.f32 %v516_v42, %v494_v39  ;;  %v519_v49 = vadd.f32 %v518_v47, %v517_v43 }
  0xfd   :  { %v404_v50 = vmul.f32 %v465_v45, %v382_v48  ;;  %v385_v51 = vadd.f32 %v519_v49, %v497_v46 }
  0xff   :  { %v405_v53 = vmul.f32 %v465_v45, %v385_v51  ;;  %v413_v54 = vadd.f32 %v466_v52, %v404_v50 }
 0x101   :  { %v414_v55 = vadd.f32 %v466_v52, %v405_v53 }
 0x103   :  { %v474_v56 = vpack.c.bf16 %v414_v55, %v413_v54 }
 0x105   :  { %475 = vst [vmem:[%s704_s4] sm:$0xff] %v474_v56  }

// kernel: resnet18_baseline_forward.49
= control target key start
LH: loop header
LB: loop body
LE: loop exit
PB: predicated region body
PF: predicated region fallthrough
CT: control target
= control target key end

     0   :  { %v223_v0 = vmov 0.0   ;;  %vm224_vm0 = vmmov 0   ;;  %s289_s1 = inlined_call_operand.vmem [shape: bf16[128,128], index: 1, kind: input, shape index: {}]   ;;  %s290_s0 = inlined_call_operand.vmem [shape: bf16[16,128], index: 0, kind: input, shape index: {}]   ;;  %s291_s2 = inlined_call_operand.vmem [shape: f32[1,128], index: 2, kind: input, shape index: {}]   ;;  %s292_s3 = inlined_call_operand.vmem [shape: f32[1,128], index: 3, kind: input, shape index: {}]   ;;  %s293_s4 = inlined_call_operand.vmem [shape: f32[16,128], index: 4, kind: output, shape index: {}]  }
   0x1   :  { %192 = vmatprep.subr.bf16.mxu0 %v223_v0  ;;  %v214_v1 = vld [vmem:[%s289_s1] sm:$0xff]   ;;  %208 = vmatprep.mubr.msk.bf16.mxu0 %vm224_vm0, %v223_v0  ;;  %v215_v2 = vld [vmem:[%s289_s1 + $0x8] sm:$0xff]   ;;  %v216_v3 = vld [vmem:[%s289_s1 + $0x10] sm:$0xff]  }
   0x2   :  { %193 = vmatpush3.bf16.msra.mxu0 %v214_v1  ;;  %v217_v4 = vld [vmem:[%s289_s1 + $0x18] sm:$0xff]   ;;  %v218_v5 = vld [vmem:[%s289_s1 + $0x20] sm:$0xff]   ;;  %v219_v6 = vld [vmem:[%s289_s1 + $0x28] sm:$0xff]  }
   0x3   :  { %194 = vmatprep.subr.bf16.mxu0 %v223_v0  ;;  %v220_v7 = vld [vmem:[%s289_s1 + $0x30] sm:$0xff]   ;;  %v221_v8 = vld [vmem:[%s289_s1 + $0x38] sm:$0xff]   ;;  %v222_v9 = vld [vmem:[%s290_s0] sm:$0xff]  }
   0x4   :  { %v181_v10 = vld [vmem:[%s291_s2] ss:$0 sm:$0xff] }
   0x5   :  { %v182_v12 = vld [vmem:[%s292_s3] ss:$0 sm:$0xff] }
   0x6   :  { %195 = vmatpush3.bf16.msra.mxu0 %v215_v2 }
   0x7   :  { %196 = vmatprep.subr.bf16.mxu0 %v223_v0 }
   0xa   :  { %197 = vmatpush3.bf16.msra.mxu0 %v216_v3 }
   0xb   :  { %198 = vmatprep.subr.bf16.mxu0 %v223_v0 }
   0xe   :  { %199 = vmatpush3.bf16.msra.mxu0 %v217_v4 }
   0xf   :  { %200 = vmatprep.subr.bf16.mxu0 %v223_v0 }
  0x12   :  { %201 = vmatpush3.bf16.msra.mxu0 %v218_v5 }
  0x13   :  { %202 = vmatprep.subr.bf16.mxu0 %v223_v0 }
  0x16   :  { %203 = vmatpush3.bf16.msra.mxu0 %v219_v6 }
  0x17   :  { %204 = vmatprep.subr.bf16.mxu0 %v223_v0 }
  0x1a   :  { %205 = vmatpush3.bf16.msra.mxu0 %v220_v7 }
  0x1b   :  { %206 = vmatprep.subr.bf16.mxu0 %v223_v0 }
  0x1e   :  { %207 = vmatpush3.bf16.msra.mxu0 %v221_v8 }
  0x21   :  { %209 = vmatmul.mubr.bf16.vlgmr.msra.gmra.mrb[0].mxu0 %v222_v9 }
  0xf4   :  { %v132_v11 = vpop.f32.mrb[0].mxu0 }
  0xf5   :  { %v155_v13 = vmul.f32 %v181_v10, %v132_v11  ;;  %v210_v14 = vpop.f32.mrb[1].mxu0 }
  0xf6   :  { %v135_v15 = vpop.f32.mrb[2].mxu0 }
  0xf7   :  { %v164_v16 = vadd.f32 %v182_v12, %v155_v13  ;;  %v156_v17 = vmul.f32 %v181_v10, %v135_v15  ;;  %v211_v18 = vpop.f32.mrb[3].mxu0 }
  0xf9   :  { %166 = vst [vmem:[%s293_s4] sm:$0xff] %v164_v16  ;;  %v165_v19 = vadd.f32 %v182_v12, %v156_v17 }
  0xfb   :  { %167 = vst [vmem:[%s293_s4 + $0x8] sm:$0xff] %v165_v19 }

</bundles_post_ra>
